<compile_context>
chip_gen: v7x
topology: tpu7x:2x2x1
jax: 0.10.0
libtpu: 0.0.40
codegen_flags: <defaults>
</compile_context>

<pallas_src>
import functools
import math

import jax
import jax.numpy as jnp
from jax import lax
from jax.experimental import pallas as pl
from jax.experimental.pallas import tpu as pltpu


def _round_up(x, m):
    return ((x + m - 1) // m) * m


# ------------------------------ fused kernel --------------------------------
def d_fused_kernel(sent_ref, emb_ref, wih_ref, whh_ref, bih_ref, bhh_ref,
                   wg_ref, wc_ref, bsc_ref, out_ref, xbuf_ref,
                   *, T, B, L, HP, VOC):
    """Whole D.forward in a single kernel invocation.

    sent_ref : (T*B, 1)      int32  token ids, row t*B + b  (time-major)
    emb_ref  : (VOC, HP)     f32    embedding table, lanes >= H are zero
    wih_ref  : (L, HP, 3*HP) f32    W_ih^T, gate g on lanes [g*HP, g*HP+H)
    whh_ref  : (L, HP, 3*HP) f32    W_hh^T, same gate blocking
    bih_ref  : (L, 1, 3*HP)  f32
    bhh_ref  : (L, 1, 3*HP)  f32
    wg_ref   : (1, HP)       f32    score weights for relu(gru_out[-1])
    wc_ref   : (L, B, B, HP) f32    score weights for the final states, with the
                                    torch states.view(batch, L*H) interleaving
                                    and output routing baked in
    bsc_ref  : (1, 1)        f32    score bias
    out_ref  : (B, 1)        f32    sigmoid scores
    xbuf_ref : (T*B, HP)     f32    VMEM scratch: current layer's input sequence
    """
    # ---- embedding lookup as a one-hot matmul (no XLA gather, stays on MXU) ----
    toks = sent_ref[...]                                          # (T*B, 1) int32
    voc_iota = lax.broadcasted_iota(jnp.int32, (T * B, VOC), 1)
    onehot = (toks == voc_iota).astype(jnp.float32)               # (T*B, VOC)
    x_seq = jnp.dot(onehot, emb_ref[...],
                    preferred_element_type=jnp.float32)           # (T*B, HP)

    states_logit = jnp.zeros((B, 1), jnp.float32)
    h = jnp.zeros((B, HP), jnp.float32)

    for l in range(L):                        # layers: static unroll
        # whole-sequence input projection: one matmul, off the serial path
        gi_all = jnp.dot(x_seq, wih_ref[l],
                         preferred_element_type=jnp.float32) + bih_ref[l]  # (T*B, 3HP)
        whh = whh_ref[l]                                          # (HP, 3*HP)
        bhh = bhh_ref[l]                                          # (1, 3*HP)
        h = jnp.zeros((B, HP), jnp.float32)
        for t in range(T):                    # timesteps: static unroll
            gi = gi_all[t * B:(t + 1) * B, :]                     # (B, 3*HP)
            gh = jnp.dot(h, whh, preferred_element_type=jnp.float32) + bhh
            # lane-aligned gate blocks (128 lanes each), PyTorch order (r, z, n)
            i_r, i_z, i_n = gi[:, :HP], gi[:, HP:2 * HP], gi[:, 2 * HP:]
            h_r, h_z, h_n = gh[:, :HP], gh[:, HP:2 * HP], gh[:, 2 * HP:]
            r = jax.nn.sigmoid(i_r + h_r)
            z = jax.nn.sigmoid(i_z + h_z)
            n = jnp.tanh(i_n + r * h_n)
            h = (1.0 - z) * n + z * h                             # (B, HP)
            if l < L - 1:
                xbuf_ref[t * B:(t + 1) * B, :] = h                # next layer's input
        if l < L - 1:
            x_seq = xbuf_ref[...]                                 # (T*B, HP)

        # score-head contribution of this layer's final hidden state.
        # wc[l, b_out, b_src, :] already encodes torch's states.view(batch, L*H)
        # layer/batch interleaving and which output row each source row feeds.
        prod = h[None, :, :] * wc_ref[l]                          # (B, B, HP)
        states_logit = states_logit + jnp.sum(
            jnp.sum(prod, axis=-1), axis=-1, keepdims=True)       # (B, 1)

    # h == gru_out[-1] (top layer output at the last timestep)
    g = jnp.maximum(h, 0.0)                                       # relu
    logit = (jnp.sum(g * wg_ref[...], axis=-1, keepdims=True)
             + states_logit + bsc_ref[...])                       # (B, 1)
    out_ref[...] = jax.nn.sigmoid(logit)


# ------------------------------- wrapper -------------------------------------
@jax.jit
def d_forward(packed, sentence):
    """sentence: (T, B) int32 token ids -> (B, 1) sigmoid scores."""
    T, B = sentence.shape
    L, HP, _ = packed["wih"].shape
    VOC = packed["emb"].shape[0]
    assert packed["wc"].shape[1] == B, "pack_params() batch must match sentence batch"

    sent2d = sentence.reshape(T * B, 1).astype(jnp.int32)   # row t*B+b == token (t, b)
    kernel = functools.partial(d_fused_kernel, T=T, B=B, L=L, HP=HP, VOC=VOC)
    return pl.pallas_call(
        kernel,
        out_shape=jax.ShapeDtypeStruct((B, 1), jnp.float32),
        scratch_shapes=[pltpu.VMEM((T * B, HP), jnp.float32)],
    )(sent2d, packed["emb"], packed["wih"], packed["whh"],
      packed["bih"], packed["bhh"], packed["w_g"], packed["wc"],
      packed["b_score"])


# ------------------------- parameters (torch layout) -------------------------
def init_params(key, voc_size, hidden_size, num_layers):
    """PyTorch-equivalent parameterization: Embedding + GRU stack + Linear(.,1)."""
    H = hidden_size
    k = 1.0 / math.sqrt(H)
    keys = iter(jax.random.split(key, 4 * num_layers + 3))

    params = {"emb": jax.random.normal(next(keys), (voc_size, H), jnp.float32)}
    layers = []
    for _ in range(num_layers):
        layers.append(dict(
            wih=jax.random.uniform(next(keys), (3 * H, H), jnp.float32, -k, k),
            whh=jax.random.uniform(next(keys), (3 * H, H), jnp.float32, -k, k),
            bih=jax.random.uniform(next(keys), (3 * H,), jnp.float32, -k, k),
            bhh=jax.random.uniform(next(keys), (3 * H,), jnp.float32, -k, k),
        ))
    params["gru"] = layers

    d_in = H * (num_layers + 1)
    ks = 1.0 / math.sqrt(d_in)
    params["w_score"] = jax.random.uniform(next(keys), (1, d_in), jnp.float32, -ks, ks)
    params["b_score"] = jax.random.uniform(next(keys), (1,), jnp.float32, -ks, ks)
    return params


def pack_params(params, batch):
    """One-time layout transform for the fused kernel: pad hidden dim to 128,
    give each GRU gate its own 128-lane block, pre-transpose weights, and bake
    torch's (buggy but bit-faithful) states.view(batch, L*H) interleaving into
    the score weights."""
    H = params["emb"].shape[1]
    L = len(params["gru"])
    B = batch
    HP = _round_up(H, 128)
    voc = params["emb"].shape[0]

    emb_p = jnp.zeros((voc, HP), jnp.float32).at[:, :H].set(params["emb"])

    wih_p = jnp.zeros((L, HP, 3 * HP), jnp.float32)
    whh_p = jnp.zeros((L, HP, 3 * HP), jnp.float32)
    bih_p = jnp.zeros((L, 1, 3 * HP), jnp.float32)
    bhh_p = jnp.zeros((L, 1, 3 * HP), jnp.float32)
    for l, p in enumerate(params["gru"]):
        for g in range(3):                       # PyTorch gate order: r, z, n
            wih_p = wih_p.at[l, :H, g * HP:g * HP + H].set(p["wih"][g * H:(g + 1) * H, :].T)
            whh_p = whh_p.at[l, :H, g * HP:g * HP + H].set(p["whh"][g * H:(g + 1) * H, :].T)
            bih_p = bih_p.at[l, 0, g * HP:g * HP + H].set(p["bih"][g * H:(g + 1) * H])
            bhh_p = bhh_p.at[l, 0, g * HP:g * HP + H].set(p["bhh"][g * H:(g + 1) * H])

    w = params["w_score"][0]                     # ((L+1)*H,)
    w_g = jnp.zeros((1, HP), jnp.float32).at[0, :H].set(w[:H])
    w_s = w[H:]                                  # (L*H,)

    # torch: states.view(batch, L*H) on a C-contiguous (L, B, H) tensor.
    # Natural row r = l*B + b_src of the flattened states feeds output row r//L
    # with weight chunk r%L.  This interleaves batches -- faithful to the spec.
    wc = jnp.zeros((L, B, B, HP), jnp.float32)
    for l in range(L):
        for b_src in range(B):
            r = l * B + b_src
            b_out, chunk = r // L, r % L
            wc = wc.at[l, b_out, b_src, :H].set(w_s[chunk * H:(chunk + 1) * H])

    return dict(emb=emb_p, wih=wih_p, whh=whh_p, bih=bih_p, bhh=bhh_p,
                w_g=w_g, wc=wc,
                b_score=params["b_score"].reshape(1, 1).astype(jnp.float32))


# --------------------------- pure-JAX reference ------------------------------
@jax.jit
def d_forward_reference(params, sentence):
    T, B = sentence.shape
    H = params["emb"].shape[1]
    L = len(params["gru"])
    x = params["emb"][sentence]                           # (T, B, H)
    finals = []
    for l in range(L):
        p = params["gru"][l]
        wih_t, whh_t = p["wih"].T, p["whh"].T
        h = jnp.zeros((B, H), jnp.float32)
        outs = []
        for t in range(T):
            gi = x[t] @ wih_t + p["bih"]
            gh = h @ whh_t + p["bhh"]
            i_r, i_z, i_n = gi[:, :H], gi[:, H:2 * H], gi[:, 2 * H:]
            h_r, h_z, h_n = gh[:, :H], gh[:, H:2 * H], gh[:, 2 * H:]
            r = jax.nn.sigmoid(i_r + h_r)
            z = jax.nn.sigmoid(i_z + h_z)
            n = jnp.tanh(i_n + r * h_n)
            h = (1.0 - z) * n + z * h
            outs.append(h)
        x = jnp.stack(outs, axis=0)
        finals.append(h)
    gru_last = jax.nn.relu(x[-1])                         # (B, H)
    states = jnp.stack(finals, axis=0)                    # (L, B, H)
    feat = jnp.concatenate([gru_last, states.reshape(B, L * H)], axis=-1)
    return jax.nn.sigmoid(feat @ params["w_score"].T + params["b_score"])


# ----------------------------------- main ------------------------------------
if __name__ == "__main__":
    VOC, HIDDEN, NUM_LAYERS = 16, 32, 5
    T, B = 8, 2

    key = jax.random.PRNGKey(0)
    kp, kx = jax.random.split(key)
    params = init_params(kp, VOC, HIDDEN, NUM_LAYERS)
    packed = pack_params(params, B)
    sentence = jax.random.randint(kx, (T, B), 0, VOC, dtype=jnp.int32)

    out = jax.block_until_ready(d_forward(packed, sentence))
    assert out.shape == (B, 1)
    assert bool(jnp.all((out > 0.0) & (out < 1.0)))

    with jax.default_matmul_precision("highest"):
        ref = jax.block_until_ready(d_forward_reference(params, sentence))
    assert jnp.allclose(out, ref, atol=2e-3, rtol=2e-3), (out, ref)

    print("KERNEL_OK")
</pallas_src>

<mosaic_0001>
module attributes {stable_mosaic.version = 11 : i64} {
  func.func @d_fused_kernel(%arg0: memref<16x1xi32, #tpu.memory_space<vmem>>, %arg1: memref<16x128xf32, #tpu.memory_space<vmem>>, %arg2: memref<5x128x384xf32, #tpu.memory_space<vmem>>, %arg3: memref<5x128x384xf32, #tpu.memory_space<vmem>>, %arg4: memref<5x1x384xf32, #tpu.memory_space<vmem>>, %arg5: memref<5x1x384xf32, #tpu.memory_space<vmem>>, %arg6: memref<1x128xf32, #tpu.memory_space<vmem>>, %arg7: memref<5x2x2x128xf32, #tpu.memory_space<vmem>>, %arg8: memref<1x1xf32, #tpu.memory_space<vmem>>, %arg9: memref<2x1xf32, #tpu.memory_space<vmem>>, %arg10: memref<16x128xf32, #tpu.memory_space<vmem>>) attributes {dimension_semantics = [], scalar_prefetch = 0 : i64, scratch_operands = 1 : i64, tpu.core_type = #tpu.core_type<tc>} {
    %c0 = arith.constant 0 : index
    %c0_0 = arith.constant 0 : index
    %0 = vector.load %arg0[%c0, %c0_0] : memref<16x1xi32, #tpu.memory_space<vmem>>, vector<16x1xi32>
    %1 = tpu.iota {dimensions = array<i32: 1>} : vector<16x16xi32>
    %2 = vector.broadcast %0 : vector<16x1xi32> to vector<16x16xi32>
    %3 = arith.cmpi eq, %2, %1 : vector<16x16xi32>
    %4 = arith.extui %3 : vector<16x16xi1> to vector<16x16xi32>
    %5 = arith.sitofp %4 : vector<16x16xi32> to vector<16x16xf32>
    %c0_1 = arith.constant 0 : index
    %c0_2 = arith.constant 0 : index
    %6 = vector.load %arg1[%c0_1, %c0_2] : memref<16x128xf32, #tpu.memory_space<vmem>>, vector<16x128xf32>
    %cst = arith.constant dense<0.000000e+00> : vector<16x128xf32>
    %7 = tpu.matmul %5, %6, %cst {dimension_numbers = #tpu.dot_dimension_numbers<[1], [0], [0], [1], [0, 0, 1, 1], [], []>} : vector<16x16xf32>, vector<16x128xf32>, vector<16x128xf32> -> vector<16x128xf32>
    %cst_3 = arith.constant 0.000000e+00 : f32
    %8 = vector.broadcast %cst_3 : f32 to vector<2x1xf32>
    %c0_4 = arith.constant 0 : index
    %c0_5 = arith.constant 0 : index
    %c0_6 = arith.constant 0 : index
    %9 = vector.load %arg2[%c0_4, %c0_5, %c0_6] : memref<5x128x384xf32, #tpu.memory_space<vmem>>, vector<1x128x384xf32>
    %10 = vector.shape_cast %9 : vector<1x128x384xf32> to vector<128x384xf32>
    %cst_7 = arith.constant dense<0.000000e+00> : vector<16x384xf32>
    %11 = tpu.matmul %7, %10, %cst_7 {dimension_numbers = #tpu.dot_dimension_numbers<[1], [0], [0], [1], [0, 0, 1, 1], [], []>} : vector<16x128xf32>, vector<128x384xf32>, vector<16x384xf32> -> vector<16x384xf32>
    %c0_8 = arith.constant 0 : index
    %c0_9 = arith.constant 0 : index
    %c0_10 = arith.constant 0 : index
    %12 = vector.load %arg4[%c0_8, %c0_9, %c0_10] : memref<5x1x384xf32, #tpu.memory_space<vmem>>, vector<1x1x384xf32>
    %13 = vector.shape_cast %12 : vector<1x1x384xf32> to vector<1x384xf32>
    %14 = vector.broadcast %13 : vector<1x384xf32> to vector<16x384xf32>
    %15 = arith.addf %11, %14 : vector<16x384xf32>
    %c0_11 = arith.constant 0 : index
    %c0_12 = arith.constant 0 : index
    %c0_13 = arith.constant 0 : index
    %16 = vector.load %arg3[%c0_11, %c0_12, %c0_13] : memref<5x128x384xf32, #tpu.memory_space<vmem>>, vector<1x128x384xf32>
    %17 = vector.shape_cast %16 : vector<1x128x384xf32> to vector<128x384xf32>
    %c0_14 = arith.constant 0 : index
    %c0_15 = arith.constant 0 : index
    %c0_16 = arith.constant 0 : index
    %18 = vector.load %arg5[%c0_14, %c0_15, %c0_16] : memref<5x1x384xf32, #tpu.memory_space<vmem>>, vector<1x1x384xf32>
    %19 = vector.shape_cast %18 : vector<1x1x384xf32> to vector<1x384xf32>
    %cst_17 = arith.constant 0.000000e+00 : f32
    %20 = vector.broadcast %cst_17 : f32 to vector<2x128xf32>
    %21 = vector.extract_strided_slice %15 {offsets = [0, 0], sizes = [2, 384], strides = [1, 1]} : vector<16x384xf32> to vector<2x384xf32>
    %cst_18 = arith.constant dense<0.000000e+00> : vector<2x384xf32>
    %22 = tpu.matmul %20, %17, %cst_18 {dimension_numbers = #tpu.dot_dimension_numbers<[1], [0], [0], [1], [0, 0, 1, 1], [], []>} : vector<2x128xf32>, vector<128x384xf32>, vector<2x384xf32> -> vector<2x384xf32>
    %23 = vector.broadcast %19 : vector<1x384xf32> to vector<2x384xf32>
    %24 = arith.addf %22, %23 : vector<2x384xf32>
    %25 = vector.extract_strided_slice %21 {offsets = [0, 0], sizes = [2, 128], strides = [1, 1]} : vector<2x384xf32> to vector<2x128xf32>
    %26 = vector.extract_strided_slice %21 {offsets = [0, 128], sizes = [2, 128], strides = [1, 1]} : vector<2x384xf32> to vector<2x128xf32>
    %27 = vector.extract_strided_slice %21 {offsets = [0, 256], sizes = [2, 128], strides = [1, 1]} : vector<2x384xf32> to vector<2x128xf32>
    %28 = vector.extract_strided_slice %24 {offsets = [0, 0], sizes = [2, 128], strides = [1, 1]} : vector<2x384xf32> to vector<2x128xf32>
    %29 = vector.extract_strided_slice %24 {offsets = [0, 128], sizes = [2, 128], strides = [1, 1]} : vector<2x384xf32> to vector<2x128xf32>
    %30 = vector.extract_strided_slice %24 {offsets = [0, 256], sizes = [2, 128], strides = [1, 1]} : vector<2x384xf32> to vector<2x128xf32>
    %31 = arith.addf %25, %28 : vector<2x128xf32>
    %32 = arith.negf %31 : vector<2x128xf32>
    %33 = math.exp %32 : vector<2x128xf32>
    %cst_19 = arith.constant 1.000000e+00 : f32
    %34 = vector.broadcast %cst_19 : f32 to vector<2x128xf32>
    %35 = arith.addf %34, %33 : vector<2x128xf32>
    %36 = arith.divf %34, %35 : vector<2x128xf32>
    %37 = arith.addf %26, %29 : vector<2x128xf32>
    %38 = arith.negf %37 : vector<2x128xf32>
    %39 = math.exp %38 : vector<2x128xf32>
    %cst_20 = arith.constant 1.000000e+00 : f32
    %40 = vector.broadcast %cst_20 : f32 to vector<2x128xf32>
    %41 = arith.addf %40, %39 : vector<2x128xf32>
    %42 = arith.divf %40, %41 : vector<2x128xf32>
    %43 = arith.mulf %36, %30 : vector<2x128xf32>
    %44 = arith.addf %27, %43 : vector<2x128xf32>
    %45 = math.tanh %44 : vector<2x128xf32>
    %cst_21 = arith.constant 1.000000e+00 : f32
    %46 = vector.broadcast %cst_21 : f32 to vector<2x128xf32>
    %47 = arith.subf %46, %42 : vector<2x128xf32>
    %48 = arith.mulf %47, %45 : vector<2x128xf32>
    %49 = arith.mulf %42, %20 : vector<2x128xf32>
    %50 = arith.addf %48, %49 : vector<2x128xf32>
    %c0_22 = arith.constant 0 : index
    %c0_23 = arith.constant 0 : index
    %51 = vector.load %arg10[%c0_22, %c0_23] : memref<16x128xf32, #tpu.memory_space<vmem>>, vector<2x128xf32>
    tpu.vector_store %arg10[%c0_22, %c0_23], %50 {strides = array<i32>} : memref<16x128xf32, #tpu.memory_space<vmem>>, vector<2x128xf32>,
    %52 = vector.extract_strided_slice %15 {offsets = [2, 0], sizes = [2, 384], strides = [1, 1]} : vector<16x384xf32> to vector<2x384xf32>
    %cst_24 = arith.constant dense<0.000000e+00> : vector<2x384xf32>
    %53 = tpu.matmul %50, %17, %cst_24 {dimension_numbers = #tpu.dot_dimension_numbers<[1], [0], [0], [1], [0, 0, 1, 1], [], []>} : vector<2x128xf32>, vector<128x384xf32>, vector<2x384xf32> -> vector<2x384xf32>
    %54 = vector.broadcast %19 : vector<1x384xf32> to vector<2x384xf32>
    %55 = arith.addf %53, %54 : vector<2x384xf32>
    %56 = vector.extract_strided_slice %52 {offsets = [0, 0], sizes = [2, 128], strides = [1, 1]} : vector<2x384xf32> to vector<2x128xf32>
    %57 = vector.extract_strided_slice %52 {offsets = [0, 128], sizes = [2, 128], strides = [1, 1]} : vector<2x384xf32> to vector<2x128xf32>
    %58 = vector.extract_strided_slice %52 {offsets = [0, 256], sizes = [2, 128], strides = [1, 1]} : vector<2x384xf32> to vector<2x128xf32>
    %59 = vector.extract_strided_slice %55 {offsets = [0, 0], sizes = [2, 128], strides = [1, 1]} : vector<2x384xf32> to vector<2x128xf32>
    %60 = vector.extract_strided_slice %55 {offsets = [0, 128], sizes = [2, 128], strides = [1, 1]} : vector<2x384xf32> to vector<2x128xf32>
    %61 = vector.extract_strided_slice %55 {offsets = [0, 256], sizes = [2, 128], strides = [1, 1]} : vector<2x384xf32> to vector<2x128xf32>
    %62 = arith.addf %56, %59 : vector<2x128xf32>
    %63 = arith.negf %62 : vector<2x128xf32>
    %64 = math.exp %63 : vector<2x128xf32>
    %cst_25 = arith.constant 1.000000e+00 : f32
    %65 = vector.broadcast %cst_25 : f32 to vector<2x128xf32>
    %66 = arith.addf %65, %64 : vector<2x128xf32>
    %67 = arith.divf %65, %66 : vector<2x128xf32>
    %68 = arith.addf %57, %60 : vector<2x128xf32>
    %69 = arith.negf %68 : vector<2x128xf32>
    %70 = math.exp %69 : vector<2x128xf32>
    %cst_26 = arith.constant 1.000000e+00 : f32
    %71 = vector.broadcast %cst_26 : f32 to vector<2x128xf32>
    %72 = arith.addf %71, %70 : vector<2x128xf32>
    %73 = arith.divf %71, %72 : vector<2x128xf32>
    %74 = arith.mulf %67, %61 : vector<2x128xf32>
    %75 = arith.addf %58, %74 : vector<2x128xf32>
    %76 = math.tanh %75 : vector<2x128xf32>
    %cst_27 = arith.constant 1.000000e+00 : f32
    %77 = vector.broadcast %cst_27 : f32 to vector<2x128xf32>
    %78 = arith.subf %77, %73 : vector<2x128xf32>
    %79 = arith.mulf %78, %76 : vector<2x128xf32>
    %80 = arith.mulf %73, %50 : vector<2x128xf32>
    %81 = arith.addf %79, %80 : vector<2x128xf32>
    %c2 = arith.constant 2 : index
    %c0_28 = arith.constant 0 : index
    %82 = vector.load %arg10[%c2, %c0_28] : memref<16x128xf32, #tpu.memory_space<vmem>>, vector<2x128xf32>
    tpu.vector_store %arg10[%c2, %c0_28], %81 {strides = array<i32>} : memref<16x128xf32, #tpu.memory_space<vmem>>, vector<2x128xf32>,
    %83 = vector.extract_strided_slice %15 {offsets = [4, 0], sizes = [2, 384], strides = [1, 1]} : vector<16x384xf32> to vector<2x384xf32>
    %cst_29 = arith.constant dense<0.000000e+00> : vector<2x384xf32>
    %84 = tpu.matmul %81, %17, %cst_29 {dimension_numbers = #tpu.dot_dimension_numbers<[1], [0], [0], [1], [0, 0, 1, 1], [], []>} : vector<2x128xf32>, vector<128x384xf32>, vector<2x384xf32> -> vector<2x384xf32>
    %85 = vector.broadcast %19 : vector<1x384xf32> to vector<2x384xf32>
    %86 = arith.addf %84, %85 : vector<2x384xf32>
    %87 = vector.extract_strided_slice %83 {offsets = [0, 0], sizes = [2, 128], strides = [1, 1]} : vector<2x384xf32> to vector<2x128xf32>
    %88 = vector.extract_strided_slice %83 {offsets = [0, 128], sizes = [2, 128], strides = [1, 1]} : vector<2x384xf32> to vector<2x128xf32>
    %89 = vector.extract_strided_slice %83 {offsets = [0, 256], sizes = [2, 128], strides = [1, 1]} : vector<2x384xf32> to vector<2x128xf32>
    %90 = vector.extract_strided_slice %86 {offsets = [0, 0], sizes = [2, 128], strides = [1, 1]} : vector<2x384xf32> to vector<2x128xf32>
    %91 = vector.extract_strided_slice %86 {offsets = [0, 128], sizes = [2, 128], strides = [1, 1]} : vector<2x384xf32> to vector<2x128xf32>
    %92 = vector.extract_strided_slice %86 {offsets = [0, 256], sizes = [2, 128], strides = [1, 1]} : vector<2x384xf32> to vector<2x128xf32>
    %93 = arith.addf %87, %90 : vector<2x128xf32>
    %94 = arith.negf %93 : vector<2x128xf32>
    %95 = math.exp %94 : vector<2x128xf32>
    %cst_30 = arith.constant 1.000000e+00 : f32
    %96 = vector.broadcast %cst_30 : f32 to vector<2x128xf32>
    %97 = arith.addf %96, %95 : vector<2x128xf32>
    %98 = arith.divf %96, %97 : vector<2x128xf32>
    %99 = arith.addf %88, %91 : vector<2x128xf32>
    %100 = arith.negf %99 : vector<2x128xf32>
    %101 = math.exp %100 : vector<2x128xf32>
    %cst_31 = arith.constant 1.000000e+00 : f32
    %102 = vector.broadcast %cst_31 : f32 to vector<2x128xf32>
    %103 = arith.addf %102, %101 : vector<2x128xf32>
    %104 = arith.divf %102, %103 : vector<2x128xf32>
    %105 = arith.mulf %98, %92 : vector<2x128xf32>
    %106 = arith.addf %89, %105 : vector<2x128xf32>
    %107 = math.tanh %106 : vector<2x128xf32>
    %cst_32 = arith.constant 1.000000e+00 : f32
    %108 = vector.broadcast %cst_32 : f32 to vector<2x128xf32>
    %109 = arith.subf %108, %104 : vector<2x128xf32>
    %110 = arith.mulf %109, %107 : vector<2x128xf32>
    %111 = arith.mulf %104, %81 : vector<2x128xf32>
    %112 = arith.addf %110, %111 : vector<2x128xf32>
    %c4 = arith.constant 4 : index
    %c0_33 = arith.constant 0 : index
    %113 = vector.load %arg10[%c4, %c0_33] : memref<16x128xf32, #tpu.memory_space<vmem>>, vector<2x128xf32>
    tpu.vector_store %arg10[%c4, %c0_33], %112 {strides = array<i32>} : memref<16x128xf32, #tpu.memory_space<vmem>>, vector<2x128xf32>,
    %114 = vector.extract_strided_slice %15 {offsets = [6, 0], sizes = [2, 384], strides = [1, 1]} : vector<16x384xf32> to vector<2x384xf32>
    %cst_34 = arith.constant dense<0.000000e+00> : vector<2x384xf32>
    %115 = tpu.matmul %112, %17, %cst_34 {dimension_numbers = #tpu.dot_dimension_numbers<[1], [0], [0], [1], [0, 0, 1, 1], [], []>} : vector<2x128xf32>, vector<128x384xf32>, vector<2x384xf32> -> vector<2x384xf32>
    %116 = vector.broadcast %19 : vector<1x384xf32> to vector<2x384xf32>
    %117 = arith.addf %115, %116 : vector<2x384xf32>
    %118 = vector.extract_strided_slice %114 {offsets = [0, 0], sizes = [2, 128], strides = [1, 1]} : vector<2x384xf32> to vector<2x128xf32>
    %119 = vector.extract_strided_slice %114 {offsets = [0, 128], sizes = [2, 128], strides = [1, 1]} : vector<2x384xf32> to vector<2x128xf32>
    %120 = vector.extract_strided_slice %114 {offsets = [0, 256], sizes = [2, 128], strides = [1, 1]} : vector<2x384xf32> to vector<2x128xf32>
    %121 = vector.extract_strided_slice %117 {offsets = [0, 0], sizes = [2, 128], strides = [1, 1]} : vector<2x384xf32> to vector<2x128xf32>
    %122 = vector.extract_strided_slice %117 {offsets = [0, 128], sizes = [2, 128], strides = [1, 1]} : vector<2x384xf32> to vector<2x128xf32>
    %123 = vector.extract_strided_slice %117 {offsets = [0, 256], sizes = [2, 128], strides = [1, 1]} : vector<2x384xf32> to vector<2x128xf32>
    %124 = arith.addf %118, %121 : vector<2x128xf32>
    %125 = arith.negf %124 : vector<2x128xf32>
    %126 = math.exp %125 : vector<2x128xf32>
    %cst_35 = arith.constant 1.000000e+00 : f32
    %127 = vector.broadcast %cst_35 : f32 to vector<2x128xf32>
    %128 = arith.addf %127, %126 : vector<2x128xf32>
    %129 = arith.divf %127, %128 : vector<2x128xf32>
    %130 = arith.addf %119, %122 : vector<2x128xf32>
    %131 = arith.negf %130 : vector<2x128xf32>
    %132 = math.exp %131 : vector<2x128xf32>
    %cst_36 = arith.constant 1.000000e+00 : f32
    %133 = vector.broadcast %cst_36 : f32 to vector<2x128xf32>
    %134 = arith.addf %133, %132 : vector<2x128xf32>
    %135 = arith.divf %133, %134 : vector<2x128xf32>
    %136 = arith.mulf %129, %123 : vector<2x128xf32>
    %137 = arith.addf %120, %136 : vector<2x128xf32>
    %138 = math.tanh %137 : vector<2x128xf32>
    %cst_37 = arith.constant 1.000000e+00 : f32
    %139 = vector.broadcast %cst_37 : f32 to vector<2x128xf32>
    %140 = arith.subf %139, %135 : vector<2x128xf32>
    %141 = arith.mulf %140, %138 : vector<2x128xf32>
    %142 = arith.mulf %135, %112 : vector<2x128xf32>
    %143 = arith.addf %141, %142 : vector<2x128xf32>
    %c6 = arith.constant 6 : index
    %c0_38 = arith.constant 0 : index
    %144 = vector.load %arg10[%c6, %c0_38] : memref<16x128xf32, #tpu.memory_space<vmem>>, vector<2x128xf32>
    tpu.vector_store %arg10[%c6, %c0_38], %143 {strides = array<i32>} : memref<16x128xf32, #tpu.memory_space<vmem>>, vector<2x128xf32>,
    %145 = vector.extract_strided_slice %15 {offsets = [8, 0], sizes = [2, 384], strides = [1, 1]} : vector<16x384xf32> to vector<2x384xf32>
    %cst_39 = arith.constant dense<0.000000e+00> : vector<2x384xf32>
    %146 = tpu.matmul %143, %17, %cst_39 {dimension_numbers = #tpu.dot_dimension_numbers<[1], [0], [0], [1], [0, 0, 1, 1], [], []>} : vector<2x128xf32>, vector<128x384xf32>, vector<2x384xf32> -> vector<2x384xf32>
    %147 = vector.broadcast %19 : vector<1x384xf32> to vector<2x384xf32>
    %148 = arith.addf %146, %147 : vector<2x384xf32>
    %149 = vector.extract_strided_slice %145 {offsets = [0, 0], sizes = [2, 128], strides = [1, 1]} : vector<2x384xf32> to vector<2x128xf32>
    %150 = vector.extract_strided_slice %145 {offsets = [0, 128], sizes = [2, 128], strides = [1, 1]} : vector<2x384xf32> to vector<2x128xf32>
    %151 = vector.extract_strided_slice %145 {offsets = [0, 256], sizes = [2, 128], strides = [1, 1]} : vector<2x384xf32> to vector<2x128xf32>
    %152 = vector.extract_strided_slice %148 {offsets = [0, 0], sizes = [2, 128], strides = [1, 1]} : vector<2x384xf32> to vector<2x128xf32>
    %153 = vector.extract_strided_slice %148 {offsets = [0, 128], sizes = [2, 128], strides = [1, 1]} : vector<2x384xf32> to vector<2x128xf32>
    %154 = vector.extract_strided_slice %148 {offsets = [0, 256], sizes = [2, 128], strides = [1, 1]} : vector<2x384xf32> to vector<2x128xf32>
    %155 = arith.addf %149, %152 : vector<2x128xf32>
    %156 = arith.negf %155 : vector<2x128xf32>
    %157 = math.exp %156 : vector<2x128xf32>
    %cst_40 = arith.constant 1.000000e+00 : f32
    %158 = vector.broadcast %cst_40 : f32 to vector<2x128xf32>
    %159 = arith.addf %158, %157 : vector<2x128xf32>
    %160 = arith.divf %158, %159 : vector<2x128xf32>
    %161 = arith.addf %150, %153 : vector<2x128xf32>
    %162 = arith.negf %161 : vector<2x128xf32>
    %163 = math.exp %162 : vector<2x128xf32>
    %cst_41 = arith.constant 1.000000e+00 : f32
    %164 = vector.broadcast %cst_41 : f32 to vector<2x128xf32>
    %165 = arith.addf %164, %163 : vector<2x128xf32>
    %166 = arith.divf %164, %165 : vector<2x128xf32>
    %167 = arith.mulf %160, %154 : vector<2x128xf32>
    %168 = arith.addf %151, %167 : vector<2x128xf32>
    %169 = math.tanh %168 : vector<2x128xf32>
    %cst_42 = arith.constant 1.000000e+00 : f32
    %170 = vector.broadcast %cst_42 : f32 to vector<2x128xf32>
    %171 = arith.subf %170, %166 : vector<2x128xf32>
    %172 = arith.mulf %171, %169 : vector<2x128xf32>
    %173 = arith.mulf %166, %143 : vector<2x128xf32>
    %174 = arith.addf %172, %173 : vector<2x128xf32>
    %c8 = arith.constant 8 : index
    %c0_43 = arith.constant 0 : index
    %175 = vector.load %arg10[%c8, %c0_43] : memref<16x128xf32, #tpu.memory_space<vmem>>, vector<2x128xf32>
    tpu.vector_store %arg10[%c8, %c0_43], %174 {strides = array<i32>} : memref<16x128xf32, #tpu.memory_space<vmem>>, vector<2x128xf32>,
    %176 = vector.extract_strided_slice %15 {offsets = [10, 0], sizes = [2, 384], strides = [1, 1]} : vector<16x384xf32> to vector<2x384xf32>
    %cst_44 = arith.constant dense<0.000000e+00> : vector<2x384xf32>
    %177 = tpu.matmul %174, %17, %cst_44 {dimension_numbers = #tpu.dot_dimension_numbers<[1], [0], [0], [1], [0, 0, 1, 1], [], []>} : vector<2x128xf32>, vector<128x384xf32>, vector<2x384xf32> -> vector<2x384xf32>
    %178 = vector.broadcast %19 : vector<1x384xf32> to vector<2x384xf32>
    %179 = arith.addf %177, %178 : vector<2x384xf32>
    %180 = vector.extract_strided_slice %176 {offsets = [0, 0], sizes = [2, 128], strides = [1, 1]} : vector<2x384xf32> to vector<2x128xf32>
    %181 = vector.extract_strided_slice %176 {offsets = [0, 128], sizes = [2, 128], strides = [1, 1]} : vector<2x384xf32> to vector<2x128xf32>
    %182 = vector.extract_strided_slice %176 {offsets = [0, 256], sizes = [2, 128], strides = [1, 1]} : vector<2x384xf32> to vector<2x128xf32>
    %183 = vector.extract_strided_slice %179 {offsets = [0, 0], sizes = [2, 128], strides = [1, 1]} : vector<2x384xf32> to vector<2x128xf32>
    %184 = vector.extract_strided_slice %179 {offsets = [0, 128], sizes = [2, 128], strides = [1, 1]} : vector<2x384xf32> to vector<2x128xf32>
    %185 = vector.extract_strided_slice %179 {offsets = [0, 256], sizes = [2, 128], strides = [1, 1]} : vector<2x384xf32> to vector<2x128xf32>
    %186 = arith.addf %180, %183 : vector<2x128xf32>
    %187 = arith.negf %186 : vector<2x128xf32>
    %188 = math.exp %187 : vector<2x128xf32>
    %cst_45 = arith.constant 1.000000e+00 : f32
    %189 = vector.broadcast %cst_45 : f32 to vector<2x128xf32>
    %190 = arith.addf %189, %188 : vector<2x128xf32>
    %191 = arith.divf %189, %190 : vector<2x128xf32>
    %192 = arith.addf %181, %184 : vector<2x128xf32>
    %193 = arith.negf %192 : vector<2x128xf32>
    %194 = math.exp %193 : vector<2x128xf32>
    %cst_46 = arith.constant 1.000000e+00 : f32
    %195 = vector.broadcast %cst_46 : f32 to vector<2x128xf32>
    %196 = arith.addf %195, %194 : vector<2x128xf32>
    %197 = arith.divf %195, %196 : vector<2x128xf32>
    %198 = arith.mulf %191, %185 : vector<2x128xf32>
    %199 = arith.addf %182, %198 : vector<2x128xf32>
    %200 = math.tanh %199 : vector<2x128xf32>
    %cst_47 = arith.constant 1.000000e+00 : f32
    %201 = vector.broadcast %cst_47 : f32 to vector<2x128xf32>
    %202 = arith.subf %201, %197 : vector<2x128xf32>
    %203 = arith.mulf %202, %200 : vector<2x128xf32>
    %204 = arith.mulf %197, %174 : vector<2x128xf32>
    %205 = arith.addf %203, %204 : vector<2x128xf32>
    %c10 = arith.constant 10 : index
    %c0_48 = arith.constant 0 : index
    %206 = vector.load %arg10[%c10, %c0_48] : memref<16x128xf32, #tpu.memory_space<vmem>>, vector<2x128xf32>
    tpu.vector_store %arg10[%c10, %c0_48], %205 {strides = array<i32>} : memref<16x128xf32, #tpu.memory_space<vmem>>, vector<2x128xf32>,
    %207 = vector.extract_strided_slice %15 {offsets = [12, 0], sizes = [2, 384], strides = [1, 1]} : vector<16x384xf32> to vector<2x384xf32>
    %cst_49 = arith.constant dense<0.000000e+00> : vector<2x384xf32>
    %208 = tpu.matmul %205, %17, %cst_49 {dimension_numbers = #tpu.dot_dimension_numbers<[1], [0], [0], [1], [0, 0, 1, 1], [], []>} : vector<2x128xf32>, vector<128x384xf32>, vector<2x384xf32> -> vector<2x384xf32>
    %209 = vector.broadcast %19 : vector<1x384xf32> to vector<2x384xf32>
    %210 = arith.addf %208, %209 : vector<2x384xf32>
    %211 = vector.extract_strided_slice %207 {offsets = [0, 0], sizes = [2, 128], strides = [1, 1]} : vector<2x384xf32> to vector<2x128xf32>
    %212 = vector.extract_strided_slice %207 {offsets = [0, 128], sizes = [2, 128], strides = [1, 1]} : vector<2x384xf32> to vector<2x128xf32>
    %213 = vector.extract_strided_slice %207 {offsets = [0, 256], sizes = [2, 128], strides = [1, 1]} : vector<2x384xf32> to vector<2x128xf32>
    %214 = vector.extract_strided_slice %210 {offsets = [0, 0], sizes = [2, 128], strides = [1, 1]} : vector<2x384xf32> to vector<2x128xf32>
    %215 = vector.extract_strided_slice %210 {offsets = [0, 128], sizes = [2, 128], strides = [1, 1]} : vector<2x384xf32> to vector<2x128xf32>
    %216 = vector.extract_strided_slice %210 {offsets = [0, 256], sizes = [2, 128], strides = [1, 1]} : vector<2x384xf32> to vector<2x128xf32>
    %217 = arith.addf %211, %214 : vector<2x128xf32>
    %218 = arith.negf %217 : vector<2x128xf32>
    %219 = math.exp %218 : vector<2x128xf32>
    %cst_50 = arith.constant 1.000000e+00 : f32
    %220 = vector.broadcast %cst_50 : f32 to vector<2x128xf32>
    %221 = arith.addf %220, %219 : vector<2x128xf32>
    %222 = arith.divf %220, %221 : vector<2x128xf32>
    %223 = arith.addf %212, %215 : vector<2x128xf32>
    %224 = arith.negf %223 : vector<2x128xf32>
    %225 = math.exp %224 : vector<2x128xf32>
    %cst_51 = arith.constant 1.000000e+00 : f32
    %226 = vector.broadcast %cst_51 : f32 to vector<2x128xf32>
    %227 = arith.addf %226, %225 : vector<2x128xf32>
    %228 = arith.divf %226, %227 : vector<2x128xf32>
    %229 = arith.mulf %222, %216 : vector<2x128xf32>
    %230 = arith.addf %213, %229 : vector<2x128xf32>
    %231 = math.tanh %230 : vector<2x128xf32>
    %cst_52 = arith.constant 1.000000e+00 : f32
    %232 = vector.broadcast %cst_52 : f32 to vector<2x128xf32>
    %233 = arith.subf %232, %228 : vector<2x128xf32>
    %234 = arith.mulf %233, %231 : vector<2x128xf32>
    %235 = arith.mulf %228, %205 : vector<2x128xf32>
    %236 = arith.addf %234, %235 : vector<2x128xf32>
    %c12 = arith.constant 12 : index
    %c0_53 = arith.constant 0 : index
    %237 = vector.load %arg10[%c12, %c0_53] : memref<16x128xf32, #tpu.memory_space<vmem>>, vector<2x128xf32>
    tpu.vector_store %arg10[%c12, %c0_53], %236 {strides = array<i32>} : memref<16x128xf32, #tpu.memory_space<vmem>>, vector<2x128xf32>,
    %238 = vector.extract_strided_slice %15 {offsets = [14, 0], sizes = [2, 384], strides = [1, 1]} : vector<16x384xf32> to vector<2x384xf32>
    %cst_54 = arith.constant dense<0.000000e+00> : vector<2x384xf32>
    %239 = tpu.matmul %236, %17, %cst_54 {dimension_numbers = #tpu.dot_dimension_numbers<[1], [0], [0], [1], [0, 0, 1, 1], [], []>} : vector<2x128xf32>, vector<128x384xf32>, vector<2x384xf32> -> vector<2x384xf32>
    %240 = vector.broadcast %19 : vector<1x384xf32> to vector<2x384xf32>
    %241 = arith.addf %239, %240 : vector<2x384xf32>
    %242 = vector.extract_strided_slice %238 {offsets = [0, 0], sizes = [2, 128], strides = [1, 1]} : vector<2x384xf32> to vector<2x128xf32>
    %243 = vector.extract_strided_slice %238 {offsets = [0, 128], sizes = [2, 128], strides = [1, 1]} : vector<2x384xf32> to vector<2x128xf32>
    %244 = vector.extract_strided_slice %238 {offsets = [0, 256], sizes = [2, 128], strides = [1, 1]} : vector<2x384xf32> to vector<2x128xf32>
    %245 = vector.extract_strided_slice %241 {offsets = [0, 0], sizes = [2, 128], strides = [1, 1]} : vector<2x384xf32> to vector<2x128xf32>
    %246 = vector.extract_strided_slice %241 {offsets = [0, 128], sizes = [2, 128], strides = [1, 1]} : vector<2x384xf32> to vector<2x128xf32>
    %247 = vector.extract_strided_slice %241 {offsets = [0, 256], sizes = [2, 128], strides = [1, 1]} : vector<2x384xf32> to vector<2x128xf32>
    %248 = arith.addf %242, %245 : vector<2x128xf32>
    %249 = arith.negf %248 : vector<2x128xf32>
    %250 = math.exp %249 : vector<2x128xf32>
    %cst_55 = arith.constant 1.000000e+00 : f32
    %251 = vector.broadcast %cst_55 : f32 to vector<2x128xf32>
    %252 = arith.addf %251, %250 : vector<2x128xf32>
    %253 = arith.divf %251, %252 : vector<2x128xf32>
    %254 = arith.addf %243, %246 : vector<2x128xf32>
    %255 = arith.negf %254 : vector<2x128xf32>
    %256 = math.exp %255 : vector<2x128xf32>
    %cst_56 = arith.constant 1.000000e+00 : f32
    %257 = vector.broadcast %cst_56 : f32 to vector<2x128xf32>
    %258 = arith.addf %257, %256 : vector<2x128xf32>
    %259 = arith.divf %257, %258 : vector<2x128xf32>
    %260 = arith.mulf %253, %247 : vector<2x128xf32>
    %261 = arith.addf %244, %260 : vector<2x128xf32>
    %262 = math.tanh %261 : vector<2x128xf32>
    %cst_57 = arith.constant 1.000000e+00 : f32
    %263 = vector.broadcast %cst_57 : f32 to vector<2x128xf32>
    %264 = arith.subf %263, %259 : vector<2x128xf32>
    %265 = arith.mulf %264, %262 : vector<2x128xf32>
    %266 = arith.mulf %259, %236 : vector<2x128xf32>
    %267 = arith.addf %265, %266 : vector<2x128xf32>
    %c14 = arith.constant 14 : index
    %c0_58 = arith.constant 0 : index
    %268 = vector.load %arg10[%c14, %c0_58] : memref<16x128xf32, #tpu.memory_space<vmem>>, vector<2x128xf32>
    tpu.vector_store %arg10[%c14, %c0_58], %267 {strides = array<i32>} : memref<16x128xf32, #tpu.memory_space<vmem>>, vector<2x128xf32>,
    %c0_59 = arith.constant 0 : index
    %c0_60 = arith.constant 0 : index
    %269 = vector.load %arg10[%c0_59, %c0_60] : memref<16x128xf32, #tpu.memory_space<vmem>>, vector<16x128xf32>
    %270 = vector.shape_cast %267 : vector<2x128xf32> to vector<1x2x128xf32>
    %c0_61 = arith.constant 0 : index
    %c0_62 = arith.constant 0 : index
    %c0_63 = arith.constant 0 : index
    %c0_64 = arith.constant 0 : index
    %271 = vector.load %arg7[%c0_61, %c0_62, %c0_63, %c0_64] : memref<5x2x2x128xf32, #tpu.memory_space<vmem>>, vector<1x2x2x128xf32>
    %272 = vector.shape_cast %271 : vector<1x2x2x128xf32> to vector<2x2x128xf32>
    %273 = vector.broadcast %270 : vector<1x2x128xf32> to vector<2x2x128xf32>
    %274 = arith.mulf %273, %272 : vector<2x2x128xf32>
    %cst_65 = arith.constant dense<0.000000e+00> : vector<2x2xf32>
    %275 = vector.multi_reduction <add>, %274, %cst_65 [2] : vector<2x2x128xf32> to vector<2x2xf32>
    %cst_66 = arith.constant dense<0.000000e+00> : vector<2xf32>
    %276 = vector.multi_reduction <add>, %275, %cst_66 [1] : vector<2x2xf32> to vector<2xf32>
    %277 = vector.shape_cast %276 : vector<2xf32> to vector<2x1xf32>
    %278 = arith.addf %8, %277 : vector<2x1xf32>
    %c1 = arith.constant 1 : index
    %c0_67 = arith.constant 0 : index
    %c0_68 = arith.constant 0 : index
    %279 = vector.load %arg2[%c1, %c0_67, %c0_68] : memref<5x128x384xf32, #tpu.memory_space<vmem>>, vector<1x128x384xf32>
    %280 = vector.shape_cast %279 : vector<1x128x384xf32> to vector<128x384xf32>
    %cst_69 = arith.constant dense<0.000000e+00> : vector<16x384xf32>
    %281 = tpu.matmul %269, %280, %cst_69 {dimension_numbers = #tpu.dot_dimension_numbers<[1], [0], [0], [1], [0, 0, 1, 1], [], []>} : vector<16x128xf32>, vector<128x384xf32>, vector<16x384xf32> -> vector<16x384xf32>
    %c1_70 = arith.constant 1 : index
    %c0_71 = arith.constant 0 : index
    %c0_72 = arith.constant 0 : index
    %282 = vector.load %arg4[%c1_70, %c0_71, %c0_72] : memref<5x1x384xf32, #tpu.memory_space<vmem>>, vector<1x1x384xf32>
    %283 = vector.shape_cast %282 : vector<1x1x384xf32> to vector<1x384xf32>
    %284 = vector.broadcast %283 : vector<1x384xf32> to vector<16x384xf32>
    %285 = arith.addf %281, %284 : vector<16x384xf32>
    %c1_73 = arith.constant 1 : index
    %c0_74 = arith.constant 0 : index
    %c0_75 = arith.constant 0 : index
    %286 = vector.load %arg3[%c1_73, %c0_74, %c0_75] : memref<5x128x384xf32, #tpu.memory_space<vmem>>, vector<1x128x384xf32>
    %287 = vector.shape_cast %286 : vector<1x128x384xf32> to vector<128x384xf32>
    %c1_76 = arith.constant 1 : index
    %c0_77 = arith.constant 0 : index
    %c0_78 = arith.constant 0 : index
    %288 = vector.load %arg5[%c1_76, %c0_77, %c0_78] : memref<5x1x384xf32, #tpu.memory_space<vmem>>, vector<1x1x384xf32>
    %289 = vector.shape_cast %288 : vector<1x1x384xf32> to vector<1x384xf32>
    %cst_79 = arith.constant 0.000000e+00 : f32
    %290 = vector.broadcast %cst_79 : f32 to vector<2x128xf32>
    %291 = vector.extract_strided_slice %285 {offsets = [0, 0], sizes = [2, 384], strides = [1, 1]} : vector<16x384xf32> to vector<2x384xf32>
    %cst_80 = arith.constant dense<0.000000e+00> : vector<2x384xf32>
    %292 = tpu.matmul %290, %287, %cst_80 {dimension_numbers = #tpu.dot_dimension_numbers<[1], [0], [0], [1], [0, 0, 1, 1], [], []>} : vector<2x128xf32>, vector<128x384xf32>, vector<2x384xf32> -> vector<2x384xf32>
    %293 = vector.broadcast %289 : vector<1x384xf32> to vector<2x384xf32>
    %294 = arith.addf %292, %293 : vector<2x384xf32>
    %295 = vector.extract_strided_slice %291 {offsets = [0, 0], sizes = [2, 128], strides = [1, 1]} : vector<2x384xf32> to vector<2x128xf32>
    %296 = vector.extract_strided_slice %291 {offsets = [0, 128], sizes = [2, 128], strides = [1, 1]} : vector<2x384xf32> to vector<2x128xf32>
    %297 = vector.extract_strided_slice %291 {offsets = [0, 256], sizes = [2, 128], strides = [1, 1]} : vector<2x384xf32> to vector<2x128xf32>
    %298 = vector.extract_strided_slice %294 {offsets = [0, 0], sizes = [2, 128], strides = [1, 1]} : vector<2x384xf32> to vector<2x128xf32>
    %299 = vector.extract_strided_slice %294 {offsets = [0, 128], sizes = [2, 128], strides = [1, 1]} : vector<2x384xf32> to vector<2x128xf32>
    %300 = vector.extract_strided_slice %294 {offsets = [0, 256], sizes = [2, 128], strides = [1, 1]} : vector<2x384xf32> to vector<2x128xf32>
    %301 = arith.addf %295, %298 : vector<2x128xf32>
    %302 = arith.negf %301 : vector<2x128xf32>
    %303 = math.exp %302 : vector<2x128xf32>
    %cst_81 = arith.constant 1.000000e+00 : f32
    %304 = vector.broadcast %cst_81 : f32 to vector<2x128xf32>
    %305 = arith.addf %304, %303 : vector<2x128xf32>
    %306 = arith.divf %304, %305 : vector<2x128xf32>
    %307 = arith.addf %296, %299 : vector<2x128xf32>
    %308 = arith.negf %307 : vector<2x128xf32>
    %309 = math.exp %308 : vector<2x128xf32>
    %cst_82 = arith.constant 1.000000e+00 : f32
    %310 = vector.broadcast %cst_82 : f32 to vector<2x128xf32>
    %311 = arith.addf %310, %309 : vector<2x128xf32>
    %312 = arith.divf %310, %311 : vector<2x128xf32>
    %313 = arith.mulf %306, %300 : vector<2x128xf32>
    %314 = arith.addf %297, %313 : vector<2x128xf32>
    %315 = math.tanh %314 : vector<2x128xf32>
    %cst_83 = arith.constant 1.000000e+00 : f32
    %316 = vector.broadcast %cst_83 : f32 to vector<2x128xf32>
    %317 = arith.subf %316, %312 : vector<2x128xf32>
    %318 = arith.mulf %317, %315 : vector<2x128xf32>
    %319 = arith.mulf %312, %290 : vector<2x128xf32>
    %320 = arith.addf %318, %319 : vector<2x128xf32>
    %c0_84 = arith.constant 0 : index
    %c0_85 = arith.constant 0 : index
    %321 = vector.load %arg10[%c0_84, %c0_85] : memref<16x128xf32, #tpu.memory_space<vmem>>, vector<2x128xf32>
    tpu.vector_store %arg10[%c0_84, %c0_85], %320 {strides = array<i32>} : memref<16x128xf32, #tpu.memory_space<vmem>>, vector<2x128xf32>,
    %322 = vector.extract_strided_slice %285 {offsets = [2, 0], sizes = [2, 384], strides = [1, 1]} : vector<16x384xf32> to vector<2x384xf32>
    %cst_86 = arith.constant dense<0.000000e+00> : vector<2x384xf32>
    %323 = tpu.matmul %320, %287, %cst_86 {dimension_numbers = #tpu.dot_dimension_numbers<[1], [0], [0], [1], [0, 0, 1, 1], [], []>} : vector<2x128xf32>, vector<128x384xf32>, vector<2x384xf32> -> vector<2x384xf32>
    %324 = vector.broadcast %289 : vector<1x384xf32> to vector<2x384xf32>
    %325 = arith.addf %323, %324 : vector<2x384xf32>
    %326 = vector.extract_strided_slice %322 {offsets = [0, 0], sizes = [2, 128], strides = [1, 1]} : vector<2x384xf32> to vector<2x128xf32>
    %327 = vector.extract_strided_slice %322 {offsets = [0, 128], sizes = [2, 128], strides = [1, 1]} : vector<2x384xf32> to vector<2x128xf32>
    %328 = vector.extract_strided_slice %322 {offsets = [0, 256], sizes = [2, 128], strides = [1, 1]} : vector<2x384xf32> to vector<2x128xf32>
    %329 = vector.extract_strided_slice %325 {offsets = [0, 0], sizes = [2, 128], strides = [1, 1]} : vector<2x384xf32> to vector<2x128xf32>
    %330 = vector.extract_strided_slice %325 {offsets = [0, 128], sizes = [2, 128], strides = [1, 1]} : vector<2x384xf32> to vector<2x128xf32>
    %331 = vector.extract_strided_slice %325 {offsets = [0, 256], sizes = [2, 128], strides = [1, 1]} : vector<2x384xf32> to vector<2x128xf32>
    %332 = arith.addf %326, %329 : vector<2x128xf32>
    %333 = arith.negf %332 : vector<2x128xf32>
    %334 = math.exp %333 : vector<2x128xf32>
    %cst_87 = arith.constant 1.000000e+00 : f32
    %335 = vector.broadcast %cst_87 : f32 to vector<2x128xf32>
    %336 = arith.addf %335, %334 : vector<2x128xf32>
    %337 = arith.divf %335, %336 : vector<2x128xf32>
    %338 = arith.addf %327, %330 : vector<2x128xf32>
    %339 = arith.negf %338 : vector<2x128xf32>
    %340 = math.exp %339 : vector<2x128xf32>
    %cst_88 = arith.constant 1.000000e+00 : f32
    %341 = vector.broadcast %cst_88 : f32 to vector<2x128xf32>
    %342 = arith.addf %341, %340 : vector<2x128xf32>
    %343 = arith.divf %341, %342 : vector<2x128xf32>
    %344 = arith.mulf %337, %331 : vector<2x128xf32>
    %345 = arith.addf %328, %344 : vector<2x128xf32>
    %346 = math.tanh %345 : vector<2x128xf32>
    %cst_89 = arith.constant 1.000000e+00 : f32
    %347 = vector.broadcast %cst_89 : f32 to vector<2x128xf32>
    %348 = arith.subf %347, %343 : vector<2x128xf32>
    %349 = arith.mulf %348, %346 : vector<2x128xf32>
    %350 = arith.mulf %343, %320 : vector<2x128xf32>
    %351 = arith.addf %349, %350 : vector<2x128xf32>
    %c2_90 = arith.constant 2 : index
    %c0_91 = arith.constant 0 : index
    %352 = vector.load %arg10[%c2_90, %c0_91] : memref<16x128xf32, #tpu.memory_space<vmem>>, vector<2x128xf32>
    tpu.vector_store %arg10[%c2_90, %c0_91], %351 {strides = array<i32>} : memref<16x128xf32, #tpu.memory_space<vmem>>, vector<2x128xf32>,
    %353 = vector.extract_strided_slice %285 {offsets = [4, 0], sizes = [2, 384], strides = [1, 1]} : vector<16x384xf32> to vector<2x384xf32>
    %cst_92 = arith.constant dense<0.000000e+00> : vector<2x384xf32>
    %354 = tpu.matmul %351, %287, %cst_92 {dimension_numbers = #tpu.dot_dimension_numbers<[1], [0], [0], [1], [0, 0, 1, 1], [], []>} : vector<2x128xf32>, vector<128x384xf32>, vector<2x384xf32> -> vector<2x384xf32>
    %355 = vector.broadcast %289 : vector<1x384xf32> to vector<2x384xf32>
    %356 = arith.addf %354, %355 : vector<2x384xf32>
    %357 = vector.extract_strided_slice %353 {offsets = [0, 0], sizes = [2, 128], strides = [1, 1]} : vector<2x384xf32> to vector<2x128xf32>
    %358 = vector.extract_strided_slice %353 {offsets = [0, 128], sizes = [2, 128], strides = [1, 1]} : vector<2x384xf32> to vector<2x128xf32>
    %359 = vector.extract_strided_slice %353 {offsets = [0, 256], sizes = [2, 128], strides = [1, 1]} : vector<2x384xf32> to vector<2x128xf32>
    %360 = vector.extract_strided_slice %356 {offsets = [0, 0], sizes = [2, 128], strides = [1, 1]} : vector<2x384xf32> to vector<2x128xf32>
    %361 = vector.extract_strided_slice %356 {offsets = [0, 128], sizes = [2, 128], strides = [1, 1]} : vector<2x384xf32> to vector<2x128xf32>
    %362 = vector.extract_strided_slice %356 {offsets = [0, 256], sizes = [2, 128], strides = [1, 1]} : vector<2x384xf32> to vector<2x128xf32>
    %363 = arith.addf %357, %360 : vector<2x128xf32>
    %364 = arith.negf %363 : vector<2x128xf32>
    %365 = math.exp %364 : vector<2x128xf32>
    %cst_93 = arith.constant 1.000000e+00 : f32
    %366 = vector.broadcast %cst_93 : f32 to vector<2x128xf32>
    %367 = arith.addf %366, %365 : vector<2x128xf32>
    %368 = arith.divf %366, %367 : vector<2x128xf32>
    %369 = arith.addf %358, %361 : vector<2x128xf32>
    %370 = arith.negf %369 : vector<2x128xf32>
    %371 = math.exp %370 : vector<2x128xf32>
    %cst_94 = arith.constant 1.000000e+00 : f32
    %372 = vector.broadcast %cst_94 : f32 to vector<2x128xf32>
    %373 = arith.addf %372, %371 : vector<2x128xf32>
    %374 = arith.divf %372, %373 : vector<2x128xf32>
    %375 = arith.mulf %368, %362 : vector<2x128xf32>
    %376 = arith.addf %359, %375 : vector<2x128xf32>
    %377 = math.tanh %376 : vector<2x128xf32>
    %cst_95 = arith.constant 1.000000e+00 : f32
    %378 = vector.broadcast %cst_95 : f32 to vector<2x128xf32>
    %379 = arith.subf %378, %374 : vector<2x128xf32>
    %380 = arith.mulf %379, %377 : vector<2x128xf32>
    %381 = arith.mulf %374, %351 : vector<2x128xf32>
    %382 = arith.addf %380, %381 : vector<2x128xf32>
    %c4_96 = arith.constant 4 : index
    %c0_97 = arith.constant 0 : index
    %383 = vector.load %arg10[%c4_96, %c0_97] : memref<16x128xf32, #tpu.memory_space<vmem>>, vector<2x128xf32>
    tpu.vector_store %arg10[%c4_96, %c0_97], %382 {strides = array<i32>} : memref<16x128xf32, #tpu.memory_space<vmem>>, vector<2x128xf32>,
    %384 = vector.extract_strided_slice %285 {offsets = [6, 0], sizes = [2, 384], strides = [1, 1]} : vector<16x384xf32> to vector<2x384xf32>
    %cst_98 = arith.constant dense<0.000000e+00> : vector<2x384xf32>
    %385 = tpu.matmul %382, %287, %cst_98 {dimension_numbers = #tpu.dot_dimension_numbers<[1], [0], [0], [1], [0, 0, 1, 1], [], []>} : vector<2x128xf32>, vector<128x384xf32>, vector<2x384xf32> -> vector<2x384xf32>
    %386 = vector.broadcast %289 : vector<1x384xf32> to vector<2x384xf32>
    %387 = arith.addf %385, %386 : vector<2x384xf32>
    %388 = vector.extract_strided_slice %384 {offsets = [0, 0], sizes = [2, 128], strides = [1, 1]} : vector<2x384xf32> to vector<2x128xf32>
    %389 = vector.extract_strided_slice %384 {offsets = [0, 128], sizes = [2, 128], strides = [1, 1]} : vector<2x384xf32> to vector<2x128xf32>
    %390 = vector.extract_strided_slice %384 {offsets = [0, 256], sizes = [2, 128], strides = [1, 1]} : vector<2x384xf32> to vector<2x128xf32>
    %391 = vector.extract_strided_slice %387 {offsets = [0, 0], sizes = [2, 128], strides = [1, 1]} : vector<2x384xf32> to vector<2x128xf32>
    %392 = vector.extract_strided_slice %387 {offsets = [0, 128], sizes = [2, 128], strides = [1, 1]} : vector<2x384xf32> to vector<2x128xf32>
    %393 = vector.extract_strided_slice %387 {offsets = [0, 256], sizes = [2, 128], strides = [1, 1]} : vector<2x384xf32> to vector<2x128xf32>
    %394 = arith.addf %388, %391 : vector<2x128xf32>
    %395 = arith.negf %394 : vector<2x128xf32>
    %396 = math.exp %395 : vector<2x128xf32>
    %cst_99 = arith.constant 1.000000e+00 : f32
    %397 = vector.broadcast %cst_99 : f32 to vector<2x128xf32>
    %398 = arith.addf %397, %396 : vector<2x128xf32>
    %399 = arith.divf %397, %398 : vector<2x128xf32>
    %400 = arith.addf %389, %392 : vector<2x128xf32>
    %401 = arith.negf %400 : vector<2x128xf32>
    %402 = math.exp %401 : vector<2x128xf32>
    %cst_100 = arith.constant 1.000000e+00 : f32
    %403 = vector.broadcast %cst_100 : f32 to vector<2x128xf32>
    %404 = arith.addf %403, %402 : vector<2x128xf32>
    %405 = arith.divf %403, %404 : vector<2x128xf32>
    %406 = arith.mulf %399, %393 : vector<2x128xf32>
    %407 = arith.addf %390, %406 : vector<2x128xf32>
    %408 = math.tanh %407 : vector<2x128xf32>
    %cst_101 = arith.constant 1.000000e+00 : f32
    %409 = vector.broadcast %cst_101 : f32 to vector<2x128xf32>
    %410 = arith.subf %409, %405 : vector<2x128xf32>
    %411 = arith.mulf %410, %408 : vector<2x128xf32>
    %412 = arith.mulf %405, %382 : vector<2x128xf32>
    %413 = arith.addf %411, %412 : vector<2x128xf32>
    %c6_102 = arith.constant 6 : index
    %c0_103 = arith.constant 0 : index
    %414 = vector.load %arg10[%c6_102, %c0_103] : memref<16x128xf32, #tpu.memory_space<vmem>>, vector<2x128xf32>
    tpu.vector_store %arg10[%c6_102, %c0_103], %413 {strides = array<i32>} : memref<16x128xf32, #tpu.memory_space<vmem>>, vector<2x128xf32>,
    %415 = vector.extract_strided_slice %285 {offsets = [8, 0], sizes = [2, 384], strides = [1, 1]} : vector<16x384xf32> to vector<2x384xf32>
    %cst_104 = arith.constant dense<0.000000e+00> : vector<2x384xf32>
    %416 = tpu.matmul %413, %287, %cst_104 {dimension_numbers = #tpu.dot_dimension_numbers<[1], [0], [0], [1], [0, 0, 1, 1], [], []>} : vector<2x128xf32>, vector<128x384xf32>, vector<2x384xf32> -> vector<2x384xf32>
    %417 = vector.broadcast %289 : vector<1x384xf32> to vector<2x384xf32>
    %418 = arith.addf %416, %417 : vector<2x384xf32>
    %419 = vector.extract_strided_slice %415 {offsets = [0, 0], sizes = [2, 128], strides = [1, 1]} : vector<2x384xf32> to vector<2x128xf32>
    %420 = vector.extract_strided_slice %415 {offsets = [0, 128], sizes = [2, 128], strides = [1, 1]} : vector<2x384xf32> to vector<2x128xf32>
    %421 = vector.extract_strided_slice %415 {offsets = [0, 256], sizes = [2, 128], strides = [1, 1]} : vector<2x384xf32> to vector<2x128xf32>
    %422 = vector.extract_strided_slice %418 {offsets = [0, 0], sizes = [2, 128], strides = [1, 1]} : vector<2x384xf32> to vector<2x128xf32>
    %423 = vector.extract_strided_slice %418 {offsets = [0, 128], sizes = [2, 128], strides = [1, 1]} : vector<2x384xf32> to vector<2x128xf32>
    %424 = vector.extract_strided_slice %418 {offsets = [0, 256], sizes = [2, 128], strides = [1, 1]} : vector<2x384xf32> to vector<2x128xf32>
    %425 = arith.addf %419, %422 : vector<2x128xf32>
    %426 = arith.negf %425 : vector<2x128xf32>
    %427 = math.exp %426 : vector<2x128xf32>
    %cst_105 = arith.constant 1.000000e+00 : f32
    %428 = vector.broadcast %cst_105 : f32 to vector<2x128xf32>
    %429 = arith.addf %428, %427 : vector<2x128xf32>
    %430 = arith.divf %428, %429 : vector<2x128xf32>
    %431 = arith.addf %420, %423 : vector<2x128xf32>
    %432 = arith.negf %431 : vector<2x128xf32>
    %433 = math.exp %432 : vector<2x128xf32>
    %cst_106 = arith.constant 1.000000e+00 : f32
    %434 = vector.broadcast %cst_106 : f32 to vector<2x128xf32>
    %435 = arith.addf %434, %433 : vector<2x128xf32>
    %436 = arith.divf %434, %435 : vector<2x128xf32>
    %437 = arith.mulf %430, %424 : vector<2x128xf32>
    %438 = arith.addf %421, %437 : vector<2x128xf32>
    %439 = math.tanh %438 : vector<2x128xf32>
    %cst_107 = arith.constant 1.000000e+00 : f32
    %440 = vector.broadcast %cst_107 : f32 to vector<2x128xf32>
    %441 = arith.subf %440, %436 : vector<2x128xf32>
    %442 = arith.mulf %441, %439 : vector<2x128xf32>
    %443 = arith.mulf %436, %413 : vector<2x128xf32>
    %444 = arith.addf %442, %443 : vector<2x128xf32>
    %c8_108 = arith.constant 8 : index
    %c0_109 = arith.constant 0 : index
    %445 = vector.load %arg10[%c8_108, %c0_109] : memref<16x128xf32, #tpu.memory_space<vmem>>, vector<2x128xf32>
    tpu.vector_store %arg10[%c8_108, %c0_109], %444 {strides = array<i32>} : memref<16x128xf32, #tpu.memory_space<vmem>>, vector<2x128xf32>,
    %446 = vector.extract_strided_slice %285 {offsets = [10, 0], sizes = [2, 384], strides = [1, 1]} : vector<16x384xf32> to vector<2x384xf32>
    %cst_110 = arith.constant dense<0.000000e+00> : vector<2x384xf32>
    %447 = tpu.matmul %444, %287, %cst_110 {dimension_numbers = #tpu.dot_dimension_numbers<[1], [0], [0], [1], [0, 0, 1, 1], [], []>} : vector<2x128xf32>, vector<128x384xf32>, vector<2x384xf32> -> vector<2x384xf32>
    %448 = vector.broadcast %289 : vector<1x384xf32> to vector<2x384xf32>
    %449 = arith.addf %447, %448 : vector<2x384xf32>
    %450 = vector.extract_strided_slice %446 {offsets = [0, 0], sizes = [2, 128], strides = [1, 1]} : vector<2x384xf32> to vector<2x128xf32>
    %451 = vector.extract_strided_slice %446 {offsets = [0, 128], sizes = [2, 128], strides = [1, 1]} : vector<2x384xf32> to vector<2x128xf32>
    %452 = vector.extract_strided_slice %446 {offsets = [0, 256], sizes = [2, 128], strides = [1, 1]} : vector<2x384xf32> to vector<2x128xf32>
    %453 = vector.extract_strided_slice %449 {offsets = [0, 0], sizes = [2, 128], strides = [1, 1]} : vector<2x384xf32> to vector<2x128xf32>
    %454 = vector.extract_strided_slice %449 {offsets = [0, 128], sizes = [2, 128], strides = [1, 1]} : vector<2x384xf32> to vector<2x128xf32>
    %455 = vector.extract_strided_slice %449 {offsets = [0, 256], sizes = [2, 128], strides = [1, 1]} : vector<2x384xf32> to vector<2x128xf32>
    %456 = arith.addf %450, %453 : vector<2x128xf32>
    %457 = arith.negf %456 : vector<2x128xf32>
    %458 = math.exp %457 : vector<2x128xf32>
    %cst_111 = arith.constant 1.000000e+00 : f32
    %459 = vector.broadcast %cst_111 : f32 to vector<2x128xf32>
    %460 = arith.addf %459, %458 : vector<2x128xf32>
    %461 = arith.divf %459, %460 : vector<2x128xf32>
    %462 = arith.addf %451, %454 : vector<2x128xf32>
    %463 = arith.negf %462 : vector<2x128xf32>
    %464 = math.exp %463 : vector<2x128xf32>
    %cst_112 = arith.constant 1.000000e+00 : f32
    %465 = vector.broadcast %cst_112 : f32 to vector<2x128xf32>
    %466 = arith.addf %465, %464 : vector<2x128xf32>
    %467 = arith.divf %465, %466 : vector<2x128xf32>
    %468 = arith.mulf %461, %455 : vector<2x128xf32>
    %469 = arith.addf %452, %468 : vector<2x128xf32>
    %470 = math.tanh %469 : vector<2x128xf32>
    %cst_113 = arith.constant 1.000000e+00 : f32
    %471 = vector.broadcast %cst_113 : f32 to vector<2x128xf32>
    %472 = arith.subf %471, %467 : vector<2x128xf32>
    %473 = arith.mulf %472, %470 : vector<2x128xf32>
    %474 = arith.mulf %467, %444 : vector<2x128xf32>
    %475 = arith.addf %473, %474 : vector<2x128xf32>
    %c10_114 = arith.constant 10 : index
    %c0_115 = arith.constant 0 : index
    %476 = vector.load %arg10[%c10_114, %c0_115] : memref<16x128xf32, #tpu.memory_space<vmem>>, vector<2x128xf32>
    tpu.vector_store %arg10[%c10_114, %c0_115], %475 {strides = array<i32>} : memref<16x128xf32, #tpu.memory_space<vmem>>, vector<2x128xf32>,
    %477 = vector.extract_strided_slice %285 {offsets = [12, 0], sizes = [2, 384], strides = [1, 1]} : vector<16x384xf32> to vector<2x384xf32>
    %cst_116 = arith.constant dense<0.000000e+00> : vector<2x384xf32>
    %478 = tpu.matmul %475, %287, %cst_116 {dimension_numbers = #tpu.dot_dimension_numbers<[1], [0], [0], [1], [0, 0, 1, 1], [], []>} : vector<2x128xf32>, vector<128x384xf32>, vector<2x384xf32> -> vector<2x384xf32>
    %479 = vector.broadcast %289 : vector<1x384xf32> to vector<2x384xf32>
    %480 = arith.addf %478, %479 : vector<2x384xf32>
    %481 = vector.extract_strided_slice %477 {offsets = [0, 0], sizes = [2, 128], strides = [1, 1]} : vector<2x384xf32> to vector<2x128xf32>
    %482 = vector.extract_strided_slice %477 {offsets = [0, 128], sizes = [2, 128], strides = [1, 1]} : vector<2x384xf32> to vector<2x128xf32>
    %483 = vector.extract_strided_slice %477 {offsets = [0, 256], sizes = [2, 128], strides = [1, 1]} : vector<2x384xf32> to vector<2x128xf32>
    %484 = vector.extract_strided_slice %480 {offsets = [0, 0], sizes = [2, 128], strides = [1, 1]} : vector<2x384xf32> to vector<2x128xf32>
    %485 = vector.extract_strided_slice %480 {offsets = [0, 128], sizes = [2, 128], strides = [1, 1]} : vector<2x384xf32> to vector<2x128xf32>
    %486 = vector.extract_strided_slice %480 {offsets = [0, 256], sizes = [2, 128], strides = [1, 1]} : vector<2x384xf32> to vector<2x128xf32>
    %487 = arith.addf %481, %484 : vector<2x128xf32>
    %488 = arith.negf %487 : vector<2x128xf32>
    %489 = math.exp %488 : vector<2x128xf32>
    %cst_117 = arith.constant 1.000000e+00 : f32
    %490 = vector.broadcast %cst_117 : f32 to vector<2x128xf32>
    %491 = arith.addf %490, %489 : vector<2x128xf32>
    %492 = arith.divf %490, %491 : vector<2x128xf32>
    %493 = arith.addf %482, %485 : vector<2x128xf32>
    %494 = arith.negf %493 : vector<2x128xf32>
    %495 = math.exp %494 : vector<2x128xf32>
    %cst_118 = arith.constant 1.000000e+00 : f32
    %496 = vector.broadcast %cst_118 : f32 to vector<2x128xf32>
    %497 = arith.addf %496, %495 : vector<2x128xf32>
    %498 = arith.divf %496, %497 : vector<2x128xf32>
    %499 = arith.mulf %492, %486 : vector<2x128xf32>
    %500 = arith.addf %483, %499 : vector<2x128xf32>
    %501 = math.tanh %500 : vector<2x128xf32>
    %cst_119 = arith.constant 1.000000e+00 : f32
    %502 = vector.broadcast %cst_119 : f32 to vector<2x128xf32>
    %503 = arith.subf %502, %498 : vector<2x128xf32>
    %504 = arith.mulf %503, %501 : vector<2x128xf32>
    %505 = arith.mulf %498, %475 : vector<2x128xf32>
    %506 = arith.addf %504, %505 : vector<2x128xf32>
    %c12_120 = arith.constant 12 : index
    %c0_121 = arith.constant 0 : index
    %507 = vector.load %arg10[%c12_120, %c0_121] : memref<16x128xf32, #tpu.memory_space<vmem>>, vector<2x128xf32>
    tpu.vector_store %arg10[%c12_120, %c0_121], %506 {strides = array<i32>} : memref<16x128xf32, #tpu.memory_space<vmem>>, vector<2x128xf32>,
    %508 = vector.extract_strided_slice %285 {offsets = [14, 0], sizes = [2, 384], strides = [1, 1]} : vector<16x384xf32> to vector<2x384xf32>
    %cst_122 = arith.constant dense<0.000000e+00> : vector<2x384xf32>
    %509 = tpu.matmul %506, %287, %cst_122 {dimension_numbers = #tpu.dot_dimension_numbers<[1], [0], [0], [1], [0, 0, 1, 1], [], []>} : vector<2x128xf32>, vector<128x384xf32>, vector<2x384xf32> -> vector<2x384xf32>
    %510 = vector.broadcast %289 : vector<1x384xf32> to vector<2x384xf32>
    %511 = arith.addf %509, %510 : vector<2x384xf32>
    %512 = vector.extract_strided_slice %508 {offsets = [0, 0], sizes = [2, 128], strides = [1, 1]} : vector<2x384xf32> to vector<2x128xf32>
    %513 = vector.extract_strided_slice %508 {offsets = [0, 128], sizes = [2, 128], strides = [1, 1]} : vector<2x384xf32> to vector<2x128xf32>
    %514 = vector.extract_strided_slice %508 {offsets = [0, 256], sizes = [2, 128], strides = [1, 1]} : vector<2x384xf32> to vector<2x128xf32>
    %515 = vector.extract_strided_slice %511 {offsets = [0, 0], sizes = [2, 128], strides = [1, 1]} : vector<2x384xf32> to vector<2x128xf32>
    %516 = vector.extract_strided_slice %511 {offsets = [0, 128], sizes = [2, 128], strides = [1, 1]} : vector<2x384xf32> to vector<2x128xf32>
    %517 = vector.extract_strided_slice %511 {offsets = [0, 256], sizes = [2, 128], strides = [1, 1]} : vector<2x384xf32> to vector<2x128xf32>
    %518 = arith.addf %512, %515 : vector<2x128xf32>
    %519 = arith.negf %518 : vector<2x128xf32>
    %520 = math.exp %519 : vector<2x128xf32>
    %cst_123 = arith.constant 1.000000e+00 : f32
    %521 = vector.broadcast %cst_123 : f32 to vector<2x128xf32>
    %522 = arith.addf %521, %520 : vector<2x128xf32>
    %523 = arith.divf %521, %522 : vector<2x128xf32>
    %524 = arith.addf %513, %516 : vector<2x128xf32>
    %525 = arith.negf %524 : vector<2x128xf32>
    %526 = math.exp %525 : vector<2x128xf32>
    %cst_124 = arith.constant 1.000000e+00 : f32
    %527 = vector.broadcast %cst_124 : f32 to vector<2x128xf32>
    %528 = arith.addf %527, %526 : vector<2x128xf32>
    %529 = arith.divf %527, %528 : vector<2x128xf32>
    %530 = arith.mulf %523, %517 : vector<2x128xf32>
    %531 = arith.addf %514, %530 : vector<2x128xf32>
    %532 = math.tanh %531 : vector<2x128xf32>
    %cst_125 = arith.constant 1.000000e+00 : f32
    %533 = vector.broadcast %cst_125 : f32 to vector<2x128xf32>
    %534 = arith.subf %533, %529 : vector<2x128xf32>
    %535 = arith.mulf %534, %532 : vector<2x128xf32>
    %536 = arith.mulf %529, %506 : vector<2x128xf32>
    %537 = arith.addf %535, %536 : vector<2x128xf32>
    %c14_126 = arith.constant 14 : index
    %c0_127 = arith.constant 0 : index
    %538 = vector.load %arg10[%c14_126, %c0_127] : memref<16x128xf32, #tpu.memory_space<vmem>>, vector<2x128xf32>
    tpu.vector_store %arg10[%c14_126, %c0_127], %537 {strides = array<i32>} : memref<16x128xf32, #tpu.memory_space<vmem>>, vector<2x128xf32>,
    %c0_128 = arith.constant 0 : index
    %c0_129 = arith.constant 0 : index
    %539 = vector.load %arg10[%c0_128, %c0_129] : memref<16x128xf32, #tpu.memory_space<vmem>>, vector<16x128xf32>
    %540 = vector.shape_cast %537 : vector<2x128xf32> to vector<1x2x128xf32>
    %c1_130 = arith.constant 1 : index
    %c0_131 = arith.constant 0 : index
    %c0_132 = arith.constant 0 : index
    %c0_133 = arith.constant 0 : index
    %541 = vector.load %arg7[%c1_130, %c0_131, %c0_132, %c0_133] : memref<5x2x2x128xf32, #tpu.memory_space<vmem>>, vector<1x2x2x128xf32>
    %542 = vector.shape_cast %541 : vector<1x2x2x128xf32> to vector<2x2x128xf32>
    %543 = vector.broadcast %540 : vector<1x2x128xf32> to vector<2x2x128xf32>
    %544 = arith.mulf %543, %542 : vector<2x2x128xf32>
    %cst_134 = arith.constant dense<0.000000e+00> : vector<2x2xf32>
    %545 = vector.multi_reduction <add>, %544, %cst_134 [2] : vector<2x2x128xf32> to vector<2x2xf32>
    %cst_135 = arith.constant dense<0.000000e+00> : vector<2xf32>
    %546 = vector.multi_reduction <add>, %545, %cst_135 [1] : vector<2x2xf32> to vector<2xf32>
    %547 = vector.shape_cast %546 : vector<2xf32> to vector<2x1xf32>
    %548 = arith.addf %278, %547 : vector<2x1xf32>
    %c2_136 = arith.constant 2 : index
    %c0_137 = arith.constant 0 : index
    %c0_138 = arith.constant 0 : index
    %549 = vector.load %arg2[%c2_136, %c0_137, %c0_138] : memref<5x128x384xf32, #tpu.memory_space<vmem>>, vector<1x128x384xf32>
    %550 = vector.shape_cast %549 : vector<1x128x384xf32> to vector<128x384xf32>
    %cst_139 = arith.constant dense<0.000000e+00> : vector<16x384xf32>
    %551 = tpu.matmul %539, %550, %cst_139 {dimension_numbers = #tpu.dot_dimension_numbers<[1], [0], [0], [1], [0, 0, 1, 1], [], []>} : vector<16x128xf32>, vector<128x384xf32>, vector<16x384xf32> -> vector<16x384xf32>
    %c2_140 = arith.constant 2 : index
    %c0_141 = arith.constant 0 : index
    %c0_142 = arith.constant 0 : index
    %552 = vector.load %arg4[%c2_140, %c0_141, %c0_142] : memref<5x1x384xf32, #tpu.memory_space<vmem>>, vector<1x1x384xf32>
    %553 = vector.shape_cast %552 : vector<1x1x384xf32> to vector<1x384xf32>
    %554 = vector.broadcast %553 : vector<1x384xf32> to vector<16x384xf32>
    %555 = arith.addf %551, %554 : vector<16x384xf32>
    %c2_143 = arith.constant 2 : index
    %c0_144 = arith.constant 0 : index
    %c0_145 = arith.constant 0 : index
    %556 = vector.load %arg3[%c2_143, %c0_144, %c0_145] : memref<5x128x384xf32, #tpu.memory_space<vmem>>, vector<1x128x384xf32>
    %557 = vector.shape_cast %556 : vector<1x128x384xf32> to vector<128x384xf32>
    %c2_146 = arith.constant 2 : index
    %c0_147 = arith.constant 0 : index
    %c0_148 = arith.constant 0 : index
    %558 = vector.load %arg5[%c2_146, %c0_147, %c0_148] : memref<5x1x384xf32, #tpu.memory_space<vmem>>, vector<1x1x384xf32>
    %559 = vector.shape_cast %558 : vector<1x1x384xf32> to vector<1x384xf32>
    %cst_149 = arith.constant 0.000000e+00 : f32
    %560 = vector.broadcast %cst_149 : f32 to vector<2x128xf32>
    %561 = vector.extract_strided_slice %555 {offsets = [0, 0], sizes = [2, 384], strides = [1, 1]} : vector<16x384xf32> to vector<2x384xf32>
    %cst_150 = arith.constant dense<0.000000e+00> : vector<2x384xf32>
    %562 = tpu.matmul %560, %557, %cst_150 {dimension_numbers = #tpu.dot_dimension_numbers<[1], [0], [0], [1], [0, 0, 1, 1], [], []>} : vector<2x128xf32>, vector<128x384xf32>, vector<2x384xf32> -> vector<2x384xf32>
    %563 = vector.broadcast %559 : vector<1x384xf32> to vector<2x384xf32>
    %564 = arith.addf %562, %563 : vector<2x384xf32>
    %565 = vector.extract_strided_slice %561 {offsets = [0, 0], sizes = [2, 128], strides = [1, 1]} : vector<2x384xf32> to vector<2x128xf32>
    %566 = vector.extract_strided_slice %561 {offsets = [0, 128], sizes = [2, 128], strides = [1, 1]} : vector<2x384xf32> to vector<2x128xf32>
    %567 = vector.extract_strided_slice %561 {offsets = [0, 256], sizes = [2, 128], strides = [1, 1]} : vector<2x384xf32> to vector<2x128xf32>
    %568 = vector.extract_strided_slice %564 {offsets = [0, 0], sizes = [2, 128], strides = [1, 1]} : vector<2x384xf32> to vector<2x128xf32>
    %569 = vector.extract_strided_slice %564 {offsets = [0, 128], sizes = [2, 128], strides = [1, 1]} : vector<2x384xf32> to vector<2x128xf32>
    %570 = vector.extract_strided_slice %564 {offsets = [0, 256], sizes = [2, 128], strides = [1, 1]} : vector<2x384xf32> to vector<2x128xf32>
    %571 = arith.addf %565, %568 : vector<2x128xf32>
    %572 = arith.negf %571 : vector<2x128xf32>
    %573 = math.exp %572 : vector<2x128xf32>
    %cst_151 = arith.constant 1.000000e+00 : f32
    %574 = vector.broadcast %cst_151 : f32 to vector<2x128xf32>
    %575 = arith.addf %574, %573 : vector<2x128xf32>
    %576 = arith.divf %574, %575 : vector<2x128xf32>
    %577 = arith.addf %566, %569 : vector<2x128xf32>
    %578 = arith.negf %577 : vector<2x128xf32>
    %579 = math.exp %578 : vector<2x128xf32>
    %cst_152 = arith.constant 1.000000e+00 : f32
    %580 = vector.broadcast %cst_152 : f32 to vector<2x128xf32>
    %581 = arith.addf %580, %579 : vector<2x128xf32>
    %582 = arith.divf %580, %581 : vector<2x128xf32>
    %583 = arith.mulf %576, %570 : vector<2x128xf32>
    %584 = arith.addf %567, %583 : vector<2x128xf32>
    %585 = math.tanh %584 : vector<2x128xf32>
    %cst_153 = arith.constant 1.000000e+00 : f32
    %586 = vector.broadcast %cst_153 : f32 to vector<2x128xf32>
    %587 = arith.subf %586, %582 : vector<2x128xf32>
    %588 = arith.mulf %587, %585 : vector<2x128xf32>
    %589 = arith.mulf %582, %560 : vector<2x128xf32>
    %590 = arith.addf %588, %589 : vector<2x128xf32>
    %c0_154 = arith.constant 0 : index
    %c0_155 = arith.constant 0 : index
    %591 = vector.load %arg10[%c0_154, %c0_155] : memref<16x128xf32, #tpu.memory_space<vmem>>, vector<2x128xf32>
    tpu.vector_store %arg10[%c0_154, %c0_155], %590 {strides = array<i32>} : memref<16x128xf32, #tpu.memory_space<vmem>>, vector<2x128xf32>,
    %592 = vector.extract_strided_slice %555 {offsets = [2, 0], sizes = [2, 384], strides = [1, 1]} : vector<16x384xf32> to vector<2x384xf32>
    %cst_156 = arith.constant dense<0.000000e+00> : vector<2x384xf32>
    %593 = tpu.matmul %590, %557, %cst_156 {dimension_numbers = #tpu.dot_dimension_numbers<[1], [0], [0], [1], [0, 0, 1, 1], [], []>} : vector<2x128xf32>, vector<128x384xf32>, vector<2x384xf32> -> vector<2x384xf32>
    %594 = vector.broadcast %559 : vector<1x384xf32> to vector<2x384xf32>
    %595 = arith.addf %593, %594 : vector<2x384xf32>
    %596 = vector.extract_strided_slice %592 {offsets = [0, 0], sizes = [2, 128], strides = [1, 1]} : vector<2x384xf32> to vector<2x128xf32>
    %597 = vector.extract_strided_slice %592 {offsets = [0, 128], sizes = [2, 128], strides = [1, 1]} : vector<2x384xf32> to vector<2x128xf32>
    %598 = vector.extract_strided_slice %592 {offsets = [0, 256], sizes = [2, 128], strides = [1, 1]} : vector<2x384xf32> to vector<2x128xf32>
    %599 = vector.extract_strided_slice %595 {offsets = [0, 0], sizes = [2, 128], strides = [1, 1]} : vector<2x384xf32> to vector<2x128xf32>
    %600 = vector.extract_strided_slice %595 {offsets = [0, 128], sizes = [2, 128], strides = [1, 1]} : vector<2x384xf32> to vector<2x128xf32>
    %601 = vector.extract_strided_slice %595 {offsets = [0, 256], sizes = [2, 128], strides = [1, 1]} : vector<2x384xf32> to vector<2x128xf32>
    %602 = arith.addf %596, %599 : vector<2x128xf32>
    %603 = arith.negf %602 : vector<2x128xf32>
    %604 = math.exp %603 : vector<2x128xf32>
    %cst_157 = arith.constant 1.000000e+00 : f32
    %605 = vector.broadcast %cst_157 : f32 to vector<2x128xf32>
    %606 = arith.addf %605, %604 : vector<2x128xf32>
    %607 = arith.divf %605, %606 : vector<2x128xf32>
    %608 = arith.addf %597, %600 : vector<2x128xf32>
    %609 = arith.negf %608 : vector<2x128xf32>
    %610 = math.exp %609 : vector<2x128xf32>
    %cst_158 = arith.constant 1.000000e+00 : f32
    %611 = vector.broadcast %cst_158 : f32 to vector<2x128xf32>
    %612 = arith.addf %611, %610 : vector<2x128xf32>
    %613 = arith.divf %611, %612 : vector<2x128xf32>
    %614 = arith.mulf %607, %601 : vector<2x128xf32>
    %615 = arith.addf %598, %614 : vector<2x128xf32>
    %616 = math.tanh %615 : vector<2x128xf32>
    %cst_159 = arith.constant 1.000000e+00 : f32
    %617 = vector.broadcast %cst_159 : f32 to vector<2x128xf32>
    %618 = arith.subf %617, %613 : vector<2x128xf32>
    %619 = arith.mulf %618, %616 : vector<2x128xf32>
    %620 = arith.mulf %613, %590 : vector<2x128xf32>
    %621 = arith.addf %619, %620 : vector<2x128xf32>
    %c2_160 = arith.constant 2 : index
    %c0_161 = arith.constant 0 : index
    %622 = vector.load %arg10[%c2_160, %c0_161] : memref<16x128xf32, #tpu.memory_space<vmem>>, vector<2x128xf32>
    tpu.vector_store %arg10[%c2_160, %c0_161], %621 {strides = array<i32>} : memref<16x128xf32, #tpu.memory_space<vmem>>, vector<2x128xf32>,
    %623 = vector.extract_strided_slice %555 {offsets = [4, 0], sizes = [2, 384], strides = [1, 1]} : vector<16x384xf32> to vector<2x384xf32>
    %cst_162 = arith.constant dense<0.000000e+00> : vector<2x384xf32>
    %624 = tpu.matmul %621, %557, %cst_162 {dimension_numbers = #tpu.dot_dimension_numbers<[1], [0], [0], [1], [0, 0, 1, 1], [], []>} : vector<2x128xf32>, vector<128x384xf32>, vector<2x384xf32> -> vector<2x384xf32>
    %625 = vector.broadcast %559 : vector<1x384xf32> to vector<2x384xf32>
    %626 = arith.addf %624, %625 : vector<2x384xf32>
    %627 = vector.extract_strided_slice %623 {offsets = [0, 0], sizes = [2, 128], strides = [1, 1]} : vector<2x384xf32> to vector<2x128xf32>
    %628 = vector.extract_strided_slice %623 {offsets = [0, 128], sizes = [2, 128], strides = [1, 1]} : vector<2x384xf32> to vector<2x128xf32>
    %629 = vector.extract_strided_slice %623 {offsets = [0, 256], sizes = [2, 128], strides = [1, 1]} : vector<2x384xf32> to vector<2x128xf32>
    %630 = vector.extract_strided_slice %626 {offsets = [0, 0], sizes = [2, 128], strides = [1, 1]} : vector<2x384xf32> to vector<2x128xf32>
    %631 = vector.extract_strided_slice %626 {offsets = [0, 128], sizes = [2, 128], strides = [1, 1]} : vector<2x384xf32> to vector<2x128xf32>
    %632 = vector.extract_strided_slice %626 {offsets = [0, 256], sizes = [2, 128], strides = [1, 1]} : vector<2x384xf32> to vector<2x128xf32>
    %633 = arith.addf %627, %630 : vector<2x128xf32>
    %634 = arith.negf %633 : vector<2x128xf32>
    %635 = math.exp %634 : vector<2x128xf32>
    %cst_163 = arith.constant 1.000000e+00 : f32
    %636 = vector.broadcast %cst_163 : f32 to vector<2x128xf32>
    %637 = arith.addf %636, %635 : vector<2x128xf32>
    %638 = arith.divf %636, %637 : vector<2x128xf32>
    %639 = arith.addf %628, %631 : vector<2x128xf32>
    %640 = arith.negf %639 : vector<2x128xf32>
    %641 = math.exp %640 : vector<2x128xf32>
    %cst_164 = arith.constant 1.000000e+00 : f32
    %642 = vector.broadcast %cst_164 : f32 to vector<2x128xf32>
    %643 = arith.addf %642, %641 : vector<2x128xf32>
    %644 = arith.divf %642, %643 : vector<2x128xf32>
    %645 = arith.mulf %638, %632 : vector<2x128xf32>
    %646 = arith.addf %629, %645 : vector<2x128xf32>
    %647 = math.tanh %646 : vector<2x128xf32>
    %cst_165 = arith.constant 1.000000e+00 : f32
    %648 = vector.broadcast %cst_165 : f32 to vector<2x128xf32>
    %649 = arith.subf %648, %644 : vector<2x128xf32>
    %650 = arith.mulf %649, %647 : vector<2x128xf32>
    %651 = arith.mulf %644, %621 : vector<2x128xf32>
    %652 = arith.addf %650, %651 : vector<2x128xf32>
    %c4_166 = arith.constant 4 : index
    %c0_167 = arith.constant 0 : index
    %653 = vector.load %arg10[%c4_166, %c0_167] : memref<16x128xf32, #tpu.memory_space<vmem>>, vector<2x128xf32>
    tpu.vector_store %arg10[%c4_166, %c0_167], %652 {strides = array<i32>} : memref<16x128xf32, #tpu.memory_space<vmem>>, vector<2x128xf32>,
    %654 = vector.extract_strided_slice %555 {offsets = [6, 0], sizes = [2, 384], strides = [1, 1]} : vector<16x384xf32> to vector<2x384xf32>
    %cst_168 = arith.constant dense<0.000000e+00> : vector<2x384xf32>
    %655 = tpu.matmul %652, %557, %cst_168 {dimension_numbers = #tpu.dot_dimension_numbers<[1], [0], [0], [1], [0, 0, 1, 1], [], []>} : vector<2x128xf32>, vector<128x384xf32>, vector<2x384xf32> -> vector<2x384xf32>
    %656 = vector.broadcast %559 : vector<1x384xf32> to vector<2x384xf32>
    %657 = arith.addf %655, %656 : vector<2x384xf32>
    %658 = vector.extract_strided_slice %654 {offsets = [0, 0], sizes = [2, 128], strides = [1, 1]} : vector<2x384xf32> to vector<2x128xf32>
    %659 = vector.extract_strided_slice %654 {offsets = [0, 128], sizes = [2, 128], strides = [1, 1]} : vector<2x384xf32> to vector<2x128xf32>
    %660 = vector.extract_strided_slice %654 {offsets = [0, 256], sizes = [2, 128], strides = [1, 1]} : vector<2x384xf32> to vector<2x128xf32>
    %661 = vector.extract_strided_slice %657 {offsets = [0, 0], sizes = [2, 128], strides = [1, 1]} : vector<2x384xf32> to vector<2x128xf32>
    %662 = vector.extract_strided_slice %657 {offsets = [0, 128], sizes = [2, 128], strides = [1, 1]} : vector<2x384xf32> to vector<2x128xf32>
    %663 = vector.extract_strided_slice %657 {offsets = [0, 256], sizes = [2, 128], strides = [1, 1]} : vector<2x384xf32> to vector<2x128xf32>
    %664 = arith.addf %658, %661 : vector<2x128xf32>
    %665 = arith.negf %664 : vector<2x128xf32>
    %666 = math.exp %665 : vector<2x128xf32>
    %cst_169 = arith.constant 1.000000e+00 : f32
    %667 = vector.broadcast %cst_169 : f32 to vector<2x128xf32>
    %668 = arith.addf %667, %666 : vector<2x128xf32>
    %669 = arith.divf %667, %668 : vector<2x128xf32>
    %670 = arith.addf %659, %662 : vector<2x128xf32>
    %671 = arith.negf %670 : vector<2x128xf32>
    %672 = math.exp %671 : vector<2x128xf32>
    %cst_170 = arith.constant 1.000000e+00 : f32
    %673 = vector.broadcast %cst_170 : f32 to vector<2x128xf32>
    %674 = arith.addf %673, %672 : vector<2x128xf32>
    %675 = arith.divf %673, %674 : vector<2x128xf32>
    %676 = arith.mulf %669, %663 : vector<2x128xf32>
    %677 = arith.addf %660, %676 : vector<2x128xf32>
    %678 = math.tanh %677 : vector<2x128xf32>
    %cst_171 = arith.constant 1.000000e+00 : f32
    %679 = vector.broadcast %cst_171 : f32 to vector<2x128xf32>
    %680 = arith.subf %679, %675 : vector<2x128xf32>
    %681 = arith.mulf %680, %678 : vector<2x128xf32>
    %682 = arith.mulf %675, %652 : vector<2x128xf32>
    %683 = arith.addf %681, %682 : vector<2x128xf32>
    %c6_172 = arith.constant 6 : index
    %c0_173 = arith.constant 0 : index
    %684 = vector.load %arg10[%c6_172, %c0_173] : memref<16x128xf32, #tpu.memory_space<vmem>>, vector<2x128xf32>
    tpu.vector_store %arg10[%c6_172, %c0_173], %683 {strides = array<i32>} : memref<16x128xf32, #tpu.memory_space<vmem>>, vector<2x128xf32>,
    %685 = vector.extract_strided_slice %555 {offsets = [8, 0], sizes = [2, 384], strides = [1, 1]} : vector<16x384xf32> to vector<2x384xf32>
    %cst_174 = arith.constant dense<0.000000e+00> : vector<2x384xf32>
    %686 = tpu.matmul %683, %557, %cst_174 {dimension_numbers = #tpu.dot_dimension_numbers<[1], [0], [0], [1], [0, 0, 1, 1], [], []>} : vector<2x128xf32>, vector<128x384xf32>, vector<2x384xf32> -> vector<2x384xf32>
    %687 = vector.broadcast %559 : vector<1x384xf32> to vector<2x384xf32>
    %688 = arith.addf %686, %687 : vector<2x384xf32>
    %689 = vector.extract_strided_slice %685 {offsets = [0, 0], sizes = [2, 128], strides = [1, 1]} : vector<2x384xf32> to vector<2x128xf32>
    %690 = vector.extract_strided_slice %685 {offsets = [0, 128], sizes = [2, 128], strides = [1, 1]} : vector<2x384xf32> to vector<2x128xf32>
    %691 = vector.extract_strided_slice %685 {offsets = [0, 256], sizes = [2, 128], strides = [1, 1]} : vector<2x384xf32> to vector<2x128xf32>
    %692 = vector.extract_strided_slice %688 {offsets = [0, 0], sizes = [2, 128], strides = [1, 1]} : vector<2x384xf32> to vector<2x128xf32>
    %693 = vector.extract_strided_slice %688 {offsets = [0, 128], sizes = [2, 128], strides = [1, 1]} : vector<2x384xf32> to vector<2x128xf32>
    %694 = vector.extract_strided_slice %688 {offsets = [0, 256], sizes = [2, 128], strides = [1, 1]} : vector<2x384xf32> to vector<2x128xf32>
    %695 = arith.addf %689, %692 : vector<2x128xf32>
    %696 = arith.negf %695 : vector<2x128xf32>
    %697 = math.exp %696 : vector<2x128xf32>
    %cst_175 = arith.constant 1.000000e+00 : f32
    %698 = vector.broadcast %cst_175 : f32 to vector<2x128xf32>
    %699 = arith.addf %698, %697 : vector<2x128xf32>
    %700 = arith.divf %698, %699 : vector<2x128xf32>
    %701 = arith.addf %690, %693 : vector<2x128xf32>
    %702 = arith.negf %701 : vector<2x128xf32>
    %703 = math.exp %702 : vector<2x128xf32>
    %cst_176 = arith.constant 1.000000e+00 : f32
    %704 = vector.broadcast %cst_176 : f32 to vector<2x128xf32>
    %705 = arith.addf %704, %703 : vector<2x128xf32>
    %706 = arith.divf %704, %705 : vector<2x128xf32>
    %707 = arith.mulf %700, %694 : vector<2x128xf32>
    %708 = arith.addf %691, %707 : vector<2x128xf32>
    %709 = math.tanh %708 : vector<2x128xf32>
    %cst_177 = arith.constant 1.000000e+00 : f32
    %710 = vector.broadcast %cst_177 : f32 to vector<2x128xf32>
    %711 = arith.subf %710, %706 : vector<2x128xf32>
    %712 = arith.mulf %711, %709 : vector<2x128xf32>
    %713 = arith.mulf %706, %683 : vector<2x128xf32>
    %714 = arith.addf %712, %713 : vector<2x128xf32>
    %c8_178 = arith.constant 8 : index
    %c0_179 = arith.constant 0 : index
    %715 = vector.load %arg10[%c8_178, %c0_179] : memref<16x128xf32, #tpu.memory_space<vmem>>, vector<2x128xf32>
    tpu.vector_store %arg10[%c8_178, %c0_179], %714 {strides = array<i32>} : memref<16x128xf32, #tpu.memory_space<vmem>>, vector<2x128xf32>,
    %716 = vector.extract_strided_slice %555 {offsets = [10, 0], sizes = [2, 384], strides = [1, 1]} : vector<16x384xf32> to vector<2x384xf32>
    %cst_180 = arith.constant dense<0.000000e+00> : vector<2x384xf32>
    %717 = tpu.matmul %714, %557, %cst_180 {dimension_numbers = #tpu.dot_dimension_numbers<[1], [0], [0], [1], [0, 0, 1, 1], [], []>} : vector<2x128xf32>, vector<128x384xf32>, vector<2x384xf32> -> vector<2x384xf32>
    %718 = vector.broadcast %559 : vector<1x384xf32> to vector<2x384xf32>
    %719 = arith.addf %717, %718 : vector<2x384xf32>
    %720 = vector.extract_strided_slice %716 {offsets = [0, 0], sizes = [2, 128], strides = [1, 1]} : vector<2x384xf32> to vector<2x128xf32>
    %721 = vector.extract_strided_slice %716 {offsets = [0, 128], sizes = [2, 128], strides = [1, 1]} : vector<2x384xf32> to vector<2x128xf32>
    %722 = vector.extract_strided_slice %716 {offsets = [0, 256], sizes = [2, 128], strides = [1, 1]} : vector<2x384xf32> to vector<2x128xf32>
    %723 = vector.extract_strided_slice %719 {offsets = [0, 0], sizes = [2, 128], strides = [1, 1]} : vector<2x384xf32> to vector<2x128xf32>
    %724 = vector.extract_strided_slice %719 {offsets = [0, 128], sizes = [2, 128], strides = [1, 1]} : vector<2x384xf32> to vector<2x128xf32>
    %725 = vector.extract_strided_slice %719 {offsets = [0, 256], sizes = [2, 128], strides = [1, 1]} : vector<2x384xf32> to vector<2x128xf32>
    %726 = arith.addf %720, %723 : vector<2x128xf32>
    %727 = arith.negf %726 : vector<2x128xf32>
    %728 = math.exp %727 : vector<2x128xf32>
    %cst_181 = arith.constant 1.000000e+00 : f32
    %729 = vector.broadcast %cst_181 : f32 to vector<2x128xf32>
    %730 = arith.addf %729, %728 : vector<2x128xf32>
    %731 = arith.divf %729, %730 : vector<2x128xf32>
    %732 = arith.addf %721, %724 : vector<2x128xf32>
    %733 = arith.negf %732 : vector<2x128xf32>
    %734 = math.exp %733 : vector<2x128xf32>
    %cst_182 = arith.constant 1.000000e+00 : f32
    %735 = vector.broadcast %cst_182 : f32 to vector<2x128xf32>
    %736 = arith.addf %735, %734 : vector<2x128xf32>
    %737 = arith.divf %735, %736 : vector<2x128xf32>
    %738 = arith.mulf %731, %725 : vector<2x128xf32>
    %739 = arith.addf %722, %738 : vector<2x128xf32>
    %740 = math.tanh %739 : vector<2x128xf32>
    %cst_183 = arith.constant 1.000000e+00 : f32
    %741 = vector.broadcast %cst_183 : f32 to vector<2x128xf32>
    %742 = arith.subf %741, %737 : vector<2x128xf32>
    %743 = arith.mulf %742, %740 : vector<2x128xf32>
    %744 = arith.mulf %737, %714 : vector<2x128xf32>
    %745 = arith.addf %743, %744 : vector<2x128xf32>
    %c10_184 = arith.constant 10 : index
    %c0_185 = arith.constant 0 : index
    %746 = vector.load %arg10[%c10_184, %c0_185] : memref<16x128xf32, #tpu.memory_space<vmem>>, vector<2x128xf32>
    tpu.vector_store %arg10[%c10_184, %c0_185], %745 {strides = array<i32>} : memref<16x128xf32, #tpu.memory_space<vmem>>, vector<2x128xf32>,
    %747 = vector.extract_strided_slice %555 {offsets = [12, 0], sizes = [2, 384], strides = [1, 1]} : vector<16x384xf32> to vector<2x384xf32>
    %cst_186 = arith.constant dense<0.000000e+00> : vector<2x384xf32>
    %748 = tpu.matmul %745, %557, %cst_186 {dimension_numbers = #tpu.dot_dimension_numbers<[1], [0], [0], [1], [0, 0, 1, 1], [], []>} : vector<2x128xf32>, vector<128x384xf32>, vector<2x384xf32> -> vector<2x384xf32>
    %749 = vector.broadcast %559 : vector<1x384xf32> to vector<2x384xf32>
    %750 = arith.addf %748, %749 : vector<2x384xf32>
    %751 = vector.extract_strided_slice %747 {offsets = [0, 0], sizes = [2, 128], strides = [1, 1]} : vector<2x384xf32> to vector<2x128xf32>
    %752 = vector.extract_strided_slice %747 {offsets = [0, 128], sizes = [2, 128], strides = [1, 1]} : vector<2x384xf32> to vector<2x128xf32>
    %753 = vector.extract_strided_slice %747 {offsets = [0, 256], sizes = [2, 128], strides = [1, 1]} : vector<2x384xf32> to vector<2x128xf32>
    %754 = vector.extract_strided_slice %750 {offsets = [0, 0], sizes = [2, 128], strides = [1, 1]} : vector<2x384xf32> to vector<2x128xf32>
    %755 = vector.extract_strided_slice %750 {offsets = [0, 128], sizes = [2, 128], strides = [1, 1]} : vector<2x384xf32> to vector<2x128xf32>
    %756 = vector.extract_strided_slice %750 {offsets = [0, 256], sizes = [2, 128], strides = [1, 1]} : vector<2x384xf32> to vector<2x128xf32>
    %757 = arith.addf %751, %754 : vector<2x128xf32>
    %758 = arith.negf %757 : vector<2x128xf32>
    %759 = math.exp %758 : vector<2x128xf32>
    %cst_187 = arith.constant 1.000000e+00 : f32
    %760 = vector.broadcast %cst_187 : f32 to vector<2x128xf32>
    %761 = arith.addf %760, %759 : vector<2x128xf32>
    %762 = arith.divf %760, %761 : vector<2x128xf32>
    %763 = arith.addf %752, %755 : vector<2x128xf32>
    %764 = arith.negf %763 : vector<2x128xf32>
    %765 = math.exp %764 : vector<2x128xf32>
    %cst_188 = arith.constant 1.000000e+00 : f32
    %766 = vector.broadcast %cst_188 : f32 to vector<2x128xf32>
    %767 = arith.addf %766, %765 : vector<2x128xf32>
    %768 = arith.divf %766, %767 : vector<2x128xf32>
    %769 = arith.mulf %762, %756 : vector<2x128xf32>
    %770 = arith.addf %753, %769 : vector<2x128xf32>
    %771 = math.tanh %770 : vector<2x128xf32>
    %cst_189 = arith.constant 1.000000e+00 : f32
    %772 = vector.broadcast %cst_189 : f32 to vector<2x128xf32>
    %773 = arith.subf %772, %768 : vector<2x128xf32>
    %774 = arith.mulf %773, %771 : vector<2x128xf32>
    %775 = arith.mulf %768, %745 : vector<2x128xf32>
    %776 = arith.addf %774, %775 : vector<2x128xf32>
    %c12_190 = arith.constant 12 : index
    %c0_191 = arith.constant 0 : index
    %777 = vector.load %arg10[%c12_190, %c0_191] : memref<16x128xf32, #tpu.memory_space<vmem>>, vector<2x128xf32>
    tpu.vector_store %arg10[%c12_190, %c0_191], %776 {strides = array<i32>} : memref<16x128xf32, #tpu.memory_space<vmem>>, vector<2x128xf32>,
    %778 = vector.extract_strided_slice %555 {offsets = [14, 0], sizes = [2, 384], strides = [1, 1]} : vector<16x384xf32> to vector<2x384xf32>
    %cst_192 = arith.constant dense<0.000000e+00> : vector<2x384xf32>
    %779 = tpu.matmul %776, %557, %cst_192 {dimension_numbers = #tpu.dot_dimension_numbers<[1], [0], [0], [1], [0, 0, 1, 1], [], []>} : vector<2x128xf32>, vector<128x384xf32>, vector<2x384xf32> -> vector<2x384xf32>
    %780 = vector.broadcast %559 : vector<1x384xf32> to vector<2x384xf32>
    %781 = arith.addf %779, %780 : vector<2x384xf32>
    %782 = vector.extract_strided_slice %778 {offsets = [0, 0], sizes = [2, 128], strides = [1, 1]} : vector<2x384xf32> to vector<2x128xf32>
    %783 = vector.extract_strided_slice %778 {offsets = [0, 128], sizes = [2, 128], strides = [1, 1]} : vector<2x384xf32> to vector<2x128xf32>
    %784 = vector.extract_strided_slice %778 {offsets = [0, 256], sizes = [2, 128], strides = [1, 1]} : vector<2x384xf32> to vector<2x128xf32>
    %785 = vector.extract_strided_slice %781 {offsets = [0, 0], sizes = [2, 128], strides = [1, 1]} : vector<2x384xf32> to vector<2x128xf32>
    %786 = vector.extract_strided_slice %781 {offsets = [0, 128], sizes = [2, 128], strides = [1, 1]} : vector<2x384xf32> to vector<2x128xf32>
    %787 = vector.extract_strided_slice %781 {offsets = [0, 256], sizes = [2, 128], strides = [1, 1]} : vector<2x384xf32> to vector<2x128xf32>
    %788 = arith.addf %782, %785 : vector<2x128xf32>
    %789 = arith.negf %788 : vector<2x128xf32>
    %790 = math.exp %789 : vector<2x128xf32>
    %cst_193 = arith.constant 1.000000e+00 : f32
    %791 = vector.broadcast %cst_193 : f32 to vector<2x128xf32>
    %792 = arith.addf %791, %790 : vector<2x128xf32>
    %793 = arith.divf %791, %792 : vector<2x128xf32>
    %794 = arith.addf %783, %786 : vector<2x128xf32>
    %795 = arith.negf %794 : vector<2x128xf32>
    %796 = math.exp %795 : vector<2x128xf32>
    %cst_194 = arith.constant 1.000000e+00 : f32
    %797 = vector.broadcast %cst_194 : f32 to vector<2x128xf32>
    %798 = arith.addf %797, %796 : vector<2x128xf32>
    %799 = arith.divf %797, %798 : vector<2x128xf32>
    %800 = arith.mulf %793, %787 : vector<2x128xf32>
    %801 = arith.addf %784, %800 : vector<2x128xf32>
    %802 = math.tanh %801 : vector<2x128xf32>
    %cst_195 = arith.constant 1.000000e+00 : f32
    %803 = vector.broadcast %cst_195 : f32 to vector<2x128xf32>
    %804 = arith.subf %803, %799 : vector<2x128xf32>
    %805 = arith.mulf %804, %802 : vector<2x128xf32>
    %806 = arith.mulf %799, %776 : vector<2x128xf32>
    %807 = arith.addf %805, %806 : vector<2x128xf32>
    %c14_196 = arith.constant 14 : index
    %c0_197 = arith.constant 0 : index
    %808 = vector.load %arg10[%c14_196, %c0_197] : memref<16x128xf32, #tpu.memory_space<vmem>>, vector<2x128xf32>
    tpu.vector_store %arg10[%c14_196, %c0_197], %807 {strides = array<i32>} : memref<16x128xf32, #tpu.memory_space<vmem>>, vector<2x128xf32>,
    %c0_198 = arith.constant 0 : index
    %c0_199 = arith.constant 0 : index
    %809 = vector.load %arg10[%c0_198, %c0_199] : memref<16x128xf32, #tpu.memory_space<vmem>>, vector<16x128xf32>
    %810 = vector.shape_cast %807 : vector<2x128xf32> to vector<1x2x128xf32>
    %c2_200 = arith.constant 2 : index
    %c0_201 = arith.constant 0 : index
    %c0_202 = arith.constant 0 : index
    %c0_203 = arith.constant 0 : index
    %811 = vector.load %arg7[%c2_200, %c0_201, %c0_202, %c0_203] : memref<5x2x2x128xf32, #tpu.memory_space<vmem>>, vector<1x2x2x128xf32>
    %812 = vector.shape_cast %811 : vector<1x2x2x128xf32> to vector<2x2x128xf32>
    %813 = vector.broadcast %810 : vector<1x2x128xf32> to vector<2x2x128xf32>
    %814 = arith.mulf %813, %812 : vector<2x2x128xf32>
    %cst_204 = arith.constant dense<0.000000e+00> : vector<2x2xf32>
    %815 = vector.multi_reduction <add>, %814, %cst_204 [2] : vector<2x2x128xf32> to vector<2x2xf32>
    %cst_205 = arith.constant dense<0.000000e+00> : vector<2xf32>
    %816 = vector.multi_reduction <add>, %815, %cst_205 [1] : vector<2x2xf32> to vector<2xf32>
    %817 = vector.shape_cast %816 : vector<2xf32> to vector<2x1xf32>
    %818 = arith.addf %548, %817 : vector<2x1xf32>
    %c3 = arith.constant 3 : index
    %c0_206 = arith.constant 0 : index
    %c0_207 = arith.constant 0 : index
    %819 = vector.load %arg2[%c3, %c0_206, %c0_207] : memref<5x128x384xf32, #tpu.memory_space<vmem>>, vector<1x128x384xf32>
    %820 = vector.shape_cast %819 : vector<1x128x384xf32> to vector<128x384xf32>
    %cst_208 = arith.constant dense<0.000000e+00> : vector<16x384xf32>
    %821 = tpu.matmul %809, %820, %cst_208 {dimension_numbers = #tpu.dot_dimension_numbers<[1], [0], [0], [1], [0, 0, 1, 1], [], []>} : vector<16x128xf32>, vector<128x384xf32>, vector<16x384xf32> -> vector<16x384xf32>
    %c3_209 = arith.constant 3 : index
    %c0_210 = arith.constant 0 : index
    %c0_211 = arith.constant 0 : index
    %822 = vector.load %arg4[%c3_209, %c0_210, %c0_211] : memref<5x1x384xf32, #tpu.memory_space<vmem>>, vector<1x1x384xf32>
    %823 = vector.shape_cast %822 : vector<1x1x384xf32> to vector<1x384xf32>
    %824 = vector.broadcast %823 : vector<1x384xf32> to vector<16x384xf32>
    %825 = arith.addf %821, %824 : vector<16x384xf32>
    %c3_212 = arith.constant 3 : index
    %c0_213 = arith.constant 0 : index
    %c0_214 = arith.constant 0 : index
    %826 = vector.load %arg3[%c3_212, %c0_213, %c0_214] : memref<5x128x384xf32, #tpu.memory_space<vmem>>, vector<1x128x384xf32>
    %827 = vector.shape_cast %826 : vector<1x128x384xf32> to vector<128x384xf32>
    %c3_215 = arith.constant 3 : index
    %c0_216 = arith.constant 0 : index
    %c0_217 = arith.constant 0 : index
    %828 = vector.load %arg5[%c3_215, %c0_216, %c0_217] : memref<5x1x384xf32, #tpu.memory_space<vmem>>, vector<1x1x384xf32>
    %829 = vector.shape_cast %828 : vector<1x1x384xf32> to vector<1x384xf32>
    %cst_218 = arith.constant 0.000000e+00 : f32
    %830 = vector.broadcast %cst_218 : f32 to vector<2x128xf32>
    %831 = vector.extract_strided_slice %825 {offsets = [0, 0], sizes = [2, 384], strides = [1, 1]} : vector<16x384xf32> to vector<2x384xf32>
    %cst_219 = arith.constant dense<0.000000e+00> : vector<2x384xf32>
    %832 = tpu.matmul %830, %827, %cst_219 {dimension_numbers = #tpu.dot_dimension_numbers<[1], [0], [0], [1], [0, 0, 1, 1], [], []>} : vector<2x128xf32>, vector<128x384xf32>, vector<2x384xf32> -> vector<2x384xf32>
    %833 = vector.broadcast %829 : vector<1x384xf32> to vector<2x384xf32>
    %834 = arith.addf %832, %833 : vector<2x384xf32>
    %835 = vector.extract_strided_slice %831 {offsets = [0, 0], sizes = [2, 128], strides = [1, 1]} : vector<2x384xf32> to vector<2x128xf32>
    %836 = vector.extract_strided_slice %831 {offsets = [0, 128], sizes = [2, 128], strides = [1, 1]} : vector<2x384xf32> to vector<2x128xf32>
    %837 = vector.extract_strided_slice %831 {offsets = [0, 256], sizes = [2, 128], strides = [1, 1]} : vector<2x384xf32> to vector<2x128xf32>
    %838 = vector.extract_strided_slice %834 {offsets = [0, 0], sizes = [2, 128], strides = [1, 1]} : vector<2x384xf32> to vector<2x128xf32>
    %839 = vector.extract_strided_slice %834 {offsets = [0, 128], sizes = [2, 128], strides = [1, 1]} : vector<2x384xf32> to vector<2x128xf32>
    %840 = vector.extract_strided_slice %834 {offsets = [0, 256], sizes = [2, 128], strides = [1, 1]} : vector<2x384xf32> to vector<2x128xf32>
    %841 = arith.addf %835, %838 : vector<2x128xf32>
    %842 = arith.negf %841 : vector<2x128xf32>
    %843 = math.exp %842 : vector<2x128xf32>
    %cst_220 = arith.constant 1.000000e+00 : f32
    %844 = vector.broadcast %cst_220 : f32 to vector<2x128xf32>
    %845 = arith.addf %844, %843 : vector<2x128xf32>
    %846 = arith.divf %844, %845 : vector<2x128xf32>
    %847 = arith.addf %836, %839 : vector<2x128xf32>
    %848 = arith.negf %847 : vector<2x128xf32>
    %849 = math.exp %848 : vector<2x128xf32>
    %cst_221 = arith.constant 1.000000e+00 : f32
    %850 = vector.broadcast %cst_221 : f32 to vector<2x128xf32>
    %851 = arith.addf %850, %849 : vector<2x128xf32>
    %852 = arith.divf %850, %851 : vector<2x128xf32>
    %853 = arith.mulf %846, %840 : vector<2x128xf32>
    %854 = arith.addf %837, %853 : vector<2x128xf32>
    %855 = math.tanh %854 : vector<2x128xf32>
    %cst_222 = arith.constant 1.000000e+00 : f32
    %856 = vector.broadcast %cst_222 : f32 to vector<2x128xf32>
    %857 = arith.subf %856, %852 : vector<2x128xf32>
    %858 = arith.mulf %857, %855 : vector<2x128xf32>
    %859 = arith.mulf %852, %830 : vector<2x128xf32>
    %860 = arith.addf %858, %859 : vector<2x128xf32>
    %c0_223 = arith.constant 0 : index
    %c0_224 = arith.constant 0 : index
    %861 = vector.load %arg10[%c0_223, %c0_224] : memref<16x128xf32, #tpu.memory_space<vmem>>, vector<2x128xf32>
    tpu.vector_store %arg10[%c0_223, %c0_224], %860 {strides = array<i32>} : memref<16x128xf32, #tpu.memory_space<vmem>>, vector<2x128xf32>,
    %862 = vector.extract_strided_slice %825 {offsets = [2, 0], sizes = [2, 384], strides = [1, 1]} : vector<16x384xf32> to vector<2x384xf32>
    %cst_225 = arith.constant dense<0.000000e+00> : vector<2x384xf32>
    %863 = tpu.matmul %860, %827, %cst_225 {dimension_numbers = #tpu.dot_dimension_numbers<[1], [0], [0], [1], [0, 0, 1, 1], [], []>} : vector<2x128xf32>, vector<128x384xf32>, vector<2x384xf32> -> vector<2x384xf32>
    %864 = vector.broadcast %829 : vector<1x384xf32> to vector<2x384xf32>
    %865 = arith.addf %863, %864 : vector<2x384xf32>
    %866 = vector.extract_strided_slice %862 {offsets = [0, 0], sizes = [2, 128], strides = [1, 1]} : vector<2x384xf32> to vector<2x128xf32>
    %867 = vector.extract_strided_slice %862 {offsets = [0, 128], sizes = [2, 128], strides = [1, 1]} : vector<2x384xf32> to vector<2x128xf32>
    %868 = vector.extract_strided_slice %862 {offsets = [0, 256], sizes = [2, 128], strides = [1, 1]} : vector<2x384xf32> to vector<2x128xf32>
    %869 = vector.extract_strided_slice %865 {offsets = [0, 0], sizes = [2, 128], strides = [1, 1]} : vector<2x384xf32> to vector<2x128xf32>
    %870 = vector.extract_strided_slice %865 {offsets = [0, 128], sizes = [2, 128], strides = [1, 1]} : vector<2x384xf32> to vector<2x128xf32>
    %871 = vector.extract_strided_slice %865 {offsets = [0, 256], sizes = [2, 128], strides = [1, 1]} : vector<2x384xf32> to vector<2x128xf32>
    %872 = arith.addf %866, %869 : vector<2x128xf32>
    %873 = arith.negf %872 : vector<2x128xf32>
    %874 = math.exp %873 : vector<2x128xf32>
    %cst_226 = arith.constant 1.000000e+00 : f32
    %875 = vector.broadcast %cst_226 : f32 to vector<2x128xf32>
    %876 = arith.addf %875, %874 : vector<2x128xf32>
    %877 = arith.divf %875, %876 : vector<2x128xf32>
    %878 = arith.addf %867, %870 : vector<2x128xf32>
    %879 = arith.negf %878 : vector<2x128xf32>
    %880 = math.exp %879 : vector<2x128xf32>
    %cst_227 = arith.constant 1.000000e+00 : f32
    %881 = vector.broadcast %cst_227 : f32 to vector<2x128xf32>
    %882 = arith.addf %881, %880 : vector<2x128xf32>
    %883 = arith.divf %881, %882 : vector<2x128xf32>
    %884 = arith.mulf %877, %871 : vector<2x128xf32>
    %885 = arith.addf %868, %884 : vector<2x128xf32>
    %886 = math.tanh %885 : vector<2x128xf32>
    %cst_228 = arith.constant 1.000000e+00 : f32
    %887 = vector.broadcast %cst_228 : f32 to vector<2x128xf32>
    %888 = arith.subf %887, %883 : vector<2x128xf32>
    %889 = arith.mulf %888, %886 : vector<2x128xf32>
    %890 = arith.mulf %883, %860 : vector<2x128xf32>
    %891 = arith.addf %889, %890 : vector<2x128xf32>
    %c2_229 = arith.constant 2 : index
    %c0_230 = arith.constant 0 : index
    %892 = vector.load %arg10[%c2_229, %c0_230] : memref<16x128xf32, #tpu.memory_space<vmem>>, vector<2x128xf32>
    tpu.vector_store %arg10[%c2_229, %c0_230], %891 {strides = array<i32>} : memref<16x128xf32, #tpu.memory_space<vmem>>, vector<2x128xf32>,
    %893 = vector.extract_strided_slice %825 {offsets = [4, 0], sizes = [2, 384], strides = [1, 1]} : vector<16x384xf32> to vector<2x384xf32>
    %cst_231 = arith.constant dense<0.000000e+00> : vector<2x384xf32>
    %894 = tpu.matmul %891, %827, %cst_231 {dimension_numbers = #tpu.dot_dimension_numbers<[1], [0], [0], [1], [0, 0, 1, 1], [], []>} : vector<2x128xf32>, vector<128x384xf32>, vector<2x384xf32> -> vector<2x384xf32>
    %895 = vector.broadcast %829 : vector<1x384xf32> to vector<2x384xf32>
    %896 = arith.addf %894, %895 : vector<2x384xf32>
    %897 = vector.extract_strided_slice %893 {offsets = [0, 0], sizes = [2, 128], strides = [1, 1]} : vector<2x384xf32> to vector<2x128xf32>
    %898 = vector.extract_strided_slice %893 {offsets = [0, 128], sizes = [2, 128], strides = [1, 1]} : vector<2x384xf32> to vector<2x128xf32>
    %899 = vector.extract_strided_slice %893 {offsets = [0, 256], sizes = [2, 128], strides = [1, 1]} : vector<2x384xf32> to vector<2x128xf32>
    %900 = vector.extract_strided_slice %896 {offsets = [0, 0], sizes = [2, 128], strides = [1, 1]} : vector<2x384xf32> to vector<2x128xf32>
    %901 = vector.extract_strided_slice %896 {offsets = [0, 128], sizes = [2, 128], strides = [1, 1]} : vector<2x384xf32> to vector<2x128xf32>
    %902 = vector.extract_strided_slice %896 {offsets = [0, 256], sizes = [2, 128], strides = [1, 1]} : vector<2x384xf32> to vector<2x128xf32>
    %903 = arith.addf %897, %900 : vector<2x128xf32>
    %904 = arith.negf %903 : vector<2x128xf32>
    %905 = math.exp %904 : vector<2x128xf32>
    %cst_232 = arith.constant 1.000000e+00 : f32
    %906 = vector.broadcast %cst_232 : f32 to vector<2x128xf32>
    %907 = arith.addf %906, %905 : vector<2x128xf32>
    %908 = arith.divf %906, %907 : vector<2x128xf32>
    %909 = arith.addf %898, %901 : vector<2x128xf32>
    %910 = arith.negf %909 : vector<2x128xf32>
    %911 = math.exp %910 : vector<2x128xf32>
    %cst_233 = arith.constant 1.000000e+00 : f32
    %912 = vector.broadcast %cst_233 : f32 to vector<2x128xf32>
    %913 = arith.addf %912, %911 : vector<2x128xf32>
    %914 = arith.divf %912, %913 : vector<2x128xf32>
    %915 = arith.mulf %908, %902 : vector<2x128xf32>
    %916 = arith.addf %899, %915 : vector<2x128xf32>
    %917 = math.tanh %916 : vector<2x128xf32>
    %cst_234 = arith.constant 1.000000e+00 : f32
    %918 = vector.broadcast %cst_234 : f32 to vector<2x128xf32>
    %919 = arith.subf %918, %914 : vector<2x128xf32>
    %920 = arith.mulf %919, %917 : vector<2x128xf32>
    %921 = arith.mulf %914, %891 : vector<2x128xf32>
    %922 = arith.addf %920, %921 : vector<2x128xf32>
    %c4_235 = arith.constant 4 : index
    %c0_236 = arith.constant 0 : index
    %923 = vector.load %arg10[%c4_235, %c0_236] : memref<16x128xf32, #tpu.memory_space<vmem>>, vector<2x128xf32>
    tpu.vector_store %arg10[%c4_235, %c0_236], %922 {strides = array<i32>} : memref<16x128xf32, #tpu.memory_space<vmem>>, vector<2x128xf32>,
    %924 = vector.extract_strided_slice %825 {offsets = [6, 0], sizes = [2, 384], strides = [1, 1]} : vector<16x384xf32> to vector<2x384xf32>
    %cst_237 = arith.constant dense<0.000000e+00> : vector<2x384xf32>
    %925 = tpu.matmul %922, %827, %cst_237 {dimension_numbers = #tpu.dot_dimension_numbers<[1], [0], [0], [1], [0, 0, 1, 1], [], []>} : vector<2x128xf32>, vector<128x384xf32>, vector<2x384xf32> -> vector<2x384xf32>
    %926 = vector.broadcast %829 : vector<1x384xf32> to vector<2x384xf32>
    %927 = arith.addf %925, %926 : vector<2x384xf32>
    %928 = vector.extract_strided_slice %924 {offsets = [0, 0], sizes = [2, 128], strides = [1, 1]} : vector<2x384xf32> to vector<2x128xf32>
    %929 = vector.extract_strided_slice %924 {offsets = [0, 128], sizes = [2, 128], strides = [1, 1]} : vector<2x384xf32> to vector<2x128xf32>
    %930 = vector.extract_strided_slice %924 {offsets = [0, 256], sizes = [2, 128], strides = [1, 1]} : vector<2x384xf32> to vector<2x128xf32>
    %931 = vector.extract_strided_slice %927 {offsets = [0, 0], sizes = [2, 128], strides = [1, 1]} : vector<2x384xf32> to vector<2x128xf32>
    %932 = vector.extract_strided_slice %927 {offsets = [0, 128], sizes = [2, 128], strides = [1, 1]} : vector<2x384xf32> to vector<2x128xf32>
    %933 = vector.extract_strided_slice %927 {offsets = [0, 256], sizes = [2, 128], strides = [1, 1]} : vector<2x384xf32> to vector<2x128xf32>
    %934 = arith.addf %928, %931 : vector<2x128xf32>
    %935 = arith.negf %934 : vector<2x128xf32>
    %936 = math.exp %935 : vector<2x128xf32>
    %cst_238 = arith.constant 1.000000e+00 : f32
    %937 = vector.broadcast %cst_238 : f32 to vector<2x128xf32>
    %938 = arith.addf %937, %936 : vector<2x128xf32>
    %939 = arith.divf %937, %938 : vector<2x128xf32>
    %940 = arith.addf %929, %932 : vector<2x128xf32>
    %941 = arith.negf %940 : vector<2x128xf32>
    %942 = math.exp %941 : vector<2x128xf32>
    %cst_239 = arith.constant 1.000000e+00 : f32
    %943 = vector.broadcast %cst_239 : f32 to vector<2x128xf32>
    %944 = arith.addf %943, %942 : vector<2x128xf32>
    %945 = arith.divf %943, %944 : vector<2x128xf32>
    %946 = arith.mulf %939, %933 : vector<2x128xf32>
    %947 = arith.addf %930, %946 : vector<2x128xf32>
    %948 = math.tanh %947 : vector<2x128xf32>
    %cst_240 = arith.constant 1.000000e+00 : f32
    %949 = vector.broadcast %cst_240 : f32 to vector<2x128xf32>
    %950 = arith.subf %949, %945 : vector<2x128xf32>
    %951 = arith.mulf %950, %948 : vector<2x128xf32>
    %952 = arith.mulf %945, %922 : vector<2x128xf32>
    %953 = arith.addf %951, %952 : vector<2x128xf32>
    %c6_241 = arith.constant 6 : index
    %c0_242 = arith.constant 0 : index
    %954 = vector.load %arg10[%c6_241, %c0_242] : memref<16x128xf32, #tpu.memory_space<vmem>>, vector<2x128xf32>
    tpu.vector_store %arg10[%c6_241, %c0_242], %953 {strides = array<i32>} : memref<16x128xf32, #tpu.memory_space<vmem>>, vector<2x128xf32>,
    %955 = vector.extract_strided_slice %825 {offsets = [8, 0], sizes = [2, 384], strides = [1, 1]} : vector<16x384xf32> to vector<2x384xf32>
    %cst_243 = arith.constant dense<0.000000e+00> : vector<2x384xf32>
    %956 = tpu.matmul %953, %827, %cst_243 {dimension_numbers = #tpu.dot_dimension_numbers<[1], [0], [0], [1], [0, 0, 1, 1], [], []>} : vector<2x128xf32>, vector<128x384xf32>, vector<2x384xf32> -> vector<2x384xf32>
    %957 = vector.broadcast %829 : vector<1x384xf32> to vector<2x384xf32>
    %958 = arith.addf %956, %957 : vector<2x384xf32>
    %959 = vector.extract_strided_slice %955 {offsets = [0, 0], sizes = [2, 128], strides = [1, 1]} : vector<2x384xf32> to vector<2x128xf32>
    %960 = vector.extract_strided_slice %955 {offsets = [0, 128], sizes = [2, 128], strides = [1, 1]} : vector<2x384xf32> to vector<2x128xf32>
    %961 = vector.extract_strided_slice %955 {offsets = [0, 256], sizes = [2, 128], strides = [1, 1]} : vector<2x384xf32> to vector<2x128xf32>
    %962 = vector.extract_strided_slice %958 {offsets = [0, 0], sizes = [2, 128], strides = [1, 1]} : vector<2x384xf32> to vector<2x128xf32>
    %963 = vector.extract_strided_slice %958 {offsets = [0, 128], sizes = [2, 128], strides = [1, 1]} : vector<2x384xf32> to vector<2x128xf32>
    %964 = vector.extract_strided_slice %958 {offsets = [0, 256], sizes = [2, 128], strides = [1, 1]} : vector<2x384xf32> to vector<2x128xf32>
    %965 = arith.addf %959, %962 : vector<2x128xf32>
    %966 = arith.negf %965 : vector<2x128xf32>
    %967 = math.exp %966 : vector<2x128xf32>
    %cst_244 = arith.constant 1.000000e+00 : f32
    %968 = vector.broadcast %cst_244 : f32 to vector<2x128xf32>
    %969 = arith.addf %968, %967 : vector<2x128xf32>
    %970 = arith.divf %968, %969 : vector<2x128xf32>
    %971 = arith.addf %960, %963 : vector<2x128xf32>
    %972 = arith.negf %971 : vector<2x128xf32>
    %973 = math.exp %972 : vector<2x128xf32>
    %cst_245 = arith.constant 1.000000e+00 : f32
    %974 = vector.broadcast %cst_245 : f32 to vector<2x128xf32>
    %975 = arith.addf %974, %973 : vector<2x128xf32>
    %976 = arith.divf %974, %975 : vector<2x128xf32>
    %977 = arith.mulf %970, %964 : vector<2x128xf32>
    %978 = arith.addf %961, %977 : vector<2x128xf32>
    %979 = math.tanh %978 : vector<2x128xf32>
    %cst_246 = arith.constant 1.000000e+00 : f32
    %980 = vector.broadcast %cst_246 : f32 to vector<2x128xf32>
    %981 = arith.subf %980, %976 : vector<2x128xf32>
    %982 = arith.mulf %981, %979 : vector<2x128xf32>
    %983 = arith.mulf %976, %953 : vector<2x128xf32>
    %984 = arith.addf %982, %983 : vector<2x128xf32>
    %c8_247 = arith.constant 8 : index
    %c0_248 = arith.constant 0 : index
    %985 = vector.load %arg10[%c8_247, %c0_248] : memref<16x128xf32, #tpu.memory_space<vmem>>, vector<2x128xf32>
    tpu.vector_store %arg10[%c8_247, %c0_248], %984 {strides = array<i32>} : memref<16x128xf32, #tpu.memory_space<vmem>>, vector<2x128xf32>,
    %986 = vector.extract_strided_slice %825 {offsets = [10, 0], sizes = [2, 384], strides = [1, 1]} : vector<16x384xf32> to vector<2x384xf32>
    %cst_249 = arith.constant dense<0.000000e+00> : vector<2x384xf32>
    %987 = tpu.matmul %984, %827, %cst_249 {dimension_numbers = #tpu.dot_dimension_numbers<[1], [0], [0], [1], [0, 0, 1, 1], [], []>} : vector<2x128xf32>, vector<128x384xf32>, vector<2x384xf32> -> vector<2x384xf32>
    %988 = vector.broadcast %829 : vector<1x384xf32> to vector<2x384xf32>
    %989 = arith.addf %987, %988 : vector<2x384xf32>
    %990 = vector.extract_strided_slice %986 {offsets = [0, 0], sizes = [2, 128], strides = [1, 1]} : vector<2x384xf32> to vector<2x128xf32>
    %991 = vector.extract_strided_slice %986 {offsets = [0, 128], sizes = [2, 128], strides = [1, 1]} : vector<2x384xf32> to vector<2x128xf32>
    %992 = vector.extract_strided_slice %986 {offsets = [0, 256], sizes = [2, 128], strides = [1, 1]} : vector<2x384xf32> to vector<2x128xf32>
    %993 = vector.extract_strided_slice %989 {offsets = [0, 0], sizes = [2, 128], strides = [1, 1]} : vector<2x384xf32> to vector<2x128xf32>
    %994 = vector.extract_strided_slice %989 {offsets = [0, 128], sizes = [2, 128], strides = [1, 1]} : vector<2x384xf32> to vector<2x128xf32>
    %995 = vector.extract_strided_slice %989 {offsets = [0, 256], sizes = [2, 128], strides = [1, 1]} : vector<2x384xf32> to vector<2x128xf32>
    %996 = arith.addf %990, %993 : vector<2x128xf32>
    %997 = arith.negf %996 : vector<2x128xf32>
    %998 = math.exp %997 : vector<2x128xf32>
    %cst_250 = arith.constant 1.000000e+00 : f32
    %999 = vector.broadcast %cst_250 : f32 to vector<2x128xf32>
    %1000 = arith.addf %999, %998 : vector<2x128xf32>
    %1001 = arith.divf %999, %1000 : vector<2x128xf32>
    %1002 = arith.addf %991, %994 : vector<2x128xf32>
    %1003 = arith.negf %1002 : vector<2x128xf32>
    %1004 = math.exp %1003 : vector<2x128xf32>
    %cst_251 = arith.constant 1.000000e+00 : f32
    %1005 = vector.broadcast %cst_251 : f32 to vector<2x128xf32>
    %1006 = arith.addf %1005, %1004 : vector<2x128xf32>
    %1007 = arith.divf %1005, %1006 : vector<2x128xf32>
    %1008 = arith.mulf %1001, %995 : vector<2x128xf32>
    %1009 = arith.addf %992, %1008 : vector<2x128xf32>
    %1010 = math.tanh %1009 : vector<2x128xf32>
    %cst_252 = arith.constant 1.000000e+00 : f32
    %1011 = vector.broadcast %cst_252 : f32 to vector<2x128xf32>
    %1012 = arith.subf %1011, %1007 : vector<2x128xf32>
    %1013 = arith.mulf %1012, %1010 : vector<2x128xf32>
    %1014 = arith.mulf %1007, %984 : vector<2x128xf32>
    %1015 = arith.addf %1013, %1014 : vector<2x128xf32>
    %c10_253 = arith.constant 10 : index
    %c0_254 = arith.constant 0 : index
    %1016 = vector.load %arg10[%c10_253, %c0_254] : memref<16x128xf32, #tpu.memory_space<vmem>>, vector<2x128xf32>
    tpu.vector_store %arg10[%c10_253, %c0_254], %1015 {strides = array<i32>} : memref<16x128xf32, #tpu.memory_space<vmem>>, vector<2x128xf32>,
    %1017 = vector.extract_strided_slice %825 {offsets = [12, 0], sizes = [2, 384], strides = [1, 1]} : vector<16x384xf32> to vector<2x384xf32>
    %cst_255 = arith.constant dense<0.000000e+00> : vector<2x384xf32>
    %1018 = tpu.matmul %1015, %827, %cst_255 {dimension_numbers = #tpu.dot_dimension_numbers<[1], [0], [0], [1], [0, 0, 1, 1], [], []>} : vector<2x128xf32>, vector<128x384xf32>, vector<2x384xf32> -> vector<2x384xf32>
    %1019 = vector.broadcast %829 : vector<1x384xf32> to vector<2x384xf32>
    %1020 = arith.addf %1018, %1019 : vector<2x384xf32>
    %1021 = vector.extract_strided_slice %1017 {offsets = [0, 0], sizes = [2, 128], strides = [1, 1]} : vector<2x384xf32> to vector<2x128xf32>
    %1022 = vector.extract_strided_slice %1017 {offsets = [0, 128], sizes = [2, 128], strides = [1, 1]} : vector<2x384xf32> to vector<2x128xf32>
    %1023 = vector.extract_strided_slice %1017 {offsets = [0, 256], sizes = [2, 128], strides = [1, 1]} : vector<2x384xf32> to vector<2x128xf32>
    %1024 = vector.extract_strided_slice %1020 {offsets = [0, 0], sizes = [2, 128], strides = [1, 1]} : vector<2x384xf32> to vector<2x128xf32>
    %1025 = vector.extract_strided_slice %1020 {offsets = [0, 128], sizes = [2, 128], strides = [1, 1]} : vector<2x384xf32> to vector<2x128xf32>
    %1026 = vector.extract_strided_slice %1020 {offsets = [0, 256], sizes = [2, 128], strides = [1, 1]} : vector<2x384xf32> to vector<2x128xf32>
    %1027 = arith.addf %1021, %1024 : vector<2x128xf32>
    %1028 = arith.negf %1027 : vector<2x128xf32>
    %1029 = math.exp %1028 : vector<2x128xf32>
    %cst_256 = arith.constant 1.000000e+00 : f32
    %1030 = vector.broadcast %cst_256 : f32 to vector<2x128xf32>
    %1031 = arith.addf %1030, %1029 : vector<2x128xf32>
    %1032 = arith.divf %1030, %1031 : vector<2x128xf32>
    %1033 = arith.addf %1022, %1025 : vector<2x128xf32>
    %1034 = arith.negf %1033 : vector<2x128xf32>
    %1035 = math.exp %1034 : vector<2x128xf32>
    %cst_257 = arith.constant 1.000000e+00 : f32
    %1036 = vector.broadcast %cst_257 : f32 to vector<2x128xf32>
    %1037 = arith.addf %1036, %1035 : vector<2x128xf32>
    %1038 = arith.divf %1036, %1037 : vector<2x128xf32>
    %1039 = arith.mulf %1032, %1026 : vector<2x128xf32>
    %1040 = arith.addf %1023, %1039 : vector<2x128xf32>
    %1041 = math.tanh %1040 : vector<2x128xf32>
    %cst_258 = arith.constant 1.000000e+00 : f32
    %1042 = vector.broadcast %cst_258 : f32 to vector<2x128xf32>
    %1043 = arith.subf %1042, %1038 : vector<2x128xf32>
    %1044 = arith.mulf %1043, %1041 : vector<2x128xf32>
    %1045 = arith.mulf %1038, %1015 : vector<2x128xf32>
    %1046 = arith.addf %1044, %1045 : vector<2x128xf32>
    %c12_259 = arith.constant 12 : index
    %c0_260 = arith.constant 0 : index
    %1047 = vector.load %arg10[%c12_259, %c0_260] : memref<16x128xf32, #tpu.memory_space<vmem>>, vector<2x128xf32>
    tpu.vector_store %arg10[%c12_259, %c0_260], %1046 {strides = array<i32>} : memref<16x128xf32, #tpu.memory_space<vmem>>, vector<2x128xf32>,
    %1048 = vector.extract_strided_slice %825 {offsets = [14, 0], sizes = [2, 384], strides = [1, 1]} : vector<16x384xf32> to vector<2x384xf32>
    %cst_261 = arith.constant dense<0.000000e+00> : vector<2x384xf32>
    %1049 = tpu.matmul %1046, %827, %cst_261 {dimension_numbers = #tpu.dot_dimension_numbers<[1], [0], [0], [1], [0, 0, 1, 1], [], []>} : vector<2x128xf32>, vector<128x384xf32>, vector<2x384xf32> -> vector<2x384xf32>
    %1050 = vector.broadcast %829 : vector<1x384xf32> to vector<2x384xf32>
    %1051 = arith.addf %1049, %1050 : vector<2x384xf32>
    %1052 = vector.extract_strided_slice %1048 {offsets = [0, 0], sizes = [2, 128], strides = [1, 1]} : vector<2x384xf32> to vector<2x128xf32>
    %1053 = vector.extract_strided_slice %1048 {offsets = [0, 128], sizes = [2, 128], strides = [1, 1]} : vector<2x384xf32> to vector<2x128xf32>
    %1054 = vector.extract_strided_slice %1048 {offsets = [0, 256], sizes = [2, 128], strides = [1, 1]} : vector<2x384xf32> to vector<2x128xf32>
    %1055 = vector.extract_strided_slice %1051 {offsets = [0, 0], sizes = [2, 128], strides = [1, 1]} : vector<2x384xf32> to vector<2x128xf32>
    %1056 = vector.extract_strided_slice %1051 {offsets = [0, 128], sizes = [2, 128], strides = [1, 1]} : vector<2x384xf32> to vector<2x128xf32>
    %1057 = vector.extract_strided_slice %1051 {offsets = [0, 256], sizes = [2, 128], strides = [1, 1]} : vector<2x384xf32> to vector<2x128xf32>
    %1058 = arith.addf %1052, %1055 : vector<2x128xf32>
    %1059 = arith.negf %1058 : vector<2x128xf32>
    %1060 = math.exp %1059 : vector<2x128xf32>
    %cst_262 = arith.constant 1.000000e+00 : f32
    %1061 = vector.broadcast %cst_262 : f32 to vector<2x128xf32>
    %1062 = arith.addf %1061, %1060 : vector<2x128xf32>
    %1063 = arith.divf %1061, %1062 : vector<2x128xf32>
    %1064 = arith.addf %1053, %1056 : vector<2x128xf32>
    %1065 = arith.negf %1064 : vector<2x128xf32>
    %1066 = math.exp %1065 : vector<2x128xf32>
    %cst_263 = arith.constant 1.000000e+00 : f32
    %1067 = vector.broadcast %cst_263 : f32 to vector<2x128xf32>
    %1068 = arith.addf %1067, %1066 : vector<2x128xf32>
    %1069 = arith.divf %1067, %1068 : vector<2x128xf32>
    %1070 = arith.mulf %1063, %1057 : vector<2x128xf32>
    %1071 = arith.addf %1054, %1070 : vector<2x128xf32>
    %1072 = math.tanh %1071 : vector<2x128xf32>
    %cst_264 = arith.constant 1.000000e+00 : f32
    %1073 = vector.broadcast %cst_264 : f32 to vector<2x128xf32>
    %1074 = arith.subf %1073, %1069 : vector<2x128xf32>
    %1075 = arith.mulf %1074, %1072 : vector<2x128xf32>
    %1076 = arith.mulf %1069, %1046 : vector<2x128xf32>
    %1077 = arith.addf %1075, %1076 : vector<2x128xf32>
    %c14_265 = arith.constant 14 : index
    %c0_266 = arith.constant 0 : index
    %1078 = vector.load %arg10[%c14_265, %c0_266] : memref<16x128xf32, #tpu.memory_space<vmem>>, vector<2x128xf32>
    tpu.vector_store %arg10[%c14_265, %c0_266], %1077 {strides = array<i32>} : memref<16x128xf32, #tpu.memory_space<vmem>>, vector<2x128xf32>,
    %c0_267 = arith.constant 0 : index
    %c0_268 = arith.constant 0 : index
    %1079 = vector.load %arg10[%c0_267, %c0_268] : memref<16x128xf32, #tpu.memory_space<vmem>>, vector<16x128xf32>
    %1080 = vector.shape_cast %1077 : vector<2x128xf32> to vector<1x2x128xf32>
    %c3_269 = arith.constant 3 : index
    %c0_270 = arith.constant 0 : index
    %c0_271 = arith.constant 0 : index
    %c0_272 = arith.constant 0 : index
    %1081 = vector.load %arg7[%c3_269, %c0_270, %c0_271, %c0_272] : memref<5x2x2x128xf32, #tpu.memory_space<vmem>>, vector<1x2x2x128xf32>
    %1082 = vector.shape_cast %1081 : vector<1x2x2x128xf32> to vector<2x2x128xf32>
    %1083 = vector.broadcast %1080 : vector<1x2x128xf32> to vector<2x2x128xf32>
    %1084 = arith.mulf %1083, %1082 : vector<2x2x128xf32>
    %cst_273 = arith.constant dense<0.000000e+00> : vector<2x2xf32>
    %1085 = vector.multi_reduction <add>, %1084, %cst_273 [2] : vector<2x2x128xf32> to vector<2x2xf32>
    %cst_274 = arith.constant dense<0.000000e+00> : vector<2xf32>
    %1086 = vector.multi_reduction <add>, %1085, %cst_274 [1] : vector<2x2xf32> to vector<2xf32>
    %1087 = vector.shape_cast %1086 : vector<2xf32> to vector<2x1xf32>
    %1088 = arith.addf %818, %1087 : vector<2x1xf32>
    %c4_275 = arith.constant 4 : index
    %c0_276 = arith.constant 0 : index
    %c0_277 = arith.constant 0 : index
    %1089 = vector.load %arg2[%c4_275, %c0_276, %c0_277] : memref<5x128x384xf32, #tpu.memory_space<vmem>>, vector<1x128x384xf32>
    %1090 = vector.shape_cast %1089 : vector<1x128x384xf32> to vector<128x384xf32>
    %cst_278 = arith.constant dense<0.000000e+00> : vector<16x384xf32>
    %1091 = tpu.matmul %1079, %1090, %cst_278 {dimension_numbers = #tpu.dot_dimension_numbers<[1], [0], [0], [1], [0, 0, 1, 1], [], []>} : vector<16x128xf32>, vector<128x384xf32>, vector<16x384xf32> -> vector<16x384xf32>
    %c4_279 = arith.constant 4 : index
    %c0_280 = arith.constant 0 : index
    %c0_281 = arith.constant 0 : index
    %1092 = vector.load %arg4[%c4_279, %c0_280, %c0_281] : memref<5x1x384xf32, #tpu.memory_space<vmem>>, vector<1x1x384xf32>
    %1093 = vector.shape_cast %1092 : vector<1x1x384xf32> to vector<1x384xf32>
    %1094 = vector.broadcast %1093 : vector<1x384xf32> to vector<16x384xf32>
    %1095 = arith.addf %1091, %1094 : vector<16x384xf32>
    %c4_282 = arith.constant 4 : index
    %c0_283 = arith.constant 0 : index
    %c0_284 = arith.constant 0 : index
    %1096 = vector.load %arg3[%c4_282, %c0_283, %c0_284] : memref<5x128x384xf32, #tpu.memory_space<vmem>>, vector<1x128x384xf32>
    %1097 = vector.shape_cast %1096 : vector<1x128x384xf32> to vector<128x384xf32>
    %c4_285 = arith.constant 4 : index
    %c0_286 = arith.constant 0 : index
    %c0_287 = arith.constant 0 : index
    %1098 = vector.load %arg5[%c4_285, %c0_286, %c0_287] : memref<5x1x384xf32, #tpu.memory_space<vmem>>, vector<1x1x384xf32>
    %1099 = vector.shape_cast %1098 : vector<1x1x384xf32> to vector<1x384xf32>
    %cst_288 = arith.constant 0.000000e+00 : f32
    %1100 = vector.broadcast %cst_288 : f32 to vector<2x128xf32>
    %1101 = vector.extract_strided_slice %1095 {offsets = [0, 0], sizes = [2, 384], strides = [1, 1]} : vector<16x384xf32> to vector<2x384xf32>
    %cst_289 = arith.constant dense<0.000000e+00> : vector<2x384xf32>
    %1102 = tpu.matmul %1100, %1097, %cst_289 {dimension_numbers = #tpu.dot_dimension_numbers<[1], [0], [0], [1], [0, 0, 1, 1], [], []>} : vector<2x128xf32>, vector<128x384xf32>, vector<2x384xf32> -> vector<2x384xf32>
    %1103 = vector.broadcast %1099 : vector<1x384xf32> to vector<2x384xf32>
    %1104 = arith.addf %1102, %1103 : vector<2x384xf32>
    %1105 = vector.extract_strided_slice %1101 {offsets = [0, 0], sizes = [2, 128], strides = [1, 1]} : vector<2x384xf32> to vector<2x128xf32>
    %1106 = vector.extract_strided_slice %1101 {offsets = [0, 128], sizes = [2, 128], strides = [1, 1]} : vector<2x384xf32> to vector<2x128xf32>
    %1107 = vector.extract_strided_slice %1101 {offsets = [0, 256], sizes = [2, 128], strides = [1, 1]} : vector<2x384xf32> to vector<2x128xf32>
    %1108 = vector.extract_strided_slice %1104 {offsets = [0, 0], sizes = [2, 128], strides = [1, 1]} : vector<2x384xf32> to vector<2x128xf32>
    %1109 = vector.extract_strided_slice %1104 {offsets = [0, 128], sizes = [2, 128], strides = [1, 1]} : vector<2x384xf32> to vector<2x128xf32>
    %1110 = vector.extract_strided_slice %1104 {offsets = [0, 256], sizes = [2, 128], strides = [1, 1]} : vector<2x384xf32> to vector<2x128xf32>
    %1111 = arith.addf %1105, %1108 : vector<2x128xf32>
    %1112 = arith.negf %1111 : vector<2x128xf32>
    %1113 = math.exp %1112 : vector<2x128xf32>
    %cst_290 = arith.constant 1.000000e+00 : f32
    %1114 = vector.broadcast %cst_290 : f32 to vector<2x128xf32>
    %1115 = arith.addf %1114, %1113 : vector<2x128xf32>
    %1116 = arith.divf %1114, %1115 : vector<2x128xf32>
    %1117 = arith.addf %1106, %1109 : vector<2x128xf32>
    %1118 = arith.negf %1117 : vector<2x128xf32>
    %1119 = math.exp %1118 : vector<2x128xf32>
    %cst_291 = arith.constant 1.000000e+00 : f32
    %1120 = vector.broadcast %cst_291 : f32 to vector<2x128xf32>
    %1121 = arith.addf %1120, %1119 : vector<2x128xf32>
    %1122 = arith.divf %1120, %1121 : vector<2x128xf32>
    %1123 = arith.mulf %1116, %1110 : vector<2x128xf32>
    %1124 = arith.addf %1107, %1123 : vector<2x128xf32>
    %1125 = math.tanh %1124 : vector<2x128xf32>
    %cst_292 = arith.constant 1.000000e+00 : f32
    %1126 = vector.broadcast %cst_292 : f32 to vector<2x128xf32>
    %1127 = arith.subf %1126, %1122 : vector<2x128xf32>
    %1128 = arith.mulf %1127, %1125 : vector<2x128xf32>
    %1129 = arith.mulf %1122, %1100 : vector<2x128xf32>
    %1130 = arith.addf %1128, %1129 : vector<2x128xf32>
    %1131 = vector.extract_strided_slice %1095 {offsets = [2, 0], sizes = [2, 384], strides = [1, 1]} : vector<16x384xf32> to vector<2x384xf32>
    %cst_293 = arith.constant dense<0.000000e+00> : vector<2x384xf32>
    %1132 = tpu.matmul %1130, %1097, %cst_293 {dimension_numbers = #tpu.dot_dimension_numbers<[1], [0], [0], [1], [0, 0, 1, 1], [], []>} : vector<2x128xf32>, vector<128x384xf32>, vector<2x384xf32> -> vector<2x384xf32>
    %1133 = vector.broadcast %1099 : vector<1x384xf32> to vector<2x384xf32>
    %1134 = arith.addf %1132, %1133 : vector<2x384xf32>
    %1135 = vector.extract_strided_slice %1131 {offsets = [0, 0], sizes = [2, 128], strides = [1, 1]} : vector<2x384xf32> to vector<2x128xf32>
    %1136 = vector.extract_strided_slice %1131 {offsets = [0, 128], sizes = [2, 128], strides = [1, 1]} : vector<2x384xf32> to vector<2x128xf32>
    %1137 = vector.extract_strided_slice %1131 {offsets = [0, 256], sizes = [2, 128], strides = [1, 1]} : vector<2x384xf32> to vector<2x128xf32>
    %1138 = vector.extract_strided_slice %1134 {offsets = [0, 0], sizes = [2, 128], strides = [1, 1]} : vector<2x384xf32> to vector<2x128xf32>
    %1139 = vector.extract_strided_slice %1134 {offsets = [0, 128], sizes = [2, 128], strides = [1, 1]} : vector<2x384xf32> to vector<2x128xf32>
    %1140 = vector.extract_strided_slice %1134 {offsets = [0, 256], sizes = [2, 128], strides = [1, 1]} : vector<2x384xf32> to vector<2x128xf32>
    %1141 = arith.addf %1135, %1138 : vector<2x128xf32>
    %1142 = arith.negf %1141 : vector<2x128xf32>
    %1143 = math.exp %1142 : vector<2x128xf32>
    %cst_294 = arith.constant 1.000000e+00 : f32
    %1144 = vector.broadcast %cst_294 : f32 to vector<2x128xf32>
    %1145 = arith.addf %1144, %1143 : vector<2x128xf32>
    %1146 = arith.divf %1144, %1145 : vector<2x128xf32>
    %1147 = arith.addf %1136, %1139 : vector<2x128xf32>
    %1148 = arith.negf %1147 : vector<2x128xf32>
    %1149 = math.exp %1148 : vector<2x128xf32>
    %cst_295 = arith.constant 1.000000e+00 : f32
    %1150 = vector.broadcast %cst_295 : f32 to vector<2x128xf32>
    %1151 = arith.addf %1150, %1149 : vector<2x128xf32>
    %1152 = arith.divf %1150, %1151 : vector<2x128xf32>
    %1153 = arith.mulf %1146, %1140 : vector<2x128xf32>
    %1154 = arith.addf %1137, %1153 : vector<2x128xf32>
    %1155 = math.tanh %1154 : vector<2x128xf32>
    %cst_296 = arith.constant 1.000000e+00 : f32
    %1156 = vector.broadcast %cst_296 : f32 to vector<2x128xf32>
    %1157 = arith.subf %1156, %1152 : vector<2x128xf32>
    %1158 = arith.mulf %1157, %1155 : vector<2x128xf32>
    %1159 = arith.mulf %1152, %1130 : vector<2x128xf32>
    %1160 = arith.addf %1158, %1159 : vector<2x128xf32>
    %1161 = vector.extract_strided_slice %1095 {offsets = [4, 0], sizes = [2, 384], strides = [1, 1]} : vector<16x384xf32> to vector<2x384xf32>
    %cst_297 = arith.constant dense<0.000000e+00> : vector<2x384xf32>
    %1162 = tpu.matmul %1160, %1097, %cst_297 {dimension_numbers = #tpu.dot_dimension_numbers<[1], [0], [0], [1], [0, 0, 1, 1], [], []>} : vector<2x128xf32>, vector<128x384xf32>, vector<2x384xf32> -> vector<2x384xf32>
    %1163 = vector.broadcast %1099 : vector<1x384xf32> to vector<2x384xf32>
    %1164 = arith.addf %1162, %1163 : vector<2x384xf32>
    %1165 = vector.extract_strided_slice %1161 {offsets = [0, 0], sizes = [2, 128], strides = [1, 1]} : vector<2x384xf32> to vector<2x128xf32>
    %1166 = vector.extract_strided_slice %1161 {offsets = [0, 128], sizes = [2, 128], strides = [1, 1]} : vector<2x384xf32> to vector<2x128xf32>
    %1167 = vector.extract_strided_slice %1161 {offsets = [0, 256], sizes = [2, 128], strides = [1, 1]} : vector<2x384xf32> to vector<2x128xf32>
    %1168 = vector.extract_strided_slice %1164 {offsets = [0, 0], sizes = [2, 128], strides = [1, 1]} : vector<2x384xf32> to vector<2x128xf32>
    %1169 = vector.extract_strided_slice %1164 {offsets = [0, 128], sizes = [2, 128], strides = [1, 1]} : vector<2x384xf32> to vector<2x128xf32>
    %1170 = vector.extract_strided_slice %1164 {offsets = [0, 256], sizes = [2, 128], strides = [1, 1]} : vector<2x384xf32> to vector<2x128xf32>
    %1171 = arith.addf %1165, %1168 : vector<2x128xf32>
    %1172 = arith.negf %1171 : vector<2x128xf32>
    %1173 = math.exp %1172 : vector<2x128xf32>
    %cst_298 = arith.constant 1.000000e+00 : f32
    %1174 = vector.broadcast %cst_298 : f32 to vector<2x128xf32>
    %1175 = arith.addf %1174, %1173 : vector<2x128xf32>
    %1176 = arith.divf %1174, %1175 : vector<2x128xf32>
    %1177 = arith.addf %1166, %1169 : vector<2x128xf32>
    %1178 = arith.negf %1177 : vector<2x128xf32>
    %1179 = math.exp %1178 : vector<2x128xf32>
    %cst_299 = arith.constant 1.000000e+00 : f32
    %1180 = vector.broadcast %cst_299 : f32 to vector<2x128xf32>
    %1181 = arith.addf %1180, %1179 : vector<2x128xf32>
    %1182 = arith.divf %1180, %1181 : vector<2x128xf32>
    %1183 = arith.mulf %1176, %1170 : vector<2x128xf32>
    %1184 = arith.addf %1167, %1183 : vector<2x128xf32>
    %1185 = math.tanh %1184 : vector<2x128xf32>
    %cst_300 = arith.constant 1.000000e+00 : f32
    %1186 = vector.broadcast %cst_300 : f32 to vector<2x128xf32>
    %1187 = arith.subf %1186, %1182 : vector<2x128xf32>
    %1188 = arith.mulf %1187, %1185 : vector<2x128xf32>
    %1189 = arith.mulf %1182, %1160 : vector<2x128xf32>
    %1190 = arith.addf %1188, %1189 : vector<2x128xf32>
    %1191 = vector.extract_strided_slice %1095 {offsets = [6, 0], sizes = [2, 384], strides = [1, 1]} : vector<16x384xf32> to vector<2x384xf32>
    %cst_301 = arith.constant dense<0.000000e+00> : vector<2x384xf32>
    %1192 = tpu.matmul %1190, %1097, %cst_301 {dimension_numbers = #tpu.dot_dimension_numbers<[1], [0], [0], [1], [0, 0, 1, 1], [], []>} : vector<2x128xf32>, vector<128x384xf32>, vector<2x384xf32> -> vector<2x384xf32>
    %1193 = vector.broadcast %1099 : vector<1x384xf32> to vector<2x384xf32>
    %1194 = arith.addf %1192, %1193 : vector<2x384xf32>
    %1195 = vector.extract_strided_slice %1191 {offsets = [0, 0], sizes = [2, 128], strides = [1, 1]} : vector<2x384xf32> to vector<2x128xf32>
    %1196 = vector.extract_strided_slice %1191 {offsets = [0, 128], sizes = [2, 128], strides = [1, 1]} : vector<2x384xf32> to vector<2x128xf32>
    %1197 = vector.extract_strided_slice %1191 {offsets = [0, 256], sizes = [2, 128], strides = [1, 1]} : vector<2x384xf32> to vector<2x128xf32>
    %1198 = vector.extract_strided_slice %1194 {offsets = [0, 0], sizes = [2, 128], strides = [1, 1]} : vector<2x384xf32> to vector<2x128xf32>
    %1199 = vector.extract_strided_slice %1194 {offsets = [0, 128], sizes = [2, 128], strides = [1, 1]} : vector<2x384xf32> to vector<2x128xf32>
    %1200 = vector.extract_strided_slice %1194 {offsets = [0, 256], sizes = [2, 128], strides = [1, 1]} : vector<2x384xf32> to vector<2x128xf32>
    %1201 = arith.addf %1195, %1198 : vector<2x128xf32>
    %1202 = arith.negf %1201 : vector<2x128xf32>
    %1203 = math.exp %1202 : vector<2x128xf32>
    %cst_302 = arith.constant 1.000000e+00 : f32
    %1204 = vector.broadcast %cst_302 : f32 to vector<2x128xf32>
    %1205 = arith.addf %1204, %1203 : vector<2x128xf32>
    %1206 = arith.divf %1204, %1205 : vector<2x128xf32>
    %1207 = arith.addf %1196, %1199 : vector<2x128xf32>
    %1208 = arith.negf %1207 : vector<2x128xf32>
    %1209 = math.exp %1208 : vector<2x128xf32>
    %cst_303 = arith.constant 1.000000e+00 : f32
    %1210 = vector.broadcast %cst_303 : f32 to vector<2x128xf32>
    %1211 = arith.addf %1210, %1209 : vector<2x128xf32>
    %1212 = arith.divf %1210, %1211 : vector<2x128xf32>
    %1213 = arith.mulf %1206, %1200 : vector<2x128xf32>
    %1214 = arith.addf %1197, %1213 : vector<2x128xf32>
    %1215 = math.tanh %1214 : vector<2x128xf32>
    %cst_304 = arith.constant 1.000000e+00 : f32
    %1216 = vector.broadcast %cst_304 : f32 to vector<2x128xf32>
    %1217 = arith.subf %1216, %1212 : vector<2x128xf32>
    %1218 = arith.mulf %1217, %1215 : vector<2x128xf32>
    %1219 = arith.mulf %1212, %1190 : vector<2x128xf32>
    %1220 = arith.addf %1218, %1219 : vector<2x128xf32>
    %1221 = vector.extract_strided_slice %1095 {offsets = [8, 0], sizes = [2, 384], strides = [1, 1]} : vector<16x384xf32> to vector<2x384xf32>
    %cst_305 = arith.constant dense<0.000000e+00> : vector<2x384xf32>
    %1222 = tpu.matmul %1220, %1097, %cst_305 {dimension_numbers = #tpu.dot_dimension_numbers<[1], [0], [0], [1], [0, 0, 1, 1], [], []>} : vector<2x128xf32>, vector<128x384xf32>, vector<2x384xf32> -> vector<2x384xf32>
    %1223 = vector.broadcast %1099 : vector<1x384xf32> to vector<2x384xf32>
    %1224 = arith.addf %1222, %1223 : vector<2x384xf32>
    %1225 = vector.extract_strided_slice %1221 {offsets = [0, 0], sizes = [2, 128], strides = [1, 1]} : vector<2x384xf32> to vector<2x128xf32>
    %1226 = vector.extract_strided_slice %1221 {offsets = [0, 128], sizes = [2, 128], strides = [1, 1]} : vector<2x384xf32> to vector<2x128xf32>
    %1227 = vector.extract_strided_slice %1221 {offsets = [0, 256], sizes = [2, 128], strides = [1, 1]} : vector<2x384xf32> to vector<2x128xf32>
    %1228 = vector.extract_strided_slice %1224 {offsets = [0, 0], sizes = [2, 128], strides = [1, 1]} : vector<2x384xf32> to vector<2x128xf32>
    %1229 = vector.extract_strided_slice %1224 {offsets = [0, 128], sizes = [2, 128], strides = [1, 1]} : vector<2x384xf32> to vector<2x128xf32>
    %1230 = vector.extract_strided_slice %1224 {offsets = [0, 256], sizes = [2, 128], strides = [1, 1]} : vector<2x384xf32> to vector<2x128xf32>
    %1231 = arith.addf %1225, %1228 : vector<2x128xf32>
    %1232 = arith.negf %1231 : vector<2x128xf32>
    %1233 = math.exp %1232 : vector<2x128xf32>
    %cst_306 = arith.constant 1.000000e+00 : f32
    %1234 = vector.broadcast %cst_306 : f32 to vector<2x128xf32>
    %1235 = arith.addf %1234, %1233 : vector<2x128xf32>
    %1236 = arith.divf %1234, %1235 : vector<2x128xf32>
    %1237 = arith.addf %1226, %1229 : vector<2x128xf32>
    %1238 = arith.negf %1237 : vector<2x128xf32>
    %1239 = math.exp %1238 : vector<2x128xf32>
    %cst_307 = arith.constant 1.000000e+00 : f32
    %1240 = vector.broadcast %cst_307 : f32 to vector<2x128xf32>
    %1241 = arith.addf %1240, %1239 : vector<2x128xf32>
    %1242 = arith.divf %1240, %1241 : vector<2x128xf32>
    %1243 = arith.mulf %1236, %1230 : vector<2x128xf32>
    %1244 = arith.addf %1227, %1243 : vector<2x128xf32>
    %1245 = math.tanh %1244 : vector<2x128xf32>
    %cst_308 = arith.constant 1.000000e+00 : f32
    %1246 = vector.broadcast %cst_308 : f32 to vector<2x128xf32>
    %1247 = arith.subf %1246, %1242 : vector<2x128xf32>
    %1248 = arith.mulf %1247, %1245 : vector<2x128xf32>
    %1249 = arith.mulf %1242, %1220 : vector<2x128xf32>
    %1250 = arith.addf %1248, %1249 : vector<2x128xf32>
    %1251 = vector.extract_strided_slice %1095 {offsets = [10, 0], sizes = [2, 384], strides = [1, 1]} : vector<16x384xf32> to vector<2x384xf32>
    %cst_309 = arith.constant dense<0.000000e+00> : vector<2x384xf32>
    %1252 = tpu.matmul %1250, %1097, %cst_309 {dimension_numbers = #tpu.dot_dimension_numbers<[1], [0], [0], [1], [0, 0, 1, 1], [], []>} : vector<2x128xf32>, vector<128x384xf32>, vector<2x384xf32> -> vector<2x384xf32>
    %1253 = vector.broadcast %1099 : vector<1x384xf32> to vector<2x384xf32>
    %1254 = arith.addf %1252, %1253 : vector<2x384xf32>
    %1255 = vector.extract_strided_slice %1251 {offsets = [0, 0], sizes = [2, 128], strides = [1, 1]} : vector<2x384xf32> to vector<2x128xf32>
    %1256 = vector.extract_strided_slice %1251 {offsets = [0, 128], sizes = [2, 128], strides = [1, 1]} : vector<2x384xf32> to vector<2x128xf32>
    %1257 = vector.extract_strided_slice %1251 {offsets = [0, 256], sizes = [2, 128], strides = [1, 1]} : vector<2x384xf32> to vector<2x128xf32>
    %1258 = vector.extract_strided_slice %1254 {offsets = [0, 0], sizes = [2, 128], strides = [1, 1]} : vector<2x384xf32> to vector<2x128xf32>
    %1259 = vector.extract_strided_slice %1254 {offsets = [0, 128], sizes = [2, 128], strides = [1, 1]} : vector<2x384xf32> to vector<2x128xf32>
    %1260 = vector.extract_strided_slice %1254 {offsets = [0, 256], sizes = [2, 128], strides = [1, 1]} : vector<2x384xf32> to vector<2x128xf32>
    %1261 = arith.addf %1255, %1258 : vector<2x128xf32>
    %1262 = arith.negf %1261 : vector<2x128xf32>
    %1263 = math.exp %1262 : vector<2x128xf32>
    %cst_310 = arith.constant 1.000000e+00 : f32
    %1264 = vector.broadcast %cst_310 : f32 to vector<2x128xf32>
    %1265 = arith.addf %1264, %1263 : vector<2x128xf32>
    %1266 = arith.divf %1264, %1265 : vector<2x128xf32>
    %1267 = arith.addf %1256, %1259 : vector<2x128xf32>
    %1268 = arith.negf %1267 : vector<2x128xf32>
    %1269 = math.exp %1268 : vector<2x128xf32>
    %cst_311 = arith.constant 1.000000e+00 : f32
    %1270 = vector.broadcast %cst_311 : f32 to vector<2x128xf32>
    %1271 = arith.addf %1270, %1269 : vector<2x128xf32>
    %1272 = arith.divf %1270, %1271 : vector<2x128xf32>
    %1273 = arith.mulf %1266, %1260 : vector<2x128xf32>
    %1274 = arith.addf %1257, %1273 : vector<2x128xf32>
    %1275 = math.tanh %1274 : vector<2x128xf32>
    %cst_312 = arith.constant 1.000000e+00 : f32
    %1276 = vector.broadcast %cst_312 : f32 to vector<2x128xf32>
    %1277 = arith.subf %1276, %1272 : vector<2x128xf32>
    %1278 = arith.mulf %1277, %1275 : vector<2x128xf32>
    %1279 = arith.mulf %1272, %1250 : vector<2x128xf32>
    %1280 = arith.addf %1278, %1279 : vector<2x128xf32>
    %1281 = vector.extract_strided_slice %1095 {offsets = [12, 0], sizes = [2, 384], strides = [1, 1]} : vector<16x384xf32> to vector<2x384xf32>
    %cst_313 = arith.constant dense<0.000000e+00> : vector<2x384xf32>
    %1282 = tpu.matmul %1280, %1097, %cst_313 {dimension_numbers = #tpu.dot_dimension_numbers<[1], [0], [0], [1], [0, 0, 1, 1], [], []>} : vector<2x128xf32>, vector<128x384xf32>, vector<2x384xf32> -> vector<2x384xf32>
    %1283 = vector.broadcast %1099 : vector<1x384xf32> to vector<2x384xf32>
    %1284 = arith.addf %1282, %1283 : vector<2x384xf32>
    %1285 = vector.extract_strided_slice %1281 {offsets = [0, 0], sizes = [2, 128], strides = [1, 1]} : vector<2x384xf32> to vector<2x128xf32>
    %1286 = vector.extract_strided_slice %1281 {offsets = [0, 128], sizes = [2, 128], strides = [1, 1]} : vector<2x384xf32> to vector<2x128xf32>
    %1287 = vector.extract_strided_slice %1281 {offsets = [0, 256], sizes = [2, 128], strides = [1, 1]} : vector<2x384xf32> to vector<2x128xf32>
    %1288 = vector.extract_strided_slice %1284 {offsets = [0, 0], sizes = [2, 128], strides = [1, 1]} : vector<2x384xf32> to vector<2x128xf32>
    %1289 = vector.extract_strided_slice %1284 {offsets = [0, 128], sizes = [2, 128], strides = [1, 1]} : vector<2x384xf32> to vector<2x128xf32>
    %1290 = vector.extract_strided_slice %1284 {offsets = [0, 256], sizes = [2, 128], strides = [1, 1]} : vector<2x384xf32> to vector<2x128xf32>
    %1291 = arith.addf %1285, %1288 : vector<2x128xf32>
    %1292 = arith.negf %1291 : vector<2x128xf32>
    %1293 = math.exp %1292 : vector<2x128xf32>
    %cst_314 = arith.constant 1.000000e+00 : f32
    %1294 = vector.broadcast %cst_314 : f32 to vector<2x128xf32>
    %1295 = arith.addf %1294, %1293 : vector<2x128xf32>
    %1296 = arith.divf %1294, %1295 : vector<2x128xf32>
    %1297 = arith.addf %1286, %1289 : vector<2x128xf32>
    %1298 = arith.negf %1297 : vector<2x128xf32>
    %1299 = math.exp %1298 : vector<2x128xf32>
    %cst_315 = arith.constant 1.000000e+00 : f32
    %1300 = vector.broadcast %cst_315 : f32 to vector<2x128xf32>
    %1301 = arith.addf %1300, %1299 : vector<2x128xf32>
    %1302 = arith.divf %1300, %1301 : vector<2x128xf32>
    %1303 = arith.mulf %1296, %1290 : vector<2x128xf32>
    %1304 = arith.addf %1287, %1303 : vector<2x128xf32>
    %1305 = math.tanh %1304 : vector<2x128xf32>
    %cst_316 = arith.constant 1.000000e+00 : f32
    %1306 = vector.broadcast %cst_316 : f32 to vector<2x128xf32>
    %1307 = arith.subf %1306, %1302 : vector<2x128xf32>
    %1308 = arith.mulf %1307, %1305 : vector<2x128xf32>
    %1309 = arith.mulf %1302, %1280 : vector<2x128xf32>
    %1310 = arith.addf %1308, %1309 : vector<2x128xf32>
    %1311 = vector.extract_strided_slice %1095 {offsets = [14, 0], sizes = [2, 384], strides = [1, 1]} : vector<16x384xf32> to vector<2x384xf32>
    %cst_317 = arith.constant dense<0.000000e+00> : vector<2x384xf32>
    %1312 = tpu.matmul %1310, %1097, %cst_317 {dimension_numbers = #tpu.dot_dimension_numbers<[1], [0], [0], [1], [0, 0, 1, 1], [], []>} : vector<2x128xf32>, vector<128x384xf32>, vector<2x384xf32> -> vector<2x384xf32>
    %1313 = vector.broadcast %1099 : vector<1x384xf32> to vector<2x384xf32>
    %1314 = arith.addf %1312, %1313 : vector<2x384xf32>
    %1315 = vector.extract_strided_slice %1311 {offsets = [0, 0], sizes = [2, 128], strides = [1, 1]} : vector<2x384xf32> to vector<2x128xf32>
    %1316 = vector.extract_strided_slice %1311 {offsets = [0, 128], sizes = [2, 128], strides = [1, 1]} : vector<2x384xf32> to vector<2x128xf32>
    %1317 = vector.extract_strided_slice %1311 {offsets = [0, 256], sizes = [2, 128], strides = [1, 1]} : vector<2x384xf32> to vector<2x128xf32>
    %1318 = vector.extract_strided_slice %1314 {offsets = [0, 0], sizes = [2, 128], strides = [1, 1]} : vector<2x384xf32> to vector<2x128xf32>
    %1319 = vector.extract_strided_slice %1314 {offsets = [0, 128], sizes = [2, 128], strides = [1, 1]} : vector<2x384xf32> to vector<2x128xf32>
    %1320 = vector.extract_strided_slice %1314 {offsets = [0, 256], sizes = [2, 128], strides = [1, 1]} : vector<2x384xf32> to vector<2x128xf32>
    %1321 = arith.addf %1315, %1318 : vector<2x128xf32>
    %1322 = arith.negf %1321 : vector<2x128xf32>
    %1323 = math.exp %1322 : vector<2x128xf32>
    %cst_318 = arith.constant 1.000000e+00 : f32
    %1324 = vector.broadcast %cst_318 : f32 to vector<2x128xf32>
    %1325 = arith.addf %1324, %1323 : vector<2x128xf32>
    %1326 = arith.divf %1324, %1325 : vector<2x128xf32>
    %1327 = arith.addf %1316, %1319 : vector<2x128xf32>
    %1328 = arith.negf %1327 : vector<2x128xf32>
    %1329 = math.exp %1328 : vector<2x128xf32>
    %cst_319 = arith.constant 1.000000e+00 : f32
    %1330 = vector.broadcast %cst_319 : f32 to vector<2x128xf32>
    %1331 = arith.addf %1330, %1329 : vector<2x128xf32>
    %1332 = arith.divf %1330, %1331 : vector<2x128xf32>
    %1333 = arith.mulf %1326, %1320 : vector<2x128xf32>
    %1334 = arith.addf %1317, %1333 : vector<2x128xf32>
    %1335 = math.tanh %1334 : vector<2x128xf32>
    %cst_320 = arith.constant 1.000000e+00 : f32
    %1336 = vector.broadcast %cst_320 : f32 to vector<2x128xf32>
    %1337 = arith.subf %1336, %1332 : vector<2x128xf32>
    %1338 = arith.mulf %1337, %1335 : vector<2x128xf32>
    %1339 = arith.mulf %1332, %1310 : vector<2x128xf32>
    %1340 = arith.addf %1338, %1339 : vector<2x128xf32>
    %1341 = vector.shape_cast %1340 : vector<2x128xf32> to vector<1x2x128xf32>
    %c4_321 = arith.constant 4 : index
    %c0_322 = arith.constant 0 : index
    %c0_323 = arith.constant 0 : index
    %c0_324 = arith.constant 0 : index
    %1342 = vector.load %arg7[%c4_321, %c0_322, %c0_323, %c0_324] : memref<5x2x2x128xf32, #tpu.memory_space<vmem>>, vector<1x2x2x128xf32>
    %1343 = vector.shape_cast %1342 : vector<1x2x2x128xf32> to vector<2x2x128xf32>
    %1344 = vector.broadcast %1341 : vector<1x2x128xf32> to vector<2x2x128xf32>
    %1345 = arith.mulf %1344, %1343 : vector<2x2x128xf32>
    %cst_325 = arith.constant dense<0.000000e+00> : vector<2x2xf32>
    %1346 = vector.multi_reduction <add>, %1345, %cst_325 [2] : vector<2x2x128xf32> to vector<2x2xf32>
    %cst_326 = arith.constant dense<0.000000e+00> : vector<2xf32>
    %1347 = vector.multi_reduction <add>, %1346, %cst_326 [1] : vector<2x2xf32> to vector<2xf32>
    %1348 = vector.shape_cast %1347 : vector<2xf32> to vector<2x1xf32>
    %1349 = arith.addf %1088, %1348 : vector<2x1xf32>
    %cst_327 = arith.constant 0.000000e+00 : f32
    %1350 = vector.broadcast %cst_327 : f32 to vector<2x128xf32>
    %1351 = arith.maximumf %1340, %1350 : vector<2x128xf32>
    %c0_328 = arith.constant 0 : index
    %c0_329 = arith.constant 0 : index
    %1352 = vector.load %arg6[%c0_328, %c0_329] : memref<1x128xf32, #tpu.memory_space<vmem>>, vector<1x128xf32>
    %1353 = vector.broadcast %1352 : vector<1x128xf32> to vector<2x128xf32>
    %1354 = arith.mulf %1351, %1353 : vector<2x128xf32>
    %cst_330 = arith.constant dense<0.000000e+00> : vector<2xf32>
    %1355 = vector.multi_reduction <add>, %1354, %cst_330 [1] : vector<2x128xf32> to vector<2xf32>
    %1356 = vector.shape_cast %1355 : vector<2xf32> to vector<2x1xf32>
    %1357 = arith.addf %1356, %1349 : vector<2x1xf32>
    %c0_331 = arith.constant 0 : index
    %c0_332 = arith.constant 0 : index
    %1358 = vector.load %arg8[%c0_331, %c0_332] : memref<1x1xf32, #tpu.memory_space<vmem>>, vector<1x1xf32>
    %1359 = vector.broadcast %1358 : vector<1x1xf32> to vector<2x1xf32>
    %1360 = arith.addf %1357, %1359 : vector<2x1xf32>
    %1361 = arith.negf %1360 : vector<2x1xf32>
    %1362 = math.exp %1361 : vector<2x1xf32>
    %cst_333 = arith.constant 1.000000e+00 : f32
    %1363 = vector.broadcast %cst_333 : f32 to vector<2x1xf32>
    %1364 = arith.addf %1363, %1362 : vector<2x1xf32>
    %1365 = arith.divf %1363, %1364 : vector<2x1xf32>
    %c0_334 = arith.constant 0 : index
    %c0_335 = arith.constant 0 : index
    %1366 = vector.load %arg9[%c0_334, %c0_335] : memref<2x1xf32, #tpu.memory_space<vmem>>, vector<2x1xf32>
    tpu.vector_store %arg9[%c0_334, %c0_335], %1365 {strides = array<i32>} : memref<2x1xf32, #tpu.memory_space<vmem>>, vector<2x1xf32>,
    return
  }
}

</mosaic_0001>

<bundles_post_ra>
// kernel: d_forward.1
= control target key start
LH: loop header
LB: loop body
LE: loop exit
PB: predicated region body
PF: predicated region fallthrough
CT: control target
= control target key end

     0   :  { %s16762_s0 = inlined_call_operand.vmem [shape: s32[16,1], index: 0, kind: input, shape index: {}]   ;;  %s16763_s1 = inlined_call_operand.vmem [shape: f32[16,128], index: 1, kind: input, shape index: {}]   ;;  %s16764_s2 = inlined_call_operand.hbm [shape: f32[5,128,384], index: 2, kind: input, shape index: {}]   ;;  %s16765_s3 = inlined_call_operand.hbm [shape: f32[5,128,384], index: 3, kind: input, shape index: {}]   ;;  %s16766_s4 = inlined_call_operand.vmem [shape: f32[5,1,384], index: 4, kind: input, shape index: {}]   ;;  %s16767_s5 = inlined_call_operand.hbm [shape: f32[5,1,384], index: 5, kind: input, shape index: {}]   ;;  %s16768_s6 = inlined_call_operand.vmem [shape: f32[1,128], index: 6, kind: input, shape index: {}]   ;;  %s16769_s7 = inlined_call_operand.vmem [shape: f32[5,2,2,128], index: 7, kind: input, shape index: {}]   ;;  %s16770_s8 = inlined_call_operand.<no memory space> [shape: f32[1,1], index: 8, kind: input, shape index: {}]   ;;  %s16771_s9 = inlined_call_operand.vmem [shape: f32[2,1], index: 9, kind: output, shape index: {}]  }
   0x1   :  { %v14_v0 = vstv %s16770_s8 }
   0x2   :  { %15 = vst [vmem:[#allocation3] sm:$0x1] %v14_v0 }
   0x3   :  { %16 = vsyncpa [#allocation5], 0 }
   0x4   :  { %17 = vsyncpa [#allocation7], 0  ;;  %s14247_s11 = smov [#allocation6]   ;;  %s14248_s13 = smov [#allocation4]  }
   0x5   :  { %s39_s12 = sshll.u32 %s14247_s11, 4  ;;  %s27_s14 = sshll.u32 %s14248_s13, 4  ;;  %s40_s12 = int_to_ptr.vmem [resolvable:$true] %s39_s12  ;;  %s14311_s14 = int_to_ptr.vmem [resolvable:$true] %s27_s14 }
   0x6   :  { %s14177_s17 = scalar_lea.hbm %s16765_s3, 30720 }
   0x7   :  { %p14178_p0 = scmp.ne.s32.totalorder %s16765_s3, %s14177_s17  ;;  %p14181_p1 = scmp.lt.u32.totalorder %s14177_s17, %s16765_s3 }
   0x9   :  { %p14183_p2 = pnand %p14181_p1, %p14178_p0 }
   0xb   :  { %14186 = shalt.err (!%p14183_p2)
}
   0xc   :  { %s14187_s21 = scalar_lea.vmem %s40_s12, 30720  ;;  %p14192_p4 = scmp.lt.s32.totalorder %s40_s12, %s40_s12 }
   0xd   :  { %p14188_p3 = scmp.ne.s32.totalorder %s40_s12, %s14187_s21  ;;  %p14193_p5 = scmp.lt.s32.totalorder %s14187_s21, %s14187_s21 }
   0xf   :  { %p14194_p6 = por %p14193_p5, %p14192_p4 }
  0x11   :  { %p14195_p7 = pnand %p14194_p6, %p14188_p3 }
  0x13   :  { %14198 = shalt.err (!%p14195_p7)
}
  0x14   :  { %s14249_s22 = smov 384   ;;  %s14250_s23 = smov 24  }
  0x15   :  { %45 = dma.hbm_to_vmem [thread:$0]  %s16765_s3, 30720, %s40_s12, [#allocation7], %s14249_s22, %s14249_s22, %s14250_s23  }
  0x16   :  { %s14199_s28 = scalar_lea.hbm %s16764_s2, 30720 }
  0x17   :  { %p14200_p8 = scmp.ne.s32.totalorder %s16764_s2, %s14199_s28  ;;  %p14203_p9 = scmp.lt.u32.totalorder %s14199_s28, %s16764_s2 }
  0x19   :  { %p14205_p10 = pnand %p14203_p9, %p14200_p8 }
  0x1b   :  { %14208 = shalt.err (!%p14205_p10)
}
  0x1c   :  { %s14209_s13 = scalar_lea.vmem %s14311_s14, 30720  ;;  %p14214_p12 = scmp.lt.s32.totalorder %s14311_s14, %s14311_s14 }
  0x1d   :  { %p14210_p11 = scmp.ne.s32.totalorder %s14311_s14, %s14209_s13  ;;  %p14215_p13 = scmp.lt.s32.totalorder %s14209_s13, %s14209_s13 }
  0x1f   :  { %p14216_p0 = por %p14215_p13, %p14214_p12 }
  0x21   :  { %p14217_p1 = pnand %p14216_p0, %p14210_p11 }
  0x23   :  { %14220 = shalt.err (!%p14217_p1)
}
  0x24   :  { %33 = dma.hbm_to_vmem [thread:$0]  %s16764_s2, 30720, %s14311_s14, [#allocation5], %s14249_s22, %s14249_s22, %s14250_s23  }
  0x25   :  { %s14251_s15 = smov [#allocation8]   ;;  %s14221_s19 = scalar_lea.hbm %s16767_s5, 240 }
  0x26   :  { %s53_s16 = sshll.u32 %s14251_s15, 4  ;;  %p14222_p2 = scmp.ne.s32.totalorder %s16767_s5, %s14221_s19  ;;  %s54_s16 = int_to_ptr.vmem [resolvable:$true] %s53_s16 }
  0x27   :  { %p14225_p3 = scmp.lt.u32.totalorder %s14221_s19, %s16767_s5 }
  0x29   :  { %p14227_p4 = pnand %p14225_p3, %p14222_p2 }
  0x2b   :  { %14230 = shalt.err (!%p14227_p4)
}
  0x2c   :  { %s14231_s25 = scalar_lea.vmem %s54_s16, 240  ;;  %s14235_s2 = scalar_lea.vmem %s54_s16, 256 }
  0x2d   :  { %p14232_p5 = scmp.ne.s32.totalorder %s54_s16, %s14231_s25  ;;  %p14236_p6 = scmp.lt.s32.totalorder %s54_s16, %s54_s16 }
  0x2e   :  { %p14237_p7 = scmp.lt.s32.totalorder %s14235_s2, %s14231_s25 }
  0x30   :  { %p14238_p8 = por %p14237_p7, %p14236_p6 }
  0x32   :  { %p14239_p9 = pnand %p14238_p8, %p14232_p5 }
  0x34   :  { %14242 = shalt.err (!%p14239_p9)
}
  0x35   :  { %s14252_s14 = smov 48   ;;  %s14253_s22 = smov 3  }
  0x36   :  { %59 = dma.hbm_to_vmem [thread:$0]  %s16767_s5, 240, %s54_s16, [#allocation7], %s14252_s14, %s14252_s14, %s14253_s22  }
  0x37   :  { %14243 = dma.done.wait [#allocation5], 30720  }
  0x38   :  { %14244 = vsyncadd [#allocation5], 4294936576 }
  0x39   :  { %14245 = dma.done.wait [#allocation7], 30960  }
  0x3a   :  { %14246 = vsyncadd [#allocation7], 4294936336  ;;  %v14254_v1 = vmov 0   ;;  %v75_v2 = vld [vmem:[%s16762_s0] sm:$0xff]  ;;  %v92_v4 = vld [vmem:[%s16763_s1 + $0x8] sm:$0xff]  ;;  %v14255_v7 = vmov 0.0   ;;  %v77_v59 = vlaneseq }
  0x3b   :  { %13772 = vset.pattern.permute.xlu0 %v14254_v1  ;;  %v91_v3 = vld [vmem:[%s16763_s1] sm:$0xff]  ;;  %v76_v5 = vld [vmem:[%s16762_s0 + $0x8] sm:$0xff]  ;;  %304 = vmatprep.mubr.f32.mxu1 %v14255_v7  ;;  %v179_v9 = vld [vmem:[#allocation4 + $0x20] sm:$0xff]  ;;  %vm93_vm0 = vcmask 130048   ;;  %vm14257_vm3 = vmmov 0   ;;  %vm1856_vm4 = vcmask 1047558  }
  0x3c   :  { %80 = vperm.xlu0 %13772, %v75_v2   ;;  %v11197_v6 = vpack.c.bf16 %v92_v4, %v91_v3  ;;  %v176_v8 = vld [vmem:[#allocation4 + $0x8] sm:$0xff]  ;;  %v175_v10 = vld [vmem:[#allocation4] sm:$0xff]  ;;  %v178_v12 = vld [vmem:[#allocation4 + $0x18] sm:$0xff]  ;;  %v14371_v60 = vand.u32 127, %v77_v59  ;;  %vm1874_vm5 = vcmask 1041409   ;;  %vm1877_vm6 = vcmask 9216  }
  0x3d   :  { %v11201_v11 = vpack.c.bf16 %v179_v9, %v176_v8  ;;  %v177_v13 = vld [vmem:[#allocation4 + $0x10] sm:$0xff]  ;;  %v180_v14 = vld [vmem:[#allocation4 + $0x28] sm:$0xff]  ;;  %v11203_v15 = vpack.c.bf16 %v178_v12, %v175_v10  ;;  %v182_v17 = vld [vmem:[#allocation4 + $0x38] sm:$0xff]  ;;  %vm8734_vm7 = vcmask 7174  }
  0x3e   :  { %11198 = vmatprep.subr.bf16.mxu0 %v11197_v6  ;;  %v14367_v16 = vpack.c.bf16 %v180_v14, %v177_v13  ;;  %v185_v18 = vld [vmem:[#allocation4 + $0x50] sm:$0xff]  ;;  %v184_v21 = vld [vmem:[#allocation4 + $0x48] sm:$0xff]  ;;  %v191_v24 = vld [vmem:[#allocation4 + $0x80] sm:$0xff] }
  0x3f   :  { %11200 = vmatpush3.bf16.msra.mxu0 %v11197_v6  ;;  %v181_v19 = vld [vmem:[#allocation4 + $0x30] sm:$0xff]  ;;  %11202 = vmatprep.subr.bf16.mxu1 %v11201_v11  ;;  %v11205_v20 = vpack.c.bf16 %v185_v18, %v182_v17  ;;  %v188_v23 = vld [vmem:[#allocation4 + $0x68] sm:$0xff]  ;;  %v187_v25 = vld [vmem:[#allocation4 + $0x60] sm:$0xff] }
  0x40   :  { %83 = vperm.xlu0 %13772, %v76_v5   ;;  %11204 = vmatpush1.bf16.msra.mxu1 %v11203_v15  ;;  %v11207_v22 = vpack.c.bf16 %v184_v21, %v181_v19  ;;  %v11209_v26 = vpack.c.bf16 %v191_v24, %v188_v23  ;;  %v190_v27 = vld [vmem:[#allocation4 + $0x78] sm:$0xff]  ;;  %v197_v30 = vld [vmem:[#allocation4 + $0xb0] sm:$0xff]  ;;  %v196_v33 = vld [vmem:[#allocation4 + $0xa8] sm:$0xff] }
  0x41   :  { %11234 = vmatprep.subr.bf16.mxu0 %v14367_v16  ;;  %11206 = vmatprep.subr.bf16.mxu1 %v11205_v20  ;;  %v11211_v28 = vpack.c.bf16 %v190_v27, %v187_v25  ;;  %v194_v29 = vld [vmem:[#allocation4 + $0x98] sm:$0xff]  ;;  %v193_v31 = vld [vmem:[#allocation4 + $0x90] sm:$0xff]  ;;  %v200_v35 = vld [vmem:[#allocation4 + $0xc8] sm:$0xff] }
  0x42   :  { %v11213_v32 = vpack.c.bf16 %v197_v30, %v194_v29  ;;  %v11215_v34 = vpack.c.bf16 %v196_v33, %v193_v31  ;;  %v203_v36 = vld [vmem:[#allocation4 + $0xe0] sm:$0xff]  ;;  %v202_v39 = vld [vmem:[#allocation4 + $0xd8] sm:$0xff]  ;;  %v209_v42 = vld [vmem:[#allocation4 + $0x110] sm:$0xff] }
  0x43   :  { %v199_v37 = vld [vmem:[#allocation4 + $0xc0] sm:$0xff]  ;;  %v11217_v38 = vpack.c.bf16 %v203_v36, %v200_v35  ;;  %v206_v41 = vld [vmem:[#allocation4 + $0xf8] sm:$0xff]  ;;  %v205_v43 = vld [vmem:[#allocation4 + $0xf0] sm:$0xff] }
  0x44   :  { %11208 = vmatpush1.bf16.msra.mxu1 %v11207_v22  ;;  %v11219_v40 = vpack.c.bf16 %v202_v39, %v199_v37  ;;  %v11221_v44 = vpack.c.bf16 %v209_v42, %v206_v41  ;;  %v208_v45 = vld [vmem:[#allocation4 + $0x108] sm:$0xff]  ;;  %v215_v48 = vld [vmem:[#allocation4 + $0x140] sm:$0xff]  ;;  %v214_v51 = vld [vmem:[#allocation4 + $0x138] sm:$0xff] }
  0x45   :  { %11210 = vmatprep.subr.bf16.mxu1 %v11209_v26  ;;  %v11223_v46 = vpack.c.bf16 %v208_v45, %v205_v43  ;;  %v212_v47 = vld [vmem:[#allocation4 + $0x128] sm:$0xff]  ;;  %v211_v49 = vld [vmem:[#allocation4 + $0x120] sm:$0xff]  ;;  %v218_v53 = vld [vmem:[#allocation4 + $0x158] sm:$0xff]  ;;  %v14256_v26 = vmov 0.0|0.0  }
  0x46   :  { %v11225_v50 = vpack.c.bf16 %v215_v48, %v212_v47  ;;  %v11227_v52 = vpack.c.bf16 %v214_v51, %v211_v49  ;;  %v221_v54 = vld [vmem:[#allocation4 + $0x170] sm:$0xff]  ;;  %v220_v57 = vld [vmem:[#allocation4 + $0x168] sm:$0xff]  ;;  %v183_v63 = vld [vmem:[#allocation4 + $0x40] sm:$0xff] }
  0x47   :  { %v217_v55 = vld [vmem:[#allocation4 + $0x150] sm:$0xff]  ;;  %v11229_v56 = vpack.c.bf16 %v221_v54, %v218_v53  ;;  %v186_v0 = vld [vmem:[#allocation4 + $0x58] sm:$0xff]  ;;  %v192_v5 = vld [vmem:[#allocation4 + $0x88] sm:$0xff] }
  0x48   :  { %11212 = vmatpush1.bf16.msra.mxu1 %v11211_v28  ;;  %v11231_v58 = vpack.c.bf16 %v220_v57, %v217_v55  ;;  %v11237_v2 = vpack.c.bf16 %v186_v0, %v183_v63  ;;  %v189_v4 = vld [vmem:[#allocation4 + $0x70] sm:$0xff]  ;;  %v195_v8 = vld [vmem:[#allocation4 + $0xa0] sm:$0xff]  ;;  %v198_v9 = vld [vmem:[#allocation4 + $0xb8] sm:$0xff] }
  0x49   :  { %11214 = vmatprep.subr.bf16.mxu1 %v11213_v32  ;;  %v11241_v6 = vpack.c.bf16 %v192_v5, %v189_v4  ;;  %v11245_v10 = vpack.c.bf16 %v198_v9, %v195_v8  ;;  %v201_v11 = vld [vmem:[#allocation4 + $0xd0] sm:$0xff]  ;;  %v204_v12 = vld [vmem:[#allocation4 + $0xe8] sm:$0xff]  ;;  %v207_v14 = vld [vmem:[#allocation4 + $0x100] sm:$0xff] }
  0x4a   :  { %v11249_v13 = vpack.c.bf16 %v204_v12, %v201_v11  ;;  %v210_v15 = vld [vmem:[#allocation4 + $0x118] sm:$0xff]  ;;  %v213_v18 = vld [vmem:[#allocation4 + $0x130] sm:$0xff]  ;;  %v216_v19 = vld [vmem:[#allocation4 + $0x148] sm:$0xff] }
  0x4b   :  { %v11253_v17 = vpack.c.bf16 %v210_v15, %v207_v14  ;;  %v219_v20 = vld [vmem:[#allocation4 + $0x160] sm:$0xff]  ;;  %v222_v21 = vld [vmem:[#allocation4 + $0x178] sm:$0xff]  ;;  %v393_v23 = vld [vmem:[#allocation6 + $0x8] sm:$0xff] }
  0x4c   :  { %11216 = vmatpush1.bf16.msra.mxu1 %v11215_v34  ;;  %v11261_v22 = vpack.c.bf16 %v222_v21, %v219_v20  ;;  %v396_v24 = vld [vmem:[#allocation6 + $0x20] sm:$0xff]  ;;  %v395_v28 = vld [vmem:[#allocation6 + $0x18] sm:$0xff]  ;;  %v402_v30 = vld [vmem:[#allocation6 + $0x50] sm:$0xff] }
  0x4d   :  { %11218 = vmatprep.subr.bf16.mxu1 %v11217_v38  ;;  %v14378_v25 = vpack.c.bf16 %v396_v24, %v393_v23  ;;  %v392_v27 = vld [vmem:[#allocation6] sm:$0xff]  ;;  %v399_v29 = vld [vmem:[#allocation6 + $0x38] sm:$0xff]  ;;  %v394_v31 = vld [vmem:[#allocation6 + $0x10] sm:$0xff] }
  0x4e   :  { %v397_v32 = vld [vmem:[#allocation6 + $0x28] sm:$0xff]  ;;  %v14382_v33 = vpack.c.bf16 %v395_v28, %v392_v27  ;;  %v14384_v35 = vpack.c.bf16 %v402_v30, %v399_v29  ;;  %v398_v36 = vld [vmem:[#allocation6 + $0x30] sm:$0xff]  ;;  %v400_v42 = vld [vmem:[#allocation6 + $0x40] sm:$0xff] }
  0x4f   :  { %v401_v37 = vld [vmem:[#allocation6 + $0x48] sm:$0xff]  ;;  %v14386_v41 = vpack.c.bf16 %v397_v32, %v394_v31  ;;  %v403_v43 = vld [vmem:[#allocation6 + $0x58] sm:$0xff]  ;;  %v414_v49 = vld [vmem:[#allocation6 + $0xb0] sm:$0xff] }
  0x50   :  { %11220 = vmatpush1.bf16.msra.mxu1 %v11219_v40  ;;  %v405_v39 = vld [vmem:[#allocation6 + $0x68] sm:$0xff]  ;;  %v408_v40 = vld [vmem:[#allocation6 + $0x80] sm:$0xff]  ;;  %v407_v47 = vld [vmem:[#allocation6 + $0x78] sm:$0xff] }
  0x51   :  { %11222 = vmatprep.subr.bf16.mxu1 %v11221_v44  ;;  %v14389_v44 = vpack.c.bf16 %v401_v37, %v398_v36  ;;  %v14393_v45 = vpack.c.bf16 %v408_v40, %v405_v39  ;;  %v411_v48 = vld [vmem:[#allocation6 + $0x98] sm:$0xff]  ;;  %v406_v51 = vld [vmem:[#allocation6 + $0x70] sm:$0xff]  ;;  %v417_v57 = vld [vmem:[#allocation6 + $0xc8] sm:$0xff] }
  0x52   :  { %v14406_v54 = vpack.c.bf16 %v414_v49, %v411_v48  ;;  %v410_v55 = vld [vmem:[#allocation6 + $0x90] sm:$0xff]  ;;  %v415_v63 = vld [vmem:[#allocation6 + $0xb8] sm:$0xff]  ;;  %v421_v9 = vld [vmem:[#allocation6 + $0xe8] sm:$0xff] }
  0x53   :  { %v423_v4 = vld [vmem:[#allocation6 + $0xf8] sm:$0xff]  ;;  %v426_v5 = vld [vmem:[#allocation6 + $0x110] sm:$0xff]  ;;  %v429_v14 = vld [vmem:[#allocation6 + $0x128] sm:$0xff] }
  0x54   :  { %11224 = vmatpush1.bf16.msra.mxu1 %v11223_v46  ;;  %v404_v46 = vld [vmem:[#allocation6 + $0x60] sm:$0xff]  ;;  %v418_v8 = vld [vmem:[#allocation6 + $0xd0] sm:$0xff]  ;;  %v14426_v11 = vpack.c.bf16 %v426_v5, %v423_v4  ;;  %v435_v23 = vld [vmem:[#allocation6 + $0x158] sm:$0xff] }
  0x55   :  { %11226 = vmatprep.subr.bf16.mxu1 %v11225_v50  ;;  %v14396_v50 = vpack.c.bf16 %v403_v43, %v400_v42  ;;  %v14402_v53 = vpack.c.bf16 %v407_v47, %v404_v46  ;;  %v422_v12 = vld [vmem:[#allocation6 + $0xf0] sm:$0xff]  ;;  %v432_v15 = vld [vmem:[#allocation6 + $0x140] sm:$0xff]  ;;  %v433_v29 = vld [vmem:[#allocation6 + $0x148] sm:$0xff]  ;;  %v14502_v42 = vshrl.u32 %v77_v59, 7 }
  0x56   :  { %v14436_v20 = vpack.c.bf16 %v432_v15, %v429_v14  ;;  %v428_v21 = vld [vmem:[#allocation6 + $0x120] sm:$0xff]  ;;  %v438_v24 = vld [vmem:[#allocation6 + $0x170] sm:$0xff] }
  0x57   :  { %v430_v28 = vld [vmem:[#allocation6 + $0x130] sm:$0xff]  ;;  %v14446_v31 = vpack.c.bf16 %v438_v24, %v435_v23  ;;  %v436_v37 = vld [vmem:[#allocation6 + $0x160] sm:$0xff]  ;;  %v14505_v43 = vsub.s32 2, %v14502_v42  ;;  %v14512_v48 = vsub.s32 0, %v14502_v42  ;;  %v14515_v49 = vsub.s32 1, %v14502_v42 }
  0x58   :  { %11228 = vmatpush1.bf16.msra.mxu1 %v11227_v52  ;;  %v409_v52 = vld [vmem:[#allocation6 + $0x88] sm:$0xff]  ;;  %v434_v32 = vld [vmem:[#allocation6 + $0x150] sm:$0xff]  ;;  %v14449_v36 = vpack.c.bf16 %v433_v29, %v430_v28  ;;  %v440_v4 = vld [vmem:[#allocation8] sm:$0x7] }
  0x59   :  { %11230 = vmatprep.subr.bf16.mxu1 %v11229_v56  ;;  %v413_v56 = vld [vmem:[#allocation6 + $0xa8] sm:$0xff]  ;;  %v14526_v5 = vrot.slane %v440_v4, %v14512_v48 }
  0x5a   :  { %v14413_v0 = vpack.c.bf16 %v413_v56, %v410_v55  ;;  %v223_v46 = vld [vmem:[%s16766_s4] sm:$0x7] }
  0x5b   :  { %v236_v47 = vrot.slane %v223_v46, %v14505_v43 }
  0x5c   :  { %11232 = vmatpush1.bf16.msra.mxu1 %v11231_v58  ;;  %v420_v58 = vld [vmem:[#allocation6 + $0xe0] sm:$0xff] }
  0x5d   :  { %11266 = vmatprep.subr.bf16.mxu1 %v14378_v25 }
  0xbb   :  { %v81_v61 = vpop.permute.xlu0 %80 }
  0xbc   :  { %vm85_vm1 = vcmp.eq.s32.totalorder %v81_v61, %v14371_v60  ;;  %v14409_v61 = vpack.c.bf16 %v409_v52, %v406_v51 }
  0xbd   :  { %v8742_v62 = vsel %vm85_vm1, 1.0, %v14255_v7 }
  0xbe   :  { %9619 = vmatprep.mubr.msk.f32.mxu0 %vm93_vm0, %v8742_v62  ;;  %v412_v62 = vld [vmem:[#allocation6 + $0xa0] sm:$0xff] }
  0xbf   :  { %v84_v1 = vpop.permute.xlu0 %83 }
  0xc0   :  { %vm86_vm2 = vcmp.eq.s32.totalorder %v84_v1, %v14371_v60  ;;  %v14416_v1 = vpack.c.bf16 %v420_v58, %v417_v57  ;;  %v228_v57 = vrot.slane %v223_v46, %v14512_v48  ;;  %v232_v58 = vrot.slane %v223_v46, %v14515_v49 }
  0xc1   :  { %v8743_v3 = vsel %vm86_vm2, 1.0, %v14255_v7 }
  0xc2   :  { %9620 = vmatmul.mubr.msk.f32.vlgmr.msra.gmra.mrb[0].mxu0 %vm93_vm0, %v8743_v3  ;;  %v419_v3 = vld [vmem:[#allocation6 + $0xd8] sm:$0xff] }
  0xc3   :  { %11236 = vmatpush3.bf16.msra.mxu0 %v14367_v16  ;;  %v11257_v16 = vpack.c.bf16 %v216_v19, %v213_v18  ;;  %v424_v18 = vld [vmem:[#allocation6 + $0x100] sm:$0xff]  ;;  %v427_v19 = vld [vmem:[#allocation6 + $0x118] sm:$0xff] }
  0xc4   :  { %11238 = vmatprep.subr.bf16.mxu0 %v11237_v2  ;;  %v14439_v27 = vpack.c.bf16 %v427_v19, %v424_v18 }
  0xc7   :  { %11240 = vmatpush3.bf16.msra.mxu0 %v11237_v2  ;;  %v416_v2 = vld [vmem:[#allocation6 + $0xc0] sm:$0xff] }
  0xc8   :  { %11242 = vmatprep.subr.bf16.mxu0 %v11241_v6 }
  0xcb   :  { %11244 = vmatpush3.bf16.msra.mxu0 %v11241_v6  ;;  %v14419_v6 = vpack.c.bf16 %v415_v63, %v412_v62 }
  0xcc   :  { %11246 = vmatprep.subr.bf16.mxu0 %v11245_v10 }
  0xcf   :  { %11248 = vmatpush3.bf16.msra.mxu0 %v11245_v10  ;;  %v14423_v10 = vpack.c.bf16 %v419_v3, %v416_v2 }
  0xd0   :  { %11250 = vmatprep.subr.bf16.mxu0 %v11249_v13 }
  0xd3   :  { %11252 = vmatpush3.bf16.msra.mxu0 %v11249_v13  ;;  %v425_v13 = vld [vmem:[#allocation6 + $0x108] sm:$0xff] }
  0xd4   :  { %11254 = vmatprep.subr.bf16.mxu0 %v11253_v17 }
  0xd7   :  { %11256 = vmatpush3.bf16.msra.mxu0 %v11253_v17  ;;  %v14429_v17 = vpack.c.bf16 %v421_v9, %v418_v8  ;;  %v14529_v8 = vrot.slane %v440_v4, %v14515_v49 }
  0xd8   :  { %11258 = vmatprep.subr.bf16.mxu0 %v11257_v16 }
  0xdb   :  { %11260 = vmatpush3.bf16.msra.mxu0 %v11257_v16  ;;  %v14433_v16 = vpack.c.bf16 %v425_v13, %v422_v12 }
  0xdc   :  { %11262 = vmatprep.subr.bf16.mxu0 %v11261_v22 }
  0xdf   :  { %11264 = vmatpush3.bf16.msra.mxu0 %v11261_v22  ;;  %v431_v22 = vld [vmem:[#allocation6 + $0x138] sm:$0xff] }
  0xe0   :  { %11297 = vmatprep.subr.bf16.mxu0 %v14256_v26  ;;  %v14443_v30 = vpack.c.bf16 %v431_v22, %v428_v21 }
 0x195   :  { %v9621_v34 = vpop.f32.mrb[0].mxu0 }
 0x196   :  { %v166_v38 = vpop.f32.mrb[1].mxu0 }
 0x197   :  { %305 = vmatmul.mubr.f32.vlgmr.msra.gmra.mrb[0].mxu1 %v166_v38  ;;  %9654 = vmatprep.mubr.f32.mxu0 %v166_v38  ;;  %v439_v38 = vld [vmem:[#allocation6 + $0x178] sm:$0xff] }
 0x198   :  { %11268 = vmatpush1.bf16.msra.mxu1 %v14382_v33  ;;  %9655 = vmatmul.mubr.f32.vlgmr.msra.gmra.mrb[2].mxu0 %v9621_v34  ;;  %v14457_v40 = vpack.c.bf16 %v439_v38, %v436_v37 }
 0x199   :  { %310 = vmatprep.mubr.f32.mxu1 %v14255_v7  ;;  %11270 = vmatprep.subr.bf16.mxu1 %v14384_v35 }
 0x19a   :  { %11299 = vmatpush3.bf16.msra.mxu0 %v14386_v41  ;;  %9689 = vmatprep.mubr.msk.f32.mxu0 %vm14257_vm3, %v14255_v7 }
 0x19b   :  { %311 = vmatmul.mubr.f32.gmra.mrb[2].mxu1 %v9621_v34  ;;  %11300 = vmatprep.subr.bf16.mxu0 %v14256_v26  ;;  %v437_v34 = vld [vmem:[#allocation6 + $0x168] sm:$0xff] }
 0x19c   :  { %11272 = vmatpush1.bf16.msra.mxu1 %v14389_v44  ;;  %521 = vmatprep.mubr.f32.mxu1 %v14255_v7  ;;  %v14453_v39 = vpack.c.bf16 %v437_v34, %v434_v32  ;;  %v14540_v34 = vrot.slane %v440_v4, %v14505_v43 }
 0x19d   :  { %11274 = vmatprep.subr.bf16.mxu1 %v14393_v45 }
 0x19e   :  { %11302 = vmatpush3.bf16.msra.mxu0 %v14396_v50 }
 0x19f   :  { %11303 = vmatprep.subr.bf16.mxu0 %v14256_v26 }
 0x1a0   :  { %11276 = vmatpush1.bf16.msra.mxu1 %v14402_v53 }
 0x1a1   :  { %11278 = vmatprep.subr.bf16.mxu1 %v14406_v54 }
 0x1a2   :  { %11305 = vmatpush3.bf16.msra.mxu0 %v14409_v61 }
 0x1a3   :  { %11306 = vmatprep.subr.bf16.mxu0 %v14256_v26 }
 0x1a4   :  { %11280 = vmatpush1.bf16.msra.mxu1 %v14413_v0 }
 0x1a5   :  { %11282 = vmatprep.subr.bf16.mxu1 %v14416_v1 }
 0x1a6   :  { %11308 = vmatpush3.bf16.msra.mxu0 %v14419_v6 }
 0x1a7   :  { %11309 = vmatprep.subr.bf16.mxu0 %v14256_v26 }
 0x1a8   :  { %11284 = vmatpush1.bf16.msra.mxu1 %v14423_v10 }
 0x1a9   :  { %11286 = vmatprep.subr.bf16.mxu1 %v14426_v11 }
 0x1aa   :  { %11311 = vmatpush3.bf16.msra.mxu0 %v14429_v17 }
 0x1ab   :  { %11312 = vmatprep.subr.bf16.mxu0 %v14256_v26 }
 0x1ac   :  { %11288 = vmatpush1.bf16.msra.mxu1 %v14433_v16 }
 0x1ad   :  { %11290 = vmatprep.subr.bf16.mxu1 %v14436_v20 }
 0x1ae   :  { %11314 = vmatpush3.bf16.msra.mxu0 %v14439_v27 }
 0x1af   :  { %11315 = vmatprep.subr.bf16.mxu0 %v14256_v26 }
 0x1b0   :  { %11292 = vmatpush1.bf16.msra.mxu1 %v14443_v30 }
 0x1b1   :  { %11294 = vmatprep.subr.bf16.mxu1 %v14446_v31 }
 0x1b2   :  { %11317 = vmatpush3.bf16.msra.mxu0 %v14449_v36 }
 0x1b3   :  { %11318 = vmatprep.subr.bf16.mxu0 %v14256_v26 }
 0x1b4   :  { %11296 = vmatpush1.bf16.msra.mxu1 %v14453_v39 }
 0x1b5   :  { %11322 = vmatprep.subr.bf16.mxu1 %v14378_v25 }
 0x1b6   :  { %11320 = vmatpush3.bf16.msra.mxu0 %v14457_v40 }
 0x1b7   :  { %522 = vmatmul.mubr.f32.vlgmr.msra.gmra.mrb[4].mxu1 %v14255_v7  ;;  %11353 = vmatprep.subr.bf16.mxu0 %v14256_v26 }
 0x1b8   :  { %11324 = vmatpush1.bf16.msra.mxu1 %v14382_v33  ;;  %684 = vmatprep.mubr.f32.mxu1 %v14255_v7 }
 0x1b9   :  { %9690 = vmatmul.mubr.f32.vlgmr.msra.gmra.mrb[4].mxu0 %v14255_v7  ;;  %11326 = vmatprep.subr.bf16.mxu1 %v14384_v35 }
 0x1ba   :  { %11355 = vmatpush3.bf16.msra.mxu0 %v14386_v41  ;;  %9724 = vmatprep.mubr.msk.f32.mxu0 %vm14257_vm3, %v14255_v7 }
 0x1bb   :  { %11356 = vmatprep.subr.bf16.mxu0 %v14256_v26 }
 0x1bc   :  { %11328 = vmatpush1.bf16.msra.mxu1 %v14389_v44 }
 0x1bd   :  { %11330 = vmatprep.subr.bf16.mxu1 %v14393_v45 }
 0x1be   :  { %11358 = vmatpush3.bf16.msra.mxu0 %v14396_v50 }
 0x1bf   :  { %11359 = vmatprep.subr.bf16.mxu0 %v14256_v26 }
 0x1c0   :  { %11332 = vmatpush1.bf16.msra.mxu1 %v14402_v53 }
 0x1c1   :  { %11334 = vmatprep.subr.bf16.mxu1 %v14406_v54 }
 0x1c2   :  { %11361 = vmatpush3.bf16.msra.mxu0 %v14409_v61 }
 0x1c3   :  { %11362 = vmatprep.subr.bf16.mxu0 %v14256_v26 }
 0x1c4   :  { %11336 = vmatpush1.bf16.msra.mxu1 %v14413_v0 }
 0x1c5   :  { %11338 = vmatprep.subr.bf16.mxu1 %v14416_v1 }
 0x1c6   :  { %11364 = vmatpush3.bf16.msra.mxu0 %v14419_v6 }
 0x1c7   :  { %11365 = vmatprep.subr.bf16.mxu0 %v14256_v26 }
 0x1c8   :  { %11340 = vmatpush1.bf16.msra.mxu1 %v14423_v10 }
 0x1c9   :  { %11342 = vmatprep.subr.bf16.mxu1 %v14426_v11 }
 0x1ca   :  { %11367 = vmatpush3.bf16.msra.mxu0 %v14429_v17 }
 0x1cb   :  { %11368 = vmatprep.subr.bf16.mxu0 %v14256_v26 }
 0x1cc   :  { %11344 = vmatpush1.bf16.msra.mxu1 %v14433_v16 }
 0x1cd   :  { %11346 = vmatprep.subr.bf16.mxu1 %v14436_v20 }
 0x1ce   :  { %11370 = vmatpush3.bf16.msra.mxu0 %v14439_v27 }
 0x1cf   :  { %11371 = vmatprep.subr.bf16.mxu0 %v14256_v26 }
 0x1d0   :  { %11348 = vmatpush1.bf16.msra.mxu1 %v14443_v30 }
 0x1d1   :  { %11350 = vmatprep.subr.bf16.mxu1 %v14446_v31 }
 0x1d2   :  { %11373 = vmatpush3.bf16.msra.mxu0 %v14449_v36 }
 0x1d3   :  { %11374 = vmatprep.subr.bf16.mxu0 %v14256_v26 }
 0x1d4   :  { %11352 = vmatpush1.bf16.msra.mxu1 %v14453_v39 }
 0x1d5   :  { %11378 = vmatprep.subr.bf16.mxu1 %v14378_v25 }
 0x1d6   :  { %11376 = vmatpush3.bf16.msra.mxu0 %v14457_v40 }
 0x1d7   :  { %11409 = vmatprep.subr.bf16.mxu0 %v14256_v26 }
 0x26a   :  { %v306_v51 = vpop.f32.mrb[0].mxu1 }
 0x26b   :  { %v308_v52 = vpop.f32.mrb[1].mxu1  ;;  %v9656_v55 = vpop.f32.mrb[2].mxu0  ;;  %v14531_v12 = vadd.f32 %v306_v51, %v228_v57 }
 0x26c   :  { %v14517_v59 = vadd.f32 %v9656_v55, %v236_v47  ;;  %v383_v56 = vpop.f32.mrb[3].mxu0  ;;  %v14536_v22 = vadd.f32 %v308_v52, %v232_v58 }
 0x26d   :  { %v14543_v55 = vadd.f32 %v383_v56, %v236_v47 }
 0x26e   :  { %v312_v62 = vpop.f32.mrb[2].mxu1 }
 0x26f   :  { %v14521_v63 = vadd.f32 %v312_v62, %v228_v57  ;;  %v314_v2 = vpop.f32.mrb[3].mxu1 }
 0x270   :  { %v14523_v3 = vadd.f32 %v314_v2, %v232_v58 }
 0x28a   :  { %v523_v9 = vpop.f32.mrb[4].mxu1 }
 0x28b   :  { %v524_v13 = vadd.f32 %v523_v9, %v14526_v5  ;;  %v525_v14 = vpop.f32.mrb[5].mxu1 }
 0x28c   :  { %v526_v15 = vadd.f32 %v525_v14, %v14529_v8  ;;  %v594_v18 = vpop.f32.mrb[4].mxu0 }
 0x28d   :  { %v598_v19 = vadd.f32 %v524_v13, %v14531_v12  ;;  %v9691_v21 = vpop.f32.mrb[5].mxu0  ;;  %v595_v46 = vadd.f32 %v594_v18, %v14540_v34 }
 0x28e   :  { %v605_v24 = vadd.f32 %v526_v15, %v14536_v22 }
 0x28f   :  { %v8746_v23 = vmul.f32 -1.442695, %v598_v19 }
 0x290   :  { %v8747_v28 = vmul.f32 -1.442695, %v605_v24 }
 0x291   :  { %13773 = vpow2.f32 %v8746_v23 }
 0x292   :  { %13775 = vpow2.f32 %v8747_v28 }
 0x29b   :  { %v13774_v29 = vpop.eup %13773 }
 0x29c   :  { %v602_v32 = vadd.f32 1.0, %v13774_v29  ;;  %v13776_v37 = vpop.eup %13775 }
 0x29d   :  { %v609_v38 = vadd.f32 1.0, %v13776_v37 }
 0x29e   :  { %13777 = vrcp.f32 %v602_v32 }
 0x29f   :  { %13779 = vrcp.f32 %v609_v38 }
 0x2a8   :  { %v13778_v51 = vpop.eup %13777 }
 0x2a9   :  { %v612_v52 = vmul.f32 %v13778_v51, %v595_v46  ;;  %v13780_v58 = vpop.eup %13779 }
 0x2aa   :  { %v615_v62 = vsub.f32 1.0, %v13780_v58  ;;  %v617_v13 = vmul.f32 0.0, %v13780_v58 }
 0x2ab   :  { %v613_v57 = vadd.f32 %v612_v52, %v14543_v55 }
 0x2ad   :  { %13781 = vtanh.f32 %v613_v57 }
 0x2b7   :  { %v13782_v2 = vpop.eup %13781 }
 0x2b8   :  { %v616_v9 = vmul.f32 %v13782_v2, %v615_v62 }
 0x2ba   :  { %v14546_v14 = vadd.f32 %v617_v13, %v616_v9 }
 0x2bc   :  { %619 = vst [vmem:[#allocation2] sm:$0x3] %v14546_v14  ;;  %685 = vmatmul.mubr.f32.vlgmr.msra.gmra.mrb[6].mxu1 %v14546_v14  ;;  %9725 = vmatmul.mubr.f32.vlgmr.msra.gmra.mrb[6].mxu0 %v14546_v14  ;;  %v790_v62 = vrot.slane %v14546_v14, 6 }
 0x2bd   :  { %11380 = vmatpush1.bf16.msra.mxu1 %v14382_v33  ;;  %11411 = vmatpush3.bf16.msra.mxu0 %v14386_v41 }
 0x2be   :  { %11382 = vmatprep.subr.bf16.mxu1 %v14384_v35  ;;  %11412 = vmatprep.subr.bf16.mxu0 %v14256_v26 }
 0x2bf   :  { %862 = vmatprep.mubr.f32.mxu1 %v14255_v7  ;;  %9759 = vmatprep.mubr.msk.f32.mxu0 %vm14257_vm3, %v14255_v7 }
 0x2c1   :  { %11384 = vmatpush1.bf16.msra.mxu1 %v14389_v44  ;;  %11414 = vmatpush3.bf16.msra.mxu0 %v14396_v50 }
 0x2c2   :  { %11386 = vmatprep.subr.bf16.mxu1 %v14393_v45  ;;  %11415 = vmatprep.subr.bf16.mxu0 %v14256_v26 }
 0x2c5   :  { %11388 = vmatpush1.bf16.msra.mxu1 %v14402_v53  ;;  %11417 = vmatpush3.bf16.msra.mxu0 %v14409_v61 }
 0x2c6   :  { %11390 = vmatprep.subr.bf16.mxu1 %v14406_v54  ;;  %11418 = vmatprep.subr.bf16.mxu0 %v14256_v26 }
 0x2c9   :  { %11392 = vmatpush1.bf16.msra.mxu1 %v14413_v0  ;;  %11420 = vmatpush3.bf16.msra.mxu0 %v14419_v6 }
 0x2ca   :  { %11394 = vmatprep.subr.bf16.mxu1 %v14416_v1  ;;  %11421 = vmatprep.subr.bf16.mxu0 %v14256_v26 }
 0x2cd   :  { %11396 = vmatpush1.bf16.msra.mxu1 %v14423_v10  ;;  %11423 = vmatpush3.bf16.msra.mxu0 %v14429_v17 }
 0x2ce   :  { %11398 = vmatprep.subr.bf16.mxu1 %v14426_v11  ;;  %11424 = vmatprep.subr.bf16.mxu0 %v14256_v26 }
 0x2d1   :  { %11400 = vmatpush1.bf16.msra.mxu1 %v14433_v16  ;;  %11426 = vmatpush3.bf16.msra.mxu0 %v14439_v27 }
 0x2d2   :  { %11402 = vmatprep.subr.bf16.mxu1 %v14436_v20  ;;  %11427 = vmatprep.subr.bf16.mxu0 %v14256_v26 }
 0x2d5   :  { %11404 = vmatpush1.bf16.msra.mxu1 %v14443_v30  ;;  %11429 = vmatpush3.bf16.msra.mxu0 %v14449_v36 }
 0x2d6   :  { %11406 = vmatprep.subr.bf16.mxu1 %v14446_v31  ;;  %11430 = vmatprep.subr.bf16.mxu0 %v14256_v26 }
 0x2d9   :  { %11408 = vmatpush1.bf16.msra.mxu1 %v14453_v39  ;;  %11432 = vmatpush3.bf16.msra.mxu0 %v14457_v40 }
 0x2da   :  { %11434 = vmatprep.subr.bf16.mxu1 %v14378_v25  ;;  %11465 = vmatprep.subr.bf16.mxu0 %v14256_v26 }
 0x38f   :  { %v686_v47 = vpop.f32.mrb[6].mxu1  ;;  %v757_v56 = vpop.f32.mrb[6].mxu0 }
 0x390   :  { %v687_v4 = vadd.f32 %v686_v47, %v14526_v5  ;;  %v688_v15 = vpop.f32.mrb[7].mxu1  ;;  %v9726_v18 = vpop.f32.mrb[7].mxu0  ;;  %v758_v52 = vadd.f32 %v757_v56, %v14540_v34 }
 0x391   :  { %v689_v19 = vadd.f32 %v688_v15, %v14529_v8 }
 0x392   :  { %v762_v21 = vrot.slane %v687_v4, 6  ;;  %v782_v57 = vrot.slane %v758_v52, 6 }
 0x393   :  { %v772_v23 = vrot.slane %v689_v19, 6 }
 0x394   :  { %v764_v24 = vadd.f32 %v762_v21, %v14531_v12 }
 0x395   :  { %v774_v28 = vadd.f32 %v772_v23, %v14536_v22 }
 0x396   :  { %v8748_v29 = vmul.f32 -1.442695, %v764_v24 }
 0x397   :  { %v8749_v32 = vmul.f32 -1.442695, %v774_v28 }
 0x398   :  { %13783 = vpow2.f32 %v8748_v29 }
 0x399   :  { %13785 = vpow2.f32 %v8749_v32 }
 0x3a2   :  { %v13784_v37 = vpop.eup %13783 }
 0x3a3   :  { %v13786_v38 = vpop.eup %13785  ;;  %v768_v46 = vadd.f32 1.0, %v13784_v37 }
 0x3a4   :  { %v778_v51 = vadd.f32 1.0, %v13786_v38 }
 0x3a5   :  { %13787 = vrcp.f32 %v768_v46 }
 0x3a6   :  { %13789 = vrcp.f32 %v778_v51 }
 0x3af   :  { %v13788_v58 = vpop.eup %13787 }
 0x3b0   :  { %v13790_v2 = vpop.eup %13789  ;;  %v784_v9 = vmul.f32 %v13788_v58, %v782_v57 }
 0x3b1   :  { %v792_v13 = vmul.f32 %v13790_v2, %v790_v62  ;;  %v787_v4 = vsub.f32 1.0, %v13790_v2 }
 0x3b2   :  { %v785_v47 = vadd.f32 %v784_v9, %v14543_v55 }
 0x3b4   :  { %13791 = vtanh.f32 %v785_v47 }
 0x3be   :  { %v13792_v15 = vpop.eup %13791 }
 0x3bf   :  { %v788_v18 = vmul.f32 %v13792_v15, %v787_v4 }
 0x3c1   :  { %v14593_v19 = vadd.f32 %v792_v13, %v788_v18 }
 0x3c3   :  { %794 = vst [vmem:[#allocation2] sm:$0xc] %v14593_v19  ;;  %v796_v21 = vrot.slane %v14593_v19, 2  ;;  %v967_v4 = vrot.slane %v14593_v19, 6 }
 0x3c5   :  { %863 = vmatmul.mubr.f32.vlgmr.msra.gmra.mrb[8].mxu1 %v796_v21  ;;  %9760 = vmatmul.mubr.f32.vlgmr.msra.gmra.mrb[8].mxu0 %v796_v21 }
 0x3c6   :  { %11436 = vmatpush1.bf16.msra.mxu1 %v14382_v33  ;;  %11467 = vmatpush3.bf16.msra.mxu0 %v14386_v41 }
 0x3c7   :  { %11438 = vmatprep.subr.bf16.mxu1 %v14384_v35  ;;  %11468 = vmatprep.subr.bf16.mxu0 %v14256_v26 }
 0x3c8   :  { %1039 = vmatprep.mubr.f32.mxu1 %v14255_v7  ;;  %9794 = vmatprep.mubr.msk.f32.mxu0 %vm14257_vm3, %v14255_v7 }
 0x3ca   :  { %11440 = vmatpush1.bf16.msra.mxu1 %v14389_v44  ;;  %11470 = vmatpush3.bf16.msra.mxu0 %v14396_v50 }
 0x3cb   :  { %11442 = vmatprep.subr.bf16.mxu1 %v14393_v45  ;;  %11471 = vmatprep.subr.bf16.mxu0 %v14256_v26 }
 0x3ce   :  { %11444 = vmatpush1.bf16.msra.mxu1 %v14402_v53  ;;  %11473 = vmatpush3.bf16.msra.mxu0 %v14409_v61 }
 0x3cf   :  { %11446 = vmatprep.subr.bf16.mxu1 %v14406_v54  ;;  %11474 = vmatprep.subr.bf16.mxu0 %v14256_v26 }
 0x3d2   :  { %11448 = vmatpush1.bf16.msra.mxu1 %v14413_v0  ;;  %11476 = vmatpush3.bf16.msra.mxu0 %v14419_v6 }
 0x3d3   :  { %11450 = vmatprep.subr.bf16.mxu1 %v14416_v1  ;;  %11477 = vmatprep.subr.bf16.mxu0 %v14256_v26 }
 0x3d6   :  { %11452 = vmatpush1.bf16.msra.mxu1 %v14423_v10  ;;  %11479 = vmatpush3.bf16.msra.mxu0 %v14429_v17 }
 0x3d7   :  { %11454 = vmatprep.subr.bf16.mxu1 %v14426_v11  ;;  %11480 = vmatprep.subr.bf16.mxu0 %v14256_v26 }
 0x3da   :  { %11456 = vmatpush1.bf16.msra.mxu1 %v14433_v16  ;;  %11482 = vmatpush3.bf16.msra.mxu0 %v14439_v27 }
 0x3db   :  { %11458 = vmatprep.subr.bf16.mxu1 %v14436_v20  ;;  %11483 = vmatprep.subr.bf16.mxu0 %v14256_v26 }
 0x3de   :  { %11460 = vmatpush1.bf16.msra.mxu1 %v14443_v30  ;;  %11485 = vmatpush3.bf16.msra.mxu0 %v14449_v36 }
 0x3df   :  { %11462 = vmatprep.subr.bf16.mxu1 %v14446_v31  ;;  %11486 = vmatprep.subr.bf16.mxu0 %v14256_v26 }
 0x3e2   :  { %11464 = vmatpush1.bf16.msra.mxu1 %v14453_v39  ;;  %11488 = vmatpush3.bf16.msra.mxu0 %v14457_v40 }
 0x3e3   :  { %11490 = vmatprep.subr.bf16.mxu1 %v14378_v25  ;;  %11521 = vmatprep.subr.bf16.mxu0 %v14256_v26 }
 0x498   :  { %v864_v14 = vpop.f32.mrb[8].mxu1  ;;  %v935_v56 = vpop.f32.mrb[8].mxu0 }
 0x499   :  { %v865_v23 = vadd.f32 %v864_v14, %v14526_v5  ;;  %v866_v24 = vpop.f32.mrb[9].mxu1  ;;  %v9761_v28 = vpop.f32.mrb[9].mxu0  ;;  %v936_v9 = vadd.f32 %v935_v56, %v14540_v34 }
 0x49a   :  { %v867_v29 = vadd.f32 %v866_v24, %v14529_v8 }
 0x49b   :  { %v940_v32 = vrot.slane %v865_v23, 4  ;;  %v960_v13 = vrot.slane %v936_v9, 4 }
 0x49c   :  { %v950_v37 = vrot.slane %v867_v29, 4 }
 0x49d   :  { %v942_v38 = vadd.f32 %v940_v32, %v14531_v12 }
 0x49e   :  { %v952_v46 = vadd.f32 %v950_v37, %v14536_v22 }
 0x49f   :  { %v8750_v51 = vmul.f32 -1.442695, %v942_v38 }
 0x4a0   :  { %v8751_v52 = vmul.f32 -1.442695, %v952_v46 }
 0x4a1   :  { %13793 = vpow2.f32 %v8750_v51 }
 0x4a2   :  { %13795 = vpow2.f32 %v8751_v52 }
 0x4ab   :  { %v13794_v57 = vpop.eup %13793 }
 0x4ac   :  { %v13796_v58 = vpop.eup %13795  ;;  %v946_v62 = vadd.f32 1.0, %v13794_v57 }
 0x4ad   :  { %v956_v2 = vadd.f32 1.0, %v13796_v58 }
 0x4ae   :  { %13797 = vrcp.f32 %v946_v62 }
 0x4af   :  { %13799 = vrcp.f32 %v956_v2 }
 0x4b8   :  { %v13798_v47 = vpop.eup %13797 }
 0x4b9   :  { %v13800_v15 = vpop.eup %13799  ;;  %v962_v18 = vmul.f32 %v13798_v47, %v960_v13 }
 0x4ba   :  { %v969_v21 = vmul.f32 %v13800_v15, %v967_v4  ;;  %v965_v23 = vsub.f32 1.0, %v13800_v15 }
 0x4bb   :  { %v963_v14 = vadd.f32 %v962_v18, %v14543_v55 }
 0x4bd   :  { %13801 = vtanh.f32 %v963_v14 }
 0x4c7   :  { %v13802_v24 = vpop.eup %13801 }
 0x4c8   :  { %v966_v28 = vmul.f32 %v13802_v24, %v965_v23 }
 0x4ca   :  { %v14639_v29 = vadd.f32 %v969_v21, %v966_v28 }
 0x4cc   :  { %971 = vst [vmem:[#allocation2] sm:$0x30] %v14639_v29  ;;  %v973_v32 = vrot.slane %v14639_v29, 4  ;;  %v1144_v23 = vrot.slane %v14639_v29, 6 }
 0x4ce   :  { %1040 = vmatmul.mubr.f32.vlgmr.msra.gmra.mrb[10].mxu1 %v973_v32  ;;  %9795 = vmatmul.mubr.f32.vlgmr.msra.gmra.mrb[10].mxu0 %v973_v32 }
 0x4cf   :  { %11492 = vmatpush1.bf16.msra.mxu1 %v14382_v33  ;;  %11523 = vmatpush3.bf16.msra.mxu0 %v14386_v41 }
 0x4d0   :  { %11494 = vmatprep.subr.bf16.mxu1 %v14384_v35  ;;  %11524 = vmatprep.subr.bf16.mxu0 %v14256_v26 }
 0x4d1   :  { %1216 = vmatprep.mubr.f32.mxu1 %v14255_v7  ;;  %9829 = vmatprep.mubr.msk.f32.mxu0 %vm14257_vm3, %v14255_v7 }
 0x4d3   :  { %11496 = vmatpush1.bf16.msra.mxu1 %v14389_v44  ;;  %11526 = vmatpush3.bf16.msra.mxu0 %v14396_v50 }
 0x4d4   :  { %11498 = vmatprep.subr.bf16.mxu1 %v14393_v45  ;;  %11527 = vmatprep.subr.bf16.mxu0 %v14256_v26 }
 0x4d7   :  { %11500 = vmatpush1.bf16.msra.mxu1 %v14402_v53  ;;  %11529 = vmatpush3.bf16.msra.mxu0 %v14409_v61 }
 0x4d8   :  { %11502 = vmatprep.subr.bf16.mxu1 %v14406_v54  ;;  %11530 = vmatprep.subr.bf16.mxu0 %v14256_v26 }
 0x4db   :  { %11504 = vmatpush1.bf16.msra.mxu1 %v14413_v0  ;;  %11532 = vmatpush3.bf16.msra.mxu0 %v14419_v6 }
 0x4dc   :  { %11506 = vmatprep.subr.bf16.mxu1 %v14416_v1  ;;  %11533 = vmatprep.subr.bf16.mxu0 %v14256_v26 }
 0x4df   :  { %11508 = vmatpush1.bf16.msra.mxu1 %v14423_v10  ;;  %11535 = vmatpush3.bf16.msra.mxu0 %v14429_v17 }
 0x4e0   :  { %11510 = vmatprep.subr.bf16.mxu1 %v14426_v11  ;;  %11536 = vmatprep.subr.bf16.mxu0 %v14256_v26 }
 0x4e3   :  { %11512 = vmatpush1.bf16.msra.mxu1 %v14433_v16  ;;  %11538 = vmatpush3.bf16.msra.mxu0 %v14439_v27 }
 0x4e4   :  { %11514 = vmatprep.subr.bf16.mxu1 %v14436_v20  ;;  %11539 = vmatprep.subr.bf16.mxu0 %v14256_v26 }
 0x4e7   :  { %11516 = vmatpush1.bf16.msra.mxu1 %v14443_v30  ;;  %11541 = vmatpush3.bf16.msra.mxu0 %v14449_v36 }
 0x4e8   :  { %11518 = vmatprep.subr.bf16.mxu1 %v14446_v31  ;;  %11542 = vmatprep.subr.bf16.mxu0 %v14256_v26 }
 0x4eb   :  { %11520 = vmatpush1.bf16.msra.mxu1 %v14453_v39  ;;  %11544 = vmatpush3.bf16.msra.mxu0 %v14457_v40 }
 0x4ec   :  { %11546 = vmatprep.subr.bf16.mxu1 %v14378_v25  ;;  %11577 = vmatprep.subr.bf16.mxu0 %v14256_v26 }
 0x5a1   :  { %v1041_v19 = vpop.f32.mrb[10].mxu1  ;;  %v1112_v56 = vpop.f32.mrb[10].mxu0 }
 0x5a2   :  { %v1042_v37 = vadd.f32 %v1041_v19, %v14526_v5  ;;  %v1043_v38 = vpop.f32.mrb[11].mxu1  ;;  %v9796_v46 = vpop.f32.mrb[11].mxu0  ;;  %v1113_v18 = vadd.f32 %v1112_v56, %v14540_v34 }
 0x5a3   :  { %v1044_v51 = vadd.f32 %v1043_v38, %v14529_v8 }
 0x5a4   :  { %v1117_v52 = vrot.slane %v1042_v37, 2  ;;  %v1137_v21 = vrot.slane %v1113_v18, 2 }
 0x5a5   :  { %v1127_v57 = vrot.slane %v1044_v51, 2 }
 0x5a6   :  { %v1119_v58 = vadd.f32 %v1117_v52, %v14531_v12 }
 0x5a7   :  { %v1129_v62 = vadd.f32 %v1127_v57, %v14536_v22 }
 0x5a8   :  { %v8752_v2 = vmul.f32 -1.442695, %v1119_v58 }
 0x5a9   :  { %v8753_v9 = vmul.f32 -1.442695, %v1129_v62 }
 0x5aa   :  { %13803 = vpow2.f32 %v8752_v2 }
 0x5ab   :  { %13805 = vpow2.f32 %v8753_v9 }
 0x5b4   :  { %v13804_v13 = vpop.eup %13803 }
 0x5b5   :  { %v13806_v47 = vpop.eup %13805  ;;  %v1123_v4 = vadd.f32 1.0, %v13804_v13 }
 0x5b6   :  { %v1133_v15 = vadd.f32 1.0, %v13806_v47 }
 0x5b7   :  { %13807 = vrcp.f32 %v1123_v4 }
 0x5b8   :  { %13809 = vrcp.f32 %v1133_v15 }
 0x5c1   :  { %v13808_v14 = vpop.eup %13807 }
 0x5c2   :  { %v13810_v24 = vpop.eup %13809  ;;  %v1139_v12 = vmul.f32 %v13808_v14, %v1137_v21 }
 0x5c3   :  { %v1146_v28 = vmul.f32 %v13810_v24, %v1144_v23  ;;  %v1142_v32 = vsub.f32 1.0, %v13810_v24 }
 0x5c4   :  { %v1140_v22 = vadd.f32 %v1139_v12, %v14543_v55 }
 0x5c6   :  { %13811 = vtanh.f32 %v1140_v22 }
 0x5d0   :  { %v13812_v19 = vpop.eup %13811 }
 0x5d1   :  { %v1143_v37 = vmul.f32 %v13812_v19, %v1142_v32 }
 0x5d3   :  { %v1147_v38 = vadd.f32 %v1146_v28, %v1143_v37 }
 0x5d5   :  { %1148 = vst [vmem:[#allocation2] sm:$0xc0] %v1147_v38  ;;  %v14685_v46 = vrot.slane %v1147_v38, 6 }
 0x5d7   :  { %1217 = vmatmul.mubr.f32.vlgmr.msra.gmra.mrb[12].mxu1 %v14685_v46  ;;  %9830 = vmatmul.mubr.f32.vlgmr.msra.gmra.mrb[12].mxu0 %v14685_v46 }
 0x5d8   :  { %11548 = vmatpush1.bf16.msra.mxu1 %v14382_v33  ;;  %11579 = vmatpush3.bf16.msra.mxu0 %v14386_v41 }
 0x5d9   :  { %11550 = vmatprep.subr.bf16.mxu1 %v14384_v35  ;;  %11580 = vmatprep.subr.bf16.mxu0 %v14256_v26 }
 0x5da   :  { %1379 = vmatprep.mubr.f32.mxu1 %v14255_v7  ;;  %9864 = vmatprep.mubr.msk.f32.mxu0 %vm14257_vm3, %v14255_v7 }
 0x5dc   :  { %11552 = vmatpush1.bf16.msra.mxu1 %v14389_v44  ;;  %11582 = vmatpush3.bf16.msra.mxu0 %v14396_v50 }
 0x5dd   :  { %11554 = vmatprep.subr.bf16.mxu1 %v14393_v45  ;;  %11583 = vmatprep.subr.bf16.mxu0 %v14256_v26 }
 0x5e0   :  { %11556 = vmatpush1.bf16.msra.mxu1 %v14402_v53  ;;  %11585 = vmatpush3.bf16.msra.mxu0 %v14409_v61 }
 0x5e1   :  { %11558 = vmatprep.subr.bf16.mxu1 %v14406_v54  ;;  %11586 = vmatprep.subr.bf16.mxu0 %v14256_v26 }
 0x5e4   :  { %11560 = vmatpush1.bf16.msra.mxu1 %v14413_v0  ;;  %11588 = vmatpush3.bf16.msra.mxu0 %v14419_v6 }
 0x5e5   :  { %11562 = vmatprep.subr.bf16.mxu1 %v14416_v1  ;;  %11589 = vmatprep.subr.bf16.mxu0 %v14256_v26 }
 0x5e8   :  { %11564 = vmatpush1.bf16.msra.mxu1 %v14423_v10  ;;  %11591 = vmatpush3.bf16.msra.mxu0 %v14429_v17 }
 0x5e9   :  { %11566 = vmatprep.subr.bf16.mxu1 %v14426_v11  ;;  %11592 = vmatprep.subr.bf16.mxu0 %v14256_v26 }
 0x5ec   :  { %11568 = vmatpush1.bf16.msra.mxu1 %v14433_v16  ;;  %11594 = vmatpush3.bf16.msra.mxu0 %v14439_v27 }
 0x5ed   :  { %11570 = vmatprep.subr.bf16.mxu1 %v14436_v20  ;;  %11595 = vmatprep.subr.bf16.mxu0 %v14256_v26 }
 0x5f0   :  { %11572 = vmatpush1.bf16.msra.mxu1 %v14443_v30  ;;  %11597 = vmatpush3.bf16.msra.mxu0 %v14449_v36 }
 0x5f1   :  { %11574 = vmatprep.subr.bf16.mxu1 %v14446_v31  ;;  %11598 = vmatprep.subr.bf16.mxu0 %v14256_v26 }
 0x5f4   :  { %11576 = vmatpush1.bf16.msra.mxu1 %v14453_v39  ;;  %11600 = vmatpush3.bf16.msra.mxu0 %v14457_v40 }
 0x5f5   :  { %11602 = vmatprep.subr.bf16.mxu1 %v14378_v25  ;;  %11633 = vmatprep.subr.bf16.mxu0 %v14256_v26 }
 0x6aa   :  { %v1218_v55 = vpop.f32.mrb[12].mxu1  ;;  %v1289_v29 = vpop.f32.mrb[12].mxu0 }
 0x6ab   :  { %v1219_v56 = vadd.f32 %v1218_v55, %v14526_v5  ;;  %v1220_v51 = vpop.f32.mrb[13].mxu1  ;;  %v9831_v52 = vpop.f32.mrb[13].mxu0  ;;  %v1290_v18 = vadd.f32 %v1289_v29, %v14540_v34 }
 0x6ac   :  { %v1221_v57 = vadd.f32 %v1220_v51, %v14529_v8 }
 0x6ad   :  { %v1293_v58 = vadd.f32 %v1219_v56, %v14521_v63 }
 0x6ae   :  { %v1300_v2 = vadd.f32 %v1221_v57, %v14523_v3 }
 0x6af   :  { %v8754_v62 = vmul.f32 -1.442695, %v1293_v58 }
 0x6b0   :  { %v8755_v9 = vmul.f32 -1.442695, %v1300_v2 }
 0x6b1   :  { %13813 = vpow2.f32 %v8754_v62 }
 0x6b2   :  { %13815 = vpow2.f32 %v8755_v9 }
 0x6bb   :  { %v13814_v13 = vpop.eup %13813 }
 0x6bc   :  { %v1297_v47 = vadd.f32 1.0, %v13814_v13  ;;  %v13816_v4 = vpop.eup %13815 }
 0x6bd   :  { %v1304_v15 = vadd.f32 1.0, %v13816_v4 }
 0x6be   :  { %13817 = vrcp.f32 %v1297_v47 }
 0x6bf   :  { %13819 = vrcp.f32 %v1304_v15 }
 0x6c8   :  { %v13818_v21 = vpop.eup %13817 }
 0x6c9   :  { %v1307_v14 = vmul.f32 %v13818_v21, %v1290_v18  ;;  %v13820_v24 = vpop.eup %13819 }
 0x6ca   :  { %v1310_v12 = vsub.f32 1.0, %v13820_v24  ;;  %v1312_v32 = vmul.f32 %v13820_v24, %v14685_v46 }
 0x6cb   :  { %v1308_v23 = vadd.f32 %v1307_v14, %v14517_v59 }
 0x6cd   :  { %13821 = vtanh.f32 %v1308_v23 }
 0x6d7   :  { %v13822_v28 = vpop.eup %13821 }
 0x6d8   :  { %v1311_v22 = vmul.f32 %v13822_v28, %v1310_v12 }
 0x6da   :  { %v14731_v19 = vadd.f32 %v1312_v32, %v1311_v22 }
 0x6dc   :  { %1314 = vst [vmem:[#allocation2 + $0x8] sm:$0x3] %v14731_v19  ;;  %1380 = vmatmul.mubr.f32.vlgmr.msra.gmra.mrb[14].mxu1 %v14731_v19  ;;  %9865 = vmatmul.mubr.f32.vlgmr.msra.gmra.mrb[14].mxu0 %v14731_v19  ;;  %v1485_v21 = vrot.slane %v14731_v19, 6 }
 0x6dd   :  { %11604 = vmatpush1.bf16.msra.mxu1 %v14382_v33  ;;  %11635 = vmatpush3.bf16.msra.mxu0 %v14386_v41 }
 0x6de   :  { %11606 = vmatprep.subr.bf16.mxu1 %v14384_v35  ;;  %11636 = vmatprep.subr.bf16.mxu0 %v14256_v26 }
 0x6df   :  { %1557 = vmatprep.mubr.f32.mxu1 %v14255_v7  ;;  %9899 = vmatprep.mubr.msk.f32.mxu0 %vm14257_vm3, %v14255_v7 }
 0x6e1   :  { %11608 = vmatpush1.bf16.msra.mxu1 %v14389_v44  ;;  %11638 = vmatpush3.bf16.msra.mxu0 %v14396_v50 }
 0x6e2   :  { %11610 = vmatprep.subr.bf16.mxu1 %v14393_v45  ;;  %11639 = vmatprep.subr.bf16.mxu0 %v14256_v26 }
 0x6e5   :  { %11612 = vmatpush1.bf16.msra.mxu1 %v14402_v53  ;;  %11641 = vmatpush3.bf16.msra.mxu0 %v14409_v61 }
 0x6e6   :  { %11614 = vmatprep.subr.bf16.mxu1 %v14406_v54  ;;  %11642 = vmatprep.subr.bf16.mxu0 %v14256_v26 }
 0x6e9   :  { %11616 = vmatpush1.bf16.msra.mxu1 %v14413_v0  ;;  %11644 = vmatpush3.bf16.msra.mxu0 %v14419_v6 }
 0x6ea   :  { %11618 = vmatprep.subr.bf16.mxu1 %v14416_v1  ;;  %11645 = vmatprep.subr.bf16.mxu0 %v14256_v26 }
 0x6ed   :  { %11620 = vmatpush1.bf16.msra.mxu1 %v14423_v10  ;;  %11647 = vmatpush3.bf16.msra.mxu0 %v14429_v17 }
 0x6ee   :  { %11622 = vmatprep.subr.bf16.mxu1 %v14426_v11  ;;  %11648 = vmatprep.subr.bf16.mxu0 %v14256_v26 }
 0x6f1   :  { %11624 = vmatpush1.bf16.msra.mxu1 %v14433_v16  ;;  %11650 = vmatpush3.bf16.msra.mxu0 %v14439_v27 }
 0x6f2   :  { %11626 = vmatprep.subr.bf16.mxu1 %v14436_v20  ;;  %11651 = vmatprep.subr.bf16.mxu0 %v14256_v26 }
 0x6f5   :  { %11628 = vmatpush1.bf16.msra.mxu1 %v14443_v30  ;;  %11653 = vmatpush3.bf16.msra.mxu0 %v14449_v36 }
 0x6f6   :  { %11630 = vmatprep.subr.bf16.mxu1 %v14446_v31  ;;  %11654 = vmatprep.subr.bf16.mxu0 %v14256_v26 }
 0x6f9   :  { %11632 = vmatpush1.bf16.msra.mxu1 %v14453_v39  ;;  %11656 = vmatpush3.bf16.msra.mxu0 %v14457_v40 }
 0x6fa   :  { %11658 = vmatprep.subr.bf16.mxu1 %v14378_v25  ;;  %11689 = vmatprep.subr.bf16.mxu0 %v14256_v26 }
 0x7af   :  { %v1381_v37 = vpop.f32.mrb[14].mxu1  ;;  %v1452_v38 = vpop.f32.mrb[14].mxu0 }
 0x7b0   :  { %v1382_v46 = vadd.f32 %v1381_v37, %v14526_v5  ;;  %v1383_v55 = vpop.f32.mrb[15].mxu1  ;;  %v9866_v29 = vpop.f32.mrb[15].mxu0  ;;  %v1453_v4 = vadd.f32 %v1452_v38, %v14540_v34 }
 0x7b1   :  { %v1384_v56 = vadd.f32 %v1383_v55, %v14529_v8 }
 0x7b2   :  { %v1457_v51 = vrot.slane %v1382_v46, 6  ;;  %v1477_v15 = vrot.slane %v1453_v4, 6  ;;  %v1889_v4 = vld [vmem:[#allocation4 + $0x1b0] sm:$0xff] }
 0x7b3   :  { %v1467_v52 = vrot.slane %v1384_v56, 6 }
 0x7b4   :  { %v1459_v57 = vadd.f32 %v1457_v51, %v14521_v63 }
 0x7b5   :  { %v1469_v58 = vadd.f32 %v1467_v52, %v14523_v3 }
 0x7b6   :  { %v8756_v62 = vmul.f32 -1.442695, %v1459_v57  ;;  %v1883_v57 = vld [vmem:[#allocation4 + $0x180] sm:$0xff] }
 0x7b7   :  { %v8757_v2 = vmul.f32 -1.442695, %v1469_v58  ;;  %v1886_v58 = vld [vmem:[#allocation4 + $0x198] sm:$0xff] }
 0x7b8   :  { %13823 = vpow2.f32 %v8756_v62  ;;  %v1890_v62 = vld [vmem:[#allocation4 + $0x1b8] sm:$0xff] }
 0x7b9   :  { %13825 = vpow2.f32 %v8757_v2  ;;  %v1893_v2 = vld [vmem:[#allocation4 + $0x1d0] sm:$0xff] }
 0x7c2   :  { %v13824_v25 = vpop.eup %13823 }
 0x7c3   :  { %v13826_v9 = vpop.eup %13825  ;;  %v1463_v13 = vadd.f32 1.0, %v13824_v25 }
 0x7c4   :  { %v1473_v47 = vadd.f32 1.0, %v13826_v9  ;;  %v11715_v9 = vpack.c.bf16 %v1886_v58, %v1883_v57  ;;  %v1891_v57 = vld [vmem:[#allocation4 + $0x1c0] sm:$0xff]  ;;  %v1894_v58 = vld [vmem:[#allocation4 + $0x1d8] sm:$0xff] }
 0x7c5   :  { %13827 = vrcp.f32 %v1463_v13 }
 0x7c6   :  { %13829 = vrcp.f32 %v1473_v47  ;;  %v11717_v47 = vpack.c.bf16 %v1893_v2, %v1890_v62  ;;  %v11749_v62 = vpack.c.bf16 %v1894_v58, %v1891_v57  ;;  %v2103_v2 = vld [vmem:[#allocation6 + $0x188] sm:$0xff]  ;;  %v2132_v57 = vld [vmem:[#allocation6 + $0x270] sm:$0xff] }
 0x7cf   :  { %v13828_v18 = vpop.eup %13827 }
 0x7d0   :  { %v13830_v14 = vpop.eup %13829  ;;  %v1479_v23 = vmul.f32 %v13828_v18, %v1477_v15  ;;  %v1892_v15 = vld [vmem:[#allocation4 + $0x1c8] sm:$0xff] }
 0x7d1   :  { %v1487_v24 = vmul.f32 %v13830_v14, %v1485_v21  ;;  %v1482_v28 = vsub.f32 1.0, %v13830_v14  ;;  %v1896_v18 = vld [vmem:[#allocation4 + $0x1e8] sm:$0xff]  ;;  %v1899_v21 = vld [vmem:[#allocation4 + $0x200] sm:$0xff] }
 0x7d2   :  { %v1480_v12 = vadd.f32 %v1479_v23, %v14517_v59  ;;  %v1844_v14 = vld [vmem:[#allocation2] sm:$0xff]  ;;  %v11719_v23 = vpack.c.bf16 %v1892_v15, %v1889_v4  ;;  %v2105_v4 = vld [vmem:[#allocation6 + $0x198] sm:$0xff] }
 0x7d4   :  { %13831 = vtanh.f32 %v1480_v12  ;;  %v1895_v12 = vld [vmem:[#allocation4 + $0x1e0] sm:$0xff] }
 0x7de   :  { %v13832_v22 = vpop.eup %13831 }
 0x7df   :  { %v1483_v32 = vmul.f32 %v13832_v22, %v1482_v28  ;;  %v1898_v28 = vld [vmem:[#allocation4 + $0x1f8] sm:$0xff] }
 0x7e0   :  { %v1902_v22 = vld [vmem:[#allocation4 + $0x218] sm:$0xff] }
 0x7e1   :  { %v14778_v37 = vadd.f32 %v1487_v24, %v1483_v32  ;;  %v11721_v24 = vpack.c.bf16 %v1899_v21, %v1896_v18  ;;  %v1905_v32 = vld [vmem:[#allocation4 + $0x230] sm:$0xff]  ;;  %v1900_v21 = vld [vmem:[#allocation4 + $0x208] sm:$0xff] }
 0x7e2   :  { %v1897_v18 = vld [vmem:[#allocation4 + $0x1f0] sm:$0xff] }
 0x7e3   :  { %1489 = vst [vmem:[#allocation2 + $0x8] sm:$0xc] %v14778_v37  ;;  %v1491_v46 = vrot.slane %v14778_v37, 2 }
 0x7e5   :  { %1558 = vmatmul.mubr.f32.vlgmr.msra.gmra.mrb[16].mxu1 %v1491_v46  ;;  %9900 = vmatmul.mubr.f32.vlgmr.msra.gmra.mrb[16].mxu0 %v1491_v46  ;;  %v11725_v46 = vpack.c.bf16 %v1905_v32, %v1902_v22  ;;  %v2111_v22 = vld [vmem:[#allocation6 + $0x1c8] sm:$0xff] }
 0x7e6   :  { %11660 = vmatpush1.bf16.msra.mxu1 %v14382_v33  ;;  %11691 = vmatpush3.bf16.msra.mxu0 %v14386_v41  ;;  %v1884_v33 = vld [vmem:[#allocation4 + $0x188] sm:$0xff] }
 0x7e7   :  { %11662 = vmatprep.subr.bf16.mxu1 %v14384_v35  ;;  %11692 = vmatprep.subr.bf16.mxu0 %v14256_v26  ;;  %v1887_v35 = vld [vmem:[#allocation4 + $0x1a0] sm:$0xff] }
 0x7e8   :  { %1734 = vmatprep.mubr.f32.mxu1 %v14255_v7  ;;  %9934 = vmatprep.mubr.msk.f32.mxu0 %vm14257_vm3, %v14255_v7  ;;  %v11713_v41 = vpack.c.bf16 %v1887_v35, %v1884_v33  ;;  %v1901_v33 = vld [vmem:[#allocation4 + $0x210] sm:$0xff]  ;;  %v1904_v35 = vld [vmem:[#allocation4 + $0x228] sm:$0xff] }
 0x7ea   :  { %11664 = vmatpush1.bf16.msra.mxu1 %v14389_v44  ;;  %11694 = vmatpush3.bf16.msra.mxu0 %v14396_v50 }
 0x7eb   :  { %11666 = vmatprep.subr.bf16.mxu1 %v14393_v45  ;;  %11695 = vmatprep.subr.bf16.mxu0 %v14256_v26 }
 0x7ee   :  { %11668 = vmatpush1.bf16.msra.mxu1 %v14402_v53  ;;  %11697 = vmatpush3.bf16.msra.mxu0 %v14409_v61 }
 0x7ef   :  { %11670 = vmatprep.subr.bf16.mxu1 %v14406_v54  ;;  %11698 = vmatprep.subr.bf16.mxu0 %v14256_v26 }
 0x7f2   :  { %11672 = vmatpush1.bf16.msra.mxu1 %v14413_v0  ;;  %11700 = vmatpush3.bf16.msra.mxu0 %v14419_v6 }
 0x7f3   :  { %11674 = vmatprep.subr.bf16.mxu1 %v14416_v1  ;;  %11701 = vmatprep.subr.bf16.mxu0 %v14256_v26 }
 0x7f6   :  { %11676 = vmatpush1.bf16.msra.mxu1 %v14423_v10  ;;  %11703 = vmatpush3.bf16.msra.mxu0 %v14429_v17 }
 0x7f7   :  { %11678 = vmatprep.subr.bf16.mxu1 %v14426_v11  ;;  %11704 = vmatprep.subr.bf16.mxu0 %v14256_v26 }
 0x7fa   :  { %11680 = vmatpush1.bf16.msra.mxu1 %v14433_v16  ;;  %11706 = vmatpush3.bf16.msra.mxu0 %v14439_v27 }
 0x7fb   :  { %11682 = vmatprep.subr.bf16.mxu1 %v14436_v20  ;;  %11707 = vmatprep.subr.bf16.mxu0 %v14256_v26 }
 0x7fe   :  { %11684 = vmatpush1.bf16.msra.mxu1 %v14443_v30  ;;  %11709 = vmatpush3.bf16.msra.mxu0 %v14449_v36 }
 0x7ff   :  { %11686 = vmatprep.subr.bf16.mxu1 %v14446_v31  ;;  %11710 = vmatprep.subr.bf16.mxu0 %v14256_v26 }
 0x802   :  { %11688 = vmatpush1.bf16.msra.mxu1 %v14453_v39  ;;  %11712 = vmatpush3.bf16.msra.mxu0 %v14457_v40  ;;  %v1662_v40 = vrot.slane %v14778_v37, 6  ;;  %v11723_v37 = vpack.c.bf16 %v1898_v28, %v1895_v12  ;;  %v2108_v28 = vld [vmem:[#allocation6 + $0x1b0] sm:$0xff] }
 0x803   :  { %11714 = vmatprep.subr.bf16.mxu1 %v11713_v41  ;;  %v1908_v41 = vld [vmem:[#allocation4 + $0x248] sm:$0xff]  ;;  %v14836_v32 = vpack.c.bf16 %v2111_v22, %v2108_v28  ;;  %v2145_v22 = vld [vmem:[#allocation6 + $0x2d8] sm:$0xff] }
 0x8b8   :  { %v1559_v44 = vpop.f32.mrb[16].mxu1  ;;  %v1630_v45 = vpop.f32.mrb[16].mxu0 }
 0x8b9   :  { %v1560_v50 = vadd.f32 %v1559_v44, %v14526_v5  ;;  %v1561_v53 = vpop.f32.mrb[17].mxu1  ;;  %v9901_v54 = vpop.f32.mrb[17].mxu0  ;;  %v1631_v31 = vadd.f32 %v1630_v45, %v14540_v34  ;;  %v1911_v44 = vld [vmem:[#allocation4 + $0x260] sm:$0xff]  ;;  %v11727_v45 = vpack.c.bf16 %v1904_v35, %v1901_v33  ;;  %v2115_v33 = vld [vmem:[#allocation6 + $0x1e8] sm:$0xff] }
 0x8ba   :  { %v1562_v61 = vadd.f32 %v1561_v53, %v14529_v8  ;;  %v1907_v53 = vld [vmem:[#allocation4 + $0x240] sm:$0xff]  ;;  %v1910_v54 = vld [vmem:[#allocation4 + $0x258] sm:$0xff] }
 0x8bb   :  { %v1635_v0 = vrot.slane %v1560_v50, 4  ;;  %v1655_v36 = vrot.slane %v1631_v31, 4  ;;  %v11729_v50 = vpack.c.bf16 %v1911_v44, %v1908_v41  ;;  %v1922_v31 = vld [vmem:[#allocation4 + $0x2b8] sm:$0xff]  ;;  %v2118_v41 = vld [vmem:[#allocation6 + $0x200] sm:$0xff] }
 0x8bc   :  { %v1645_v1 = vrot.slane %v1562_v61, 4  ;;  %v1914_v61 = vld [vmem:[#allocation4 + $0x278] sm:$0xff]  ;;  %v2114_v44 = vld [vmem:[#allocation6 + $0x1e0] sm:$0xff] }
 0x8bd   :  { %v1637_v6 = vadd.f32 %v1635_v0, %v14521_v63  ;;  %v1917_v0 = vld [vmem:[#allocation4 + $0x290] sm:$0xff] }
 0x8be   :  { %v1647_v10 = vadd.f32 %v1645_v1, %v14523_v3  ;;  %v11731_v1 = vpack.c.bf16 %v1910_v54, %v1907_v53  ;;  %v1909_v54 = vld [vmem:[#allocation4 + $0x250] sm:$0xff] }
 0x8bf   :  { %v8758_v11 = vmul.f32 -1.442695, %v1637_v6  ;;  %v11733_v6 = vpack.c.bf16 %v1917_v0, %v1914_v61  ;;  %v1912_v61 = vld [vmem:[#allocation4 + $0x268] sm:$0xff]  ;;  %v2121_v0 = vld [vmem:[#allocation6 + $0x218] sm:$0xff] }
 0x8c0   :  { %v8759_v17 = vmul.f32 -1.442695, %v1647_v10  ;;  %v1913_v10 = vld [vmem:[#allocation4 + $0x270] sm:$0xff] }
 0x8c1   :  { %13833 = vpow2.f32 %v8758_v11  ;;  %v1916_v11 = vld [vmem:[#allocation4 + $0x288] sm:$0xff] }
 0x8c2   :  { %13835 = vpow2.f32 %v8759_v17  ;;  %v1920_v17 = vld [vmem:[#allocation4 + $0x2a8] sm:$0xff] }
 0x8cb   :  { %v13834_v16 = vpop.eup %13833 }
 0x8cc   :  { %v13836_v20 = vpop.eup %13835  ;;  %v1641_v27 = vadd.f32 1.0, %v13834_v16  ;;  %v1923_v16 = vld [vmem:[#allocation4 + $0x2c0] sm:$0xff] }
 0x8cd   :  { %v1651_v30 = vadd.f32 1.0, %v13836_v20  ;;  %v11735_v20 = vpack.c.bf16 %v1916_v11, %v1913_v10  ;;  %v2120_v10 = vld [vmem:[#allocation6 + $0x210] sm:$0xff]  ;;  %v2123_v11 = vld [vmem:[#allocation6 + $0x228] sm:$0xff] }
 0x8ce   :  { %13837 = vrcp.f32 %v1641_v27  ;;  %v11737_v27 = vpack.c.bf16 %v1923_v16, %v1920_v17  ;;  %v1915_v16 = vld [vmem:[#allocation4 + $0x280] sm:$0xff] }
 0x8cf   :  { %13839 = vrcp.f32 %v1651_v30  ;;  %v1919_v30 = vld [vmem:[#allocation4 + $0x2a0] sm:$0xff] }
 0x8d8   :  { %v13838_v39 = vpop.eup %13837 }
 0x8d9   :  { %v13840_v19 = vpop.eup %13839  ;;  %v1657_v38 = vmul.f32 %v13838_v39, %v1655_v36  ;;  %v1926_v36 = vld [vmem:[#allocation4 + $0x2d8] sm:$0xff]  ;;  %v1929_v39 = vld [vmem:[#allocation4 + $0x2f0] sm:$0xff] }
 0x8da   :  { %v1664_v55 = vmul.f32 %v13840_v19, %v1662_v40  ;;  %v1660_v56 = vsub.f32 1.0, %v13840_v19  ;;  %v11739_v40 = vpack.c.bf16 %v1922_v31, %v1919_v30  ;;  %v11741_v19 = vpack.c.bf16 %v1929_v39, %v1926_v36  ;;  %v2130_v36 = vld [vmem:[#allocation6 + $0x260] sm:$0xff] }
 0x8db   :  { %v1658_v29 = vadd.f32 %v1657_v38, %v14517_v59  ;;  %v1925_v38 = vld [vmem:[#allocation4 + $0x2d0] sm:$0xff]  ;;  %v14848_v30 = vpack.c.bf16 %v2123_v11, %v2120_v10  ;;  %v2126_v39 = vld [vmem:[#allocation6 + $0x240] sm:$0xff] }
 0x8dd   :  { %13841 = vtanh.f32 %v1658_v29 }
 0x8e7   :  { %v13842_v51 = vpop.eup %13841 }
 0x8e8   :  { %v1661_v52 = vmul.f32 %v13842_v51, %v1660_v56  ;;  %v1885_v56 = vld [vmem:[#allocation4 + $0x190] sm:$0xff]  ;;  %v1888_v51 = vld [vmem:[#allocation4 + $0x1a8] sm:$0xff] }
 0x8ea   :  { %v14822_v25 = vadd.f32 %v1664_v55, %v1661_v52  ;;  %v1928_v55 = vld [vmem:[#allocation4 + $0x2e8] sm:$0xff]  ;;  %v11745_v52 = vpack.c.bf16 %v1888_v51, %v1885_v56  ;;  %v2136_v56 = vld [vmem:[#allocation6 + $0x290] sm:$0xff] }
 0x8eb   :  { %v11743_v29 = vpack.c.bf16 %v1928_v55, %v1925_v38  ;;  %v1921_v38 = vld [vmem:[#allocation4 + $0x2b0] sm:$0xff]  ;;  %v1924_v55 = vld [vmem:[#allocation4 + $0x2c8] sm:$0xff] }
 0x8ec   :  { %1666 = vst [vmem:[#allocation2 + $0x8] sm:$0x30] %v14822_v25  ;;  %v1668_v13 = vrot.slane %v14822_v25, 4  ;;  %11746 = vmatprep.subr.bf16.mxu0 %v11745_v52 }
 0x8ee   :  { %1735 = vmatmul.mubr.f32.vlgmr.msra.gmra.mrb[18].mxu1 %v1668_v13  ;;  %9935 = vmatmul.mubr.f32.vlgmr.msra.gmra.mrb[18].mxu0 %v1668_v13 }
 0x8ef   :  { %11716 = vmatpush1.bf16.msra.mxu1 %v11715_v9  ;;  %9969 = vmatprep.mubr.f32.mxu0 %v1844_v14  ;;  %v2106_v9 = vld [vmem:[#allocation6 + $0x1a0] sm:$0xff] }
 0x8f0   :  { %11718 = vmatprep.subr.bf16.mxu1 %v11717_v47  ;;  %2013 = vmatprep.mubr.f32.mxu1 %v14255_v7  ;;  %v14828_v13 = vpack.c.bf16 %v2106_v9, %v2103_v2  ;;  %v2102_v47 = vld [vmem:[#allocation6 + $0x180] sm:$0xff]  ;;  %v1930_v9 = vld [vmem:[#allocation4 + $0x2f8] sm:$0xff] }
 0x8f1   :  { %11748 = vmatpush3.bf16.msra.mxu0 %v11745_v52  ;;  %v14830_v15 = vpack.c.bf16 %v2105_v4, %v2102_v47  ;;  %v11769_v52 = vpack.c.bf16 %v1924_v55, %v1921_v38  ;;  %v1927_v2 = vld [vmem:[#allocation4 + $0x2e0] sm:$0xff] }
 0x8f2   :  { %11750 = vmatprep.subr.bf16.mxu0 %v11749_v62  ;;  %v11773_v4 = vpack.c.bf16 %v1930_v9, %v1927_v2  ;;  %v1847_v9 = vld [vmem:[%s16769_s7 + $0x2] sm:$0x3] }
 0x8f3   :  { %11720 = vmatpush1.bf16.msra.mxu1 %v11719_v23  ;;  %v2109_v23 = vld [vmem:[#allocation6 + $0x1b8] sm:$0xff] }
 0x8f4   :  { %11722 = vmatprep.subr.bf16.mxu1 %v11721_v24  ;;  %v2112_v24 = vld [vmem:[#allocation6 + $0x1d0] sm:$0xff] }
 0x8f5   :  { %11752 = vmatpush3.bf16.msra.mxu0 %v11749_v62  ;;  %v14834_v12 = vpack.c.bf16 %v2112_v24, %v2109_v23  ;;  %v2135_v62 = vld [vmem:[#allocation6 + $0x288] sm:$0xff]  ;;  %v2138_v23 = vld [vmem:[#allocation6 + $0x2a0] sm:$0xff]  ;;  %v2141_v24 = vld [vmem:[#allocation6 + $0x2b8] sm:$0xff] }
 0x8f6   :  { %v14860_v47 = vpack.c.bf16 %v2135_v62, %v2132_v57  ;;  %v14866_v28 = vpack.c.bf16 %v2141_v24, %v2138_v23  ;;  %v1846_v62 = vld [vmem:[%s16769_s7] sm:$0x3] }
 0x8f7   :  { %11724 = vmatpush1.bf16.msra.mxu1 %v11723_v37  ;;  %v1903_v37 = vld [vmem:[#allocation4 + $0x220] sm:$0xff] }
 0x8f8   :  { %11726 = vmatprep.subr.bf16.mxu1 %v11725_v46  ;;  %v1906_v46 = vld [vmem:[#allocation4 + $0x238] sm:$0xff] }
 0x8f9   :  { %v11757_v35 = vpack.c.bf16 %v1906_v46, %v1903_v37  ;;  %v2148_v37 = vld [vmem:[#allocation6 + $0x2f0] sm:$0xff] }
 0x8fa   :  { %v14871_v46 = vpack.c.bf16 %v2148_v37, %v2145_v22  ;;  %v2104_v22 = vld [vmem:[#allocation6 + $0x190] sm:$0xff]  ;;  %v2107_v37 = vld [vmem:[#allocation6 + $0x1a8] sm:$0xff] }
 0x8fb   :  { %11728 = vmatpush1.bf16.msra.mxu1 %v11727_v45  ;;  %v2117_v45 = vld [vmem:[#allocation6 + $0x1f8] sm:$0xff] }
 0x8fc   :  { %11730 = vmatprep.subr.bf16.mxu1 %v11729_v50  ;;  %v14840_v50 = vpack.c.bf16 %v2118_v41, %v2115_v33  ;;  %v14842_v53 = vpack.c.bf16 %v2117_v45, %v2114_v44  ;;  %v2144_v33 = vld [vmem:[#allocation6 + $0x2d0] sm:$0xff] }
 0x8ff   :  { %11732 = vmatpush1.bf16.msra.mxu1 %v11731_v1  ;;  %v11761_v1 = vpack.c.bf16 %v1912_v61, %v1909_v54 }
 0x900   :  { %11734 = vmatprep.subr.bf16.mxu1 %v11733_v6  ;;  %v2124_v6 = vld [vmem:[#allocation6 + $0x230] sm:$0xff] }
 0x901   :  { %v14845_v17 = vpack.c.bf16 %v2124_v6, %v2121_v0 }
 0x903   :  { %11736 = vmatpush1.bf16.msra.mxu1 %v11735_v20  ;;  %v1918_v20 = vld [vmem:[#allocation4 + $0x298] sm:$0xff] }
 0x904   :  { %11738 = vmatprep.subr.bf16.mxu1 %v11737_v27  ;;  %v2127_v27 = vld [vmem:[#allocation6 + $0x248] sm:$0xff]  ;;  %v11765_v31 = vpack.c.bf16 %v1918_v20, %v1915_v16 }
 0x907   :  { %11740 = vmatpush1.bf16.msra.mxu1 %v11739_v40  ;;  %v14851_v40 = vpack.c.bf16 %v2130_v36, %v2127_v27 }
 0x908   :  { %11742 = vmatprep.subr.bf16.mxu1 %v11741_v19  ;;  %v2129_v19 = vld [vmem:[#allocation6 + $0x258] sm:$0xff] }
 0x909   :  { %v14854_v51 = vpack.c.bf16 %v2129_v19, %v2126_v39 }
 0x90b   :  { %11744 = vmatpush1.bf16.msra.mxu1 %v11743_v29  ;;  %v2133_v29 = vld [vmem:[#allocation6 + $0x278] sm:$0xff] }
 0x90c   :  { %11778 = vmatprep.subr.bf16.mxu1 %v14828_v13  ;;  %v14857_v58 = vpack.c.bf16 %v2136_v56, %v2133_v29 }
 0x90e   :  { %2014 = vmatmul.mubr.f32.vlgmr.msra.gmra.mrb[20].mxu1 %v1844_v14  ;;  %v11753_v14 = vpack.c.bf16 %v1900_v21, %v1897_v18  ;;  %v2139_v18 = vld [vmem:[#allocation6 + $0x2a8] sm:$0xff]  ;;  %v2142_v21 = vld [vmem:[#allocation6 + $0x2c0] sm:$0xff] }
 0x90f   :  { %2019 = vmatprep.mubr.f32.mxu1 %v14255_v7  ;;  %11780 = vmatpush1.bf16.msra.mxu1 %v14830_v15 }
 0x910   :  { %11754 = vmatprep.subr.bf16.mxu0 %v11753_v14  ;;  %11782 = vmatprep.subr.bf16.mxu1 %v14834_v12 }
 0x911   :  { %11756 = vmatpush3.bf16.msra.mxu0 %v11753_v14  ;;  %v14864_v14 = vpack.c.bf16 %v2142_v21, %v2139_v18  ;;  %v1851_v21 = vrot.slane %v1847_v9, 2 }
 0x912   :  { %11758 = vmatprep.subr.bf16.mxu0 %v11757_v35 }
 0x913   :  { %11784 = vmatpush1.bf16.msra.mxu1 %v14836_v32 }
 0x914   :  { %11786 = vmatprep.subr.bf16.mxu1 %v14840_v50 }
 0x915   :  { %11760 = vmatpush3.bf16.msra.mxu0 %v11757_v35  ;;  %v2147_v35 = vld [vmem:[#allocation6 + $0x2e8] sm:$0xff] }
 0x916   :  { %11762 = vmatprep.subr.bf16.mxu0 %v11761_v1  ;;  %v14873_v41 = vpack.c.bf16 %v2147_v35, %v2144_v33  ;;  %v14896_v33 = vpack.c.bf16 %v2107_v37, %v2104_v22 }
 0x917   :  { %11788 = vmatpush1.bf16.msra.mxu1 %v14842_v53 }
 0x918   :  { %11790 = vmatprep.subr.bf16.mxu1 %v14845_v17 }
 0x919   :  { %11764 = vmatpush3.bf16.msra.mxu0 %v11761_v1 }
 0x91a   :  { %11766 = vmatprep.subr.bf16.mxu0 %v11765_v31 }
 0x91b   :  { %11792 = vmatpush1.bf16.msra.mxu1 %v14848_v30 }
 0x91c   :  { %11794 = vmatprep.subr.bf16.mxu1 %v14851_v40 }
 0x91d   :  { %11768 = vmatpush3.bf16.msra.mxu0 %v11765_v31 }
 0x91e   :  { %11770 = vmatprep.subr.bf16.mxu0 %v11769_v52 }
 0x91f   :  { %11796 = vmatpush1.bf16.msra.mxu1 %v14854_v51 }
 0x920   :  { %11798 = vmatprep.subr.bf16.mxu1 %v14857_v58 }
 0x921   :  { %11772 = vmatpush3.bf16.msra.mxu0 %v11769_v52 }
 0x922   :  { %11774 = vmatprep.subr.bf16.mxu0 %v11773_v4 }
 0x923   :  { %11800 = vmatpush1.bf16.msra.mxu1 %v14860_v47 }
 0x924   :  { %11802 = vmatprep.subr.bf16.mxu1 %v14864_v14 }
 0x925   :  { %11776 = vmatpush3.bf16.msra.mxu0 %v11773_v4 }
 0x926   :  { %11809 = vmatprep.subr.bf16.mxu0 %v14256_v26 }
 0x927   :  { %11804 = vmatpush1.bf16.msra.mxu1 %v14866_v28 }
 0x928   :  { %11806 = vmatprep.subr.bf16.mxu1 %v14871_v46 }
 0x92b   :  { %11808 = vmatpush1.bf16.msra.mxu1 %v14873_v41 }
 0x92c   :  { %11834 = vmatprep.subr.bf16.mxu1 %v14828_v13 }
 0x9c1   :  { %v1736_v44 = vpop.f32.mrb[18].mxu1  ;;  %v1807_v45 = vpop.f32.mrb[18].mxu0 }
 0x9c2   :  { %v1737_v54 = vadd.f32 %v1736_v44, %v14526_v5  ;;  %v1738_v61 = vpop.f32.mrb[19].mxu1  ;;  %v9936_v0 = vpop.f32.mrb[19].mxu0  ;;  %v1808_v5 = vadd.f32 %v1807_v45, %v14540_v34  ;;  %v2110_v44 = vld [vmem:[#allocation6 + $0x1c0] sm:$0xff]  ;;  %v2113_v45 = vld [vmem:[#allocation6 + $0x1d8] sm:$0xff] }
 0x9c3   :  { %v1739_v1 = vadd.f32 %v1738_v61, %v14529_v8  ;;  %v14901_v61 = vpack.c.bf16 %v2113_v45, %v2110_v44  ;;  %v2116_v0 = vld [vmem:[#allocation6 + $0x1f0] sm:$0xff] }
 0x9c4   :  { %v1812_v6 = vrot.slane %v1737_v54, 2  ;;  %v1832_v38 = vrot.slane %v1808_v5, 2  ;;  %v2140_v5 = vld [vmem:[#allocation6 + $0x2b0] sm:$0xff] }
 0x9c5   :  { %v1822_v10 = vrot.slane %v1739_v1, 2  ;;  %v2119_v1 = vld [vmem:[#allocation6 + $0x208] sm:$0xff] }
 0x9c6   :  { %v1814_v11 = vadd.f32 %v1812_v6, %v14521_v63  ;;  %v1839_v63 = vrot.slane %v14822_v25, 6  ;;  %v1850_v25 = vrot.slane %v1846_v62, 2  ;;  %v14908_v6 = vpack.c.bf16 %v2119_v1, %v2116_v0  ;;  %v2151_v62 = vld [vmem:[#allocation8 + $0x3] sm:$0x7] }
 0x9c7   :  { %v1824_v16 = vadd.f32 %v1822_v10, %v14523_v3  ;;  %v2122_v10 = vld [vmem:[#allocation6 + $0x220] sm:$0xff] }
 0x9c8   :  { %v8760_v20 = vmul.f32 -1.442695, %v1814_v11  ;;  %v2125_v11 = vld [vmem:[#allocation6 + $0x238] sm:$0xff] }
 0x9c9   :  { %v8761_v27 = vmul.f32 -1.442695, %v1824_v16  ;;  %v14915_v16 = vpack.c.bf16 %v2125_v11, %v2122_v10 }
 0x9ca   :  { %13843 = vpow2.f32 %v8760_v20  ;;  %v2128_v20 = vld [vmem:[#allocation6 + $0x250] sm:$0xff] }
 0x9cb   :  { %13845 = vpow2.f32 %v8761_v27  ;;  %v2131_v27 = vld [vmem:[#allocation6 + $0x268] sm:$0xff] }
 0x9d4   :  { %v13844_v31 = vpop.eup %13843 }
 0x9d5   :  { %v13846_v36 = vpop.eup %13845  ;;  %v1818_v39 = vadd.f32 1.0, %v13844_v31  ;;  %v14921_v31 = vpack.c.bf16 %v2131_v27, %v2128_v20  ;;  %v15004_v27 = vrot.slane %v2151_v62, %v14505_v43 }
 0x9d6   :  { %v1828_v19 = vadd.f32 1.0, %v13846_v36  ;;  %v2134_v36 = vld [vmem:[#allocation6 + $0x280] sm:$0xff] }
 0x9d7   :  { %13847 = vrcp.f32 %v1818_v39  ;;  %v2137_v39 = vld [vmem:[#allocation6 + $0x298] sm:$0xff] }
 0x9d8   :  { %13849 = vrcp.f32 %v1828_v19  ;;  %v14927_v19 = vpack.c.bf16 %v2137_v39, %v2134_v36 }
 0x9e1   :  { %v13848_v8 = vpop.eup %13847  ;;  %v14883_v55 = vpop.f32.mrb[20].mxu1 }
 0x9e2   :  { %v13850_v29 = vpop.eup %13849  ;;  %v1834_v3 = vmul.f32 %v13848_v8, %v1832_v38  ;;  %v14886_v56 = vpop.f32.mrb[21].mxu1  ;;  %v2143_v38 = vld [vmem:[#allocation6 + $0x2c8] sm:$0xff] }
 0x9e3   :  { %v1841_v52 = vmul.f32 %v13850_v29, %v1839_v63  ;;  %v1837_v2 = vsub.f32 1.0, %v13850_v29  ;;  %v14933_v8 = vpack.c.bf16 %v2143_v38, %v2140_v5  ;;  %v2146_v63 = vld [vmem:[#allocation6 + $0x2e0] sm:$0xff]  ;;  %v2149_v29 = vld [vmem:[#allocation6 + $0x2f8] sm:$0xff] }
 0x9e4   :  { %v1835_v57 = vadd.f32 %v1834_v3, %v14517_v59  ;;  %v14939_v3 = vpack.c.bf16 %v2149_v29, %v2146_v63 }
 0x9e6   :  { %13851 = vtanh.f32 %v1835_v57 }
 0x9f0   :  { %v13852_v34 = vpop.eup %13851 }
 0x9f1   :  { %v1838_v4 = vmul.f32 %v13852_v34, %v1837_v2 }
 0x9f3   :  { %v1842_v18 = vadd.f32 %v1841_v52, %v1838_v4  ;;  %v8762_v52 = vld [vmem:[%s16766_s4 + $0x3] sm:$0x7] }
 0x9f4   :  { %v1945_v57 = vrot.slane %v8762_v52, %v14505_v43  ;;  %v14976_v9 = vrot.slane %v8762_v52, %v14512_v48 }
 0x9f5   :  { %v1854_v23 = vmul.f32 %v1850_v25, %v1842_v18  ;;  %1843 = vst [vmem:[#allocation2 + $0x8] sm:$0xc0] %v1842_v18  ;;  %v1855_v24 = vmul.f32 %v1851_v21, %v1842_v18  ;;  %v14983_v21 = vrot.slane %v2151_v62, %v14512_v48 }
 0x9f6   :  { %v14993_v22 = vadd.f32 %v14883_v55, %v14976_v9 }
 0x9f7   :  { %v1857_v59 = vsel %vm1856_vm4, %v1854_v23, 0.0  ;;  %v1860_v35 = vsel %vm1856_vm4, %v1855_v24, 0.0  ;;  %v14986_v23 = vrot.slane %v2151_v62, %v14515_v49 }
 0x9f8   :  { %1858 = vadd.xlane.f32.xlu1 %v1857_v59  ;;  %v14989_v59 = vrot.slane %v8762_v52, %v14515_v49 }
 0x9fc   :  { %v1845_v54 = vld [vmem:[#allocation2 + $0x8] sm:$0xff]  ;;  %1861 = vadd.xlane.f32.xlu1 %v1860_v35 }
 0x9fd   :  { %2020 = vmatmul.mubr.f32.gmra.mrb[22].mxu1 %v1845_v54  ;;  %9970 = vmatmul.mubr.f32.vlgmr.msra.gmra.mrb[20].mxu0 %v1845_v54  ;;  %v15000_v54 = vadd.f32 %v14886_v56, %v14989_v59 }
 0x9fe   :  { %11811 = vmatpush3.bf16.msra.mxu0 %v14896_v33  ;;  %2232 = vmatprep.mubr.f32.mxu1 %v14255_v7 }
 0x9ff   :  { %11812 = vmatprep.subr.bf16.mxu0 %v14256_v26  ;;  %10004 = vmatprep.mubr.msk.f32.mxu0 %vm14257_vm3, %v14255_v7 }
 0xa01   :  { %2233 = vmatmul.mubr.f32.vlgmr.msra.gmra.mrb[24].mxu1 %v14255_v7 }
 0xa02   :  { %11814 = vmatpush3.bf16.msra.mxu0 %v14901_v61  ;;  %11836 = vmatpush1.bf16.msra.mxu1 %v14830_v15 }
 0xa03   :  { %11815 = vmatprep.subr.bf16.mxu0 %v14256_v26  ;;  %11838 = vmatprep.subr.bf16.mxu1 %v14834_v12 }
 0xa04   :  { %2395 = vmatprep.mubr.f32.mxu1 %v14255_v7 }
 0xa06   :  { %11817 = vmatpush3.bf16.msra.mxu0 %v14908_v6  ;;  %11840 = vmatpush1.bf16.msra.mxu1 %v14836_v32 }
 0xa07   :  { %11818 = vmatprep.subr.bf16.mxu0 %v14256_v26  ;;  %11842 = vmatprep.subr.bf16.mxu1 %v14840_v50 }
 0xa0a   :  { %11820 = vmatpush3.bf16.msra.mxu0 %v14915_v16  ;;  %11844 = vmatpush1.bf16.msra.mxu1 %v14842_v53 }
 0xa0b   :  { %11821 = vmatprep.subr.bf16.mxu0 %v14256_v26  ;;  %11846 = vmatprep.subr.bf16.mxu1 %v14845_v17 }
 0xa0e   :  { %11823 = vmatpush3.bf16.msra.mxu0 %v14921_v31  ;;  %11848 = vmatpush1.bf16.msra.mxu1 %v14848_v30 }
 0xa0f   :  { %11824 = vmatprep.subr.bf16.mxu0 %v14256_v26  ;;  %11850 = vmatprep.subr.bf16.mxu1 %v14851_v40 }
 0xa12   :  { %11826 = vmatpush3.bf16.msra.mxu0 %v14927_v19  ;;  %11852 = vmatpush1.bf16.msra.mxu1 %v14854_v51 }
 0xa13   :  { %11827 = vmatprep.subr.bf16.mxu0 %v14256_v26  ;;  %11854 = vmatprep.subr.bf16.mxu1 %v14857_v58 }
 0xa16   :  { %11829 = vmatpush3.bf16.msra.mxu0 %v14933_v8  ;;  %11856 = vmatpush1.bf16.msra.mxu1 %v14860_v47 }
 0xa17   :  { %11830 = vmatprep.subr.bf16.mxu0 %v14256_v26  ;;  %11858 = vmatprep.subr.bf16.mxu1 %v14864_v14 }
 0xa1a   :  { %11832 = vmatpush3.bf16.msra.mxu0 %v14939_v3  ;;  %11860 = vmatpush1.bf16.msra.mxu1 %v14866_v28 }
 0xa1b   :  { %11865 = vmatprep.subr.bf16.mxu0 %v14256_v26  ;;  %11862 = vmatprep.subr.bf16.mxu1 %v14871_v46 }
 0xa1d   :  { %10005 = vmatmul.mubr.f32.vlgmr.msra.gmra.mrb[22].mxu0 %v14255_v7 }
 0xa1e   :  { %11867 = vmatpush3.bf16.msra.mxu0 %v14896_v33  ;;  %11864 = vmatpush1.bf16.msra.mxu1 %v14873_v41 }
 0xa1f   :  { %11868 = vmatprep.subr.bf16.mxu0 %v14256_v26  ;;  %10039 = vmatprep.mubr.msk.f32.mxu0 %vm14257_vm3, %v14255_v7 }
 0xa20   :  { %11890 = vmatprep.subr.bf16.mxu1 %v14828_v13 }
 0xa22   :  { %11870 = vmatpush3.bf16.msra.mxu0 %v14901_v61 }
 0xa23   :  { %11871 = vmatprep.subr.bf16.mxu0 %v14256_v26 }
 0xa26   :  { %11873 = vmatpush3.bf16.msra.mxu0 %v14908_v6 }
 0xa27   :  { %11874 = vmatprep.subr.bf16.mxu0 %v14256_v26 }
 0xa2a   :  { %11876 = vmatpush3.bf16.msra.mxu0 %v14915_v16 }
 0xa2b   :  { %11877 = vmatprep.subr.bf16.mxu0 %v14256_v26 }
 0xa2e   :  { %11879 = vmatpush3.bf16.msra.mxu0 %v14921_v31 }
 0xa2f   :  { %11880 = vmatprep.subr.bf16.mxu0 %v14256_v26 }
 0xa32   :  { %11882 = vmatpush3.bf16.msra.mxu0 %v14927_v19 }
 0xa33   :  { %11883 = vmatprep.subr.bf16.mxu0 %v14256_v26 }
 0xa36   :  { %11885 = vmatpush3.bf16.msra.mxu0 %v14933_v8 }
 0xa37   :  { %11886 = vmatprep.subr.bf16.mxu0 %v14256_v26 }
 0xa3a   :  { %11888 = vmatpush3.bf16.msra.mxu0 %v14939_v3 }
 0xa3b   :  { %11921 = vmatprep.subr.bf16.mxu0 %v14256_v26 }
 0xad0   :  { %v14973_v2 = vpop.f32.mrb[22].mxu1  ;;  %v9971_v34 = vpop.f32.mrb[20].mxu0 }
 0xad1   :  { %v14978_v4 = vadd.f32 %v9971_v34, %v1945_v57  ;;  %v14980_v25 = vpop.f32.mrb[23].mxu1  ;;  %v2092_v18 = vpop.f32.mrb[21].mxu0 }
 0xad2   :  { %v15007_v63 = vadd.f32 %v2092_v18, %v1945_v57 }
 0xad4   :  { %v2234_v24 = vpop.f32.mrb[24].mxu1 }
 0xad5   :  { %v2235_v37 = vadd.f32 %v2234_v24, %v14983_v21  ;;  %v2236_v35 = vpop.f32.mrb[25].mxu1 }
 0xad6   :  { %v2237_v44 = vadd.f32 %v2236_v35, %v14986_v23 }
 0xad7   :  { %v2309_v45 = vadd.f32 %v2235_v37, %v14993_v22 }
 0xad8   :  { %v2316_v1 = vadd.f32 %v2237_v44, %v15000_v54 }
 0xad9   :  { %v8763_v0 = vmul.f32 -1.442695, %v2309_v45 }
 0xada   :  { %v8764_v10 = vmul.f32 -1.442695, %v2316_v1 }
 0xadb   :  { %13853 = vpow2.f32 %v8763_v0 }
 0xadc   :  { %13855 = vpow2.f32 %v8764_v10 }
 0xae5   :  { %v13854_v11 = vpop.eup %13853 }
 0xae6   :  { %v2313_v55 = vadd.f32 1.0, %v13854_v11  ;;  %v13856_v20 = vpop.eup %13855 }
 0xae7   :  { %v2320_v36 = vadd.f32 1.0, %v13856_v20 }
 0xae8   :  { %13857 = vrcp.f32 %v2313_v55 }
 0xae9   :  { %13859 = vrcp.f32 %v2320_v36 }
 0xaf0   :  { %v2305_v39 = vpop.f32.mrb[22].mxu0 }
 0xaf1   :  { %v2306_v5 = vadd.f32 %v2305_v39, %v15004_v27  ;;  %v10006_v38 = vpop.f32.mrb[23].mxu0 }
 0xaf2   :  { %v13858_v56 = vpop.eup %13857 }
 0xaf3   :  { %v2323_v29 = vmul.f32 %v13858_v56, %v2306_v5  ;;  %v13860_v34 = vpop.eup %13859 }
 0xaf4   :  { %v2326_v24 = vsub.f32 1.0, %v13860_v34  ;;  %v2328_v44 = vmul.f32 0.0, %v13860_v34 }
 0xaf5   :  { %v2324_v52 = vadd.f32 %v2323_v29, %v15007_v63 }
 0xaf7   :  { %13861 = vtanh.f32 %v2324_v52 }
 0xb01   :  { %v13862_v37 = vpop.eup %13861 }
 0xb02   :  { %v2327_v35 = vmul.f32 %v13862_v37, %v2326_v24 }
 0xb04   :  { %v15010_v62 = vadd.f32 %v2328_v44, %v2327_v35 }
 0xb06   :  { %2330 = vst [vmem:[#allocation2] sm:$0x3] %v15010_v62  ;;  %2396 = vmatmul.mubr.f32.vlgmr.msra.gmra.mrb[26].mxu1 %v15010_v62  ;;  %10040 = vmatmul.mubr.f32.vlgmr.msra.gmra.mrb[24].mxu0 %v15010_v62  ;;  %v2501_v35 = vrot.slane %v15010_v62, 6 }
 0xb07   :  { %11892 = vmatpush1.bf16.msra.mxu1 %v14830_v15  ;;  %11923 = vmatpush3.bf16.msra.mxu0 %v14896_v33 }
 0xb08   :  { %11894 = vmatprep.subr.bf16.mxu1 %v14834_v12  ;;  %11924 = vmatprep.subr.bf16.mxu0 %v14256_v26 }
 0xb09   :  { %2573 = vmatprep.mubr.f32.mxu1 %v14255_v7  ;;  %10074 = vmatprep.mubr.msk.f32.mxu0 %vm14257_vm3, %v14255_v7 }
 0xb0b   :  { %11896 = vmatpush1.bf16.msra.mxu1 %v14836_v32  ;;  %11926 = vmatpush3.bf16.msra.mxu0 %v14901_v61 }
 0xb0c   :  { %11898 = vmatprep.subr.bf16.mxu1 %v14840_v50  ;;  %11927 = vmatprep.subr.bf16.mxu0 %v14256_v26 }
 0xb0f   :  { %11900 = vmatpush1.bf16.msra.mxu1 %v14842_v53  ;;  %11929 = vmatpush3.bf16.msra.mxu0 %v14908_v6 }
 0xb10   :  { %11902 = vmatprep.subr.bf16.mxu1 %v14845_v17  ;;  %11930 = vmatprep.subr.bf16.mxu0 %v14256_v26 }
 0xb13   :  { %11904 = vmatpush1.bf16.msra.mxu1 %v14848_v30  ;;  %11932 = vmatpush3.bf16.msra.mxu0 %v14915_v16 }
 0xb14   :  { %11906 = vmatprep.subr.bf16.mxu1 %v14851_v40  ;;  %11933 = vmatprep.subr.bf16.mxu0 %v14256_v26 }
 0xb17   :  { %11908 = vmatpush1.bf16.msra.mxu1 %v14854_v51  ;;  %11935 = vmatpush3.bf16.msra.mxu0 %v14921_v31 }
 0xb18   :  { %11910 = vmatprep.subr.bf16.mxu1 %v14857_v58  ;;  %11936 = vmatprep.subr.bf16.mxu0 %v14256_v26 }
 0xb1b   :  { %11912 = vmatpush1.bf16.msra.mxu1 %v14860_v47  ;;  %11938 = vmatpush3.bf16.msra.mxu0 %v14927_v19 }
 0xb1c   :  { %11914 = vmatprep.subr.bf16.mxu1 %v14864_v14  ;;  %11939 = vmatprep.subr.bf16.mxu0 %v14256_v26 }
 0xb1f   :  { %11916 = vmatpush1.bf16.msra.mxu1 %v14866_v28  ;;  %11941 = vmatpush3.bf16.msra.mxu0 %v14933_v8 }
 0xb20   :  { %11918 = vmatprep.subr.bf16.mxu1 %v14871_v46  ;;  %11942 = vmatprep.subr.bf16.mxu0 %v14256_v26 }
 0xb23   :  { %11920 = vmatpush1.bf16.msra.mxu1 %v14873_v41  ;;  %11944 = vmatpush3.bf16.msra.mxu0 %v14939_v3 }
 0xb24   :  { %11946 = vmatprep.subr.bf16.mxu1 %v14828_v13  ;;  %11977 = vmatprep.subr.bf16.mxu0 %v14256_v26 }
 0xbd9   :  { %v2397_v57 = vpop.f32.mrb[26].mxu1  ;;  %v2468_v18 = vpop.f32.mrb[24].mxu0 }
 0xbda   :  { %v2398_v45 = vadd.f32 %v2397_v57, %v14983_v21  ;;  %v2399_v0 = vpop.f32.mrb[27].mxu1  ;;  %v10041_v1 = vpop.f32.mrb[25].mxu0  ;;  %v2469_v34 = vadd.f32 %v2468_v18, %v15004_v27 }
 0xbdb   :  { %v2400_v10 = vadd.f32 %v2399_v0, %v14986_v23 }
 0xbdc   :  { %v2473_v11 = vrot.slane %v2398_v45, 6  ;;  %v2493_v24 = vrot.slane %v2469_v34, 6 }
 0xbdd   :  { %v2483_v55 = vrot.slane %v2400_v10, 6 }
 0xbde   :  { %v2475_v20 = vadd.f32 %v2473_v11, %v14993_v22 }
 0xbdf   :  { %v2485_v36 = vadd.f32 %v2483_v55, %v15000_v54 }
 0xbe0   :  { %v8765_v39 = vmul.f32 -1.442695, %v2475_v20 }
 0xbe1   :  { %v8766_v5 = vmul.f32 -1.442695, %v2485_v36 }
 0xbe2   :  { %13863 = vpow2.f32 %v8765_v39 }
 0xbe3   :  { %13865 = vpow2.f32 %v8766_v5 }
 0xbec   :  { %v13864_v38 = vpop.eup %13863 }
 0xbed   :  { %v13866_v56 = vpop.eup %13865  ;;  %v2479_v29 = vadd.f32 1.0, %v13864_v38 }
 0xbee   :  { %v2489_v52 = vadd.f32 1.0, %v13866_v56 }
 0xbef   :  { %13867 = vrcp.f32 %v2479_v29 }
 0xbf0   :  { %13869 = vrcp.f32 %v2489_v52 }
 0xbf9   :  { %v13868_v37 = vpop.eup %13867 }
 0xbfa   :  { %v13870_v44 = vpop.eup %13869  ;;  %v2495_v57 = vmul.f32 %v13868_v37, %v2493_v24 }
 0xbfb   :  { %v2503_v45 = vmul.f32 %v13870_v44, %v2501_v35  ;;  %v2498_v1 = vsub.f32 1.0, %v13870_v44 }
 0xbfc   :  { %v2496_v0 = vadd.f32 %v2495_v57, %v15007_v63 }
 0xbfe   :  { %13871 = vtanh.f32 %v2496_v0 }
 0xc08   :  { %v13872_v10 = vpop.eup %13871 }
 0xc09   :  { %v2499_v11 = vmul.f32 %v13872_v10, %v2498_v1 }
 0xc0b   :  { %v15057_v55 = vadd.f32 %v2503_v45, %v2499_v11 }
 0xc0d   :  { %2505 = vst [vmem:[#allocation2] sm:$0xc] %v15057_v55  ;;  %v2507_v20 = vrot.slane %v15057_v55, 2  ;;  %v2678_v11 = vrot.slane %v15057_v55, 6 }
 0xc0f   :  { %2574 = vmatmul.mubr.f32.vlgmr.msra.gmra.mrb[28].mxu1 %v2507_v20  ;;  %10075 = vmatmul.mubr.f32.vlgmr.msra.gmra.mrb[26].mxu0 %v2507_v20 }
 0xc10   :  { %11948 = vmatpush1.bf16.msra.mxu1 %v14830_v15  ;;  %11979 = vmatpush3.bf16.msra.mxu0 %v14896_v33 }
 0xc11   :  { %11950 = vmatprep.subr.bf16.mxu1 %v14834_v12  ;;  %11980 = vmatprep.subr.bf16.mxu0 %v14256_v26 }
 0xc12   :  { %2750 = vmatprep.mubr.f32.mxu1 %v14255_v7  ;;  %10109 = vmatprep.mubr.msk.f32.mxu0 %vm14257_vm3, %v14255_v7 }
 0xc14   :  { %11952 = vmatpush1.bf16.msra.mxu1 %v14836_v32  ;;  %11982 = vmatpush3.bf16.msra.mxu0 %v14901_v61 }
 0xc15   :  { %11954 = vmatprep.subr.bf16.mxu1 %v14840_v50  ;;  %11983 = vmatprep.subr.bf16.mxu0 %v14256_v26 }
 0xc18   :  { %11956 = vmatpush1.bf16.msra.mxu1 %v14842_v53  ;;  %11985 = vmatpush3.bf16.msra.mxu0 %v14908_v6 }
 0xc19   :  { %11958 = vmatprep.subr.bf16.mxu1 %v14845_v17  ;;  %11986 = vmatprep.subr.bf16.mxu0 %v14256_v26 }
 0xc1c   :  { %11960 = vmatpush1.bf16.msra.mxu1 %v14848_v30  ;;  %11988 = vmatpush3.bf16.msra.mxu0 %v14915_v16 }
 0xc1d   :  { %11962 = vmatprep.subr.bf16.mxu1 %v14851_v40  ;;  %11989 = vmatprep.subr.bf16.mxu0 %v14256_v26 }
 0xc20   :  { %11964 = vmatpush1.bf16.msra.mxu1 %v14854_v51  ;;  %11991 = vmatpush3.bf16.msra.mxu0 %v14921_v31 }
 0xc21   :  { %11966 = vmatprep.subr.bf16.mxu1 %v14857_v58  ;;  %11992 = vmatprep.subr.bf16.mxu0 %v14256_v26 }
 0xc24   :  { %11968 = vmatpush1.bf16.msra.mxu1 %v14860_v47  ;;  %11994 = vmatpush3.bf16.msra.mxu0 %v14927_v19 }
 0xc25   :  { %11970 = vmatprep.subr.bf16.mxu1 %v14864_v14  ;;  %11995 = vmatprep.subr.bf16.mxu0 %v14256_v26 }
 0xc28   :  { %11972 = vmatpush1.bf16.msra.mxu1 %v14866_v28  ;;  %11997 = vmatpush3.bf16.msra.mxu0 %v14933_v8 }
 0xc29   :  { %11974 = vmatprep.subr.bf16.mxu1 %v14871_v46  ;;  %11998 = vmatprep.subr.bf16.mxu0 %v14256_v26 }
 0xc2c   :  { %11976 = vmatpush1.bf16.msra.mxu1 %v14873_v41  ;;  %12000 = vmatpush3.bf16.msra.mxu0 %v14939_v3 }
 0xc2d   :  { %12002 = vmatprep.subr.bf16.mxu1 %v14828_v13  ;;  %12033 = vmatprep.subr.bf16.mxu0 %v14256_v26 }
 0xce2   :  { %v2575_v62 = vpop.f32.mrb[28].mxu1  ;;  %v2646_v18 = vpop.f32.mrb[26].mxu0 }
 0xce3   :  { %v2576_v36 = vadd.f32 %v2575_v62, %v14983_v21  ;;  %v2577_v39 = vpop.f32.mrb[29].mxu1  ;;  %v10076_v5 = vpop.f32.mrb[27].mxu0  ;;  %v2647_v0 = vadd.f32 %v2646_v18, %v15004_v27 }
 0xce4   :  { %v2578_v38 = vadd.f32 %v2577_v39, %v14986_v23 }
 0xce5   :  { %v2651_v56 = vrot.slane %v2576_v36, 4  ;;  %v2671_v1 = vrot.slane %v2647_v0, 4 }
 0xce6   :  { %v2661_v29 = vrot.slane %v2578_v38, 4 }
 0xce7   :  { %v2653_v52 = vadd.f32 %v2651_v56, %v14993_v22 }
 0xce8   :  { %v2663_v34 = vadd.f32 %v2661_v29, %v15000_v54 }
 0xce9   :  { %v8767_v24 = vmul.f32 -1.442695, %v2653_v52 }
 0xcea   :  { %v8768_v37 = vmul.f32 -1.442695, %v2663_v34 }
 0xceb   :  { %13873 = vpow2.f32 %v8767_v24 }
 0xcec   :  { %13875 = vpow2.f32 %v8768_v37 }
 0xcf5   :  { %v13874_v35 = vpop.eup %13873 }
 0xcf6   :  { %v13876_v44 = vpop.eup %13875  ;;  %v2657_v57 = vadd.f32 1.0, %v13874_v35 }
 0xcf7   :  { %v2667_v45 = vadd.f32 1.0, %v13876_v44 }
 0xcf8   :  { %13877 = vrcp.f32 %v2657_v57 }
 0xcf9   :  { %13879 = vrcp.f32 %v2667_v45 }
 0xd02   :  { %v13878_v10 = vpop.eup %13877 }
 0xd03   :  { %v13880_v20 = vpop.eup %13879  ;;  %v2673_v62 = vmul.f32 %v13878_v10, %v2671_v1 }
 0xd04   :  { %v2680_v36 = vmul.f32 %v13880_v20, %v2678_v11  ;;  %v2676_v5 = vsub.f32 1.0, %v13880_v20 }
 0xd05   :  { %v2674_v39 = vadd.f32 %v2673_v62, %v15007_v63 }
 0xd07   :  { %13881 = vtanh.f32 %v2674_v39 }
 0xd11   :  { %v13882_v38 = vpop.eup %13881 }
 0xd12   :  { %v2677_v56 = vmul.f32 %v13882_v38, %v2676_v5 }
 0xd14   :  { %v15103_v29 = vadd.f32 %v2680_v36, %v2677_v56 }
 0xd16   :  { %2682 = vst [vmem:[#allocation2] sm:$0x30] %v15103_v29  ;;  %v2684_v52 = vrot.slane %v15103_v29, 4  ;;  %v2855_v56 = vrot.slane %v15103_v29, 6 }
 0xd18   :  { %2751 = vmatmul.mubr.f32.vlgmr.msra.gmra.mrb[30].mxu1 %v2684_v52  ;;  %10110 = vmatmul.mubr.f32.vlgmr.msra.gmra.mrb[28].mxu0 %v2684_v52 }
 0xd19   :  { %12004 = vmatpush1.bf16.msra.mxu1 %v14830_v15  ;;  %12035 = vmatpush3.bf16.msra.mxu0 %v14896_v33 }
 0xd1a   :  { %12006 = vmatprep.subr.bf16.mxu1 %v14834_v12  ;;  %12036 = vmatprep.subr.bf16.mxu0 %v14256_v26 }
 0xd1b   :  { %2927 = vmatprep.mubr.f32.mxu1 %v14255_v7  ;;  %10144 = vmatprep.mubr.msk.f32.mxu0 %vm14257_vm3, %v14255_v7 }
 0xd1d   :  { %12008 = vmatpush1.bf16.msra.mxu1 %v14836_v32  ;;  %12038 = vmatpush3.bf16.msra.mxu0 %v14901_v61 }
 0xd1e   :  { %12010 = vmatprep.subr.bf16.mxu1 %v14840_v50  ;;  %12039 = vmatprep.subr.bf16.mxu0 %v14256_v26 }
 0xd21   :  { %12012 = vmatpush1.bf16.msra.mxu1 %v14842_v53  ;;  %12041 = vmatpush3.bf16.msra.mxu0 %v14908_v6 }
 0xd22   :  { %12014 = vmatprep.subr.bf16.mxu1 %v14845_v17  ;;  %12042 = vmatprep.subr.bf16.mxu0 %v14256_v26 }
 0xd25   :  { %12016 = vmatpush1.bf16.msra.mxu1 %v14848_v30  ;;  %12044 = vmatpush3.bf16.msra.mxu0 %v14915_v16 }
 0xd26   :  { %12018 = vmatprep.subr.bf16.mxu1 %v14851_v40  ;;  %12045 = vmatprep.subr.bf16.mxu0 %v14256_v26 }
 0xd29   :  { %12020 = vmatpush1.bf16.msra.mxu1 %v14854_v51  ;;  %12047 = vmatpush3.bf16.msra.mxu0 %v14921_v31 }
 0xd2a   :  { %12022 = vmatprep.subr.bf16.mxu1 %v14857_v58  ;;  %12048 = vmatprep.subr.bf16.mxu0 %v14256_v26 }
 0xd2d   :  { %12024 = vmatpush1.bf16.msra.mxu1 %v14860_v47  ;;  %12050 = vmatpush3.bf16.msra.mxu0 %v14927_v19 }
 0xd2e   :  { %12026 = vmatprep.subr.bf16.mxu1 %v14864_v14  ;;  %12051 = vmatprep.subr.bf16.mxu0 %v14256_v26 }
 0xd31   :  { %12028 = vmatpush1.bf16.msra.mxu1 %v14866_v28  ;;  %12053 = vmatpush3.bf16.msra.mxu0 %v14933_v8 }
 0xd32   :  { %12030 = vmatprep.subr.bf16.mxu1 %v14871_v46  ;;  %12054 = vmatprep.subr.bf16.mxu0 %v14256_v26 }
 0xd35   :  { %12032 = vmatpush1.bf16.msra.mxu1 %v14873_v41  ;;  %12056 = vmatpush3.bf16.msra.mxu0 %v14939_v3 }
 0xd36   :  { %12058 = vmatprep.subr.bf16.mxu1 %v14828_v13  ;;  %12089 = vmatprep.subr.bf16.mxu0 %v14256_v26 }
 0xdeb   :  { %v2752_v55 = vpop.f32.mrb[30].mxu1  ;;  %v2823_v18 = vpop.f32.mrb[28].mxu0 }
 0xdec   :  { %v2753_v34 = vadd.f32 %v2752_v55, %v14983_v21  ;;  %v2754_v24 = vpop.f32.mrb[31].mxu1  ;;  %v10111_v37 = vpop.f32.mrb[29].mxu0  ;;  %v2824_v39 = vadd.f32 %v2823_v18, %v15004_v27  ;;  %v15190_v18 = vadd.f32 %v14973_v2, %v14976_v9 }
 0xded   :  { %v2755_v35 = vadd.f32 %v2754_v24, %v14986_v23 }
 0xdee   :  { %v2828_v44 = vrot.slane %v2753_v34, 2  ;;  %v2848_v5 = vrot.slane %v2824_v39, 2 }
 0xdef   :  { %v2838_v57 = vrot.slane %v2755_v35, 2 }
 0xdf0   :  { %v2830_v45 = vadd.f32 %v2828_v44, %v14993_v22 }
 0xdf1   :  { %v2840_v0 = vadd.f32 %v2838_v57, %v15000_v54 }
 0xdf2   :  { %v8769_v1 = vmul.f32 -1.442695, %v2830_v45 }
 0xdf3   :  { %v8770_v10 = vmul.f32 -1.442695, %v2840_v0 }
 0xdf4   :  { %13883 = vpow2.f32 %v8769_v1 }
 0xdf5   :  { %13885 = vpow2.f32 %v8770_v10 }
 0xdfe   :  { %v13884_v11 = vpop.eup %13883 }
 0xdff   :  { %v13886_v20 = vpop.eup %13885  ;;  %v2834_v62 = vadd.f32 1.0, %v13884_v11  ;;  %v15197_v11 = vadd.f32 %v14980_v25, %v14989_v59 }
 0xe00   :  { %v2844_v36 = vadd.f32 1.0, %v13886_v20 }
 0xe01   :  { %13887 = vrcp.f32 %v2834_v62 }
 0xe02   :  { %13889 = vrcp.f32 %v2844_v36 }
 0xe0b   :  { %v13888_v38 = vpop.eup %13887 }
 0xe0c   :  { %v13890_v52 = vpop.eup %13889  ;;  %v2850_v22 = vmul.f32 %v13888_v38, %v2848_v5 }
 0xe0d   :  { %v2857_v55 = vmul.f32 %v13890_v52, %v2855_v56  ;;  %v2853_v34 = vsub.f32 1.0, %v13890_v52 }
 0xe0e   :  { %v2851_v54 = vadd.f32 %v2850_v22, %v15007_v63 }
 0xe10   :  { %13891 = vtanh.f32 %v2851_v54 }
 0xe1a   :  { %v13892_v24 = vpop.eup %13891 }
 0xe1b   :  { %v2854_v37 = vmul.f32 %v13892_v24, %v2853_v34 }
 0xe1d   :  { %v2858_v35 = vadd.f32 %v2857_v55, %v2854_v37 }
 0xe1f   :  { %2859 = vst [vmem:[#allocation2] sm:$0xc0] %v2858_v35  ;;  %v15149_v44 = vrot.slane %v2858_v35, 6 }
 0xe21   :  { %2928 = vmatmul.mubr.f32.vlgmr.msra.gmra.mrb[32].mxu1 %v15149_v44  ;;  %10145 = vmatmul.mubr.f32.vlgmr.msra.gmra.mrb[30].mxu0 %v15149_v44 }
 0xe22   :  { %12060 = vmatpush1.bf16.msra.mxu1 %v14830_v15  ;;  %12091 = vmatpush3.bf16.msra.mxu0 %v14896_v33 }
 0xe23   :  { %12062 = vmatprep.subr.bf16.mxu1 %v14834_v12  ;;  %12092 = vmatprep.subr.bf16.mxu0 %v14256_v26 }
 0xe24   :  { %3090 = vmatprep.mubr.f32.mxu1 %v14255_v7  ;;  %10179 = vmatprep.mubr.msk.f32.mxu0 %vm14257_vm3, %v14255_v7 }
 0xe26   :  { %12064 = vmatpush1.bf16.msra.mxu1 %v14836_v32  ;;  %12094 = vmatpush3.bf16.msra.mxu0 %v14901_v61 }
 0xe27   :  { %12066 = vmatprep.subr.bf16.mxu1 %v14840_v50  ;;  %12095 = vmatprep.subr.bf16.mxu0 %v14256_v26 }
 0xe2a   :  { %12068 = vmatpush1.bf16.msra.mxu1 %v14842_v53  ;;  %12097 = vmatpush3.bf16.msra.mxu0 %v14908_v6 }
 0xe2b   :  { %12070 = vmatprep.subr.bf16.mxu1 %v14845_v17  ;;  %12098 = vmatprep.subr.bf16.mxu0 %v14256_v26 }
 0xe2e   :  { %12072 = vmatpush1.bf16.msra.mxu1 %v14848_v30  ;;  %12100 = vmatpush3.bf16.msra.mxu0 %v14915_v16 }
 0xe2f   :  { %12074 = vmatprep.subr.bf16.mxu1 %v14851_v40  ;;  %12101 = vmatprep.subr.bf16.mxu0 %v14256_v26 }
 0xe32   :  { %12076 = vmatpush1.bf16.msra.mxu1 %v14854_v51  ;;  %12103 = vmatpush3.bf16.msra.mxu0 %v14921_v31 }
 0xe33   :  { %12078 = vmatprep.subr.bf16.mxu1 %v14857_v58  ;;  %12104 = vmatprep.subr.bf16.mxu0 %v14256_v26 }
 0xe36   :  { %12080 = vmatpush1.bf16.msra.mxu1 %v14860_v47  ;;  %12106 = vmatpush3.bf16.msra.mxu0 %v14927_v19 }
 0xe37   :  { %12082 = vmatprep.subr.bf16.mxu1 %v14864_v14  ;;  %12107 = vmatprep.subr.bf16.mxu0 %v14256_v26 }
 0xe3a   :  { %12084 = vmatpush1.bf16.msra.mxu1 %v14866_v28  ;;  %12109 = vmatpush3.bf16.msra.mxu0 %v14933_v8 }
 0xe3b   :  { %12086 = vmatprep.subr.bf16.mxu1 %v14871_v46  ;;  %12110 = vmatprep.subr.bf16.mxu0 %v14256_v26 }
 0xe3e   :  { %12088 = vmatpush1.bf16.msra.mxu1 %v14873_v41  ;;  %12112 = vmatpush3.bf16.msra.mxu0 %v14939_v3 }
 0xe3f   :  { %12114 = vmatprep.subr.bf16.mxu1 %v14828_v13  ;;  %12145 = vmatprep.subr.bf16.mxu0 %v14256_v26 }
 0xef4   :  { %v2929_v63 = vpop.f32.mrb[32].mxu1  ;;  %v3000_v29 = vpop.f32.mrb[30].mxu0 }
 0xef5   :  { %v2930_v57 = vadd.f32 %v2929_v63, %v14983_v21  ;;  %v2931_v45 = vpop.f32.mrb[33].mxu1  ;;  %v10146_v0 = vpop.f32.mrb[31].mxu0  ;;  %v3001_v38 = vadd.f32 %v3000_v29, %v15004_v27 }
 0xef6   :  { %v2932_v1 = vadd.f32 %v2931_v45, %v14986_v23 }
 0xef7   :  { %v3004_v10 = vadd.f32 %v2930_v57, %v15190_v18 }
 0xef8   :  { %v3011_v62 = vadd.f32 %v2932_v1, %v15197_v11 }
 0xef9   :  { %v8771_v20 = vmul.f32 -1.442695, %v3004_v10 }
 0xefa   :  { %v8772_v36 = vmul.f32 -1.442695, %v3011_v62 }
 0xefb   :  { %13893 = vpow2.f32 %v8771_v20 }
 0xefc   :  { %13895 = vpow2.f32 %v8772_v36 }
 0xf05   :  { %v13894_v2 = vpop.eup %13893 }
 0xf06   :  { %v3008_v9 = vadd.f32 1.0, %v13894_v2  ;;  %v13896_v39 = vpop.eup %13895 }
 0xf07   :  { %v3015_v5 = vadd.f32 1.0, %v13896_v39 }
 0xf08   :  { %13897 = vrcp.f32 %v3008_v9 }
 0xf09   :  { %13899 = vrcp.f32 %v3015_v5 }
 0xf12   :  { %v13898_v56 = vpop.eup %13897 }
 0xf13   :  { %v3018_v52 = vmul.f32 %v13898_v56, %v3001_v38  ;;  %v13900_v25 = vpop.eup %13899 }
 0xf14   :  { %v3021_v59 = vsub.f32 1.0, %v13900_v25  ;;  %v3023_v34 = vmul.f32 %v13900_v25, %v15149_v44 }
 0xf15   :  { %v3019_v22 = vadd.f32 %v3018_v52, %v14978_v4 }
 0xf17   :  { %13901 = vtanh.f32 %v3019_v22 }
 0xf21   :  { %v13902_v55 = vpop.eup %13901 }
 0xf22   :  { %v3022_v54 = vmul.f32 %v13902_v55, %v3021_v59 }
 0xf24   :  { %v15203_v24 = vadd.f32 %v3023_v34, %v3022_v54 }
 0xf26   :  { %3025 = vst [vmem:[#allocation2 + $0x8] sm:$0x3] %v15203_v24  ;;  %3091 = vmatmul.mubr.f32.vlgmr.msra.gmra.mrb[34].mxu1 %v15203_v24  ;;  %10180 = vmatmul.mubr.f32.vlgmr.msra.gmra.mrb[32].mxu0 %v15203_v24  ;;  %v3196_v56 = vrot.slane %v15203_v24, 6 }
 0xf27   :  { %12116 = vmatpush1.bf16.msra.mxu1 %v14830_v15  ;;  %12147 = vmatpush3.bf16.msra.mxu0 %v14896_v33 }
 0xf28   :  { %12118 = vmatprep.subr.bf16.mxu1 %v14834_v12  ;;  %12148 = vmatprep.subr.bf16.mxu0 %v14256_v26 }
 0xf29   :  { %3268 = vmatprep.mubr.f32.mxu1 %v14255_v7  ;;  %10214 = vmatprep.mubr.msk.f32.mxu0 %vm14257_vm3, %v14255_v7 }
 0xf2b   :  { %12120 = vmatpush1.bf16.msra.mxu1 %v14836_v32  ;;  %12150 = vmatpush3.bf16.msra.mxu0 %v14901_v61 }
 0xf2c   :  { %12122 = vmatprep.subr.bf16.mxu1 %v14840_v50  ;;  %12151 = vmatprep.subr.bf16.mxu0 %v14256_v26 }
 0xf2f   :  { %12124 = vmatpush1.bf16.msra.mxu1 %v14842_v53  ;;  %12153 = vmatpush3.bf16.msra.mxu0 %v14908_v6 }
 0xf30   :  { %12126 = vmatprep.subr.bf16.mxu1 %v14845_v17  ;;  %12154 = vmatprep.subr.bf16.mxu0 %v14256_v26 }
 0xf33   :  { %12128 = vmatpush1.bf16.msra.mxu1 %v14848_v30  ;;  %12156 = vmatpush3.bf16.msra.mxu0 %v14915_v16 }
 0xf34   :  { %12130 = vmatprep.subr.bf16.mxu1 %v14851_v40  ;;  %12157 = vmatprep.subr.bf16.mxu0 %v14256_v26 }
 0xf37   :  { %12132 = vmatpush1.bf16.msra.mxu1 %v14854_v51  ;;  %12159 = vmatpush3.bf16.msra.mxu0 %v14921_v31 }
 0xf38   :  { %12134 = vmatprep.subr.bf16.mxu1 %v14857_v58  ;;  %12160 = vmatprep.subr.bf16.mxu0 %v14256_v26 }
 0xf3b   :  { %12136 = vmatpush1.bf16.msra.mxu1 %v14860_v47  ;;  %12162 = vmatpush3.bf16.msra.mxu0 %v14927_v19 }
 0xf3c   :  { %12138 = vmatprep.subr.bf16.mxu1 %v14864_v14  ;;  %12163 = vmatprep.subr.bf16.mxu0 %v14256_v26 }
 0xf3f   :  { %12140 = vmatpush1.bf16.msra.mxu1 %v14866_v28  ;;  %12165 = vmatpush3.bf16.msra.mxu0 %v14933_v8 }
 0xf40   :  { %12142 = vmatprep.subr.bf16.mxu1 %v14871_v46  ;;  %12166 = vmatprep.subr.bf16.mxu0 %v14256_v26 }
 0xf43   :  { %12144 = vmatpush1.bf16.msra.mxu1 %v14873_v41  ;;  %12168 = vmatpush3.bf16.msra.mxu0 %v14939_v3 }
 0xf44   :  { %12170 = vmatprep.subr.bf16.mxu1 %v14828_v13  ;;  %12201 = vmatprep.subr.bf16.mxu0 %v14256_v26 }
 0xff9   :  { %v3092_v37 = vpop.f32.mrb[34].mxu1  ;;  %v3163_v35 = vpop.f32.mrb[32].mxu0 }
 0xffa   :  { %v3093_v44 = vadd.f32 %v3092_v37, %v14983_v21  ;;  %v3094_v63 = vpop.f32.mrb[35].mxu1  ;;  %v10181_v29 = vpop.f32.mrb[33].mxu0  ;;  %v3164_v39 = vadd.f32 %v3163_v35, %v15004_v27 }
 0xffb   :  { %v3095_v57 = vadd.f32 %v3094_v63, %v14986_v23 }
 0xffc   :  { %v3168_v45 = vrot.slane %v3093_v44, 6  ;;  %v3188_v5 = vrot.slane %v3164_v39, 6  ;;  %v3597_v39 = vld [vmem:[#allocation4 + $0x330] sm:$0xff] }
 0xffd   :  { %v3178_v0 = vrot.slane %v3095_v57, 6 }
 0xffe   :  { %v3170_v1 = vadd.f32 %v3168_v45, %v15190_v18 }
 0xfff   :  { %v3180_v10 = vadd.f32 %v3178_v0, %v15197_v11 }
0x1000   :  { %v8773_v20 = vmul.f32 -1.442695, %v3170_v1  ;;  %v3591_v1 = vld [vmem:[#allocation4 + $0x300] sm:$0xff] }
0x1001   :  { %v8774_v62 = vmul.f32 -1.442695, %v3180_v10  ;;  %v3594_v10 = vld [vmem:[#allocation4 + $0x318] sm:$0xff] }
0x1002   :  { %13903 = vpow2.f32 %v8773_v20  ;;  %v3598_v20 = vld [vmem:[#allocation4 + $0x338] sm:$0xff] }
0x1003   :  { %13905 = vpow2.f32 %v8774_v62  ;;  %v3601_v62 = vld [vmem:[#allocation4 + $0x350] sm:$0xff] }
0x100c   :  { %v13904_v13 = vpop.eup %13903 }
0x100d   :  { %v13906_v36 = vpop.eup %13905  ;;  %v3174_v2 = vadd.f32 1.0, %v13904_v13 }
0x100e   :  { %v3184_v9 = vadd.f32 1.0, %v13906_v36  ;;  %v12227_v36 = vpack.c.bf16 %v3594_v10, %v3591_v1  ;;  %v3599_v1 = vld [vmem:[#allocation4 + $0x340] sm:$0xff]  ;;  %v3602_v10 = vld [vmem:[#allocation4 + $0x358] sm:$0xff] }
0x100f   :  { %13907 = vrcp.f32 %v3174_v2 }
0x1010   :  { %13909 = vrcp.f32 %v3184_v9  ;;  %v12229_v9 = vpack.c.bf16 %v3601_v62, %v3598_v20  ;;  %v12261_v20 = vpack.c.bf16 %v3602_v10, %v3599_v1  ;;  %v3811_v62 = vld [vmem:[#allocation6 + $0x308] sm:$0xff]  ;;  %v3840_v1 = vld [vmem:[#allocation6 + $0x3f0] sm:$0xff] }
0x1019   :  { %v13908_v38 = vpop.eup %13907 }
0x101a   :  { %v13910_v52 = vpop.eup %13909  ;;  %v3190_v22 = vmul.f32 %v13908_v38, %v3188_v5  ;;  %v3600_v5 = vld [vmem:[#allocation4 + $0x348] sm:$0xff] }
0x101b   :  { %v3198_v25 = vmul.f32 %v13910_v52, %v3196_v56  ;;  %v3193_v55 = vsub.f32 1.0, %v13910_v52  ;;  %v3604_v38 = vld [vmem:[#allocation4 + $0x368] sm:$0xff]  ;;  %v3607_v56 = vld [vmem:[#allocation4 + $0x380] sm:$0xff] }
0x101c   :  { %v3191_v59 = vadd.f32 %v3190_v22, %v14978_v4  ;;  %v3555_v52 = vld [vmem:[#allocation2] sm:$0xff]  ;;  %v12231_v22 = vpack.c.bf16 %v3600_v5, %v3597_v39  ;;  %v3813_v39 = vld [vmem:[#allocation6 + $0x318] sm:$0xff] }
0x101e   :  { %13911 = vtanh.f32 %v3191_v59  ;;  %v3603_v59 = vld [vmem:[#allocation4 + $0x360] sm:$0xff] }
0x1028   :  { %v13912_v54 = vpop.eup %13911 }
0x1029   :  { %v3194_v34 = vmul.f32 %v13912_v54, %v3193_v55  ;;  %v3606_v55 = vld [vmem:[#allocation4 + $0x378] sm:$0xff] }
0x102a   :  { %v3610_v54 = vld [vmem:[#allocation4 + $0x398] sm:$0xff] }
0x102b   :  { %v15250_v37 = vadd.f32 %v3198_v25, %v3194_v34  ;;  %v12233_v25 = vpack.c.bf16 %v3607_v56, %v3604_v38  ;;  %v3613_v34 = vld [vmem:[#allocation4 + $0x3b0] sm:$0xff]  ;;  %v3608_v56 = vld [vmem:[#allocation4 + $0x388] sm:$0xff] }
0x102c   :  { %v3605_v38 = vld [vmem:[#allocation4 + $0x370] sm:$0xff] }
0x102d   :  { %3200 = vst [vmem:[#allocation2 + $0x8] sm:$0xc] %v15250_v37  ;;  %v3202_v44 = vrot.slane %v15250_v37, 2 }
0x102f   :  { %3269 = vmatmul.mubr.f32.vlgmr.msra.gmra.mrb[36].mxu1 %v3202_v44  ;;  %10215 = vmatmul.mubr.f32.vlgmr.msra.gmra.mrb[34].mxu0 %v3202_v44  ;;  %v12237_v44 = vpack.c.bf16 %v3613_v34, %v3610_v54  ;;  %v3819_v54 = vld [vmem:[#allocation6 + $0x348] sm:$0xff] }
0x1030   :  { %12172 = vmatpush1.bf16.msra.mxu1 %v14830_v15  ;;  %12203 = vmatpush3.bf16.msra.mxu0 %v14896_v33  ;;  %v3592_v15 = vld [vmem:[#allocation4 + $0x308] sm:$0xff] }
0x1031   :  { %12174 = vmatprep.subr.bf16.mxu1 %v14834_v12  ;;  %12204 = vmatprep.subr.bf16.mxu0 %v14256_v26  ;;  %v3595_v12 = vld [vmem:[#allocation4 + $0x320] sm:$0xff] }
0x1032   :  { %3445 = vmatprep.mubr.f32.mxu1 %v14255_v7  ;;  %10249 = vmatprep.mubr.msk.f32.mxu0 %vm14257_vm3, %v14255_v7 }
0x1034   :  { %12176 = vmatpush1.bf16.msra.mxu1 %v14836_v32  ;;  %12206 = vmatpush3.bf16.msra.mxu0 %v14901_v61  ;;  %v12225_v32 = vpack.c.bf16 %v3595_v12, %v3592_v15  ;;  %v3609_v15 = vld [vmem:[#allocation4 + $0x390] sm:$0xff]  ;;  %v3612_v12 = vld [vmem:[#allocation4 + $0x3a8] sm:$0xff] }
0x1035   :  { %12178 = vmatprep.subr.bf16.mxu1 %v14840_v50  ;;  %12207 = vmatprep.subr.bf16.mxu0 %v14256_v26 }
0x1038   :  { %12180 = vmatpush1.bf16.msra.mxu1 %v14842_v53  ;;  %12209 = vmatpush3.bf16.msra.mxu0 %v14908_v6 }
0x1039   :  { %12182 = vmatprep.subr.bf16.mxu1 %v14845_v17  ;;  %12210 = vmatprep.subr.bf16.mxu0 %v14256_v26 }
0x103c   :  { %12184 = vmatpush1.bf16.msra.mxu1 %v14848_v30  ;;  %12212 = vmatpush3.bf16.msra.mxu0 %v14915_v16 }
0x103d   :  { %12186 = vmatprep.subr.bf16.mxu1 %v14851_v40  ;;  %12213 = vmatprep.subr.bf16.mxu0 %v14256_v26 }
0x1040   :  { %12188 = vmatpush1.bf16.msra.mxu1 %v14854_v51  ;;  %12215 = vmatpush3.bf16.msra.mxu0 %v14921_v31 }
0x1041   :  { %12190 = vmatprep.subr.bf16.mxu1 %v14857_v58  ;;  %12216 = vmatprep.subr.bf16.mxu0 %v14256_v26 }
0x1044   :  { %12192 = vmatpush1.bf16.msra.mxu1 %v14860_v47  ;;  %12218 = vmatpush3.bf16.msra.mxu0 %v14927_v19 }
0x1045   :  { %12194 = vmatprep.subr.bf16.mxu1 %v14864_v14  ;;  %12219 = vmatprep.subr.bf16.mxu0 %v14256_v26 }
0x1048   :  { %12196 = vmatpush1.bf16.msra.mxu1 %v14866_v28  ;;  %12221 = vmatpush3.bf16.msra.mxu0 %v14933_v8 }
0x1049   :  { %12198 = vmatprep.subr.bf16.mxu1 %v14871_v46  ;;  %12222 = vmatprep.subr.bf16.mxu0 %v14256_v26 }
0x104c   :  { %12200 = vmatpush1.bf16.msra.mxu1 %v14873_v41  ;;  %12224 = vmatpush3.bf16.msra.mxu0 %v14939_v3  ;;  %v3373_v3 = vrot.slane %v15250_v37, 6  ;;  %v12235_v37 = vpack.c.bf16 %v3606_v55, %v3603_v59  ;;  %v3816_v55 = vld [vmem:[#allocation6 + $0x330] sm:$0xff] }
0x104d   :  { %12226 = vmatprep.subr.bf16.mxu1 %v12225_v32  ;;  %v3616_v32 = vld [vmem:[#allocation4 + $0x3c8] sm:$0xff]  ;;  %v15308_v34 = vpack.c.bf16 %v3819_v54, %v3816_v55  ;;  %v3853_v54 = vld [vmem:[#allocation6 + $0x458] sm:$0xff] }
0x1102   :  { %v3270_v50 = vpop.f32.mrb[36].mxu1  ;;  %v3341_v53 = vpop.f32.mrb[34].mxu0 }
0x1103   :  { %v3271_v17 = vadd.f32 %v3270_v50, %v14983_v21  ;;  %v3272_v30 = vpop.f32.mrb[37].mxu1  ;;  %v10216_v40 = vpop.f32.mrb[35].mxu0  ;;  %v3342_v31 = vadd.f32 %v3341_v53, %v15004_v27  ;;  %v3619_v50 = vld [vmem:[#allocation4 + $0x3e0] sm:$0xff]  ;;  %v12239_v53 = vpack.c.bf16 %v3612_v12, %v3609_v15  ;;  %v3823_v15 = vld [vmem:[#allocation6 + $0x368] sm:$0xff] }
0x1104   :  { %v3273_v51 = vadd.f32 %v3272_v30, %v14986_v23  ;;  %v3615_v30 = vld [vmem:[#allocation4 + $0x3c0] sm:$0xff]  ;;  %v3618_v40 = vld [vmem:[#allocation4 + $0x3d8] sm:$0xff] }
0x1105   :  { %v3346_v58 = vrot.slane %v3271_v17, 4  ;;  %v3366_v19 = vrot.slane %v3342_v31, 4  ;;  %v12241_v17 = vpack.c.bf16 %v3619_v50, %v3616_v32  ;;  %v3630_v31 = vld [vmem:[#allocation4 + $0x438] sm:$0xff]  ;;  %v3826_v32 = vld [vmem:[#allocation6 + $0x380] sm:$0xff] }
0x1106   :  { %v3356_v47 = vrot.slane %v3273_v51, 4  ;;  %v3622_v51 = vld [vmem:[#allocation4 + $0x3f8] sm:$0xff]  ;;  %v3822_v50 = vld [vmem:[#allocation6 + $0x360] sm:$0xff] }
0x1107   :  { %v3348_v14 = vadd.f32 %v3346_v58, %v15190_v18  ;;  %v3625_v58 = vld [vmem:[#allocation4 + $0x410] sm:$0xff] }
0x1108   :  { %v3358_v28 = vadd.f32 %v3356_v47, %v15197_v11  ;;  %v12243_v47 = vpack.c.bf16 %v3618_v40, %v3615_v30  ;;  %v3617_v40 = vld [vmem:[#allocation4 + $0x3d0] sm:$0xff] }
0x1109   :  { %v8775_v46 = vmul.f32 -1.442695, %v3348_v14  ;;  %v12245_v14 = vpack.c.bf16 %v3625_v58, %v3622_v51  ;;  %v3620_v51 = vld [vmem:[#allocation4 + $0x3e8] sm:$0xff]  ;;  %v3829_v58 = vld [vmem:[#allocation6 + $0x398] sm:$0xff] }
0x110a   :  { %v8776_v41 = vmul.f32 -1.442695, %v3358_v28  ;;  %v3621_v28 = vld [vmem:[#allocation4 + $0x3f0] sm:$0xff] }
0x110b   :  { %13913 = vpow2.f32 %v8775_v46  ;;  %v3624_v46 = vld [vmem:[#allocation4 + $0x408] sm:$0xff] }
0x110c   :  { %13915 = vpow2.f32 %v8776_v41  ;;  %v3628_v41 = vld [vmem:[#allocation4 + $0x428] sm:$0xff] }
0x1115   :  { %v13914_v33 = vpop.eup %13913 }
0x1116   :  { %v13916_v61 = vpop.eup %13915  ;;  %v3352_v6 = vadd.f32 1.0, %v13914_v33  ;;  %v3631_v33 = vld [vmem:[#allocation4 + $0x440] sm:$0xff] }
0x1117   :  { %v3362_v16 = vadd.f32 1.0, %v13916_v61  ;;  %v12247_v61 = vpack.c.bf16 %v3624_v46, %v3621_v28  ;;  %v3828_v28 = vld [vmem:[#allocation6 + $0x390] sm:$0xff]  ;;  %v3831_v46 = vld [vmem:[#allocation6 + $0x3a8] sm:$0xff] }
0x1118   :  { %13917 = vrcp.f32 %v3352_v6  ;;  %v12249_v6 = vpack.c.bf16 %v3631_v33, %v3628_v41  ;;  %v3623_v33 = vld [vmem:[#allocation4 + $0x400] sm:$0xff] }
0x1119   :  { %13919 = vrcp.f32 %v3362_v16  ;;  %v3627_v16 = vld [vmem:[#allocation4 + $0x420] sm:$0xff] }
0x1122   :  { %v13918_v8 = vpop.eup %13917 }
0x1123   :  { %v13920_v24 = vpop.eup %13919  ;;  %v3368_v35 = vmul.f32 %v13918_v8, %v3366_v19  ;;  %v3634_v19 = vld [vmem:[#allocation4 + $0x458] sm:$0xff]  ;;  %v3637_v8 = vld [vmem:[#allocation4 + $0x470] sm:$0xff] }
0x1124   :  { %v3375_v63 = vmul.f32 %v13920_v24, %v3373_v3  ;;  %v3371_v57 = vsub.f32 1.0, %v13920_v24  ;;  %v12251_v3 = vpack.c.bf16 %v3630_v31, %v3627_v16  ;;  %v12253_v24 = vpack.c.bf16 %v3637_v8, %v3634_v19  ;;  %v3838_v19 = vld [vmem:[#allocation6 + $0x3e0] sm:$0xff] }
0x1125   :  { %v3369_v29 = vadd.f32 %v3368_v35, %v14978_v4  ;;  %v3633_v35 = vld [vmem:[#allocation4 + $0x450] sm:$0xff]  ;;  %v15320_v16 = vpack.c.bf16 %v3831_v46, %v3828_v28  ;;  %v3834_v8 = vld [vmem:[#allocation6 + $0x3c0] sm:$0xff] }
0x1127   :  { %13921 = vtanh.f32 %v3369_v29 }
0x1131   :  { %v13922_v45 = vpop.eup %13921 }
0x1132   :  { %v3372_v0 = vmul.f32 %v13922_v45, %v3371_v57  ;;  %v3593_v57 = vld [vmem:[#allocation4 + $0x310] sm:$0xff]  ;;  %v3596_v45 = vld [vmem:[#allocation4 + $0x328] sm:$0xff] }
0x1134   :  { %v15294_v13 = vadd.f32 %v3375_v63, %v3372_v0  ;;  %v3636_v63 = vld [vmem:[#allocation4 + $0x468] sm:$0xff]  ;;  %v12257_v0 = vpack.c.bf16 %v3596_v45, %v3593_v57  ;;  %v3844_v57 = vld [vmem:[#allocation6 + $0x410] sm:$0xff] }
0x1135   :  { %v12255_v29 = vpack.c.bf16 %v3636_v63, %v3633_v35  ;;  %v3629_v35 = vld [vmem:[#allocation4 + $0x430] sm:$0xff]  ;;  %v3632_v63 = vld [vmem:[#allocation4 + $0x448] sm:$0xff] }
0x1136   :  { %3377 = vst [vmem:[#allocation2 + $0x8] sm:$0x30] %v15294_v13  ;;  %v3379_v2 = vrot.slane %v15294_v13, 4  ;;  %12258 = vmatprep.subr.bf16.mxu0 %v12257_v0 }
0x1138   :  { %3446 = vmatmul.mubr.f32.vlgmr.msra.gmra.mrb[38].mxu1 %v3379_v2  ;;  %10250 = vmatmul.mubr.f32.vlgmr.msra.gmra.mrb[36].mxu0 %v3379_v2 }
0x1139   :  { %12228 = vmatpush1.bf16.msra.mxu1 %v12227_v36  ;;  %10284 = vmatprep.mubr.f32.mxu0 %v3555_v52  ;;  %v3814_v36 = vld [vmem:[#allocation6 + $0x320] sm:$0xff] }
0x113a   :  { %12230 = vmatprep.subr.bf16.mxu1 %v12229_v9  ;;  %3721 = vmatprep.mubr.f32.mxu1 %v14255_v7  ;;  %v15300_v2 = vpack.c.bf16 %v3814_v36, %v3811_v62  ;;  %v3810_v9 = vld [vmem:[#allocation6 + $0x300] sm:$0xff]  ;;  %v3638_v36 = vld [vmem:[#allocation4 + $0x478] sm:$0xff] }
0x113b   :  { %12260 = vmatpush3.bf16.msra.mxu0 %v12257_v0  ;;  %v15302_v5 = vpack.c.bf16 %v3813_v39, %v3810_v9  ;;  %v12281_v0 = vpack.c.bf16 %v3632_v63, %v3629_v35  ;;  %v3635_v62 = vld [vmem:[#allocation4 + $0x460] sm:$0xff] }
0x113c   :  { %12262 = vmatprep.subr.bf16.mxu0 %v12261_v20  ;;  %v12285_v39 = vpack.c.bf16 %v3638_v36, %v3635_v62 }
0x113d   :  { %12232 = vmatpush1.bf16.msra.mxu1 %v12231_v22  ;;  %v3817_v22 = vld [vmem:[#allocation6 + $0x338] sm:$0xff] }
0x113e   :  { %12234 = vmatprep.subr.bf16.mxu1 %v12233_v25  ;;  %v3820_v25 = vld [vmem:[#allocation6 + $0x350] sm:$0xff] }
0x113f   :  { %12264 = vmatpush3.bf16.msra.mxu0 %v12261_v20  ;;  %v15306_v59 = vpack.c.bf16 %v3820_v25, %v3817_v22  ;;  %v3843_v20 = vld [vmem:[#allocation6 + $0x408] sm:$0xff]  ;;  %v3846_v22 = vld [vmem:[#allocation6 + $0x420] sm:$0xff]  ;;  %v3849_v25 = vld [vmem:[#allocation6 + $0x438] sm:$0xff] }
0x1140   :  { %v15332_v9 = vpack.c.bf16 %v3843_v20, %v3840_v1  ;;  %v15338_v55 = vpack.c.bf16 %v3849_v25, %v3846_v22  ;;  %v8780_v20 = vld [vmem:[%s16769_s7 + $0x6] sm:$0x3] }
0x1141   :  { %12236 = vmatpush1.bf16.msra.mxu1 %v12235_v37  ;;  %v3611_v37 = vld [vmem:[#allocation4 + $0x3a0] sm:$0xff] }
0x1142   :  { %12238 = vmatprep.subr.bf16.mxu1 %v12237_v44  ;;  %v3614_v44 = vld [vmem:[#allocation4 + $0x3b8] sm:$0xff] }
0x1143   :  { %v12269_v12 = vpack.c.bf16 %v3614_v44, %v3611_v37  ;;  %v3856_v37 = vld [vmem:[#allocation6 + $0x470] sm:$0xff] }
0x1144   :  { %v15343_v44 = vpack.c.bf16 %v3856_v37, %v3853_v54  ;;  %v3812_v37 = vld [vmem:[#allocation6 + $0x310] sm:$0xff] }
0x1145   :  { %12240 = vmatpush1.bf16.msra.mxu1 %v12239_v53  ;;  %v3825_v53 = vld [vmem:[#allocation6 + $0x378] sm:$0xff] }
0x1146   :  { %12242 = vmatprep.subr.bf16.mxu1 %v12241_v17  ;;  %v15312_v17 = vpack.c.bf16 %v3826_v32, %v3823_v15  ;;  %v15314_v30 = vpack.c.bf16 %v3825_v53, %v3822_v50  ;;  %v3852_v15 = vld [vmem:[#allocation6 + $0x450] sm:$0xff] }
0x1149   :  { %12244 = vmatpush1.bf16.msra.mxu1 %v12243_v47  ;;  %v12273_v47 = vpack.c.bf16 %v3620_v51, %v3617_v40 }
0x114a   :  { %12246 = vmatprep.subr.bf16.mxu1 %v12245_v14  ;;  %v3832_v14 = vld [vmem:[#allocation6 + $0x3b0] sm:$0xff] }
0x114b   :  { %v15317_v41 = vpack.c.bf16 %v3832_v14, %v3829_v58 }
0x114d   :  { %12248 = vmatpush1.bf16.msra.mxu1 %v12247_v61  ;;  %v3626_v61 = vld [vmem:[#allocation4 + $0x418] sm:$0xff] }
0x114e   :  { %12250 = vmatprep.subr.bf16.mxu1 %v12249_v6  ;;  %v3835_v6 = vld [vmem:[#allocation6 + $0x3c8] sm:$0xff]  ;;  %v12277_v31 = vpack.c.bf16 %v3626_v61, %v3623_v33 }
0x1151   :  { %12252 = vmatpush1.bf16.msra.mxu1 %v12251_v3  ;;  %v15323_v3 = vpack.c.bf16 %v3838_v19, %v3835_v6 }
0x1152   :  { %12254 = vmatprep.subr.bf16.mxu1 %v12253_v24  ;;  %v3837_v24 = vld [vmem:[#allocation6 + $0x3d8] sm:$0xff] }
0x1153   :  { %v15326_v45 = vpack.c.bf16 %v3837_v24, %v3834_v8 }
0x1155   :  { %12256 = vmatpush1.bf16.msra.mxu1 %v12255_v29  ;;  %v3841_v29 = vld [vmem:[#allocation6 + $0x3f8] sm:$0xff] }
0x1156   :  { %12290 = vmatprep.subr.bf16.mxu1 %v15300_v2  ;;  %v15329_v10 = vpack.c.bf16 %v3844_v57, %v3841_v29 }
0x1158   :  { %3722 = vmatmul.mubr.f32.vlgmr.msra.gmra.mrb[40].mxu1 %v3555_v52  ;;  %v12265_v52 = vpack.c.bf16 %v3608_v56, %v3605_v38  ;;  %v3847_v38 = vld [vmem:[#allocation6 + $0x428] sm:$0xff]  ;;  %v3850_v56 = vld [vmem:[#allocation6 + $0x440] sm:$0xff] }
0x1159   :  { %3727 = vmatprep.mubr.f32.mxu1 %v14255_v7  ;;  %12292 = vmatpush1.bf16.msra.mxu1 %v15302_v5 }
0x115a   :  { %12266 = vmatprep.subr.bf16.mxu0 %v12265_v52  ;;  %12294 = vmatprep.subr.bf16.mxu1 %v15306_v59 }
0x115b   :  { %12268 = vmatpush3.bf16.msra.mxu0 %v12265_v52  ;;  %v15336_v52 = vpack.c.bf16 %v3850_v56, %v3847_v38 }
0x115c   :  { %12270 = vmatprep.subr.bf16.mxu0 %v12269_v12 }
0x115d   :  { %12296 = vmatpush1.bf16.msra.mxu1 %v15308_v34 }
0x115e   :  { %12298 = vmatprep.subr.bf16.mxu1 %v15312_v17 }
0x115f   :  { %12272 = vmatpush3.bf16.msra.mxu0 %v12269_v12  ;;  %v3855_v12 = vld [vmem:[#allocation6 + $0x468] sm:$0xff] }
0x1160   :  { %12274 = vmatprep.subr.bf16.mxu0 %v12273_v47  ;;  %v15345_v32 = vpack.c.bf16 %v3855_v12, %v3852_v15  ;;  %v3815_v15 = vld [vmem:[#allocation6 + $0x328] sm:$0xff] }
0x1161   :  { %12300 = vmatpush1.bf16.msra.mxu1 %v15314_v30  ;;  %v15369_v12 = vpack.c.bf16 %v3815_v15, %v3812_v37 }
0x1162   :  { %12302 = vmatprep.subr.bf16.mxu1 %v15317_v41 }
0x1163   :  { %12276 = vmatpush3.bf16.msra.mxu0 %v12273_v47 }
0x1164   :  { %12278 = vmatprep.subr.bf16.mxu0 %v12277_v31 }
0x1165   :  { %12304 = vmatpush1.bf16.msra.mxu1 %v15320_v16 }
0x1166   :  { %12306 = vmatprep.subr.bf16.mxu1 %v15323_v3 }
0x1167   :  { %12280 = vmatpush3.bf16.msra.mxu0 %v12277_v31 }
0x1168   :  { %12282 = vmatprep.subr.bf16.mxu0 %v12281_v0 }
0x1169   :  { %12308 = vmatpush1.bf16.msra.mxu1 %v15326_v45 }
0x116a   :  { %12310 = vmatprep.subr.bf16.mxu1 %v15329_v10 }
0x116b   :  { %12284 = vmatpush3.bf16.msra.mxu0 %v12281_v0 }
0x116c   :  { %12286 = vmatprep.subr.bf16.mxu0 %v12285_v39 }
0x116d   :  { %12312 = vmatpush1.bf16.msra.mxu1 %v15332_v9 }
0x116e   :  { %12314 = vmatprep.subr.bf16.mxu1 %v15336_v52 }
0x116f   :  { %12288 = vmatpush3.bf16.msra.mxu0 %v12285_v39 }
0x1170   :  { %12321 = vmatprep.subr.bf16.mxu0 %v14256_v26 }
0x1171   :  { %12316 = vmatpush1.bf16.msra.mxu1 %v15338_v55 }
0x1172   :  { %12318 = vmatprep.subr.bf16.mxu1 %v15343_v44 }
0x1175   :  { %12320 = vmatpush1.bf16.msra.mxu1 %v15345_v32 }
0x1176   :  { %12346 = vmatprep.subr.bf16.mxu1 %v15300_v2 }
0x120b   :  { %v3447_v50 = vpop.f32.mrb[38].mxu1  ;;  %v3518_v53 = vpop.f32.mrb[36].mxu0 }
0x120c   :  { %v3448_v40 = vadd.f32 %v3447_v50, %v14983_v21  ;;  %v3449_v51 = vpop.f32.mrb[39].mxu1  ;;  %v10251_v58 = vpop.f32.mrb[37].mxu0  ;;  %v3519_v21 = vadd.f32 %v3518_v53, %v15004_v27  ;;  %v8779_v27 = vld [vmem:[%s16769_s7 + $0x4] sm:$0x3]  ;;  %v3818_v50 = vld [vmem:[#allocation6 + $0x340] sm:$0xff]  ;;  %v3821_v53 = vld [vmem:[#allocation6 + $0x358] sm:$0xff] }
0x120d   :  { %v3450_v47 = vadd.f32 %v3449_v51, %v14986_v23  ;;  %v3562_v38 = vrot.slane %v8779_v27, 2  ;;  %v15373_v51 = vpack.c.bf16 %v3821_v53, %v3818_v50  ;;  %v3824_v58 = vld [vmem:[#allocation6 + $0x370] sm:$0xff] }
0x120e   :  { %v3523_v14 = vrot.slane %v3448_v40, 2  ;;  %v3543_v35 = vrot.slane %v3519_v21, 2  ;;  %v3848_v21 = vld [vmem:[#allocation6 + $0x430] sm:$0xff] }
0x120f   :  { %v3533_v28 = vrot.slane %v3450_v47, 2  ;;  %v3827_v47 = vld [vmem:[#allocation6 + $0x388] sm:$0xff] }
0x1210   :  { %v3525_v46 = vadd.f32 %v3523_v14, %v15190_v18  ;;  %v3550_v18 = vrot.slane %v15294_v13, 6  ;;  %v3563_v13 = vrot.slane %v8780_v20, 2  ;;  %v15380_v14 = vpack.c.bf16 %v3827_v47, %v3824_v58 }
0x1211   :  { %v3535_v33 = vadd.f32 %v3533_v28, %v15197_v11  ;;  %v3830_v28 = vld [vmem:[#allocation6 + $0x3a0] sm:$0xff] }
0x1212   :  { %v8777_v61 = vmul.f32 -1.442695, %v3525_v46  ;;  %v3833_v46 = vld [vmem:[#allocation6 + $0x3b8] sm:$0xff] }
0x1213   :  { %v8778_v6 = vmul.f32 -1.442695, %v3535_v33  ;;  %v15387_v33 = vpack.c.bf16 %v3833_v46, %v3830_v28 }
0x1214   :  { %13923 = vpow2.f32 %v8777_v61  ;;  %v3836_v61 = vld [vmem:[#allocation6 + $0x3d0] sm:$0xff] }
0x1215   :  { %13925 = vpow2.f32 %v8778_v6  ;;  %v3839_v6 = vld [vmem:[#allocation6 + $0x3e8] sm:$0xff] }
0x121e   :  { %v13924_v31 = vpop.eup %13923 }
0x121f   :  { %v13926_v19 = vpop.eup %13925  ;;  %v3529_v8 = vadd.f32 1.0, %v13924_v31  ;;  %v15393_v31 = vpack.c.bf16 %v3839_v6, %v3836_v61 }
0x1220   :  { %v3539_v24 = vadd.f32 1.0, %v13926_v19  ;;  %v3842_v19 = vld [vmem:[#allocation6 + $0x400] sm:$0xff] }
0x1221   :  { %13927 = vrcp.f32 %v3529_v8  ;;  %v3845_v8 = vld [vmem:[#allocation6 + $0x418] sm:$0xff] }
0x1222   :  { %13929 = vrcp.f32 %v3539_v24  ;;  %v15399_v24 = vpack.c.bf16 %v3845_v8, %v3842_v19 }
0x122b   :  { %v13928_v23 = vpop.eup %13927  ;;  %v15355_v63 = vpop.f32.mrb[40].mxu1 }
0x122c   :  { %v13930_v29 = vpop.eup %13929  ;;  %v3545_v11 = vmul.f32 %v13928_v23, %v3543_v35  ;;  %v15358_v57 = vpop.f32.mrb[41].mxu1  ;;  %v3851_v35 = vld [vmem:[#allocation6 + $0x448] sm:$0xff] }
0x122d   :  { %v3552_v0 = vmul.f32 %v13930_v29, %v3550_v18  ;;  %v3548_v62 = vsub.f32 1.0, %v13930_v29  ;;  %v15405_v23 = vpack.c.bf16 %v3851_v35, %v3848_v21  ;;  %v3854_v18 = vld [vmem:[#allocation6 + $0x460] sm:$0xff]  ;;  %v3857_v29 = vld [vmem:[#allocation6 + $0x478] sm:$0xff] }
0x122e   :  { %v3546_v1 = vadd.f32 %v3545_v11, %v14978_v4  ;;  %v15411_v11 = vpack.c.bf16 %v3857_v29, %v3854_v18 }
0x1230   :  { %13931 = vtanh.f32 %v3546_v1  ;;  %v1865_v1 = vadd.s32 6, %v14371_v60  ;;  %v8781_v60 = vld [vmem:[%s16766_s4 + $0x6] sm:$0x7] }
0x1231   :  { %v15473_v58 = vrot.slane %v8781_v60, %v14515_v49 }
0x1232   :  { %v15447_v27 = vsub.s32 %v1865_v1, %v14502_v42  ;;  %v3653_v42 = vrot.slane %v8781_v60, %v14505_v43 }
0x1233   :  { %v15484_v8 = vadd.f32 %v15358_v57, %v15473_v58 }
0x123a   :  { %v13932_v36 = vpop.eup %13931 }
0x123b   :  { %v3549_v39 = vmul.f32 %v13932_v36, %v3548_v62 }
0x123d   :  { %v3553_v56 = vadd.f32 %v3552_v0, %v3549_v39  ;;  %v15441_v0 = vpop.xlane.xlu1 %1858 }
0x123f   :  { %v3567_v22 = vmul.f32 %v3563_v13, %v3553_v56  ;;  %3554 = vst [vmem:[#allocation2 + $0x8] sm:$0xc0] %v3553_v56  ;;  %v3566_v25 = vmul.f32 %v3562_v38, %v3553_v56 }
0x1241   :  { %v3571_v4 = vsel %vm1856_vm4, %v3567_v22, 0.0  ;;  %v3568_v54 = vsel %vm1856_vm4, %v3566_v25, 0.0  ;;  %v15444_v20 = vpop.xlane.xlu1 %1861  ;;  %v3859_v22 = vld [vmem:[#allocation8 + $0x6] sm:$0x7] }
0x1242   :  { %3572 = vadd.xlane.f32.xlu1 %v3571_v4  ;;  %3569 = vadd.xlane.f32.xlu0 %v3568_v54  ;;  %v15460_v54 = vrot.slane %v8781_v60, %v14512_v48  ;;  %v15467_v53 = vrot.slane %v3859_v22, %v14512_v48 }
0x1244   :  { %v15477_v28 = vadd.f32 %v15355_v63, %v15460_v54 }
0x1246   :  { %v3556_v40 = vld [vmem:[#allocation2 + $0x8] sm:$0xff] }
0x1247   :  { %3728 = vmatmul.mubr.f32.gmra.mrb[42].mxu1 %v3556_v40  ;;  %10285 = vmatmul.mubr.f32.vlgmr.msra.gmra.mrb[38].mxu0 %v3556_v40  ;;  %v15470_v40 = vrot.slane %v3859_v22, %v14515_v49 }
0x1248   :  { %12323 = vmatpush3.bf16.msra.mxu0 %v15369_v12  ;;  %3940 = vmatprep.mubr.f32.mxu1 %v14255_v7 }
0x1249   :  { %12324 = vmatprep.subr.bf16.mxu0 %v14256_v26  ;;  %10319 = vmatprep.mubr.msk.f32.mxu0 %vm14257_vm3, %v14255_v7 }
0x124b   :  { %3941 = vmatmul.mubr.f32.vlgmr.msra.gmra.mrb[44].mxu1 %v14255_v7 }
0x124c   :  { %12326 = vmatpush3.bf16.msra.mxu0 %v15373_v51  ;;  %12348 = vmatpush1.bf16.msra.mxu1 %v15302_v5 }
0x124d   :  { %12327 = vmatprep.subr.bf16.mxu0 %v14256_v26  ;;  %12350 = vmatprep.subr.bf16.mxu1 %v15306_v59 }
0x124e   :  { %4103 = vmatprep.mubr.f32.mxu1 %v14255_v7 }
0x1250   :  { %12329 = vmatpush3.bf16.msra.mxu0 %v15380_v14  ;;  %12352 = vmatpush1.bf16.msra.mxu1 %v15308_v34 }
0x1251   :  { %12330 = vmatprep.subr.bf16.mxu0 %v14256_v26  ;;  %12354 = vmatprep.subr.bf16.mxu1 %v15312_v17 }
0x1254   :  { %12332 = vmatpush3.bf16.msra.mxu0 %v15387_v33  ;;  %12356 = vmatpush1.bf16.msra.mxu1 %v15314_v30 }
0x1255   :  { %12333 = vmatprep.subr.bf16.mxu0 %v14256_v26  ;;  %12358 = vmatprep.subr.bf16.mxu1 %v15317_v41 }
0x1258   :  { %12335 = vmatpush3.bf16.msra.mxu0 %v15393_v31  ;;  %12360 = vmatpush1.bf16.msra.mxu1 %v15320_v16 }
0x1259   :  { %12336 = vmatprep.subr.bf16.mxu0 %v14256_v26  ;;  %12362 = vmatprep.subr.bf16.mxu1 %v15323_v3 }
0x125c   :  { %12338 = vmatpush3.bf16.msra.mxu0 %v15399_v24  ;;  %12364 = vmatpush1.bf16.msra.mxu1 %v15326_v45 }
0x125d   :  { %12339 = vmatprep.subr.bf16.mxu0 %v14256_v26  ;;  %12366 = vmatprep.subr.bf16.mxu1 %v15329_v10 }
0x1260   :  { %12341 = vmatpush3.bf16.msra.mxu0 %v15405_v23  ;;  %12368 = vmatpush1.bf16.msra.mxu1 %v15332_v9 }
0x1261   :  { %12342 = vmatprep.subr.bf16.mxu0 %v14256_v26  ;;  %12370 = vmatprep.subr.bf16.mxu1 %v15336_v52 }
0x1264   :  { %12344 = vmatpush3.bf16.msra.mxu0 %v15411_v11  ;;  %12372 = vmatpush1.bf16.msra.mxu1 %v15338_v55 }
0x1265   :  { %12377 = vmatprep.subr.bf16.mxu0 %v14256_v26  ;;  %12374 = vmatprep.subr.bf16.mxu1 %v15343_v44 }
0x1267   :  { %10320 = vmatmul.mubr.f32.vlgmr.msra.gmra.mrb[40].mxu0 %v14255_v7 }
0x1268   :  { %12379 = vmatpush3.bf16.msra.mxu0 %v15369_v12  ;;  %12376 = vmatpush1.bf16.msra.mxu1 %v15345_v32 }
0x1269   :  { %12380 = vmatprep.subr.bf16.mxu0 %v14256_v26  ;;  %10354 = vmatprep.mubr.msk.f32.mxu0 %vm14257_vm3, %v14255_v7 }
0x126a   :  { %12402 = vmatprep.subr.bf16.mxu1 %v15300_v2 }
0x126c   :  { %12382 = vmatpush3.bf16.msra.mxu0 %v15373_v51 }
0x126d   :  { %12383 = vmatprep.subr.bf16.mxu0 %v14256_v26 }
0x1270   :  { %12385 = vmatpush3.bf16.msra.mxu0 %v15380_v14 }
0x1271   :  { %12386 = vmatprep.subr.bf16.mxu0 %v14256_v26 }
0x1274   :  { %12388 = vmatpush3.bf16.msra.mxu0 %v15387_v33 }
0x1275   :  { %12389 = vmatprep.subr.bf16.mxu0 %v14256_v26 }
0x1278   :  { %12391 = vmatpush3.bf16.msra.mxu0 %v15393_v31 }
0x1279   :  { %12392 = vmatprep.subr.bf16.mxu0 %v14256_v26 }
0x127c   :  { %12394 = vmatpush3.bf16.msra.mxu0 %v15399_v24 }
0x127d   :  { %12395 = vmatprep.subr.bf16.mxu0 %v14256_v26 }
0x1280   :  { %12397 = vmatpush3.bf16.msra.mxu0 %v15405_v23 }
0x1281   :  { %12398 = vmatprep.subr.bf16.mxu0 %v14256_v26 }
0x1284   :  { %12400 = vmatpush3.bf16.msra.mxu0 %v15411_v11 }
0x1285   :  { %12433 = vmatprep.subr.bf16.mxu0 %v14256_v26 }
0x12cf   :  { %v3573_v62 = vpop.xlane.xlu1 %3572  ;;  %v3570_v36 = vpop.xlane.xlu0 %3569 }
0x12d0   :  { %v3583_v39 = vrot.slane %v3573_v62, %v15447_v27  ;;  %v3579_v13 = vrot.slane %v3570_v36, %v15447_v27  ;;  %v15488_v62 = vrot.slane %v3859_v22, %v14505_v43 }
0x12d2   :  { %v3584_v38 = vsel %vm1874_vm5, %v3583_v39, %v3579_v13 }
0x12d3   :  { %v3586_v56 = vsel %vm1877_vm6, %v3584_v38, 0.0 }
0x12d4   :  { %3587 = vadd.xlane.f32.xlu0 %v3586_v56 }
0x131a   :  { %v15457_v25 = vpop.f32.mrb[42].mxu1  ;;  %v10286_v4 = vpop.f32.mrb[38].mxu0 }
0x131b   :  { %v15462_v37 = vadd.f32 %v10286_v4, %v3653_v42  ;;  %v15464_v15 = vpop.f32.mrb[43].mxu1  ;;  %v3800_v50 = vpop.f32.mrb[39].mxu0 }
0x131c   :  { %v15491_v56 = vadd.f32 %v3800_v50, %v3653_v42 }
0x131e   :  { %v3942_v47 = vpop.f32.mrb[44].mxu1 }
0x131f   :  { %v3943_v46 = vadd.f32 %v3942_v47, %v15467_v53  ;;  %v3944_v61 = vpop.f32.mrb[45].mxu1 }
0x1320   :  { %v3945_v6 = vadd.f32 %v3944_v61, %v15470_v40 }
0x1321   :  { %v4017_v19 = vadd.f32 %v3943_v46, %v15477_v28 }
0x1322   :  { %v4024_v35 = vadd.f32 %v3945_v6, %v15484_v8 }
0x1323   :  { %v8782_v21 = vmul.f32 -1.442695, %v4017_v19 }
0x1324   :  { %v8783_v18 = vmul.f32 -1.442695, %v4024_v35 }
0x1325   :  { %13933 = vpow2.f32 %v8782_v21 }
0x1326   :  { %13935 = vpow2.f32 %v8783_v18 }
0x132f   :  { %v13934_v29 = vpop.eup %13933 }
0x1330   :  { %v4021_v63 = vadd.f32 1.0, %v13934_v29  ;;  %v13936_v1 = vpop.eup %13935 }
0x1331   :  { %v4028_v36 = vadd.f32 1.0, %v13936_v1 }
0x1332   :  { %13937 = vrcp.f32 %v4021_v63 }
0x1333   :  { %13939 = vrcp.f32 %v4028_v36 }
0x133a   :  { %v4013_v39 = vpop.f32.mrb[40].mxu0 }
0x133b   :  { %v4014_v13 = vadd.f32 %v4013_v39, %v15488_v62  ;;  %v10321_v38 = vpop.f32.mrb[41].mxu0 }
0x133c   :  { %v13938_v57 = vpop.eup %13937 }
0x133d   :  { %v4031_v60 = vmul.f32 %v13938_v57, %v4014_v13  ;;  %v13940_v47 = vpop.eup %13939 }
0x133e   :  { %v4034_v46 = vsub.f32 1.0, %v13940_v47  ;;  %v4036_v19 = vmul.f32 0.0, %v13940_v47 }
0x133f   :  { %v4032_v4 = vadd.f32 %v4031_v60, %v15491_v56 }
0x1341   :  { %13941 = vtanh.f32 %v4032_v4 }
0x134b   :  { %v13942_v61 = vpop.eup %13941 }
0x134c   :  { %v4035_v6 = vmul.f32 %v13942_v61, %v4034_v46 }
0x134e   :  { %v15494_v22 = vadd.f32 %v4036_v19, %v4035_v6 }
0x1350   :  { %4038 = vst [vmem:[#allocation2] sm:$0x3] %v15494_v22  ;;  %4104 = vmatmul.mubr.f32.vlgmr.msra.gmra.mrb[46].mxu1 %v15494_v22  ;;  %10355 = vmatmul.mubr.f32.vlgmr.msra.gmra.mrb[42].mxu0 %v15494_v22  ;;  %v4209_v19 = vrot.slane %v15494_v22, 6 }
0x1351   :  { %12404 = vmatpush1.bf16.msra.mxu1 %v15302_v5  ;;  %12435 = vmatpush3.bf16.msra.mxu0 %v15369_v12 }
0x1352   :  { %12406 = vmatprep.subr.bf16.mxu1 %v15306_v59  ;;  %12436 = vmatprep.subr.bf16.mxu0 %v14256_v26 }
0x1353   :  { %4281 = vmatprep.mubr.f32.mxu1 %v14255_v7  ;;  %10389 = vmatprep.mubr.msk.f32.mxu0 %vm14257_vm3, %v14255_v7 }
0x1355   :  { %12408 = vmatpush1.bf16.msra.mxu1 %v15308_v34  ;;  %12438 = vmatpush3.bf16.msra.mxu0 %v15373_v51 }
0x1356   :  { %12410 = vmatprep.subr.bf16.mxu1 %v15312_v17  ;;  %12439 = vmatprep.subr.bf16.mxu0 %v14256_v26 }
0x1359   :  { %12412 = vmatpush1.bf16.msra.mxu1 %v15314_v30  ;;  %12441 = vmatpush3.bf16.msra.mxu0 %v15380_v14 }
0x135a   :  { %12414 = vmatprep.subr.bf16.mxu1 %v15317_v41  ;;  %12442 = vmatprep.subr.bf16.mxu0 %v14256_v26 }
0x135d   :  { %12416 = vmatpush1.bf16.msra.mxu1 %v15320_v16  ;;  %12444 = vmatpush3.bf16.msra.mxu0 %v15387_v33 }
0x135e   :  { %12418 = vmatprep.subr.bf16.mxu1 %v15323_v3  ;;  %12445 = vmatprep.subr.bf16.mxu0 %v14256_v26 }
0x1361   :  { %12420 = vmatpush1.bf16.msra.mxu1 %v15326_v45  ;;  %12447 = vmatpush3.bf16.msra.mxu0 %v15393_v31 }
0x1362   :  { %12422 = vmatprep.subr.bf16.mxu1 %v15329_v10  ;;  %12448 = vmatprep.subr.bf16.mxu0 %v14256_v26 }
0x1365   :  { %12424 = vmatpush1.bf16.msra.mxu1 %v15332_v9  ;;  %12450 = vmatpush3.bf16.msra.mxu0 %v15399_v24 }
0x1366   :  { %12426 = vmatprep.subr.bf16.mxu1 %v15336_v52  ;;  %12451 = vmatprep.subr.bf16.mxu0 %v14256_v26 }
0x1369   :  { %12428 = vmatpush1.bf16.msra.mxu1 %v15338_v55  ;;  %12453 = vmatpush3.bf16.msra.mxu0 %v15405_v23 }
0x136a   :  { %12430 = vmatprep.subr.bf16.mxu1 %v15343_v44  ;;  %12454 = vmatprep.subr.bf16.mxu0 %v14256_v26 }
0x136d   :  { %12432 = vmatpush1.bf16.msra.mxu1 %v15345_v32  ;;  %12456 = vmatpush3.bf16.msra.mxu0 %v15411_v11 }
0x136e   :  { %12458 = vmatprep.subr.bf16.mxu1 %v15300_v2  ;;  %12489 = vmatprep.subr.bf16.mxu0 %v14256_v26 }
0x1423   :  { %v4105_v42 = vpop.f32.mrb[46].mxu1  ;;  %v4176_v50 = vpop.f32.mrb[42].mxu0 }
0x1424   :  { %v4106_v21 = vadd.f32 %v4105_v42, %v15467_v53  ;;  %v4107_v35 = vpop.f32.mrb[47].mxu1  ;;  %v10356_v18 = vpop.f32.mrb[43].mxu0  ;;  %v4177_v46 = vadd.f32 %v4176_v50, %v15488_v62 }
0x1425   :  { %v4108_v29 = vadd.f32 %v4107_v35, %v15470_v40 }
0x1426   :  { %v4181_v63 = vrot.slane %v4106_v21, 6  ;;  %v4201_v61 = vrot.slane %v4177_v46, 6 }
0x1427   :  { %v4191_v1 = vrot.slane %v4108_v29, 6 }
0x1428   :  { %v4183_v36 = vadd.f32 %v4181_v63, %v15477_v28 }
0x1429   :  { %v4193_v39 = vadd.f32 %v4191_v1, %v15484_v8 }
0x142a   :  { %v8784_v13 = vmul.f32 -1.442695, %v4183_v36 }
0x142b   :  { %v8785_v38 = vmul.f32 -1.442695, %v4193_v39 }
0x142c   :  { %13943 = vpow2.f32 %v8784_v13 }
0x142d   :  { %13945 = vpow2.f32 %v8785_v38 }
0x1436   :  { %v13944_v57 = vpop.eup %13943 }
0x1437   :  { %v13946_v60 = vpop.eup %13945  ;;  %v4187_v4 = vadd.f32 1.0, %v13944_v57 }
0x1438   :  { %v4197_v47 = vadd.f32 1.0, %v13946_v60 }
0x1439   :  { %13947 = vrcp.f32 %v4187_v4 }
0x143a   :  { %13949 = vrcp.f32 %v4197_v47 }
0x1443   :  { %v13948_v6 = vpop.eup %13947 }
0x1444   :  { %v13950_v42 = vpop.eup %13949  ;;  %v4203_v21 = vmul.f32 %v13948_v6, %v4201_v61 }
0x1445   :  { %v4211_v35 = vmul.f32 %v13950_v42, %v4209_v19  ;;  %v4206_v29 = vsub.f32 1.0, %v13950_v42 }
0x1446   :  { %v4204_v18 = vadd.f32 %v4203_v21, %v15491_v56 }
0x1448   :  { %13951 = vtanh.f32 %v4204_v18 }
0x1452   :  { %v13952_v63 = vpop.eup %13951 }
0x1453   :  { %v4207_v1 = vmul.f32 %v13952_v63, %v4206_v29 }
0x1455   :  { %v15541_v36 = vadd.f32 %v4211_v35, %v4207_v1 }
0x1457   :  { %4213 = vst [vmem:[#allocation2] sm:$0xc] %v15541_v36  ;;  %v4215_v39 = vrot.slane %v15541_v36, 2 }
0x1459   :  { %4282 = vmatmul.mubr.f32.vlgmr.msra.gmra.mrb[48].mxu1 %v4215_v39  ;;  %10390 = vmatmul.mubr.f32.vlgmr.msra.gmra.mrb[44].mxu0 %v4215_v39  ;;  %v4386_v39 = vrot.slane %v15541_v36, 6 }
0x145a   :  { %12460 = vmatpush1.bf16.msra.mxu1 %v15302_v5  ;;  %12491 = vmatpush3.bf16.msra.mxu0 %v15369_v12 }
0x145b   :  { %12462 = vmatprep.subr.bf16.mxu1 %v15306_v59  ;;  %12492 = vmatprep.subr.bf16.mxu0 %v14256_v26 }
0x145c   :  { %4458 = vmatprep.mubr.f32.mxu1 %v14255_v7  ;;  %10424 = vmatprep.mubr.msk.f32.mxu0 %vm14257_vm3, %v14255_v7 }
0x145e   :  { %12464 = vmatpush1.bf16.msra.mxu1 %v15308_v34  ;;  %12494 = vmatpush3.bf16.msra.mxu0 %v15373_v51 }
0x145f   :  { %12466 = vmatprep.subr.bf16.mxu1 %v15312_v17  ;;  %12495 = vmatprep.subr.bf16.mxu0 %v14256_v26 }
0x1462   :  { %12468 = vmatpush1.bf16.msra.mxu1 %v15314_v30  ;;  %12497 = vmatpush3.bf16.msra.mxu0 %v15380_v14 }
0x1463   :  { %12470 = vmatprep.subr.bf16.mxu1 %v15317_v41  ;;  %12498 = vmatprep.subr.bf16.mxu0 %v14256_v26 }
0x1466   :  { %12472 = vmatpush1.bf16.msra.mxu1 %v15320_v16  ;;  %12500 = vmatpush3.bf16.msra.mxu0 %v15387_v33 }
0x1467   :  { %12474 = vmatprep.subr.bf16.mxu1 %v15323_v3  ;;  %12501 = vmatprep.subr.bf16.mxu0 %v14256_v26 }
0x146a   :  { %12476 = vmatpush1.bf16.msra.mxu1 %v15326_v45  ;;  %12503 = vmatpush3.bf16.msra.mxu0 %v15393_v31 }
0x146b   :  { %12478 = vmatprep.subr.bf16.mxu1 %v15329_v10  ;;  %12504 = vmatprep.subr.bf16.mxu0 %v14256_v26 }
0x146e   :  { %12480 = vmatpush1.bf16.msra.mxu1 %v15332_v9  ;;  %12506 = vmatpush3.bf16.msra.mxu0 %v15399_v24 }
0x146f   :  { %12482 = vmatprep.subr.bf16.mxu1 %v15336_v52  ;;  %12507 = vmatprep.subr.bf16.mxu0 %v14256_v26 }
0x1472   :  { %12484 = vmatpush1.bf16.msra.mxu1 %v15338_v55  ;;  %12509 = vmatpush3.bf16.msra.mxu0 %v15405_v23 }
0x1473   :  { %12486 = vmatprep.subr.bf16.mxu1 %v15343_v44  ;;  %12510 = vmatprep.subr.bf16.mxu0 %v14256_v26 }
0x1476   :  { %12488 = vmatpush1.bf16.msra.mxu1 %v15345_v32  ;;  %12512 = vmatpush3.bf16.msra.mxu0 %v15411_v11 }
0x1477   :  { %12514 = vmatprep.subr.bf16.mxu1 %v15300_v2  ;;  %12545 = vmatprep.subr.bf16.mxu0 %v14256_v26 }
0x152c   :  { %v4283_v22 = vpop.f32.mrb[48].mxu1  ;;  %v4354_v50 = vpop.f32.mrb[44].mxu0 }
0x152d   :  { %v4284_v13 = vadd.f32 %v4283_v22, %v15467_v53  ;;  %v4285_v38 = vpop.f32.mrb[49].mxu1  ;;  %v10391_v57 = vpop.f32.mrb[45].mxu0  ;;  %v4355_v29 = vadd.f32 %v4354_v50, %v15488_v62 }
0x152e   :  { %v4286_v60 = vadd.f32 %v4285_v38, %v15470_v40 }
0x152f   :  { %v4359_v4 = vrot.slane %v4284_v13, 4  ;;  %v4379_v63 = vrot.slane %v4355_v29, 4 }
0x1530   :  { %v4369_v47 = vrot.slane %v4286_v60, 4 }
0x1531   :  { %v4361_v46 = vadd.f32 %v4359_v4, %v15477_v28 }
0x1532   :  { %v4371_v61 = vadd.f32 %v4369_v47, %v15484_v8 }
0x1533   :  { %v8786_v6 = vmul.f32 -1.442695, %v4361_v46 }
0x1534   :  { %v8787_v19 = vmul.f32 -1.442695, %v4371_v61 }
0x1535   :  { %13953 = vpow2.f32 %v8786_v6 }
0x1536   :  { %13955 = vpow2.f32 %v8787_v19 }
0x153f   :  { %v13954_v42 = vpop.eup %13953 }
0x1540   :  { %v13956_v21 = vpop.eup %13955  ;;  %v4365_v35 = vadd.f32 1.0, %v13954_v42 }
0x1541   :  { %v4375_v18 = vadd.f32 1.0, %v13956_v21 }
0x1542   :  { %13957 = vrcp.f32 %v4365_v35 }
0x1543   :  { %13959 = vrcp.f32 %v4375_v18 }
0x154c   :  { %v13958_v1 = vpop.eup %13957 }
0x154d   :  { %v13960_v22 = vpop.eup %13959  ;;  %v4381_v13 = vmul.f32 %v13958_v1, %v4379_v63 }
0x154e   :  { %v4388_v38 = vmul.f32 %v13960_v22, %v4386_v39  ;;  %v4384_v60 = vsub.f32 1.0, %v13960_v22 }
0x154f   :  { %v4382_v57 = vadd.f32 %v4381_v13, %v15491_v56 }
0x1551   :  { %13961 = vtanh.f32 %v4382_v57 }
0x155b   :  { %v13962_v4 = vpop.eup %13961 }
0x155c   :  { %v4385_v47 = vmul.f32 %v13962_v4, %v4384_v60 }
0x155e   :  { %v15587_v46 = vadd.f32 %v4388_v38, %v4385_v47 }
0x1560   :  { %4390 = vst [vmem:[#allocation2] sm:$0x30] %v15587_v46  ;;  %v4392_v61 = vrot.slane %v15587_v46, 4 }
0x1562   :  { %4459 = vmatmul.mubr.f32.vlgmr.msra.gmra.mrb[50].mxu1 %v4392_v61  ;;  %10425 = vmatmul.mubr.f32.vlgmr.msra.gmra.mrb[46].mxu0 %v4392_v61  ;;  %v4563_v61 = vrot.slane %v15587_v46, 6 }
0x1563   :  { %12516 = vmatpush1.bf16.msra.mxu1 %v15302_v5  ;;  %12547 = vmatpush3.bf16.msra.mxu0 %v15369_v12 }
0x1564   :  { %12518 = vmatprep.subr.bf16.mxu1 %v15306_v59  ;;  %12548 = vmatprep.subr.bf16.mxu0 %v14256_v26 }
0x1565   :  { %4635 = vmatprep.mubr.f32.mxu1 %v14255_v7  ;;  %10459 = vmatprep.mubr.msk.f32.mxu0 %vm14257_vm3, %v14255_v7 }
0x1567   :  { %12520 = vmatpush1.bf16.msra.mxu1 %v15308_v34  ;;  %12550 = vmatpush3.bf16.msra.mxu0 %v15373_v51 }
0x1568   :  { %12522 = vmatprep.subr.bf16.mxu1 %v15312_v17  ;;  %12551 = vmatprep.subr.bf16.mxu0 %v14256_v26 }
0x156b   :  { %12524 = vmatpush1.bf16.msra.mxu1 %v15314_v30  ;;  %12553 = vmatpush3.bf16.msra.mxu0 %v15380_v14 }
0x156c   :  { %12526 = vmatprep.subr.bf16.mxu1 %v15317_v41  ;;  %12554 = vmatprep.subr.bf16.mxu0 %v14256_v26 }
0x156f   :  { %12528 = vmatpush1.bf16.msra.mxu1 %v15320_v16  ;;  %12556 = vmatpush3.bf16.msra.mxu0 %v15387_v33 }
0x1570   :  { %12530 = vmatprep.subr.bf16.mxu1 %v15323_v3  ;;  %12557 = vmatprep.subr.bf16.mxu0 %v14256_v26 }
0x1573   :  { %12532 = vmatpush1.bf16.msra.mxu1 %v15326_v45  ;;  %12559 = vmatpush3.bf16.msra.mxu0 %v15393_v31 }
0x1574   :  { %12534 = vmatprep.subr.bf16.mxu1 %v15329_v10  ;;  %12560 = vmatprep.subr.bf16.mxu0 %v14256_v26 }
0x1577   :  { %12536 = vmatpush1.bf16.msra.mxu1 %v15332_v9  ;;  %12562 = vmatpush3.bf16.msra.mxu0 %v15399_v24 }
0x1578   :  { %12538 = vmatprep.subr.bf16.mxu1 %v15336_v52  ;;  %12563 = vmatprep.subr.bf16.mxu0 %v14256_v26 }
0x157b   :  { %12540 = vmatpush1.bf16.msra.mxu1 %v15338_v55  ;;  %12565 = vmatpush3.bf16.msra.mxu0 %v15405_v23 }
0x157c   :  { %12542 = vmatprep.subr.bf16.mxu1 %v15343_v44  ;;  %12566 = vmatprep.subr.bf16.mxu0 %v14256_v26 }
0x157f   :  { %12544 = vmatpush1.bf16.msra.mxu1 %v15345_v32  ;;  %12568 = vmatpush3.bf16.msra.mxu0 %v15411_v11 }
0x1580   :  { %12570 = vmatprep.subr.bf16.mxu1 %v15300_v2  ;;  %12601 = vmatprep.subr.bf16.mxu0 %v14256_v26 }
0x1635   :  { %v4460_v36 = vpop.f32.mrb[50].mxu1  ;;  %v4531_v50 = vpop.f32.mrb[46].mxu0 }
0x1636   :  { %v4461_v6 = vadd.f32 %v4460_v36, %v15467_v53  ;;  %v4462_v19 = vpop.f32.mrb[51].mxu1  ;;  %v10426_v42 = vpop.f32.mrb[47].mxu0  ;;  %v4532_v60 = vadd.f32 %v4531_v50, %v15488_v62  ;;  %v15674_v50 = vadd.f32 %v15457_v25, %v15460_v54 }
0x1637   :  { %v4463_v21 = vadd.f32 %v4462_v19, %v15470_v40 }
0x1638   :  { %v4536_v35 = vrot.slane %v4461_v6, 2  ;;  %v4556_v4 = vrot.slane %v4532_v60, 2 }
0x1639   :  { %v4546_v18 = vrot.slane %v4463_v21, 2 }
0x163a   :  { %v4538_v29 = vadd.f32 %v4536_v35, %v15477_v28 }
0x163b   :  { %v4548_v63 = vadd.f32 %v4546_v18, %v15484_v8 }
0x163c   :  { %v8788_v1 = vmul.f32 -1.442695, %v4538_v29 }
0x163d   :  { %v8789_v39 = vmul.f32 -1.442695, %v4548_v63 }
0x163e   :  { %13963 = vpow2.f32 %v8788_v1 }
0x163f   :  { %13965 = vpow2.f32 %v8789_v39 }
0x1648   :  { %v13964_v22 = vpop.eup %13963 }
0x1649   :  { %v13966_v13 = vpop.eup %13965  ;;  %v4542_v38 = vadd.f32 1.0, %v13964_v22 }
0x164a   :  { %v4552_v57 = vadd.f32 1.0, %v13966_v13  ;;  %v15681_v13 = vadd.f32 %v15464_v15, %v15473_v58 }
0x164b   :  { %13967 = vrcp.f32 %v4542_v38 }
0x164c   :  { %13969 = vrcp.f32 %v4552_v57 }
0x1655   :  { %v13968_v47 = vpop.eup %13967 }
0x1656   :  { %v13970_v36 = vpop.eup %13969  ;;  %v4558_v28 = vmul.f32 %v13968_v47, %v4556_v4 }
0x1657   :  { %v4565_v6 = vmul.f32 %v13970_v36, %v4563_v61  ;;  %v4561_v19 = vsub.f32 1.0, %v13970_v36 }
0x1658   :  { %v4559_v8 = vadd.f32 %v4558_v28, %v15491_v56 }
0x165a   :  { %13971 = vtanh.f32 %v4559_v8 }
0x1664   :  { %v13972_v42 = vpop.eup %13971 }
0x1665   :  { %v4562_v21 = vmul.f32 %v13972_v42, %v4561_v19 }
0x1667   :  { %v4566_v35 = vadd.f32 %v4565_v6, %v4562_v21 }
0x1669   :  { %4567 = vst [vmem:[#allocation2] sm:$0xc0] %v4566_v35  ;;  %v15633_v18 = vrot.slane %v4566_v35, 6 }
0x166b   :  { %4636 = vmatmul.mubr.f32.vlgmr.msra.gmra.mrb[52].mxu1 %v15633_v18  ;;  %10460 = vmatmul.mubr.f32.vlgmr.msra.gmra.mrb[48].mxu0 %v15633_v18 }
0x166c   :  { %12572 = vmatpush1.bf16.msra.mxu1 %v15302_v5  ;;  %12603 = vmatpush3.bf16.msra.mxu0 %v15369_v12 }
0x166d   :  { %12574 = vmatprep.subr.bf16.mxu1 %v15306_v59  ;;  %12604 = vmatprep.subr.bf16.mxu0 %v14256_v26 }
0x166e   :  { %4798 = vmatprep.mubr.f32.mxu1 %v14255_v7  ;;  %10494 = vmatprep.mubr.msk.f32.mxu0 %vm14257_vm3, %v14255_v7 }
0x1670   :  { %12576 = vmatpush1.bf16.msra.mxu1 %v15308_v34  ;;  %12606 = vmatpush3.bf16.msra.mxu0 %v15373_v51 }
0x1671   :  { %12578 = vmatprep.subr.bf16.mxu1 %v15312_v17  ;;  %12607 = vmatprep.subr.bf16.mxu0 %v14256_v26 }
0x1674   :  { %12580 = vmatpush1.bf16.msra.mxu1 %v15314_v30  ;;  %12609 = vmatpush3.bf16.msra.mxu0 %v15380_v14 }
0x1675   :  { %12582 = vmatprep.subr.bf16.mxu1 %v15317_v41  ;;  %12610 = vmatprep.subr.bf16.mxu0 %v14256_v26 }
0x1678   :  { %12584 = vmatpush1.bf16.msra.mxu1 %v15320_v16  ;;  %12612 = vmatpush3.bf16.msra.mxu0 %v15387_v33 }
0x1679   :  { %12586 = vmatprep.subr.bf16.mxu1 %v15323_v3  ;;  %12613 = vmatprep.subr.bf16.mxu0 %v14256_v26 }
0x167c   :  { %12588 = vmatpush1.bf16.msra.mxu1 %v15326_v45  ;;  %12615 = vmatpush3.bf16.msra.mxu0 %v15393_v31 }
0x167d   :  { %12590 = vmatprep.subr.bf16.mxu1 %v15329_v10  ;;  %12616 = vmatprep.subr.bf16.mxu0 %v14256_v26 }
0x1680   :  { %12592 = vmatpush1.bf16.msra.mxu1 %v15332_v9  ;;  %12618 = vmatpush3.bf16.msra.mxu0 %v15399_v24 }
0x1681   :  { %12594 = vmatprep.subr.bf16.mxu1 %v15336_v52  ;;  %12619 = vmatprep.subr.bf16.mxu0 %v14256_v26 }
0x1684   :  { %12596 = vmatpush1.bf16.msra.mxu1 %v15338_v55  ;;  %12621 = vmatpush3.bf16.msra.mxu0 %v15405_v23 }
0x1685   :  { %12598 = vmatprep.subr.bf16.mxu1 %v15343_v44  ;;  %12622 = vmatprep.subr.bf16.mxu0 %v14256_v26 }
0x1688   :  { %12600 = vmatpush1.bf16.msra.mxu1 %v15345_v32  ;;  %12624 = vmatpush3.bf16.msra.mxu0 %v15411_v11 }
0x1689   :  { %12626 = vmatprep.subr.bf16.mxu1 %v15300_v2  ;;  %12657 = vmatprep.subr.bf16.mxu0 %v14256_v26 }
0x173e   :  { %v4637_v56 = vpop.f32.mrb[52].mxu1  ;;  %v4708_v46 = vpop.f32.mrb[48].mxu0 }
0x173f   :  { %v4638_v29 = vadd.f32 %v4637_v56, %v15467_v53  ;;  %v4639_v63 = vpop.f32.mrb[53].mxu1  ;;  %v10461_v1 = vpop.f32.mrb[49].mxu0  ;;  %v4709_v61 = vadd.f32 %v4708_v46, %v15488_v62 }
0x1740   :  { %v4640_v39 = vadd.f32 %v4639_v63, %v15470_v40 }
0x1741   :  { %v4712_v22 = vadd.f32 %v4638_v29, %v15674_v50 }
0x1742   :  { %v4719_v57 = vadd.f32 %v4640_v39, %v15681_v13 }
0x1743   :  { %v8790_v38 = vmul.f32 -1.442695, %v4712_v22 }
0x1744   :  { %v8791_v60 = vmul.f32 -1.442695, %v4719_v57 }
0x1745   :  { %13973 = vpow2.f32 %v8790_v38 }
0x1746   :  { %13975 = vpow2.f32 %v8791_v60 }
0x174f   :  { %v13974_v25 = vpop.eup %13973 }
0x1750   :  { %v4716_v54 = vadd.f32 1.0, %v13974_v25  ;;  %v13976_v4 = vpop.eup %13975 }
0x1751   :  { %v4723_v47 = vadd.f32 1.0, %v13976_v4 }
0x1752   :  { %13977 = vrcp.f32 %v4716_v54 }
0x1753   :  { %13979 = vrcp.f32 %v4723_v47 }
0x175c   :  { %v13978_v36 = vpop.eup %13977 }
0x175d   :  { %v4726_v28 = vmul.f32 %v13978_v36, %v4709_v61  ;;  %v13980_v15 = vpop.eup %13979 }
0x175e   :  { %v4729_v58 = vsub.f32 1.0, %v13980_v15  ;;  %v4731_v42 = vmul.f32 %v13980_v15, %v15633_v18 }
0x175f   :  { %v4727_v6 = vadd.f32 %v4726_v28, %v15462_v37 }
0x1761   :  { %13981 = vtanh.f32 %v4727_v6 }
0x176b   :  { %v13982_v8 = vpop.eup %13981 }
0x176c   :  { %v4730_v19 = vmul.f32 %v13982_v8, %v4729_v58 }
0x176e   :  { %v15687_v21 = vadd.f32 %v4731_v42, %v4730_v19 }
0x1770   :  { %4733 = vst [vmem:[#allocation2 + $0x8] sm:$0x3] %v15687_v21  ;;  %4799 = vmatmul.mubr.f32.vlgmr.msra.gmra.mrb[54].mxu1 %v15687_v21  ;;  %10495 = vmatmul.mubr.f32.vlgmr.msra.gmra.mrb[50].mxu0 %v15687_v21  ;;  %v4904_v28 = vrot.slane %v15687_v21, 6 }
0x1771   :  { %12628 = vmatpush1.bf16.msra.mxu1 %v15302_v5  ;;  %12659 = vmatpush3.bf16.msra.mxu0 %v15369_v12 }
0x1772   :  { %12630 = vmatprep.subr.bf16.mxu1 %v15306_v59  ;;  %12660 = vmatprep.subr.bf16.mxu0 %v14256_v26 }
0x1773   :  { %4976 = vmatprep.mubr.f32.mxu1 %v14255_v7  ;;  %10529 = vmatprep.mubr.msk.f32.mxu0 %vm14257_vm3, %v14255_v7 }
0x1775   :  { %12632 = vmatpush1.bf16.msra.mxu1 %v15308_v34  ;;  %12662 = vmatpush3.bf16.msra.mxu0 %v15373_v51 }
0x1776   :  { %12634 = vmatprep.subr.bf16.mxu1 %v15312_v17  ;;  %12663 = vmatprep.subr.bf16.mxu0 %v14256_v26 }
0x1779   :  { %12636 = vmatpush1.bf16.msra.mxu1 %v15314_v30  ;;  %12665 = vmatpush3.bf16.msra.mxu0 %v15380_v14 }
0x177a   :  { %12638 = vmatprep.subr.bf16.mxu1 %v15317_v41  ;;  %12666 = vmatprep.subr.bf16.mxu0 %v14256_v26 }
0x177d   :  { %12640 = vmatpush1.bf16.msra.mxu1 %v15320_v16  ;;  %12668 = vmatpush3.bf16.msra.mxu0 %v15387_v33 }
0x177e   :  { %12642 = vmatprep.subr.bf16.mxu1 %v15323_v3  ;;  %12669 = vmatprep.subr.bf16.mxu0 %v14256_v26 }
0x1781   :  { %12644 = vmatpush1.bf16.msra.mxu1 %v15326_v45  ;;  %12671 = vmatpush3.bf16.msra.mxu0 %v15393_v31 }
0x1782   :  { %12646 = vmatprep.subr.bf16.mxu1 %v15329_v10  ;;  %12672 = vmatprep.subr.bf16.mxu0 %v14256_v26 }
0x1785   :  { %12648 = vmatpush1.bf16.msra.mxu1 %v15332_v9  ;;  %12674 = vmatpush3.bf16.msra.mxu0 %v15399_v24 }
0x1786   :  { %12650 = vmatprep.subr.bf16.mxu1 %v15336_v52  ;;  %12675 = vmatprep.subr.bf16.mxu0 %v14256_v26 }
0x1789   :  { %12652 = vmatpush1.bf16.msra.mxu1 %v15338_v55  ;;  %12677 = vmatpush3.bf16.msra.mxu0 %v15405_v23 }
0x178a   :  { %12654 = vmatprep.subr.bf16.mxu1 %v15343_v44  ;;  %12678 = vmatprep.subr.bf16.mxu0 %v14256_v26 }
0x178d   :  { %12656 = vmatpush1.bf16.msra.mxu1 %v15345_v32  ;;  %12680 = vmatpush3.bf16.msra.mxu0 %v15411_v11 }
0x178e   :  { %12682 = vmatprep.subr.bf16.mxu1 %v15300_v2  ;;  %12713 = vmatprep.subr.bf16.mxu0 %v14256_v26 }
0x1843   :  { %v4800_v35 = vpop.f32.mrb[54].mxu1  ;;  %v4871_v18 = vpop.f32.mrb[50].mxu0 }
0x1844   :  { %v4801_v56 = vadd.f32 %v4800_v35, %v15467_v53  ;;  %v4802_v46 = vpop.f32.mrb[55].mxu1  ;;  %v10496_v29 = vpop.f32.mrb[51].mxu0  ;;  %v4872_v47 = vadd.f32 %v4871_v18, %v15488_v62 }
0x1845   :  { %v4803_v63 = vadd.f32 %v4802_v46, %v15470_v40 }
0x1846   :  { %v4876_v1 = vrot.slane %v4801_v56, 6  ;;  %v4896_v61 = vrot.slane %v4872_v47, 6 }
0x1847   :  { %v4886_v39 = vrot.slane %v4803_v63, 6 }
0x1848   :  { %v4878_v22 = vadd.f32 %v4876_v1, %v15674_v50 }
0x1849   :  { %v4888_v38 = vadd.f32 %v4886_v39, %v15681_v13 }
0x184a   :  { %v8792_v57 = vmul.f32 -1.442695, %v4878_v22 }
0x184b   :  { %v8793_v60 = vmul.f32 -1.442695, %v4888_v38  ;;  %v5299_v38 = vld [vmem:[#allocation4 + $0x480] sm:$0xff] }
0x184c   :  { %13983 = vpow2.f32 %v8792_v57  ;;  %v5302_v57 = vld [vmem:[#allocation4 + $0x498] sm:$0xff] }
0x184d   :  { %13985 = vpow2.f32 %v8793_v60  ;;  %v5306_v60 = vld [vmem:[#allocation4 + $0x4b8] sm:$0xff] }
0x1856   :  { %v13984_v2 = vpop.eup %13983 }
0x1857   :  { %v13986_v25 = vpop.eup %13985  ;;  %v4882_v54 = vadd.f32 1.0, %v13984_v2  ;;  %v5309_v2 = vld [vmem:[#allocation4 + $0x4d0] sm:$0xff] }
0x1858   :  { %v4892_v4 = vadd.f32 1.0, %v13986_v25  ;;  %v12741_v47 = vpack.c.bf16 %v5309_v2, %v5306_v60  ;;  %v5310_v60 = vld [vmem:[#allocation4 + $0x4d8] sm:$0xff] }
0x1859   :  { %13987 = vrcp.f32 %v4882_v54  ;;  %v12739_v54 = vpack.c.bf16 %v5302_v57, %v5299_v38  ;;  %v5307_v57 = vld [vmem:[#allocation4 + $0x4c0] sm:$0xff] }
0x185a   :  { %13989 = vrcp.f32 %v4892_v4  ;;  %v12773_v2 = vpack.c.bf16 %v5310_v60, %v5307_v57  ;;  %v5548_v60 = vld [vmem:[#allocation6 + $0x570] sm:$0xff] }
0x1863   :  { %v13988_v36 = vpop.eup %13987 }
0x1864   :  { %v13990_v6 = vpop.eup %13989  ;;  %v4898_v15 = vmul.f32 %v13988_v36, %v4896_v61  ;;  %v5305_v61 = vld [vmem:[#allocation4 + $0x4b0] sm:$0xff]  ;;  %v5308_v36 = vld [vmem:[#allocation4 + $0x4c8] sm:$0xff] }
0x1865   :  { %v4906_v58 = vmul.f32 %v13990_v6, %v4904_v28  ;;  %v4901_v19 = vsub.f32 1.0, %v13990_v6  ;;  %v5312_v28 = vld [vmem:[#allocation4 + $0x4e8] sm:$0xff]  ;;  %v5315_v6 = vld [vmem:[#allocation4 + $0x500] sm:$0xff] }
0x1866   :  { %v4899_v8 = vadd.f32 %v4898_v15, %v15462_v37  ;;  %v5263_v15 = vld [vmem:[#allocation2] sm:$0xff] }
0x1868   :  { %13991 = vtanh.f32 %v4899_v8  ;;  %v12745_v8 = vpack.c.bf16 %v5315_v6, %v5312_v28  ;;  %v5313_v6 = vld [vmem:[#allocation4 + $0x4f0] sm:$0xff] }
0x1872   :  { %v13992_v42 = vpop.eup %13991 }
0x1873   :  { %v4902_v35 = vmul.f32 %v13992_v42, %v4901_v19  ;;  %v5311_v19 = vld [vmem:[#allocation4 + $0x4e0] sm:$0xff]  ;;  %v5314_v42 = vld [vmem:[#allocation4 + $0x4f8] sm:$0xff] }
0x1875   :  { %v15734_v56 = vadd.f32 %v4906_v58, %v4902_v35  ;;  %v12743_v58 = vpack.c.bf16 %v5308_v36, %v5305_v61  ;;  %v5318_v35 = vld [vmem:[#allocation4 + $0x518] sm:$0xff]  ;;  %v5518_v61 = vld [vmem:[#allocation6 + $0x480] sm:$0xff] }
0x1876   :  { %v5521_v36 = vld [vmem:[#allocation6 + $0x498] sm:$0xff] }
0x1877   :  { %4908 = vst [vmem:[#allocation2 + $0x8] sm:$0xc] %v15734_v56  ;;  %v4910_v46 = vrot.slane %v15734_v56, 2  ;;  %v15786_v28 = vpack.c.bf16 %v5521_v36, %v5518_v61  ;;  %v5346_v61 = vld [vmem:[#allocation4 + $0x5f8] sm:$0xff] }
0x1879   :  { %4977 = vmatmul.mubr.f32.vlgmr.msra.gmra.mrb[56].mxu1 %v4910_v46  ;;  %10530 = vmatmul.mubr.f32.vlgmr.msra.gmra.mrb[52].mxu0 %v4910_v46  ;;  %v12747_v46 = vpack.c.bf16 %v5314_v42, %v5311_v19  ;;  %v5528_v19 = vld [vmem:[#allocation6 + $0x4d0] sm:$0xff] }
0x187a   :  { %12684 = vmatpush1.bf16.msra.mxu1 %v15302_v5  ;;  %12715 = vmatpush3.bf16.msra.mxu0 %v15369_v12  ;;  %v5300_v5 = vld [vmem:[#allocation4 + $0x488] sm:$0xff] }
0x187b   :  { %12686 = vmatprep.subr.bf16.mxu1 %v15306_v59  ;;  %12716 = vmatprep.subr.bf16.mxu0 %v14256_v26  ;;  %v5303_v59 = vld [vmem:[#allocation4 + $0x4a0] sm:$0xff] }
0x187c   :  { %5153 = vmatprep.mubr.f32.mxu1 %v14255_v7  ;;  %10564 = vmatprep.mubr.msk.f32.mxu0 %vm14257_vm3, %v14255_v7 }
0x187e   :  { %12688 = vmatpush1.bf16.msra.mxu1 %v15308_v34  ;;  %12718 = vmatpush3.bf16.msra.mxu0 %v15373_v51  ;;  %v12737_v34 = vpack.c.bf16 %v5303_v59, %v5300_v5  ;;  %v5317_v59 = vld [vmem:[#allocation4 + $0x510] sm:$0xff] }
0x187f   :  { %12690 = vmatprep.subr.bf16.mxu1 %v15312_v17  ;;  %12719 = vmatprep.subr.bf16.mxu0 %v14256_v26 }
0x1882   :  { %12692 = vmatpush1.bf16.msra.mxu1 %v15314_v30  ;;  %12721 = vmatpush3.bf16.msra.mxu0 %v15380_v14 }
0x1883   :  { %12694 = vmatprep.subr.bf16.mxu1 %v15317_v41  ;;  %12722 = vmatprep.subr.bf16.mxu0 %v14256_v26 }
0x1886   :  { %12696 = vmatpush1.bf16.msra.mxu1 %v15320_v16  ;;  %12724 = vmatpush3.bf16.msra.mxu0 %v15387_v33 }
0x1887   :  { %12698 = vmatprep.subr.bf16.mxu1 %v15323_v3  ;;  %12725 = vmatprep.subr.bf16.mxu0 %v14256_v26 }
0x188a   :  { %12700 = vmatpush1.bf16.msra.mxu1 %v15326_v45  ;;  %12727 = vmatpush3.bf16.msra.mxu0 %v15393_v31 }
0x188b   :  { %12702 = vmatprep.subr.bf16.mxu1 %v15329_v10  ;;  %12728 = vmatprep.subr.bf16.mxu0 %v14256_v26 }
0x188e   :  { %12704 = vmatpush1.bf16.msra.mxu1 %v15332_v9  ;;  %12730 = vmatpush3.bf16.msra.mxu0 %v15399_v24 }
0x188f   :  { %12706 = vmatprep.subr.bf16.mxu1 %v15336_v52  ;;  %12731 = vmatprep.subr.bf16.mxu0 %v14256_v26 }
0x1892   :  { %12708 = vmatpush1.bf16.msra.mxu1 %v15338_v55  ;;  %12733 = vmatpush3.bf16.msra.mxu0 %v15405_v23 }
0x1893   :  { %12710 = vmatprep.subr.bf16.mxu1 %v15343_v44  ;;  %12734 = vmatprep.subr.bf16.mxu0 %v14256_v26 }
0x1896   :  { %12712 = vmatpush1.bf16.msra.mxu1 %v15345_v32  ;;  %12736 = vmatpush3.bf16.msra.mxu0 %v15411_v11  ;;  %v5081_v11 = vrot.slane %v15734_v56, 6  ;;  %v5321_v56 = vld [vmem:[#allocation4 + $0x530] sm:$0xff] }
0x1897   :  { %12738 = vmatprep.subr.bf16.mxu1 %v12737_v34  ;;  %v12749_v5 = vpack.c.bf16 %v5321_v56, %v5318_v35  ;;  %v5320_v34 = vld [vmem:[#allocation4 + $0x528] sm:$0xff]  ;;  %v5524_v35 = vld [vmem:[#allocation6 + $0x4b0] sm:$0xff] }
0x1898   :  { %v5527_v56 = vld [vmem:[#allocation6 + $0x4c8] sm:$0xff] }
0x194c   :  { %v4978_v17 = vpop.f32.mrb[56].mxu1  ;;  %v5049_v30 = vpop.f32.mrb[52].mxu0 }
0x194d   :  { %v4979_v41 = vadd.f32 %v4978_v17, %v15467_v53  ;;  %v4980_v16 = vpop.f32.mrb[57].mxu1  ;;  %v10531_v3 = vpop.f32.mrb[53].mxu0  ;;  %v5050_v31 = vadd.f32 %v5049_v30, %v15488_v62  ;;  %v5324_v17 = vld [vmem:[#allocation4 + $0x548] sm:$0xff]  ;;  %v5327_v30 = vld [vmem:[#allocation4 + $0x560] sm:$0xff] }
0x194e   :  { %v4981_v45 = vadd.f32 %v4980_v16, %v15470_v40  ;;  %v12753_v16 = vpack.c.bf16 %v5327_v30, %v5324_v17  ;;  %v5323_v3 = vld [vmem:[#allocation4 + $0x540] sm:$0xff] }
0x194f   :  { %v5054_v10 = vrot.slane %v4979_v41, 4  ;;  %v5074_v24 = vrot.slane %v5050_v31, 4  ;;  %v12751_v41 = vpack.c.bf16 %v5320_v34, %v5317_v59  ;;  %v5335_v31 = vld [vmem:[#allocation4 + $0x5a0] sm:$0xff]  ;;  %v5322_v59 = vld [vmem:[#allocation4 + $0x538] sm:$0xff]  ;;  %v5531_v34 = vld [vmem:[#allocation6 + $0x4e8] sm:$0xff] }
0x1950   :  { %v5064_v9 = vrot.slane %v4981_v45, 4  ;;  %v5326_v45 = vld [vmem:[#allocation4 + $0x558] sm:$0xff]  ;;  %v5534_v30 = vld [vmem:[#allocation6 + $0x500] sm:$0xff] }
0x1951   :  { %v5056_v52 = vadd.f32 %v5054_v10, %v15674_v50  ;;  %v5330_v10 = vld [vmem:[#allocation4 + $0x578] sm:$0xff] }
0x1952   :  { %v5066_v55 = vadd.f32 %v5064_v9, %v15681_v13  ;;  %v5333_v9 = vld [vmem:[#allocation4 + $0x590] sm:$0xff] }
0x1953   :  { %v8794_v44 = vmul.f32 -1.442695, %v5056_v52  ;;  %v12755_v52 = vpack.c.bf16 %v5326_v45, %v5323_v3  ;;  %v15796_v3 = vpack.c.bf16 %v5534_v30, %v5531_v34  ;;  %v5563_v30 = vld [vmem:[#allocation6 + $0x5e8] sm:$0xff] }
0x1954   :  { %v8795_v32 = vmul.f32 -1.442695, %v5066_v55  ;;  %v12757_v55 = vpack.c.bf16 %v5333_v9, %v5330_v10  ;;  %v5325_v10 = vld [vmem:[#allocation4 + $0x550] sm:$0xff]  ;;  %v5328_v9 = vld [vmem:[#allocation4 + $0x568] sm:$0xff] }
0x1955   :  { %13993 = vpow2.f32 %v8794_v44  ;;  %v5329_v44 = vld [vmem:[#allocation4 + $0x570] sm:$0xff] }
0x1956   :  { %13995 = vpow2.f32 %v8795_v32  ;;  %v5332_v32 = vld [vmem:[#allocation4 + $0x588] sm:$0xff] }
0x195f   :  { %v13994_v12 = vpop.eup %13993 }
0x1960   :  { %v13996_v51 = vpop.eup %13995  ;;  %v5060_v14 = vadd.f32 1.0, %v13994_v12  ;;  %v5336_v12 = vld [vmem:[#allocation4 + $0x5a8] sm:$0xff] }
0x1961   :  { %v5070_v33 = vadd.f32 1.0, %v13996_v51  ;;  %v5339_v51 = vld [vmem:[#allocation4 + $0x5c0] sm:$0xff] }
0x1962   :  { %13997 = vrcp.f32 %v5060_v14  ;;  %v12759_v14 = vpack.c.bf16 %v5332_v32, %v5329_v44  ;;  %v5540_v44 = vld [vmem:[#allocation6 + $0x530] sm:$0xff] }
0x1963   :  { %13999 = vrcp.f32 %v5070_v33  ;;  %v12761_v33 = vpack.c.bf16 %v5339_v51, %v5336_v12  ;;  %v5536_v32 = vld [vmem:[#allocation6 + $0x510] sm:$0xff]  ;;  %v5539_v12 = vld [vmem:[#allocation6 + $0x528] sm:$0xff] }
0x196c   :  { %v13998_v23 = vpop.eup %13997 }
0x196d   :  { %v14000_v21 = vpop.eup %13999  ;;  %v5076_v18 = vmul.f32 %v13998_v23, %v5074_v24  ;;  %v5338_v24 = vld [vmem:[#allocation4 + $0x5b8] sm:$0xff] }
0x196e   :  { %v5083_v29 = vmul.f32 %v14000_v21, %v5081_v11  ;;  %v5079_v1 = vsub.f32 1.0, %v14000_v21  ;;  %v5342_v23 = vld [vmem:[#allocation4 + $0x5d8] sm:$0xff]  ;;  %v5345_v11 = vld [vmem:[#allocation4 + $0x5f0] sm:$0xff]  ;;  %v12763_v21 = vpack.c.bf16 %v5338_v24, %v5335_v31  ;;  %v5543_v31 = vld [vmem:[#allocation6 + $0x548] sm:$0xff]  ;;  %v15804_v24 = vpack.c.bf16 %v5539_v12, %v5536_v32 }
0x196f   :  { %v5077_v63 = vadd.f32 %v5076_v18, %v15462_v37  ;;  %v12765_v18 = vpack.c.bf16 %v5345_v11, %v5342_v23  ;;  %v5546_v11 = vld [vmem:[#allocation6 + $0x560] sm:$0xff] }
0x1971   :  { %14001 = vtanh.f32 %v5077_v63  ;;  %v5344_v63 = vld [vmem:[#allocation4 + $0x5e8] sm:$0xff] }
0x197b   :  { %v14002_v39 = vpop.eup %14001 }
0x197c   :  { %v5080_v22 = vmul.f32 %v14002_v39, %v5079_v1  ;;  %v5301_v39 = vld [vmem:[#allocation4 + $0x490] sm:$0xff] }
0x197e   :  { %v15778_v25 = vadd.f32 %v5083_v29, %v5080_v22  ;;  %v5341_v29 = vld [vmem:[#allocation4 + $0x5d0] sm:$0xff]  ;;  %v5304_v22 = vld [vmem:[#allocation4 + $0x4a8] sm:$0xff] }
0x197f   :  { %v12767_v1 = vpack.c.bf16 %v5344_v63, %v5341_v29  ;;  %v12769_v38 = vpack.c.bf16 %v5304_v22, %v5301_v39  ;;  %v5545_v29 = vld [vmem:[#allocation6 + $0x558] sm:$0xff]  ;;  %v5337_v63 = vld [vmem:[#allocation4 + $0x5b0] sm:$0xff] }
0x1980   :  { %5085 = vst [vmem:[#allocation2 + $0x8] sm:$0x30] %v15778_v25  ;;  %v5087_v4 = vrot.slane %v15778_v25, 4  ;;  %v5549_v39 = vld [vmem:[#allocation6 + $0x578] sm:$0xff]  ;;  %v5552_v22 = vld [vmem:[#allocation6 + $0x590] sm:$0xff] }
0x1981   :  { %12770 = vmatprep.subr.bf16.mxu0 %v12769_v38 }
0x1982   :  { %5154 = vmatmul.mubr.f32.vlgmr.msra.gmra.mrb[58].mxu1 %v5087_v4  ;;  %10565 = vmatmul.mubr.f32.vlgmr.msra.gmra.mrb[54].mxu0 %v5087_v4  ;;  %v5522_v4 = vld [vmem:[#allocation6 + $0x4a0] sm:$0xff] }
0x1983   :  { %12740 = vmatpush1.bf16.msra.mxu1 %v12739_v54  ;;  %10599 = vmatprep.mubr.f32.mxu0 %v5263_v15  ;;  %v5519_v54 = vld [vmem:[#allocation6 + $0x488] sm:$0xff] }
0x1984   :  { %12742 = vmatprep.subr.bf16.mxu1 %v12741_v47  ;;  %5429 = vmatprep.mubr.f32.mxu1 %v14255_v7  ;;  %v15784_v47 = vpack.c.bf16 %v5522_v4, %v5519_v54  ;;  %v5551_v54 = vld [vmem:[#allocation6 + $0x588] sm:$0xff]  ;;  %v5343_v4 = vld [vmem:[#allocation4 + $0x5e0] sm:$0xff] }
0x1985   :  { %12772 = vmatpush3.bf16.msra.mxu0 %v12769_v38  ;;  %v15816_v36 = vpack.c.bf16 %v5551_v54, %v5548_v60 }
0x1986   :  { %12774 = vmatprep.subr.bf16.mxu0 %v12773_v2 }
0x1987   :  { %12744 = vmatpush1.bf16.msra.mxu1 %v12743_v58 }
0x1988   :  { %12746 = vmatprep.subr.bf16.mxu1 %v12745_v8  ;;  %v5525_v8 = vld [vmem:[#allocation6 + $0x4b8] sm:$0xff] }
0x1989   :  { %12776 = vmatpush3.bf16.msra.mxu0 %v12773_v2  ;;  %v15790_v42 = vpack.c.bf16 %v5528_v19, %v5525_v8  ;;  %v15813_v2 = vpack.c.bf16 %v5552_v22, %v5549_v39  ;;  %v5554_v19 = vld [vmem:[#allocation6 + $0x5a0] sm:$0xff] }
0x198b   :  { %12748 = vmatpush1.bf16.msra.mxu1 %v12747_v46  ;;  %v15792_v46 = vpack.c.bf16 %v5527_v56, %v5524_v35  ;;  %v5557_v35 = vld [vmem:[#allocation6 + $0x5b8] sm:$0xff] }
0x198c   :  { %12750 = vmatprep.subr.bf16.mxu1 %v12749_v5  ;;  %v5319_v5 = vld [vmem:[#allocation4 + $0x520] sm:$0xff]  ;;  %v15822_v56 = vpack.c.bf16 %v5557_v35, %v5554_v19 }
0x198d   :  { %v12781_v17 = vpack.c.bf16 %v5322_v59, %v5319_v5  ;;  %v5561_v5 = vld [vmem:[#allocation6 + $0x5d8] sm:$0xff]  ;;  %v5564_v59 = vld [vmem:[#allocation6 + $0x5f0] sm:$0xff] }
0x198e   :  { %v15827_v34 = vpack.c.bf16 %v5564_v59, %v5561_v5  ;;  %v5520_v59 = vld [vmem:[#allocation6 + $0x490] sm:$0xff] }
0x198f   :  { %12752 = vmatpush1.bf16.msra.mxu1 %v12751_v41  ;;  %v5530_v41 = vld [vmem:[#allocation6 + $0x4e0] sm:$0xff] }
0x1990   :  { %12754 = vmatprep.subr.bf16.mxu1 %v12753_v16  ;;  %v5533_v16 = vld [vmem:[#allocation6 + $0x4f8] sm:$0xff] }
0x1991   :  { %v15798_v45 = vpack.c.bf16 %v5533_v16, %v5530_v41 }
0x1993   :  { %12756 = vmatpush1.bf16.msra.mxu1 %v12755_v52  ;;  %v5537_v52 = vld [vmem:[#allocation6 + $0x518] sm:$0xff] }
0x1994   :  { %12758 = vmatprep.subr.bf16.mxu1 %v12757_v55  ;;  %v12785_v55 = vpack.c.bf16 %v5328_v9, %v5325_v10  ;;  %v15801_v51 = vpack.c.bf16 %v5540_v44, %v5537_v52 }
0x1997   :  { %12760 = vmatpush1.bf16.msra.mxu1 %v12759_v14  ;;  %v5331_v14 = vld [vmem:[#allocation4 + $0x580] sm:$0xff] }
0x1998   :  { %12762 = vmatprep.subr.bf16.mxu1 %v12761_v33  ;;  %v5334_v33 = vld [vmem:[#allocation4 + $0x598] sm:$0xff] }
0x1999   :  { %v12789_v23 = vpack.c.bf16 %v5334_v33, %v5331_v14 }
0x199b   :  { %12764 = vmatpush1.bf16.msra.mxu1 %v12763_v21  ;;  %v5542_v21 = vld [vmem:[#allocation6 + $0x540] sm:$0xff] }
0x199c   :  { %12766 = vmatprep.subr.bf16.mxu1 %v12765_v18  ;;  %v15807_v18 = vpack.c.bf16 %v5546_v11, %v5543_v31  ;;  %v15810_v38 = vpack.c.bf16 %v5545_v29, %v5542_v21 }
0x199f   :  { %12768 = vmatpush1.bf16.msra.mxu1 %v12767_v1  ;;  %v5340_v1 = vld [vmem:[#allocation4 + $0x5c8] sm:$0xff] }
0x19a0   :  { %12802 = vmatprep.subr.bf16.mxu1 %v15784_v47  ;;  %v12793_v57 = vpack.c.bf16 %v5340_v1, %v5337_v63 }
0x19a2   :  { %5430 = vmatmul.mubr.f32.vlgmr.msra.gmra.mrb[60].mxu1 %v5263_v15  ;;  %v5316_v15 = vld [vmem:[#allocation4 + $0x508] sm:$0xff] }
0x19a3   :  { %5435 = vmatprep.mubr.f32.mxu1 %v14255_v7  ;;  %12804 = vmatpush1.bf16.msra.mxu1 %v15786_v28  ;;  %v12777_v58 = vpack.c.bf16 %v5316_v15, %v5313_v6  ;;  %v12797_v6 = vpack.c.bf16 %v5346_v61, %v5343_v4  ;;  %v5555_v15 = vld [vmem:[#allocation6 + $0x5a8] sm:$0xff]  ;;  %v8798_v4 = vld [vmem:[%s16769_s7 + $0x8] sm:$0x3] }
0x19a4   :  { %12806 = vmatprep.subr.bf16.mxu1 %v15790_v42 }
0x19a5   :  { %12778 = vmatprep.subr.bf16.mxu0 %v12777_v58 }
0x19a6   :  { %12780 = vmatpush3.bf16.msra.mxu0 %v12777_v58  ;;  %v5558_v58 = vld [vmem:[#allocation6 + $0x5c0] sm:$0xff] }
0x19a7   :  { %12808 = vmatpush1.bf16.msra.mxu1 %v15792_v46  ;;  %12782 = vmatprep.subr.bf16.mxu0 %v12781_v17  ;;  %v15820_v8 = vpack.c.bf16 %v5558_v58, %v5555_v15 }
0x19a8   :  { %12810 = vmatprep.subr.bf16.mxu1 %v15796_v3 }
0x19aa   :  { %12784 = vmatpush3.bf16.msra.mxu0 %v12781_v17  ;;  %v5560_v17 = vld [vmem:[#allocation6 + $0x5d0] sm:$0xff] }
0x19ab   :  { %12812 = vmatpush1.bf16.msra.mxu1 %v15798_v45  ;;  %12786 = vmatprep.subr.bf16.mxu0 %v12785_v55  ;;  %v15829_v41 = vpack.c.bf16 %v5563_v30, %v5560_v17  ;;  %v5523_v17 = vld [vmem:[#allocation6 + $0x4a8] sm:$0xff] }
0x19ac   :  { %12814 = vmatprep.subr.bf16.mxu1 %v15801_v51  ;;  %v15852_v30 = vpack.c.bf16 %v5523_v17, %v5520_v59 }
0x19ae   :  { %12788 = vmatpush3.bf16.msra.mxu0 %v12785_v55 }
0x19af   :  { %12816 = vmatpush1.bf16.msra.mxu1 %v15804_v24  ;;  %12790 = vmatprep.subr.bf16.mxu0 %v12789_v23 }
0x19b0   :  { %12818 = vmatprep.subr.bf16.mxu1 %v15807_v18 }
0x19b2   :  { %12792 = vmatpush3.bf16.msra.mxu0 %v12789_v23 }
0x19b3   :  { %12820 = vmatpush1.bf16.msra.mxu1 %v15810_v38  ;;  %12794 = vmatprep.subr.bf16.mxu0 %v12793_v57 }
0x19b4   :  { %12822 = vmatprep.subr.bf16.mxu1 %v15813_v2 }
0x19b6   :  { %12796 = vmatpush3.bf16.msra.mxu0 %v12793_v57 }
0x19b7   :  { %12824 = vmatpush1.bf16.msra.mxu1 %v15816_v36  ;;  %12798 = vmatprep.subr.bf16.mxu0 %v12797_v6 }
0x19b8   :  { %12826 = vmatprep.subr.bf16.mxu1 %v15820_v8 }
0x19ba   :  { %12800 = vmatpush3.bf16.msra.mxu0 %v12797_v6  ;;  %v8799_v6 = vld [vmem:[%s16769_s7 + $0xa] sm:$0x3] }
0x19bb   :  { %12828 = vmatpush1.bf16.msra.mxu1 %v15822_v56  ;;  %12833 = vmatprep.subr.bf16.mxu0 %v14256_v26  ;;  %v5271_v19 = vrot.slane %v8799_v6, 2 }
0x19bc   :  { %12830 = vmatprep.subr.bf16.mxu1 %v15827_v34 }
0x19bf   :  { %12832 = vmatpush1.bf16.msra.mxu1 %v15829_v41 }
0x19c0   :  { %12858 = vmatprep.subr.bf16.mxu1 %v15784_v47 }
0x1a55   :  { %v5155_v16 = vpop.f32.mrb[58].mxu1  ;;  %v5226_v10 = vpop.f32.mrb[54].mxu0 }
0x1a56   :  { %v5156_v9 = vadd.f32 %v5155_v16, %v15467_v53  ;;  %v5157_v52 = vpop.f32.mrb[59].mxu1  ;;  %v10566_v55 = vpop.f32.mrb[55].mxu0  ;;  %v5227_v53 = vadd.f32 %v5226_v10, %v15488_v62  ;;  %v5526_v10 = vld [vmem:[#allocation6 + $0x4c0] sm:$0xff] }
0x1a57   :  { %v5158_v44 = vadd.f32 %v5157_v52, %v15470_v40 }
0x1a58   :  { %v5231_v32 = vrot.slane %v5156_v9, 2  ;;  %v5251_v1 = vrot.slane %v5227_v53, 2  ;;  %v5529_v9 = vld [vmem:[#allocation6 + $0x4d8] sm:$0xff] }
0x1a59   :  { %v5241_v12 = vrot.slane %v5158_v44, 2  ;;  %v15857_v55 = vpack.c.bf16 %v5529_v9, %v5526_v10  ;;  %v5532_v44 = vld [vmem:[#allocation6 + $0x4f0] sm:$0xff] }
0x1a5a   :  { %v5233_v14 = vadd.f32 %v5231_v32, %v15674_v50  ;;  %v5258_v50 = vrot.slane %v15778_v25, 6  ;;  %v5270_v25 = vrot.slane %v8798_v4, 2  ;;  %v5535_v32 = vld [vmem:[#allocation6 + $0x508] sm:$0xff] }
0x1a5b   :  { %v5243_v33 = vadd.f32 %v5241_v12, %v15681_v13  ;;  %v15864_v12 = vpack.c.bf16 %v5535_v32, %v5532_v44 }
0x1a5c   :  { %v8796_v31 = vmul.f32 -1.442695, %v5233_v14  ;;  %v5538_v14 = vld [vmem:[#allocation6 + $0x520] sm:$0xff] }
0x1a5d   :  { %v8797_v23 = vmul.f32 -1.442695, %v5243_v33  ;;  %v5541_v33 = vld [vmem:[#allocation6 + $0x538] sm:$0xff] }
0x1a5e   :  { %14003 = vpow2.f32 %v8796_v31  ;;  %v15871_v31 = vpack.c.bf16 %v5541_v33, %v5538_v14 }
0x1a5f   :  { %14005 = vpow2.f32 %v8797_v23  ;;  %v5544_v23 = vld [vmem:[#allocation6 + $0x550] sm:$0xff] }
0x1a68   :  { %v14004_v11 = vpop.eup %14003 }
0x1a69   :  { %v14006_v21 = vpop.eup %14005  ;;  %v5237_v29 = vadd.f32 1.0, %v14004_v11  ;;  %v5547_v11 = vld [vmem:[#allocation6 + $0x568] sm:$0xff] }
0x1a6a   :  { %v5247_v63 = vadd.f32 1.0, %v14006_v21  ;;  %v15877_v21 = vpack.c.bf16 %v5547_v11, %v5544_v23 }
0x1a6b   :  { %14007 = vrcp.f32 %v5237_v29  ;;  %v5550_v29 = vld [vmem:[#allocation6 + $0x580] sm:$0xff] }
0x1a6c   :  { %14009 = vrcp.f32 %v5247_v63  ;;  %v5553_v63 = vld [vmem:[#allocation6 + $0x598] sm:$0xff] }
0x1a6d   :  { %v15883_v53 = vpack.c.bf16 %v5553_v63, %v5550_v29 }
0x1a75   :  { %v14008_v40 = vpop.eup %14007  ;;  %v15839_v39 = vpop.f32.mrb[60].mxu1 }
0x1a76   :  { %v14010_v22 = vpop.eup %14009  ;;  %v5253_v13 = vmul.f32 %v14008_v40, %v5251_v1  ;;  %v15842_v57 = vpop.f32.mrb[61].mxu1  ;;  %v5556_v1 = vld [vmem:[#allocation6 + $0x5b0] sm:$0xff]  ;;  %v5559_v40 = vld [vmem:[#allocation6 + $0x5c8] sm:$0xff] }
0x1a77   :  { %v5260_v60 = vmul.f32 %v14010_v22, %v5258_v50  ;;  %v5256_v61 = vsub.f32 1.0, %v14010_v22  ;;  %v15889_v50 = vpack.c.bf16 %v5559_v40, %v5556_v1  ;;  %v5562_v22 = vld [vmem:[#allocation6 + $0x5e0] sm:$0xff] }
0x1a78   :  { %v5254_v54 = vadd.f32 %v5253_v13, %v15462_v37  ;;  %v5565_v13 = vld [vmem:[#allocation6 + $0x5f8] sm:$0xff] }
0x1a7a   :  { %14011 = vtanh.f32 %v5254_v54  ;;  %v8800_v54 = vld [vmem:[%s16766_s4 + $0x9] sm:$0x7] }
0x1a7b   :  { %v5361_v4 = vrot.slane %v8800_v54, %v14505_v43 }
0x1a84   :  { %v14012_v62 = vpop.eup %14011 }
0x1a85   :  { %v5257_v15 = vmul.f32 %v14012_v62, %v5256_v61  ;;  %v5567_v61 = vld [vmem:[#allocation8 + $0x9] sm:$0x7] }
0x1a86   :  { %v15960_v29 = vrot.slane %v5567_v61, %v14505_v43 }
0x1a87   :  { %v5261_v58 = vadd.f32 %v5260_v60, %v5257_v15  ;;  %v15895_v60 = vpack.c.bf16 %v5565_v13, %v5562_v22  ;;  %v15932_v15 = vrot.slane %v8800_v54, %v14512_v48 }
0x1a89   :  { %v5274_v35 = vmul.f32 %v5270_v25, %v5261_v58  ;;  %5262 = vst [vmem:[#allocation2 + $0x8] sm:$0xc0] %v5261_v58  ;;  %v5275_v37 = vmul.f32 %v5271_v19, %v5261_v58  ;;  %v15949_v17 = vadd.f32 %v15839_v39, %v15932_v15 }
0x1a8b   :  { %v5276_v5 = vsel %vm1856_vm4, %v5274_v35, 0.0  ;;  %v5279_v16 = vsel %vm1856_vm4, %v5275_v37, 0.0  ;;  %v15939_v35 = vrot.slane %v5567_v61, %v14512_v48  ;;  %v15945_v37 = vrot.slane %v8800_v54, %v14515_v49 }
0x1a8c   :  { %5277 = vadd.xlane.f32.xlu1 %v5276_v5  ;;  %v15942_v5 = vrot.slane %v5567_v61, %v14515_v49 }
0x1a8d   :  { %v15956_v44 = vadd.f32 %v15842_v57, %v15945_v37 }
0x1a90   :  { %5280 = vadd.xlane.f32.xlu1 %v5279_v16  ;;  %v5264_v52 = vld [vmem:[#allocation2 + $0x8] sm:$0xff] }
0x1a91   :  { %5436 = vmatmul.mubr.f32.gmra.mrb[62].mxu1 %v5264_v52  ;;  %10600 = vmatmul.mubr.f32.vlgmr.msra.gmra.mrb[56].mxu0 %v5264_v52 }
0x1a92   :  { %12835 = vmatpush3.bf16.msra.mxu0 %v15852_v30  ;;  %5648 = vmatprep.mubr.f32.mxu1 %v14255_v7 }
0x1a93   :  { %12836 = vmatprep.subr.bf16.mxu0 %v14256_v26  ;;  %10634 = vmatprep.mubr.msk.f32.mxu0 %vm14257_vm3, %v14255_v7 }
0x1a95   :  { %5649 = vmatmul.mubr.f32.vlgmr.msra.gmra.mrb[64].mxu1 %v14255_v7 }
0x1a96   :  { %12838 = vmatpush3.bf16.msra.mxu0 %v15857_v55  ;;  %12860 = vmatpush1.bf16.msra.mxu1 %v15786_v28 }
0x1a97   :  { %12839 = vmatprep.subr.bf16.mxu0 %v14256_v26  ;;  %12862 = vmatprep.subr.bf16.mxu1 %v15790_v42 }
0x1a98   :  { %5811 = vmatprep.mubr.f32.mxu1 %v14255_v7 }
0x1a9a   :  { %12841 = vmatpush3.bf16.msra.mxu0 %v15864_v12  ;;  %12864 = vmatpush1.bf16.msra.mxu1 %v15792_v46 }
0x1a9b   :  { %12842 = vmatprep.subr.bf16.mxu0 %v14256_v26  ;;  %12866 = vmatprep.subr.bf16.mxu1 %v15796_v3 }
0x1a9e   :  { %12844 = vmatpush3.bf16.msra.mxu0 %v15871_v31  ;;  %12868 = vmatpush1.bf16.msra.mxu1 %v15798_v45 }
0x1a9f   :  { %12845 = vmatprep.subr.bf16.mxu0 %v14256_v26  ;;  %12870 = vmatprep.subr.bf16.mxu1 %v15801_v51 }
0x1aa2   :  { %12847 = vmatpush3.bf16.msra.mxu0 %v15877_v21  ;;  %12872 = vmatpush1.bf16.msra.mxu1 %v15804_v24 }
0x1aa3   :  { %12848 = vmatprep.subr.bf16.mxu0 %v14256_v26  ;;  %12874 = vmatprep.subr.bf16.mxu1 %v15807_v18 }
0x1aa6   :  { %12850 = vmatpush3.bf16.msra.mxu0 %v15883_v53  ;;  %12876 = vmatpush1.bf16.msra.mxu1 %v15810_v38 }
0x1aa7   :  { %12851 = vmatprep.subr.bf16.mxu0 %v14256_v26  ;;  %12878 = vmatprep.subr.bf16.mxu1 %v15813_v2 }
0x1aaa   :  { %12853 = vmatpush3.bf16.msra.mxu0 %v15889_v50  ;;  %12880 = vmatpush1.bf16.msra.mxu1 %v15816_v36 }
0x1aab   :  { %12854 = vmatprep.subr.bf16.mxu0 %v14256_v26  ;;  %12882 = vmatprep.subr.bf16.mxu1 %v15820_v8 }
0x1aae   :  { %12856 = vmatpush3.bf16.msra.mxu0 %v15895_v60  ;;  %12884 = vmatpush1.bf16.msra.mxu1 %v15822_v56 }
0x1aaf   :  { %12889 = vmatprep.subr.bf16.mxu0 %v14256_v26  ;;  %12886 = vmatprep.subr.bf16.mxu1 %v15827_v34 }
0x1ab1   :  { %10635 = vmatmul.mubr.f32.vlgmr.msra.gmra.mrb[58].mxu0 %v14255_v7 }
0x1ab2   :  { %12891 = vmatpush3.bf16.msra.mxu0 %v15852_v30  ;;  %12888 = vmatpush1.bf16.msra.mxu1 %v15829_v41 }
0x1ab3   :  { %12892 = vmatprep.subr.bf16.mxu0 %v14256_v26  ;;  %10669 = vmatprep.mubr.msk.f32.mxu0 %vm14257_vm3, %v14255_v7 }
0x1ab4   :  { %12914 = vmatprep.subr.bf16.mxu1 %v15784_v47 }
0x1ab6   :  { %12894 = vmatpush3.bf16.msra.mxu0 %v15857_v55 }
0x1ab7   :  { %12895 = vmatprep.subr.bf16.mxu0 %v14256_v26 }
0x1aba   :  { %12897 = vmatpush3.bf16.msra.mxu0 %v15864_v12 }
0x1abb   :  { %12898 = vmatprep.subr.bf16.mxu0 %v14256_v26 }
0x1abe   :  { %12900 = vmatpush3.bf16.msra.mxu0 %v15871_v31 }
0x1abf   :  { %12901 = vmatprep.subr.bf16.mxu0 %v14256_v26 }
0x1ac2   :  { %12903 = vmatpush3.bf16.msra.mxu0 %v15877_v21 }
0x1ac3   :  { %12904 = vmatprep.subr.bf16.mxu0 %v14256_v26 }
0x1ac6   :  { %12906 = vmatpush3.bf16.msra.mxu0 %v15883_v53 }
0x1ac7   :  { %12907 = vmatprep.subr.bf16.mxu0 %v14256_v26 }
0x1aca   :  { %12909 = vmatpush3.bf16.msra.mxu0 %v15889_v50 }
0x1acb   :  { %12910 = vmatprep.subr.bf16.mxu0 %v14256_v26 }
0x1ace   :  { %12912 = vmatpush3.bf16.msra.mxu0 %v15895_v60 }
0x1acf   :  { %12945 = vmatprep.subr.bf16.mxu0 %v14256_v26 }
0x1b64   :  { %v15929_v62 = vpop.f32.mrb[62].mxu1  ;;  %v10601_v6 = vpop.f32.mrb[56].mxu0 }
0x1b65   :  { %v15934_v25 = vadd.f32 %v10601_v6, %v5361_v4  ;;  %v15936_v58 = vpop.f32.mrb[63].mxu1  ;;  %v5508_v19 = vpop.f32.mrb[57].mxu0 }
0x1b66   :  { %v15963_v13 = vadd.f32 %v5508_v19, %v5361_v4 }
0x1b68   :  { %v5650_v59 = vpop.f32.mrb[64].mxu1 }
0x1b69   :  { %v5651_v16 = vadd.f32 %v5650_v59, %v15939_v35  ;;  %v5652_v10 = vpop.f32.mrb[65].mxu1 }
0x1b6a   :  { %v5653_v9 = vadd.f32 %v5652_v10, %v15942_v5 }
0x1b6b   :  { %v5725_v52 = vadd.f32 %v5651_v16, %v15949_v17 }
0x1b6c   :  { %v5732_v14 = vadd.f32 %v5653_v9, %v15956_v44 }
0x1b6d   :  { %v8801_v32 = vmul.f32 -1.442695, %v5725_v52 }
0x1b6e   :  { %v8802_v33 = vmul.f32 -1.442695, %v5732_v14 }
0x1b6f   :  { %14013 = vpow2.f32 %v8801_v32 }
0x1b70   :  { %14015 = vpow2.f32 %v8802_v33 }
0x1b79   :  { %v14014_v23 = vpop.eup %14013 }
0x1b7a   :  { %v5729_v39 = vadd.f32 1.0, %v14014_v23  ;;  %v14016_v11 = vpop.eup %14015 }
0x1b7b   :  { %v5736_v63 = vadd.f32 1.0, %v14016_v11 }
0x1b7c   :  { %14017 = vrcp.f32 %v5729_v39 }
0x1b7d   :  { %14019 = vrcp.f32 %v5736_v63 }
0x1b84   :  { %v5721_v1 = vpop.f32.mrb[58].mxu0 }
0x1b85   :  { %v5722_v40 = vadd.f32 %v5721_v1, %v15960_v29  ;;  %v10636_v22 = vpop.f32.mrb[59].mxu0 }
0x1b86   :  { %v14018_v57 = vpop.eup %14017 }
0x1b87   :  { %v5739_v54 = vmul.f32 %v14018_v57, %v5722_v40  ;;  %v14020_v59 = vpop.eup %14019 }
0x1b88   :  { %v5742_v16 = vsub.f32 1.0, %v14020_v59  ;;  %v5744_v52 = vmul.f32 0.0, %v14020_v59 }
0x1b89   :  { %v5740_v6 = vadd.f32 %v5739_v54, %v15963_v13 }
0x1b8b   :  { %14021 = vtanh.f32 %v5740_v6 }
0x1b95   :  { %v14022_v10 = vpop.eup %14021 }
0x1b96   :  { %v5743_v9 = vmul.f32 %v14022_v10, %v5742_v16 }
0x1b98   :  { %v15966_v61 = vadd.f32 %v5744_v52, %v5743_v9 }
0x1b9a   :  { %5746 = vst [vmem:[#allocation2] sm:$0x3] %v15966_v61  ;;  %5812 = vmatmul.mubr.f32.vlgmr.msra.gmra.mrb[66].mxu1 %v15966_v61  ;;  %10670 = vmatmul.mubr.f32.vlgmr.msra.gmra.mrb[60].mxu0 %v15966_v61  ;;  %v5917_v52 = vrot.slane %v15966_v61, 6 }
0x1b9b   :  { %12916 = vmatpush1.bf16.msra.mxu1 %v15786_v28  ;;  %12947 = vmatpush3.bf16.msra.mxu0 %v15852_v30 }
0x1b9c   :  { %12918 = vmatprep.subr.bf16.mxu1 %v15790_v42  ;;  %12948 = vmatprep.subr.bf16.mxu0 %v14256_v26 }
0x1b9d   :  { %5989 = vmatprep.mubr.f32.mxu1 %v14255_v7  ;;  %10704 = vmatprep.mubr.msk.f32.mxu0 %vm14257_vm3, %v14255_v7 }
0x1b9f   :  { %12920 = vmatpush1.bf16.msra.mxu1 %v15792_v46  ;;  %12950 = vmatpush3.bf16.msra.mxu0 %v15857_v55 }
0x1ba0   :  { %12922 = vmatprep.subr.bf16.mxu1 %v15796_v3  ;;  %12951 = vmatprep.subr.bf16.mxu0 %v14256_v26 }
0x1ba3   :  { %12924 = vmatpush1.bf16.msra.mxu1 %v15798_v45  ;;  %12953 = vmatpush3.bf16.msra.mxu0 %v15864_v12 }
0x1ba4   :  { %12926 = vmatprep.subr.bf16.mxu1 %v15801_v51  ;;  %12954 = vmatprep.subr.bf16.mxu0 %v14256_v26 }
0x1ba7   :  { %12928 = vmatpush1.bf16.msra.mxu1 %v15804_v24  ;;  %12956 = vmatpush3.bf16.msra.mxu0 %v15871_v31 }
0x1ba8   :  { %12930 = vmatprep.subr.bf16.mxu1 %v15807_v18  ;;  %12957 = vmatprep.subr.bf16.mxu0 %v14256_v26 }
0x1bab   :  { %12932 = vmatpush1.bf16.msra.mxu1 %v15810_v38  ;;  %12959 = vmatpush3.bf16.msra.mxu0 %v15877_v21 }
0x1bac   :  { %12934 = vmatprep.subr.bf16.mxu1 %v15813_v2  ;;  %12960 = vmatprep.subr.bf16.mxu0 %v14256_v26 }
0x1baf   :  { %12936 = vmatpush1.bf16.msra.mxu1 %v15816_v36  ;;  %12962 = vmatpush3.bf16.msra.mxu0 %v15883_v53 }
0x1bb0   :  { %12938 = vmatprep.subr.bf16.mxu1 %v15820_v8  ;;  %12963 = vmatprep.subr.bf16.mxu0 %v14256_v26 }
0x1bb3   :  { %12940 = vmatpush1.bf16.msra.mxu1 %v15822_v56  ;;  %12965 = vmatpush3.bf16.msra.mxu0 %v15889_v50 }
0x1bb4   :  { %12942 = vmatprep.subr.bf16.mxu1 %v15827_v34  ;;  %12966 = vmatprep.subr.bf16.mxu0 %v14256_v26 }
0x1bb7   :  { %12944 = vmatpush1.bf16.msra.mxu1 %v15829_v41  ;;  %12968 = vmatpush3.bf16.msra.mxu0 %v15895_v60 }
0x1bb8   :  { %12970 = vmatprep.subr.bf16.mxu1 %v15784_v47  ;;  %13001 = vmatprep.subr.bf16.mxu0 %v14256_v26 }
0x1c6d   :  { %v5813_v4 = vpop.f32.mrb[66].mxu1  ;;  %v5884_v19 = vpop.f32.mrb[60].mxu0 }
0x1c6e   :  { %v5814_v32 = vadd.f32 %v5813_v4, %v15939_v35  ;;  %v5815_v14 = vpop.f32.mrb[67].mxu1  ;;  %v10671_v33 = vpop.f32.mrb[61].mxu0  ;;  %v5885_v16 = vadd.f32 %v5884_v19, %v15960_v29 }
0x1c6f   :  { %v5816_v23 = vadd.f32 %v5815_v14, %v15942_v5 }
0x1c70   :  { %v5889_v39 = vrot.slane %v5814_v32, 6  ;;  %v5909_v10 = vrot.slane %v5885_v16, 6 }
0x1c71   :  { %v5899_v11 = vrot.slane %v5816_v23, 6 }
0x1c72   :  { %v5891_v63 = vadd.f32 %v5889_v39, %v15949_v17 }
0x1c73   :  { %v5901_v1 = vadd.f32 %v5899_v11, %v15956_v44 }
0x1c74   :  { %v8803_v40 = vmul.f32 -1.442695, %v5891_v63 }
0x1c75   :  { %v8804_v22 = vmul.f32 -1.442695, %v5901_v1 }
0x1c76   :  { %14023 = vpow2.f32 %v8803_v40 }
0x1c77   :  { %14025 = vpow2.f32 %v8804_v22 }
0x1c80   :  { %v14024_v57 = vpop.eup %14023 }
0x1c81   :  { %v14026_v54 = vpop.eup %14025  ;;  %v5895_v6 = vadd.f32 1.0, %v14024_v57 }
0x1c82   :  { %v5905_v59 = vadd.f32 1.0, %v14026_v54 }
0x1c83   :  { %14027 = vrcp.f32 %v5895_v6 }
0x1c84   :  { %14029 = vrcp.f32 %v5905_v59 }
0x1c8d   :  { %v14028_v9 = vpop.eup %14027 }
0x1c8e   :  { %v14030_v4 = vpop.eup %14029  ;;  %v5911_v32 = vmul.f32 %v14028_v9, %v5909_v10 }
0x1c8f   :  { %v5919_v14 = vmul.f32 %v14030_v4, %v5917_v52  ;;  %v5914_v23 = vsub.f32 1.0, %v14030_v4 }
0x1c90   :  { %v5912_v33 = vadd.f32 %v5911_v32, %v15963_v13 }
0x1c92   :  { %14031 = vtanh.f32 %v5912_v33 }
0x1c9c   :  { %v14032_v39 = vpop.eup %14031 }
0x1c9d   :  { %v5915_v11 = vmul.f32 %v14032_v39, %v5914_v23 }
0x1c9f   :  { %v16013_v63 = vadd.f32 %v5919_v14, %v5915_v11 }
0x1ca1   :  { %5921 = vst [vmem:[#allocation2] sm:$0xc] %v16013_v63  ;;  %v5923_v1 = vrot.slane %v16013_v63, 2 }
0x1ca3   :  { %5990 = vmatmul.mubr.f32.vlgmr.msra.gmra.mrb[68].mxu1 %v5923_v1  ;;  %10705 = vmatmul.mubr.f32.vlgmr.msra.gmra.mrb[62].mxu0 %v5923_v1  ;;  %v6094_v1 = vrot.slane %v16013_v63, 6 }
0x1ca4   :  { %12972 = vmatpush1.bf16.msra.mxu1 %v15786_v28  ;;  %13003 = vmatpush3.bf16.msra.mxu0 %v15852_v30 }
0x1ca5   :  { %12974 = vmatprep.subr.bf16.mxu1 %v15790_v42  ;;  %13004 = vmatprep.subr.bf16.mxu0 %v14256_v26 }
0x1ca6   :  { %6166 = vmatprep.mubr.f32.mxu1 %v14255_v7  ;;  %10739 = vmatprep.mubr.msk.f32.mxu0 %vm14257_vm3, %v14255_v7 }
0x1ca8   :  { %12976 = vmatpush1.bf16.msra.mxu1 %v15792_v46  ;;  %13006 = vmatpush3.bf16.msra.mxu0 %v15857_v55 }
0x1ca9   :  { %12978 = vmatprep.subr.bf16.mxu1 %v15796_v3  ;;  %13007 = vmatprep.subr.bf16.mxu0 %v14256_v26 }
0x1cac   :  { %12980 = vmatpush1.bf16.msra.mxu1 %v15798_v45  ;;  %13009 = vmatpush3.bf16.msra.mxu0 %v15864_v12 }
0x1cad   :  { %12982 = vmatprep.subr.bf16.mxu1 %v15801_v51  ;;  %13010 = vmatprep.subr.bf16.mxu0 %v14256_v26 }
0x1cb0   :  { %12984 = vmatpush1.bf16.msra.mxu1 %v15804_v24  ;;  %13012 = vmatpush3.bf16.msra.mxu0 %v15871_v31 }
0x1cb1   :  { %12986 = vmatprep.subr.bf16.mxu1 %v15807_v18  ;;  %13013 = vmatprep.subr.bf16.mxu0 %v14256_v26 }
0x1cb4   :  { %12988 = vmatpush1.bf16.msra.mxu1 %v15810_v38  ;;  %13015 = vmatpush3.bf16.msra.mxu0 %v15877_v21 }
0x1cb5   :  { %12990 = vmatprep.subr.bf16.mxu1 %v15813_v2  ;;  %13016 = vmatprep.subr.bf16.mxu0 %v14256_v26 }
0x1cb8   :  { %12992 = vmatpush1.bf16.msra.mxu1 %v15816_v36  ;;  %13018 = vmatpush3.bf16.msra.mxu0 %v15883_v53 }
0x1cb9   :  { %12994 = vmatprep.subr.bf16.mxu1 %v15820_v8  ;;  %13019 = vmatprep.subr.bf16.mxu0 %v14256_v26 }
0x1cbc   :  { %12996 = vmatpush1.bf16.msra.mxu1 %v15822_v56  ;;  %13021 = vmatpush3.bf16.msra.mxu0 %v15889_v50 }
0x1cbd   :  { %12998 = vmatprep.subr.bf16.mxu1 %v15827_v34  ;;  %13022 = vmatprep.subr.bf16.mxu0 %v14256_v26 }
0x1cc0   :  { %13000 = vmatpush1.bf16.msra.mxu1 %v15829_v41  ;;  %13024 = vmatpush3.bf16.msra.mxu0 %v15895_v60 }
0x1cc1   :  { %13026 = vmatprep.subr.bf16.mxu1 %v15784_v47  ;;  %13057 = vmatprep.subr.bf16.mxu0 %v14256_v26 }
0x1d76   :  { %v5991_v61 = vpop.f32.mrb[68].mxu1  ;;  %v6062_v19 = vpop.f32.mrb[62].mxu0 }
0x1d77   :  { %v5992_v40 = vadd.f32 %v5991_v61, %v15939_v35  ;;  %v5993_v22 = vpop.f32.mrb[69].mxu1  ;;  %v10706_v57 = vpop.f32.mrb[63].mxu0  ;;  %v6063_v23 = vadd.f32 %v6062_v19, %v15960_v29 }
0x1d78   :  { %v5994_v54 = vadd.f32 %v5993_v22, %v15942_v5 }
0x1d79   :  { %v6067_v6 = vrot.slane %v5992_v40, 4  ;;  %v6087_v39 = vrot.slane %v6063_v23, 4 }
0x1d7a   :  { %v6077_v59 = vrot.slane %v5994_v54, 4 }
0x1d7b   :  { %v6069_v16 = vadd.f32 %v6067_v6, %v15949_v17 }
0x1d7c   :  { %v6079_v10 = vadd.f32 %v6077_v59, %v15956_v44 }
0x1d7d   :  { %v8805_v9 = vmul.f32 -1.442695, %v6069_v16 }
0x1d7e   :  { %v8806_v52 = vmul.f32 -1.442695, %v6079_v10 }
0x1d7f   :  { %14033 = vpow2.f32 %v8805_v9 }
0x1d80   :  { %14035 = vpow2.f32 %v8806_v52 }
0x1d89   :  { %v14034_v4 = vpop.eup %14033 }
0x1d8a   :  { %v14036_v32 = vpop.eup %14035  ;;  %v6073_v14 = vadd.f32 1.0, %v14034_v4 }
0x1d8b   :  { %v6083_v33 = vadd.f32 1.0, %v14036_v32 }
0x1d8c   :  { %14037 = vrcp.f32 %v6073_v14 }
0x1d8d   :  { %14039 = vrcp.f32 %v6083_v33 }
0x1d96   :  { %v14038_v11 = vpop.eup %14037 }
0x1d97   :  { %v14040_v61 = vpop.eup %14039  ;;  %v6089_v40 = vmul.f32 %v14038_v11, %v6087_v39 }
0x1d98   :  { %v6096_v22 = vmul.f32 %v14040_v61, %v6094_v1  ;;  %v6092_v54 = vsub.f32 1.0, %v14040_v61 }
0x1d99   :  { %v6090_v57 = vadd.f32 %v6089_v40, %v15963_v13 }
0x1d9b   :  { %14041 = vtanh.f32 %v6090_v57 }
0x1da5   :  { %v14042_v6 = vpop.eup %14041 }
0x1da6   :  { %v6093_v59 = vmul.f32 %v14042_v6, %v6092_v54 }
0x1da8   :  { %v16059_v16 = vadd.f32 %v6096_v22, %v6093_v59 }
0x1daa   :  { %6098 = vst [vmem:[#allocation2] sm:$0x30] %v16059_v16  ;;  %v6100_v10 = vrot.slane %v16059_v16, 4 }
0x1dac   :  { %6167 = vmatmul.mubr.f32.vlgmr.msra.gmra.mrb[70].mxu1 %v6100_v10  ;;  %10740 = vmatmul.mubr.f32.vlgmr.msra.gmra.mrb[64].mxu0 %v6100_v10  ;;  %v6271_v10 = vrot.slane %v16059_v16, 6 }
0x1dad   :  { %13028 = vmatpush1.bf16.msra.mxu1 %v15786_v28  ;;  %13059 = vmatpush3.bf16.msra.mxu0 %v15852_v30 }
0x1dae   :  { %13030 = vmatprep.subr.bf16.mxu1 %v15790_v42  ;;  %13060 = vmatprep.subr.bf16.mxu0 %v14256_v26 }
0x1daf   :  { %6343 = vmatprep.mubr.f32.mxu1 %v14255_v7  ;;  %10774 = vmatprep.mubr.msk.f32.mxu0 %vm14257_vm3, %v14255_v7 }
0x1db1   :  { %13032 = vmatpush1.bf16.msra.mxu1 %v15792_v46  ;;  %13062 = vmatpush3.bf16.msra.mxu0 %v15857_v55 }
0x1db2   :  { %13034 = vmatprep.subr.bf16.mxu1 %v15796_v3  ;;  %13063 = vmatprep.subr.bf16.mxu0 %v14256_v26 }
0x1db5   :  { %13036 = vmatpush1.bf16.msra.mxu1 %v15798_v45  ;;  %13065 = vmatpush3.bf16.msra.mxu0 %v15864_v12 }
0x1db6   :  { %13038 = vmatprep.subr.bf16.mxu1 %v15801_v51  ;;  %13066 = vmatprep.subr.bf16.mxu0 %v14256_v26 }
0x1db9   :  { %13040 = vmatpush1.bf16.msra.mxu1 %v15804_v24  ;;  %13068 = vmatpush3.bf16.msra.mxu0 %v15871_v31 }
0x1dba   :  { %13042 = vmatprep.subr.bf16.mxu1 %v15807_v18  ;;  %13069 = vmatprep.subr.bf16.mxu0 %v14256_v26 }
0x1dbd   :  { %13044 = vmatpush1.bf16.msra.mxu1 %v15810_v38  ;;  %13071 = vmatpush3.bf16.msra.mxu0 %v15877_v21 }
0x1dbe   :  { %13046 = vmatprep.subr.bf16.mxu1 %v15813_v2  ;;  %13072 = vmatprep.subr.bf16.mxu0 %v14256_v26 }
0x1dc1   :  { %13048 = vmatpush1.bf16.msra.mxu1 %v15816_v36  ;;  %13074 = vmatpush3.bf16.msra.mxu0 %v15883_v53 }
0x1dc2   :  { %13050 = vmatprep.subr.bf16.mxu1 %v15820_v8  ;;  %13075 = vmatprep.subr.bf16.mxu0 %v14256_v26 }
0x1dc5   :  { %13052 = vmatpush1.bf16.msra.mxu1 %v15822_v56  ;;  %13077 = vmatpush3.bf16.msra.mxu0 %v15889_v50 }
0x1dc6   :  { %13054 = vmatprep.subr.bf16.mxu1 %v15827_v34  ;;  %13078 = vmatprep.subr.bf16.mxu0 %v14256_v26 }
0x1dc9   :  { %13056 = vmatpush1.bf16.msra.mxu1 %v15829_v41  ;;  %13080 = vmatpush3.bf16.msra.mxu0 %v15895_v60 }
0x1dca   :  { %13082 = vmatprep.subr.bf16.mxu1 %v15784_v47  ;;  %13113 = vmatprep.subr.bf16.mxu0 %v14256_v26 }
0x1e7f   :  { %v6168_v63 = vpop.f32.mrb[70].mxu1  ;;  %v6239_v19 = vpop.f32.mrb[64].mxu0 }
0x1e80   :  { %v6169_v9 = vadd.f32 %v6168_v63, %v15939_v35  ;;  %v6170_v52 = vpop.f32.mrb[71].mxu1  ;;  %v10741_v4 = vpop.f32.mrb[65].mxu0  ;;  %v6240_v54 = vadd.f32 %v6239_v19, %v15960_v29  ;;  %v16146_v19 = vadd.f32 %v15929_v62, %v15932_v15 }
0x1e81   :  { %v6171_v32 = vadd.f32 %v6170_v52, %v15942_v5 }
0x1e82   :  { %v6244_v14 = vrot.slane %v6169_v9, 2  ;;  %v6264_v6 = vrot.slane %v6240_v54, 2 }
0x1e83   :  { %v6254_v33 = vrot.slane %v6171_v32, 2 }
0x1e84   :  { %v6246_v23 = vadd.f32 %v6244_v14, %v15949_v17 }
0x1e85   :  { %v6256_v39 = vadd.f32 %v6254_v33, %v15956_v44 }
0x1e86   :  { %v8807_v11 = vmul.f32 -1.442695, %v6246_v23 }
0x1e87   :  { %v8808_v1 = vmul.f32 -1.442695, %v6256_v39 }
0x1e88   :  { %14043 = vpow2.f32 %v8807_v11 }
0x1e89   :  { %14045 = vpow2.f32 %v8808_v1 }
0x1e92   :  { %v14044_v61 = vpop.eup %14043 }
0x1e93   :  { %v14046_v40 = vpop.eup %14045  ;;  %v6250_v22 = vadd.f32 1.0, %v14044_v61 }
0x1e94   :  { %v6260_v57 = vadd.f32 1.0, %v14046_v40  ;;  %v16153_v40 = vadd.f32 %v15936_v58, %v15945_v37 }
0x1e95   :  { %14047 = vrcp.f32 %v6250_v22 }
0x1e96   :  { %14049 = vrcp.f32 %v6260_v57 }
0x1e9f   :  { %v14048_v59 = vpop.eup %14047 }
0x1ea0   :  { %v14050_v63 = vpop.eup %14049  ;;  %v6266_v17 = vmul.f32 %v14048_v59, %v6264_v6 }
0x1ea1   :  { %v6273_v9 = vmul.f32 %v14050_v63, %v6271_v10  ;;  %v6269_v52 = vsub.f32 1.0, %v14050_v63 }
0x1ea2   :  { %v6267_v44 = vadd.f32 %v6266_v17, %v15963_v13 }
0x1ea4   :  { %14051 = vtanh.f32 %v6267_v44 }
0x1eae   :  { %v14052_v4 = vpop.eup %14051 }
0x1eaf   :  { %v6270_v32 = vmul.f32 %v14052_v4, %v6269_v52 }
0x1eb1   :  { %v6274_v14 = vadd.f32 %v6273_v9, %v6270_v32 }
0x1eb3   :  { %6275 = vst [vmem:[#allocation2] sm:$0xc0] %v6274_v14  ;;  %v16105_v33 = vrot.slane %v6274_v14, 6 }
0x1eb5   :  { %6344 = vmatmul.mubr.f32.vlgmr.msra.gmra.mrb[72].mxu1 %v16105_v33  ;;  %10775 = vmatmul.mubr.f32.vlgmr.msra.gmra.mrb[66].mxu0 %v16105_v33 }
0x1eb6   :  { %13084 = vmatpush1.bf16.msra.mxu1 %v15786_v28  ;;  %13115 = vmatpush3.bf16.msra.mxu0 %v15852_v30 }
0x1eb7   :  { %13086 = vmatprep.subr.bf16.mxu1 %v15790_v42  ;;  %13116 = vmatprep.subr.bf16.mxu0 %v14256_v26 }
0x1eb8   :  { %6506 = vmatprep.mubr.f32.mxu1 %v14255_v7  ;;  %10809 = vmatprep.mubr.msk.f32.mxu0 %vm14257_vm3, %v14255_v7 }
0x1eba   :  { %13088 = vmatpush1.bf16.msra.mxu1 %v15792_v46  ;;  %13118 = vmatpush3.bf16.msra.mxu0 %v15857_v55 }
0x1ebb   :  { %13090 = vmatprep.subr.bf16.mxu1 %v15796_v3  ;;  %13119 = vmatprep.subr.bf16.mxu0 %v14256_v26 }
0x1ebe   :  { %13092 = vmatpush1.bf16.msra.mxu1 %v15798_v45  ;;  %13121 = vmatpush3.bf16.msra.mxu0 %v15864_v12 }
0x1ebf   :  { %13094 = vmatprep.subr.bf16.mxu1 %v15801_v51  ;;  %13122 = vmatprep.subr.bf16.mxu0 %v14256_v26 }
0x1ec2   :  { %13096 = vmatpush1.bf16.msra.mxu1 %v15804_v24  ;;  %13124 = vmatpush3.bf16.msra.mxu0 %v15871_v31 }
0x1ec3   :  { %13098 = vmatprep.subr.bf16.mxu1 %v15807_v18  ;;  %13125 = vmatprep.subr.bf16.mxu0 %v14256_v26 }
0x1ec6   :  { %13100 = vmatpush1.bf16.msra.mxu1 %v15810_v38  ;;  %13127 = vmatpush3.bf16.msra.mxu0 %v15877_v21 }
0x1ec7   :  { %13102 = vmatprep.subr.bf16.mxu1 %v15813_v2  ;;  %13128 = vmatprep.subr.bf16.mxu0 %v14256_v26 }
0x1eca   :  { %13104 = vmatpush1.bf16.msra.mxu1 %v15816_v36  ;;  %13130 = vmatpush3.bf16.msra.mxu0 %v15883_v53 }
0x1ecb   :  { %13106 = vmatprep.subr.bf16.mxu1 %v15820_v8  ;;  %13131 = vmatprep.subr.bf16.mxu0 %v14256_v26 }
0x1ece   :  { %13108 = vmatpush1.bf16.msra.mxu1 %v15822_v56  ;;  %13133 = vmatpush3.bf16.msra.mxu0 %v15889_v50 }
0x1ecf   :  { %13110 = vmatprep.subr.bf16.mxu1 %v15827_v34  ;;  %13134 = vmatprep.subr.bf16.mxu0 %v14256_v26 }
0x1ed2   :  { %13112 = vmatpush1.bf16.msra.mxu1 %v15829_v41  ;;  %13136 = vmatpush3.bf16.msra.mxu0 %v15895_v60 }
0x1ed3   :  { %13138 = vmatprep.subr.bf16.mxu1 %v15784_v47  ;;  %13169 = vmatprep.subr.bf16.mxu0 %v14256_v26 }
0x1f88   :  { %v6345_v13 = vpop.f32.mrb[72].mxu1  ;;  %v6416_v16 = vpop.f32.mrb[66].mxu0 }
0x1f89   :  { %v6346_v23 = vadd.f32 %v6345_v13, %v15939_v35  ;;  %v6347_v39 = vpop.f32.mrb[73].mxu1  ;;  %v10776_v11 = vpop.f32.mrb[67].mxu0  ;;  %v6417_v10 = vadd.f32 %v6416_v16, %v15960_v29 }
0x1f8a   :  { %v6348_v1 = vadd.f32 %v6347_v39, %v15942_v5 }
0x1f8b   :  { %v6420_v61 = vadd.f32 %v6346_v23, %v16146_v19 }
0x1f8c   :  { %v6427_v57 = vadd.f32 %v6348_v1, %v16153_v40 }
0x1f8d   :  { %v8809_v22 = vmul.f32 -1.442695, %v6420_v61 }
0x1f8e   :  { %v8810_v54 = vmul.f32 -1.442695, %v6427_v57 }
0x1f8f   :  { %14053 = vpow2.f32 %v8809_v22 }
0x1f90   :  { %14055 = vpow2.f32 %v8810_v54 }
0x1f99   :  { %v14054_v62 = vpop.eup %14053 }
0x1f9a   :  { %v6424_v15 = vadd.f32 1.0, %v14054_v62  ;;  %v14056_v6 = vpop.eup %14055 }
0x1f9b   :  { %v6431_v59 = vadd.f32 1.0, %v14056_v6 }
0x1f9c   :  { %14057 = vrcp.f32 %v6424_v15 }
0x1f9d   :  { %14059 = vrcp.f32 %v6431_v59 }
0x1fa6   :  { %v14058_v63 = vpop.eup %14057 }
0x1fa7   :  { %v6434_v17 = vmul.f32 %v14058_v63, %v6417_v10  ;;  %v14060_v58 = vpop.eup %14059 }
0x1fa8   :  { %v6437_v37 = vsub.f32 1.0, %v14060_v58  ;;  %v6439_v4 = vmul.f32 %v14060_v58, %v16105_v33 }
0x1fa9   :  { %v6435_v9 = vadd.f32 %v6434_v17, %v15934_v25 }
0x1fab   :  { %14061 = vtanh.f32 %v6435_v9 }
0x1fb5   :  { %v14062_v44 = vpop.eup %14061 }
0x1fb6   :  { %v6438_v52 = vmul.f32 %v14062_v44, %v6437_v37 }
0x1fb8   :  { %v16159_v32 = vadd.f32 %v6439_v4, %v6438_v52 }
0x1fba   :  { %6441 = vst [vmem:[#allocation2 + $0x8] sm:$0x3] %v16159_v32  ;;  %6507 = vmatmul.mubr.f32.vlgmr.msra.gmra.mrb[74].mxu1 %v16159_v32  ;;  %10810 = vmatmul.mubr.f32.vlgmr.msra.gmra.mrb[68].mxu0 %v16159_v32  ;;  %v6612_v17 = vrot.slane %v16159_v32, 6 }
0x1fbb   :  { %13140 = vmatpush1.bf16.msra.mxu1 %v15786_v28  ;;  %13171 = vmatpush3.bf16.msra.mxu0 %v15852_v30 }
0x1fbc   :  { %13142 = vmatprep.subr.bf16.mxu1 %v15790_v42  ;;  %13172 = vmatprep.subr.bf16.mxu0 %v14256_v26 }
0x1fbd   :  { %6684 = vmatprep.mubr.f32.mxu1 %v14255_v7  ;;  %10844 = vmatprep.mubr.msk.f32.mxu0 %vm14257_vm3, %v14255_v7 }
0x1fbf   :  { %13144 = vmatpush1.bf16.msra.mxu1 %v15792_v46  ;;  %13174 = vmatpush3.bf16.msra.mxu0 %v15857_v55 }
0x1fc0   :  { %13146 = vmatprep.subr.bf16.mxu1 %v15796_v3  ;;  %13175 = vmatprep.subr.bf16.mxu0 %v14256_v26 }
0x1fc3   :  { %13148 = vmatpush1.bf16.msra.mxu1 %v15798_v45  ;;  %13177 = vmatpush3.bf16.msra.mxu0 %v15864_v12 }
0x1fc4   :  { %13150 = vmatprep.subr.bf16.mxu1 %v15801_v51  ;;  %13178 = vmatprep.subr.bf16.mxu0 %v14256_v26 }
0x1fc7   :  { %13152 = vmatpush1.bf16.msra.mxu1 %v15804_v24  ;;  %13180 = vmatpush3.bf16.msra.mxu0 %v15871_v31 }
0x1fc8   :  { %13154 = vmatprep.subr.bf16.mxu1 %v15807_v18  ;;  %13181 = vmatprep.subr.bf16.mxu0 %v14256_v26 }
0x1fcb   :  { %13156 = vmatpush1.bf16.msra.mxu1 %v15810_v38  ;;  %13183 = vmatpush3.bf16.msra.mxu0 %v15877_v21 }
0x1fcc   :  { %13158 = vmatprep.subr.bf16.mxu1 %v15813_v2  ;;  %13184 = vmatprep.subr.bf16.mxu0 %v14256_v26 }
0x1fcf   :  { %13160 = vmatpush1.bf16.msra.mxu1 %v15816_v36  ;;  %13186 = vmatpush3.bf16.msra.mxu0 %v15883_v53 }
0x1fd0   :  { %13162 = vmatprep.subr.bf16.mxu1 %v15820_v8  ;;  %13187 = vmatprep.subr.bf16.mxu0 %v14256_v26 }
0x1fd3   :  { %13164 = vmatpush1.bf16.msra.mxu1 %v15822_v56  ;;  %13189 = vmatpush3.bf16.msra.mxu0 %v15889_v50 }
0x1fd4   :  { %13166 = vmatprep.subr.bf16.mxu1 %v15827_v34  ;;  %13190 = vmatprep.subr.bf16.mxu0 %v14256_v26 }
0x1fd7   :  { %13168 = vmatpush1.bf16.msra.mxu1 %v15829_v41  ;;  %13192 = vmatpush3.bf16.msra.mxu0 %v15895_v60 }
0x1fd8   :  { %13194 = vmatprep.subr.bf16.mxu1 %v15784_v47  ;;  %13225 = vmatprep.subr.bf16.mxu0 %v14256_v26 }
0x208d   :  { %v6508_v14 = vpop.f32.mrb[74].mxu1  ;;  %v6579_v33 = vpop.f32.mrb[68].mxu0 }
0x208e   :  { %v6509_v13 = vadd.f32 %v6508_v14, %v15939_v35  ;;  %v6510_v16 = vpop.f32.mrb[75].mxu1  ;;  %v10811_v23 = vpop.f32.mrb[69].mxu0  ;;  %v6580_v59 = vadd.f32 %v6579_v33, %v15960_v29 }
0x208f   :  { %v6511_v39 = vadd.f32 %v6510_v16, %v15942_v5 }
0x2090   :  { %v6584_v11 = vrot.slane %v6509_v13, 6  ;;  %v6604_v10 = vrot.slane %v6580_v59, 6 }
0x2091   :  { %v6594_v1 = vrot.slane %v6511_v39, 6 }
0x2092   :  { %v6586_v61 = vadd.f32 %v6584_v11, %v16146_v19 }
0x2093   :  { %v6596_v22 = vadd.f32 %v6594_v1, %v16153_v40 }
0x2094   :  { %v8811_v57 = vmul.f32 -1.442695, %v6586_v61 }
0x2095   :  { %v8812_v54 = vmul.f32 -1.442695, %v6596_v22  ;;  %v7007_v22 = vld [vmem:[#allocation4 + $0x600] sm:$0xff] }
0x2096   :  { %14063 = vpow2.f32 %v8811_v57  ;;  %v7010_v57 = vld [vmem:[#allocation4 + $0x618] sm:$0xff] }
0x2097   :  { %14065 = vpow2.f32 %v8812_v54  ;;  %v7014_v54 = vld [vmem:[#allocation4 + $0x638] sm:$0xff] }
0x20a0   :  { %v14064_v47 = vpop.eup %14063 }
0x20a1   :  { %v14066_v62 = vpop.eup %14065  ;;  %v6590_v15 = vadd.f32 1.0, %v14064_v47  ;;  %v7017_v47 = vld [vmem:[#allocation4 + $0x650] sm:$0xff] }
0x20a2   :  { %v6600_v6 = vadd.f32 1.0, %v14066_v62  ;;  %v13253_v59 = vpack.c.bf16 %v7017_v47, %v7014_v54  ;;  %v7018_v54 = vld [vmem:[#allocation4 + $0x658] sm:$0xff] }
0x20a3   :  { %14067 = vrcp.f32 %v6590_v15  ;;  %v13251_v15 = vpack.c.bf16 %v7010_v57, %v7007_v22  ;;  %v7015_v57 = vld [vmem:[#allocation4 + $0x640] sm:$0xff] }
0x20a4   :  { %14069 = vrcp.f32 %v6600_v6  ;;  %v13285_v47 = vpack.c.bf16 %v7018_v54, %v7015_v57  ;;  %v7256_v54 = vld [vmem:[#allocation6 + $0x6f0] sm:$0xff] }
0x20ad   :  { %v14068_v63 = vpop.eup %14067 }
0x20ae   :  { %v14070_v9 = vpop.eup %14069  ;;  %v6606_v58 = vmul.f32 %v14068_v63, %v6604_v10  ;;  %v7013_v10 = vld [vmem:[#allocation4 + $0x630] sm:$0xff]  ;;  %v7016_v63 = vld [vmem:[#allocation4 + $0x648] sm:$0xff] }
0x20af   :  { %v6614_v37 = vmul.f32 %v14070_v9, %v6612_v17  ;;  %v6609_v52 = vsub.f32 1.0, %v14070_v9  ;;  %v7020_v17 = vld [vmem:[#allocation4 + $0x668] sm:$0xff]  ;;  %v7023_v9 = vld [vmem:[#allocation4 + $0x680] sm:$0xff] }
0x20b0   :  { %v6607_v44 = vadd.f32 %v6606_v58, %v15934_v25  ;;  %v6971_v58 = vld [vmem:[#allocation2] sm:$0xff] }
0x20b2   :  { %14071 = vtanh.f32 %v6607_v44  ;;  %v13257_v44 = vpack.c.bf16 %v7023_v9, %v7020_v17  ;;  %v7021_v9 = vld [vmem:[#allocation4 + $0x670] sm:$0xff] }
0x20bc   :  { %v14072_v4 = vpop.eup %14071 }
0x20bd   :  { %v6610_v14 = vmul.f32 %v14072_v4, %v6609_v52  ;;  %v7019_v52 = vld [vmem:[#allocation4 + $0x660] sm:$0xff]  ;;  %v7022_v4 = vld [vmem:[#allocation4 + $0x678] sm:$0xff] }
0x20bf   :  { %v16206_v13 = vadd.f32 %v6614_v37, %v6610_v14  ;;  %v13255_v37 = vpack.c.bf16 %v7016_v63, %v7013_v10  ;;  %v7026_v14 = vld [vmem:[#allocation4 + $0x698] sm:$0xff]  ;;  %v7226_v10 = vld [vmem:[#allocation6 + $0x600] sm:$0xff] }
0x20c0   :  { %v7229_v63 = vld [vmem:[#allocation6 + $0x618] sm:$0xff] }
0x20c1   :  { %6616 = vst [vmem:[#allocation2 + $0x8] sm:$0xc] %v16206_v13  ;;  %v6618_v16 = vrot.slane %v16206_v13, 2  ;;  %v16258_v17 = vpack.c.bf16 %v7229_v63, %v7226_v10  ;;  %v7054_v10 = vld [vmem:[#allocation4 + $0x778] sm:$0xff] }
0x20c3   :  { %6685 = vmatmul.mubr.f32.vlgmr.msra.gmra.mrb[76].mxu1 %v6618_v16  ;;  %10845 = vmatmul.mubr.f32.vlgmr.msra.gmra.mrb[70].mxu0 %v6618_v16  ;;  %v13259_v16 = vpack.c.bf16 %v7022_v4, %v7019_v52  ;;  %v7236_v52 = vld [vmem:[#allocation6 + $0x650] sm:$0xff] }
0x20c4   :  { %13196 = vmatpush1.bf16.msra.mxu1 %v15786_v28  ;;  %13227 = vmatpush3.bf16.msra.mxu0 %v15852_v30  ;;  %v7008_v28 = vld [vmem:[#allocation4 + $0x608] sm:$0xff] }
0x20c5   :  { %13198 = vmatprep.subr.bf16.mxu1 %v15790_v42  ;;  %13228 = vmatprep.subr.bf16.mxu0 %v14256_v26  ;;  %v7011_v42 = vld [vmem:[#allocation4 + $0x620] sm:$0xff] }
0x20c6   :  { %6861 = vmatprep.mubr.f32.mxu1 %v14255_v7  ;;  %10879 = vmatprep.mubr.msk.f32.mxu0 %vm14257_vm3, %v14255_v7 }
0x20c8   :  { %13200 = vmatpush1.bf16.msra.mxu1 %v15792_v46  ;;  %13230 = vmatpush3.bf16.msra.mxu0 %v15857_v55  ;;  %v13249_v46 = vpack.c.bf16 %v7011_v42, %v7008_v28  ;;  %v7025_v42 = vld [vmem:[#allocation4 + $0x690] sm:$0xff] }
0x20c9   :  { %13202 = vmatprep.subr.bf16.mxu1 %v15796_v3  ;;  %13231 = vmatprep.subr.bf16.mxu0 %v14256_v26 }
0x20cc   :  { %13204 = vmatpush1.bf16.msra.mxu1 %v15798_v45  ;;  %13233 = vmatpush3.bf16.msra.mxu0 %v15864_v12 }
0x20cd   :  { %13206 = vmatprep.subr.bf16.mxu1 %v15801_v51  ;;  %13234 = vmatprep.subr.bf16.mxu0 %v14256_v26 }
0x20d0   :  { %13208 = vmatpush1.bf16.msra.mxu1 %v15804_v24  ;;  %13236 = vmatpush3.bf16.msra.mxu0 %v15871_v31 }
0x20d1   :  { %13210 = vmatprep.subr.bf16.mxu1 %v15807_v18  ;;  %13237 = vmatprep.subr.bf16.mxu0 %v14256_v26 }
0x20d4   :  { %13212 = vmatpush1.bf16.msra.mxu1 %v15810_v38  ;;  %13239 = vmatpush3.bf16.msra.mxu0 %v15877_v21 }
0x20d5   :  { %13214 = vmatprep.subr.bf16.mxu1 %v15813_v2  ;;  %13240 = vmatprep.subr.bf16.mxu0 %v14256_v26 }
0x20d8   :  { %13216 = vmatpush1.bf16.msra.mxu1 %v15816_v36  ;;  %13242 = vmatpush3.bf16.msra.mxu0 %v15883_v53 }
0x20d9   :  { %13218 = vmatprep.subr.bf16.mxu1 %v15820_v8  ;;  %13243 = vmatprep.subr.bf16.mxu0 %v14256_v26 }
0x20dc   :  { %13220 = vmatpush1.bf16.msra.mxu1 %v15822_v56  ;;  %13245 = vmatpush3.bf16.msra.mxu0 %v15889_v50 }
0x20dd   :  { %13222 = vmatprep.subr.bf16.mxu1 %v15827_v34  ;;  %13246 = vmatprep.subr.bf16.mxu0 %v14256_v26 }
0x20e0   :  { %13224 = vmatpush1.bf16.msra.mxu1 %v15829_v41  ;;  %13248 = vmatpush3.bf16.msra.mxu0 %v15895_v60  ;;  %v6789_v60 = vrot.slane %v16206_v13, 6  ;;  %v7029_v13 = vld [vmem:[#allocation4 + $0x6b0] sm:$0xff] }
0x20e1   :  { %13250 = vmatprep.subr.bf16.mxu1 %v13249_v46  ;;  %v13261_v28 = vpack.c.bf16 %v7029_v13, %v7026_v14  ;;  %v7028_v46 = vld [vmem:[#allocation4 + $0x6a8] sm:$0xff]  ;;  %v7232_v14 = vld [vmem:[#allocation6 + $0x630] sm:$0xff] }
0x20e2   :  { %v7235_v13 = vld [vmem:[#allocation6 + $0x648] sm:$0xff] }
0x2196   :  { %v6686_v3 = vpop.f32.mrb[76].mxu1  ;;  %v6757_v45 = vpop.f32.mrb[70].mxu0 }
0x2197   :  { %v6687_v51 = vadd.f32 %v6686_v3, %v15939_v35  ;;  %v6688_v24 = vpop.f32.mrb[77].mxu1  ;;  %v10846_v18 = vpop.f32.mrb[71].mxu0  ;;  %v6758_v21 = vadd.f32 %v6757_v45, %v15960_v29  ;;  %v7032_v3 = vld [vmem:[#allocation4 + $0x6c8] sm:$0xff]  ;;  %v7035_v45 = vld [vmem:[#allocation4 + $0x6e0] sm:$0xff] }
0x2198   :  { %v6689_v38 = vadd.f32 %v6688_v24, %v15942_v5  ;;  %v13265_v24 = vpack.c.bf16 %v7035_v45, %v7032_v3  ;;  %v7031_v18 = vld [vmem:[#allocation4 + $0x6c0] sm:$0xff] }
0x2199   :  { %v6762_v2 = vrot.slane %v6687_v51, 4  ;;  %v6782_v53 = vrot.slane %v6758_v21, 4  ;;  %v13263_v51 = vpack.c.bf16 %v7028_v46, %v7025_v42  ;;  %v7043_v21 = vld [vmem:[#allocation4 + $0x720] sm:$0xff]  ;;  %v7030_v42 = vld [vmem:[#allocation4 + $0x6b8] sm:$0xff]  ;;  %v7239_v46 = vld [vmem:[#allocation6 + $0x668] sm:$0xff] }
0x219a   :  { %v6772_v36 = vrot.slane %v6689_v38, 4  ;;  %v7034_v38 = vld [vmem:[#allocation4 + $0x6d8] sm:$0xff]  ;;  %v7242_v45 = vld [vmem:[#allocation6 + $0x680] sm:$0xff] }
0x219b   :  { %v6764_v8 = vadd.f32 %v6762_v2, %v16146_v19  ;;  %v7038_v2 = vld [vmem:[#allocation4 + $0x6f8] sm:$0xff] }
0x219c   :  { %v6774_v56 = vadd.f32 %v6772_v36, %v16153_v40  ;;  %v7041_v36 = vld [vmem:[#allocation4 + $0x710] sm:$0xff] }
0x219d   :  { %v8813_v34 = vmul.f32 -1.442695, %v6764_v8  ;;  %v13267_v8 = vpack.c.bf16 %v7034_v38, %v7031_v18  ;;  %v16268_v18 = vpack.c.bf16 %v7242_v45, %v7239_v46  ;;  %v7271_v45 = vld [vmem:[#allocation6 + $0x768] sm:$0xff] }
0x219e   :  { %v8814_v41 = vmul.f32 -1.442695, %v6774_v56  ;;  %v13269_v56 = vpack.c.bf16 %v7041_v36, %v7038_v2  ;;  %v7033_v2 = vld [vmem:[#allocation4 + $0x6d0] sm:$0xff]  ;;  %v7036_v36 = vld [vmem:[#allocation4 + $0x6e8] sm:$0xff] }
0x219f   :  { %14073 = vpow2.f32 %v8813_v34  ;;  %v7037_v34 = vld [vmem:[#allocation4 + $0x6f0] sm:$0xff] }
0x21a0   :  { %14075 = vpow2.f32 %v8814_v41  ;;  %v7040_v41 = vld [vmem:[#allocation4 + $0x708] sm:$0xff] }
0x21a9   :  { %v14074_v30 = vpop.eup %14073 }
0x21aa   :  { %v14076_v55 = vpop.eup %14075  ;;  %v6768_v12 = vadd.f32 1.0, %v14074_v30  ;;  %v7044_v30 = vld [vmem:[#allocation4 + $0x728] sm:$0xff] }
0x21ab   :  { %v6778_v31 = vadd.f32 1.0, %v14076_v55  ;;  %v7047_v55 = vld [vmem:[#allocation4 + $0x740] sm:$0xff] }
0x21ac   :  { %14077 = vrcp.f32 %v6768_v12  ;;  %v13271_v12 = vpack.c.bf16 %v7040_v41, %v7037_v34  ;;  %v7248_v34 = vld [vmem:[#allocation6 + $0x6b0] sm:$0xff] }
0x21ad   :  { %14079 = vrcp.f32 %v6778_v31  ;;  %v13273_v31 = vpack.c.bf16 %v7047_v55, %v7044_v30  ;;  %v7244_v41 = vld [vmem:[#allocation6 + $0x690] sm:$0xff]  ;;  %v7247_v30 = vld [vmem:[#allocation6 + $0x6a8] sm:$0xff] }
0x21b6   :  { %v14078_v50 = vpop.eup %14077 }
0x21b7   :  { %v14080_v32 = vpop.eup %14079  ;;  %v6784_v33 = vmul.f32 %v14078_v50, %v6782_v53  ;;  %v7046_v53 = vld [vmem:[#allocation4 + $0x738] sm:$0xff] }
0x21b8   :  { %v6791_v23 = vmul.f32 %v14080_v32, %v6789_v60  ;;  %v6787_v11 = vsub.f32 1.0, %v14080_v32  ;;  %v7050_v50 = vld [vmem:[#allocation4 + $0x758] sm:$0xff]  ;;  %v7053_v60 = vld [vmem:[#allocation4 + $0x770] sm:$0xff]  ;;  %v13275_v32 = vpack.c.bf16 %v7046_v53, %v7043_v21  ;;  %v7251_v21 = vld [vmem:[#allocation6 + $0x6c8] sm:$0xff]  ;;  %v16276_v53 = vpack.c.bf16 %v7247_v30, %v7244_v41 }
0x21b9   :  { %v6785_v39 = vadd.f32 %v6784_v33, %v15934_v25  ;;  %v13277_v33 = vpack.c.bf16 %v7053_v60, %v7050_v50  ;;  %v7254_v60 = vld [vmem:[#allocation6 + $0x6e0] sm:$0xff] }
0x21bb   :  { %14081 = vtanh.f32 %v6785_v39  ;;  %v7052_v39 = vld [vmem:[#allocation4 + $0x768] sm:$0xff] }
0x21c5   :  { %v14082_v1 = vpop.eup %14081 }
0x21c6   :  { %v6788_v61 = vmul.f32 %v14082_v1, %v6787_v11  ;;  %v7009_v1 = vld [vmem:[#allocation4 + $0x610] sm:$0xff] }
0x21c8   :  { %v16250_v62 = vadd.f32 %v6791_v23, %v6788_v61  ;;  %v7049_v23 = vld [vmem:[#allocation4 + $0x750] sm:$0xff]  ;;  %v7012_v61 = vld [vmem:[#allocation4 + $0x628] sm:$0xff] }
0x21c9   :  { %v13279_v11 = vpack.c.bf16 %v7052_v39, %v7049_v23  ;;  %v13281_v22 = vpack.c.bf16 %v7012_v61, %v7009_v1  ;;  %v7253_v23 = vld [vmem:[#allocation6 + $0x6d8] sm:$0xff]  ;;  %v7045_v39 = vld [vmem:[#allocation4 + $0x730] sm:$0xff] }
0x21ca   :  { %6793 = vst [vmem:[#allocation2 + $0x8] sm:$0x30] %v16250_v62  ;;  %v6795_v6 = vrot.slane %v16250_v62, 4  ;;  %v7257_v1 = vld [vmem:[#allocation6 + $0x6f8] sm:$0xff]  ;;  %v7260_v61 = vld [vmem:[#allocation6 + $0x710] sm:$0xff] }
0x21cb   :  { %13282 = vmatprep.subr.bf16.mxu0 %v13281_v22 }
0x21cc   :  { %6862 = vmatmul.mubr.f32.vlgmr.msra.gmra.mrb[78].mxu1 %v6795_v6  ;;  %10880 = vmatmul.mubr.f32.vlgmr.msra.gmra.mrb[72].mxu0 %v6795_v6  ;;  %v7230_v6 = vld [vmem:[#allocation6 + $0x620] sm:$0xff] }
0x21cd   :  { %13252 = vmatpush1.bf16.msra.mxu1 %v13251_v15  ;;  %10914 = vmatprep.mubr.f32.mxu0 %v6971_v58  ;;  %v7227_v15 = vld [vmem:[#allocation6 + $0x608] sm:$0xff] }
0x21ce   :  { %13254 = vmatprep.subr.bf16.mxu1 %v13253_v59  ;;  %7137 = vmatprep.mubr.f32.mxu1 %v14255_v7  ;;  %v16256_v59 = vpack.c.bf16 %v7230_v6, %v7227_v15  ;;  %v7259_v15 = vld [vmem:[#allocation6 + $0x708] sm:$0xff]  ;;  %v7051_v6 = vld [vmem:[#allocation4 + $0x760] sm:$0xff] }
0x21cf   :  { %13284 = vmatpush3.bf16.msra.mxu0 %v13281_v22  ;;  %v16288_v63 = vpack.c.bf16 %v7259_v15, %v7256_v54 }
0x21d0   :  { %13286 = vmatprep.subr.bf16.mxu0 %v13285_v47 }
0x21d1   :  { %13256 = vmatpush1.bf16.msra.mxu1 %v13255_v37 }
0x21d2   :  { %13258 = vmatprep.subr.bf16.mxu1 %v13257_v44  ;;  %v7233_v44 = vld [vmem:[#allocation6 + $0x638] sm:$0xff] }
0x21d3   :  { %13288 = vmatpush3.bf16.msra.mxu0 %v13285_v47  ;;  %v16262_v4 = vpack.c.bf16 %v7236_v52, %v7233_v44  ;;  %v16285_v47 = vpack.c.bf16 %v7260_v61, %v7257_v1  ;;  %v7262_v52 = vld [vmem:[#allocation6 + $0x720] sm:$0xff] }
0x21d5   :  { %13260 = vmatpush1.bf16.msra.mxu1 %v13259_v16  ;;  %v16264_v16 = vpack.c.bf16 %v7235_v13, %v7232_v14  ;;  %v7265_v14 = vld [vmem:[#allocation6 + $0x738] sm:$0xff] }
0x21d6   :  { %13262 = vmatprep.subr.bf16.mxu1 %v13261_v28  ;;  %v7027_v28 = vld [vmem:[#allocation4 + $0x6a0] sm:$0xff]  ;;  %v16294_v13 = vpack.c.bf16 %v7265_v14, %v7262_v52 }
0x21d7   :  { %v13293_v3 = vpack.c.bf16 %v7030_v42, %v7027_v28  ;;  %v7269_v28 = vld [vmem:[#allocation6 + $0x758] sm:$0xff]  ;;  %v7272_v42 = vld [vmem:[#allocation6 + $0x770] sm:$0xff] }
0x21d8   :  { %v16299_v46 = vpack.c.bf16 %v7272_v42, %v7269_v28  ;;  %v7228_v42 = vld [vmem:[#allocation6 + $0x610] sm:$0xff] }
0x21d9   :  { %13264 = vmatpush1.bf16.msra.mxu1 %v13263_v51  ;;  %v7238_v51 = vld [vmem:[#allocation6 + $0x660] sm:$0xff] }
0x21da   :  { %13266 = vmatprep.subr.bf16.mxu1 %v13265_v24  ;;  %v7241_v24 = vld [vmem:[#allocation6 + $0x678] sm:$0xff] }
0x21db   :  { %v16270_v38 = vpack.c.bf16 %v7241_v24, %v7238_v51 }
0x21dd   :  { %13268 = vmatpush1.bf16.msra.mxu1 %v13267_v8  ;;  %v7245_v8 = vld [vmem:[#allocation6 + $0x698] sm:$0xff] }
0x21de   :  { %13270 = vmatprep.subr.bf16.mxu1 %v13269_v56  ;;  %v13297_v56 = vpack.c.bf16 %v7036_v36, %v7033_v2  ;;  %v16273_v55 = vpack.c.bf16 %v7248_v34, %v7245_v8 }
0x21e1   :  { %13272 = vmatpush1.bf16.msra.mxu1 %v13271_v12  ;;  %v7039_v12 = vld [vmem:[#allocation4 + $0x700] sm:$0xff] }
0x21e2   :  { %13274 = vmatprep.subr.bf16.mxu1 %v13273_v31  ;;  %v7042_v31 = vld [vmem:[#allocation4 + $0x718] sm:$0xff] }
0x21e3   :  { %v13301_v50 = vpack.c.bf16 %v7042_v31, %v7039_v12 }
0x21e5   :  { %13276 = vmatpush1.bf16.msra.mxu1 %v13275_v32  ;;  %v7250_v32 = vld [vmem:[#allocation6 + $0x6c0] sm:$0xff] }
0x21e6   :  { %13278 = vmatprep.subr.bf16.mxu1 %v13277_v33  ;;  %v16279_v33 = vpack.c.bf16 %v7254_v60, %v7251_v21  ;;  %v16282_v22 = vpack.c.bf16 %v7253_v23, %v7250_v32 }
0x21e9   :  { %13280 = vmatpush1.bf16.msra.mxu1 %v13279_v11  ;;  %v7048_v11 = vld [vmem:[#allocation4 + $0x748] sm:$0xff] }
0x21ea   :  { %13314 = vmatprep.subr.bf16.mxu1 %v16256_v59  ;;  %v13305_v57 = vpack.c.bf16 %v7048_v11, %v7045_v39 }
0x21ec   :  { %7138 = vmatmul.mubr.f32.vlgmr.msra.gmra.mrb[80].mxu1 %v6971_v58  ;;  %v7024_v58 = vld [vmem:[#allocation4 + $0x688] sm:$0xff] }
0x21ed   :  { %7143 = vmatprep.mubr.f32.mxu1 %v14255_v7  ;;  %13316 = vmatpush1.bf16.msra.mxu1 %v16258_v17  ;;  %v13289_v37 = vpack.c.bf16 %v7024_v58, %v7021_v9  ;;  %v13309_v9 = vpack.c.bf16 %v7054_v10, %v7051_v6  ;;  %v7263_v58 = vld [vmem:[#allocation6 + $0x728] sm:$0xff]  ;;  %v8817_v6 = vld [vmem:[%s16769_s7 + $0xc] sm:$0x3] }
0x21ee   :  { %13318 = vmatprep.subr.bf16.mxu1 %v16262_v4 }
0x21ef   :  { %13290 = vmatprep.subr.bf16.mxu0 %v13289_v37 }
0x21f0   :  { %13292 = vmatpush3.bf16.msra.mxu0 %v13289_v37  ;;  %v7266_v37 = vld [vmem:[#allocation6 + $0x740] sm:$0xff] }
0x21f1   :  { %13320 = vmatpush1.bf16.msra.mxu1 %v16264_v16  ;;  %13294 = vmatprep.subr.bf16.mxu0 %v13293_v3  ;;  %v16292_v44 = vpack.c.bf16 %v7266_v37, %v7263_v58 }
0x21f2   :  { %13322 = vmatprep.subr.bf16.mxu1 %v16268_v18 }
0x21f4   :  { %13296 = vmatpush3.bf16.msra.mxu0 %v13293_v3  ;;  %v7268_v3 = vld [vmem:[#allocation6 + $0x750] sm:$0xff] }
0x21f5   :  { %13324 = vmatpush1.bf16.msra.mxu1 %v16270_v38  ;;  %13298 = vmatprep.subr.bf16.mxu0 %v13297_v56  ;;  %v16301_v51 = vpack.c.bf16 %v7271_v45, %v7268_v3  ;;  %v7231_v3 = vld [vmem:[#allocation6 + $0x628] sm:$0xff] }
0x21f6   :  { %13326 = vmatprep.subr.bf16.mxu1 %v16273_v55  ;;  %v16324_v45 = vpack.c.bf16 %v7231_v3, %v7228_v42 }
0x21f8   :  { %13300 = vmatpush3.bf16.msra.mxu0 %v13297_v56 }
0x21f9   :  { %13328 = vmatpush1.bf16.msra.mxu1 %v16276_v53  ;;  %13302 = vmatprep.subr.bf16.mxu0 %v13301_v50 }
0x21fa   :  { %13330 = vmatprep.subr.bf16.mxu1 %v16279_v33 }
0x21fc   :  { %13304 = vmatpush3.bf16.msra.mxu0 %v13301_v50 }
0x21fd   :  { %13332 = vmatpush1.bf16.msra.mxu1 %v16282_v22  ;;  %13306 = vmatprep.subr.bf16.mxu0 %v13305_v57 }
0x21fe   :  { %13334 = vmatprep.subr.bf16.mxu1 %v16285_v47 }
0x2200   :  { %13308 = vmatpush3.bf16.msra.mxu0 %v13305_v57 }
0x2201   :  { %13336 = vmatpush1.bf16.msra.mxu1 %v16288_v63  ;;  %13310 = vmatprep.subr.bf16.mxu0 %v13309_v9 }
0x2202   :  { %13338 = vmatprep.subr.bf16.mxu1 %v16292_v44 }
0x2204   :  { %13312 = vmatpush3.bf16.msra.mxu0 %v13309_v9  ;;  %v8818_v9 = vld [vmem:[%s16769_s7 + $0xe] sm:$0x3] }
0x2205   :  { %13340 = vmatpush1.bf16.msra.mxu1 %v16294_v13  ;;  %13345 = vmatprep.subr.bf16.mxu0 %v14256_v26  ;;  %v6979_v52 = vrot.slane %v8818_v9, 2 }
0x2206   :  { %13342 = vmatprep.subr.bf16.mxu1 %v16299_v46 }
0x2209   :  { %13344 = vmatpush1.bf16.msra.mxu1 %v16301_v51 }
0x220a   :  { %13370 = vmatprep.subr.bf16.mxu1 %v16256_v59 }
0x229f   :  { %v6863_v24 = vpop.f32.mrb[78].mxu1  ;;  %v6934_v2 = vpop.f32.mrb[72].mxu0 }
0x22a0   :  { %v6864_v36 = vadd.f32 %v6863_v24, %v15939_v35  ;;  %v6865_v8 = vpop.f32.mrb[79].mxu1  ;;  %v10881_v56 = vpop.f32.mrb[73].mxu0  ;;  %v6935_v35 = vadd.f32 %v6934_v2, %v15960_v29  ;;  %v7234_v2 = vld [vmem:[#allocation6 + $0x640] sm:$0xff] }
0x22a1   :  { %v6866_v34 = vadd.f32 %v6865_v8, %v15942_v5 }
0x22a2   :  { %v6939_v41 = vrot.slane %v6864_v36, 2  ;;  %v6959_v11 = vrot.slane %v6935_v35, 2  ;;  %v7237_v36 = vld [vmem:[#allocation6 + $0x658] sm:$0xff] }
0x22a3   :  { %v6949_v30 = vrot.slane %v6866_v34, 2  ;;  %v16329_v56 = vpack.c.bf16 %v7237_v36, %v7234_v2  ;;  %v7240_v34 = vld [vmem:[#allocation6 + $0x670] sm:$0xff] }
0x22a4   :  { %v6941_v12 = vadd.f32 %v6939_v41, %v16146_v19  ;;  %v6966_v19 = vrot.slane %v16250_v62, 6  ;;  %v6978_v62 = vrot.slane %v8817_v6, 2  ;;  %v7243_v41 = vld [vmem:[#allocation6 + $0x688] sm:$0xff] }
0x22a5   :  { %v6951_v31 = vadd.f32 %v6949_v30, %v16153_v40  ;;  %v16336_v30 = vpack.c.bf16 %v7243_v41, %v7240_v34 }
0x22a6   :  { %v8815_v21 = vmul.f32 -1.442695, %v6941_v12  ;;  %v7246_v12 = vld [vmem:[#allocation6 + $0x6a0] sm:$0xff] }
0x22a7   :  { %v8816_v50 = vmul.f32 -1.442695, %v6951_v31  ;;  %v7249_v31 = vld [vmem:[#allocation6 + $0x6b8] sm:$0xff] }
0x22a8   :  { %14083 = vpow2.f32 %v8815_v21  ;;  %v16343_v21 = vpack.c.bf16 %v7249_v31, %v7246_v12 }
0x22a9   :  { %14085 = vpow2.f32 %v8816_v50  ;;  %v7252_v50 = vld [vmem:[#allocation6 + $0x6d0] sm:$0xff] }
0x22b2   :  { %v14084_v60 = vpop.eup %14083 }
0x22b3   :  { %v14086_v32 = vpop.eup %14085  ;;  %v6945_v23 = vadd.f32 1.0, %v14084_v60  ;;  %v7255_v60 = vld [vmem:[#allocation6 + $0x6e8] sm:$0xff] }
0x22b4   :  { %v6955_v39 = vadd.f32 1.0, %v14086_v32  ;;  %v16349_v32 = vpack.c.bf16 %v7255_v60, %v7252_v50 }
0x22b5   :  { %14087 = vrcp.f32 %v6945_v23  ;;  %v7258_v23 = vld [vmem:[#allocation6 + $0x700] sm:$0xff] }
0x22b6   :  { %14089 = vrcp.f32 %v6955_v39  ;;  %v7261_v39 = vld [vmem:[#allocation6 + $0x718] sm:$0xff] }
0x22b7   :  { %v16355_v35 = vpack.c.bf16 %v7261_v39, %v7258_v23 }
0x22bf   :  { %v14088_v5 = vpop.eup %14087  ;;  %v16311_v1 = vpop.f32.mrb[80].mxu1 }
0x22c0   :  { %v14090_v61 = vpop.eup %14089  ;;  %v6961_v40 = vmul.f32 %v14088_v5, %v6959_v11  ;;  %v16314_v57 = vpop.f32.mrb[81].mxu1  ;;  %v7264_v11 = vld [vmem:[#allocation6 + $0x730] sm:$0xff]  ;;  %v7267_v5 = vld [vmem:[#allocation6 + $0x748] sm:$0xff] }
0x22c1   :  { %v6968_v54 = vmul.f32 %v14090_v61, %v6966_v19  ;;  %v6964_v10 = vsub.f32 1.0, %v14090_v61  ;;  %v16361_v19 = vpack.c.bf16 %v7267_v5, %v7264_v11  ;;  %v7270_v61 = vld [vmem:[#allocation6 + $0x760] sm:$0xff] }
0x22c2   :  { %v6962_v15 = vadd.f32 %v6961_v40, %v15934_v25  ;;  %v7273_v40 = vld [vmem:[#allocation6 + $0x778] sm:$0xff] }
0x22c4   :  { %14091 = vtanh.f32 %v6962_v15  ;;  %v16397_v15 = vpop.xlane.xlu1 %5277 }
0x22c8   :  { %v16399_v6 = vpop.xlane.xlu1 %5280 }
0x22ce   :  { %v14092_v29 = vpop.eup %14091 }
0x22cf   :  { %v6965_v58 = vmul.f32 %v14092_v29, %v6964_v10 }
0x22d1   :  { %v6969_v37 = vadd.f32 %v6968_v54, %v6965_v58  ;;  %v16367_v54 = vpack.c.bf16 %v7273_v40, %v7270_v61 }
0x22d3   :  { %v6982_v14 = vmul.f32 %v6978_v62, %v6969_v37  ;;  %6970 = vst [vmem:[#allocation2 + $0x8] sm:$0xc0] %v6969_v37  ;;  %v6983_v25 = vmul.f32 %v6979_v52, %v6969_v37  ;;  %v8819_v52 = vld [vmem:[%s16766_s4 + $0xc] sm:$0x7] }
0x22d4   :  { %v16412_v3 = vrot.slane %v8819_v52, %v14512_v48  ;;  %v16425_v41 = vrot.slane %v8819_v52, %v14515_v49 }
0x22d5   :  { %v6984_v28 = vsel %vm1856_vm4, %v6982_v14, 0.0  ;;  %v6987_v24 = vsel %vm1856_vm4, %v6983_v25, 0.0  ;;  %v7069_v14 = vrot.slane %v8819_v52, %v14505_v43 }
0x22d6   :  { %6985 = vadd.xlane.f32.xlu1 %v6984_v28  ;;  %v7275_v28 = vld [vmem:[#allocation8 + $0xc] sm:$0x7]  ;;  %v16429_v31 = vadd.f32 %v16311_v1, %v16412_v3 }
0x22d7   :  { %v16422_v34 = vrot.slane %v7275_v28, %v14515_v49 }
0x22da   :  { %6988 = vadd.xlane.f32.xlu1 %v6987_v24  ;;  %v6972_v8 = vld [vmem:[#allocation2 + $0x8] sm:$0xff] }
0x22db   :  { %7144 = vmatmul.mubr.f32.gmra.mrb[82].mxu1 %v6972_v8  ;;  %10915 = vmatmul.mubr.f32.vlgmr.msra.gmra.mrb[74].mxu0 %v6972_v8  ;;  %v16419_v8 = vrot.slane %v7275_v28, %v14512_v48  ;;  %v16436_v48 = vadd.f32 %v16314_v57, %v16425_v41 }
0x22dc   :  { %13347 = vmatpush3.bf16.msra.mxu0 %v16324_v45  ;;  %7356 = vmatprep.mubr.f32.mxu1 %v14255_v7 }
0x22dd   :  { %13348 = vmatprep.subr.bf16.mxu0 %v14256_v26  ;;  %10949 = vmatprep.mubr.msk.f32.mxu0 %vm14257_vm3, %v14255_v7 }
0x22df   :  { %7357 = vmatmul.mubr.f32.vlgmr.msra.gmra.mrb[84].mxu1 %v14255_v7 }
0x22e0   :  { %13350 = vmatpush3.bf16.msra.mxu0 %v16329_v56  ;;  %13372 = vmatpush1.bf16.msra.mxu1 %v16258_v17 }
0x22e1   :  { %13351 = vmatprep.subr.bf16.mxu0 %v14256_v26  ;;  %13374 = vmatprep.subr.bf16.mxu1 %v16262_v4 }
0x22e2   :  { %7518 = vmatprep.mubr.f32.mxu1 %v14255_v7 }
0x22e4   :  { %13353 = vmatpush3.bf16.msra.mxu0 %v16336_v30  ;;  %13376 = vmatpush1.bf16.msra.mxu1 %v16264_v16 }
0x22e5   :  { %13354 = vmatprep.subr.bf16.mxu0 %v14256_v26  ;;  %13378 = vmatprep.subr.bf16.mxu1 %v16268_v18 }
0x22e8   :  { %13356 = vmatpush3.bf16.msra.mxu0 %v16343_v21  ;;  %13380 = vmatpush1.bf16.msra.mxu1 %v16270_v38 }
0x22e9   :  { %13357 = vmatprep.subr.bf16.mxu0 %v14256_v26  ;;  %13382 = vmatprep.subr.bf16.mxu1 %v16273_v55 }
0x22ec   :  { %13359 = vmatpush3.bf16.msra.mxu0 %v16349_v32  ;;  %13384 = vmatpush1.bf16.msra.mxu1 %v16276_v53 }
0x22ed   :  { %13360 = vmatprep.subr.bf16.mxu0 %v14256_v26  ;;  %13386 = vmatprep.subr.bf16.mxu1 %v16279_v33 }
0x22f0   :  { %13362 = vmatpush3.bf16.msra.mxu0 %v16355_v35  ;;  %13388 = vmatpush1.bf16.msra.mxu1 %v16282_v22 }
0x22f1   :  { %13363 = vmatprep.subr.bf16.mxu0 %v14256_v26  ;;  %13390 = vmatprep.subr.bf16.mxu1 %v16285_v47 }
0x22f4   :  { %13365 = vmatpush3.bf16.msra.mxu0 %v16361_v19  ;;  %13392 = vmatpush1.bf16.msra.mxu1 %v16288_v63 }
0x22f5   :  { %13366 = vmatprep.subr.bf16.mxu0 %v14256_v26  ;;  %13394 = vmatprep.subr.bf16.mxu1 %v16292_v44 }
0x22f8   :  { %13368 = vmatpush3.bf16.msra.mxu0 %v16367_v54  ;;  %13396 = vmatpush1.bf16.msra.mxu1 %v16294_v13 }
0x22f9   :  { %13401 = vmatprep.subr.bf16.mxu0 %v14256_v26  ;;  %13398 = vmatprep.subr.bf16.mxu1 %v16299_v46 }
0x22fb   :  { %10950 = vmatmul.mubr.f32.vlgmr.msra.gmra.mrb[76].mxu0 %v14255_v7 }
0x22fc   :  { %13403 = vmatpush3.bf16.msra.mxu0 %v16324_v45  ;;  %13400 = vmatpush1.bf16.msra.mxu1 %v16301_v51 }
0x22fd   :  { %13404 = vmatprep.subr.bf16.mxu0 %v14256_v26  ;;  %10984 = vmatprep.mubr.msk.f32.mxu0 %vm14257_vm3, %v14255_v7 }
0x22fe   :  { %13426 = vmatprep.subr.bf16.mxu1 %v16256_v59 }
0x2300   :  { %13406 = vmatpush3.bf16.msra.mxu0 %v16329_v56 }
0x2301   :  { %13407 = vmatprep.subr.bf16.mxu0 %v14256_v26 }
0x2304   :  { %13409 = vmatpush3.bf16.msra.mxu0 %v16336_v30 }
0x2305   :  { %13410 = vmatprep.subr.bf16.mxu0 %v14256_v26 }
0x2308   :  { %13412 = vmatpush3.bf16.msra.mxu0 %v16343_v21 }
0x2309   :  { %13413 = vmatprep.subr.bf16.mxu0 %v14256_v26 }
0x230c   :  { %13415 = vmatpush3.bf16.msra.mxu0 %v16349_v32 }
0x230d   :  { %13416 = vmatprep.subr.bf16.mxu0 %v14256_v26 }
0x2310   :  { %13418 = vmatpush3.bf16.msra.mxu0 %v16355_v35 }
0x2311   :  { %13419 = vmatprep.subr.bf16.mxu0 %v14256_v26 }
0x2314   :  { %13421 = vmatpush3.bf16.msra.mxu0 %v16361_v19 }
0x2315   :  { %13422 = vmatprep.subr.bf16.mxu0 %v14256_v26 }
0x2318   :  { %13424 = vmatpush3.bf16.msra.mxu0 %v16367_v54 }
0x2319   :  { %13457 = vmatprep.subr.bf16.mxu0 %v14256_v26 }
0x2363   :  { %v6986_v10 = vpop.xlane.xlu1 %6985 }
0x2364   :  { %v6995_v9 = vrot.slane %v6986_v10, %v15447_v27  ;;  %v16440_v10 = vrot.slane %v7275_v28, %v14505_v43 }
0x2367   :  { %v6989_v29 = vpop.xlane.xlu1 %6988 }
0x2368   :  { %v6999_v58 = vrot.slane %v6989_v29, %v15447_v27 }
0x236a   :  { %v7000_v62 = vsel %vm1874_vm5, %v6999_v58, %v6995_v9 }
0x236b   :  { %v7002_v37 = vsel %vm1877_vm6, %v7000_v62, 0.0 }
0x236c   :  { %7003 = vadd.xlane.f32.xlu0 %v7002_v37 }
0x23ae   :  { %v16409_v25 = vpop.f32.mrb[82].mxu1  ;;  %v10916_v42 = vpop.f32.mrb[74].mxu0 }
0x23af   :  { %v16414_v24 = vadd.f32 %v10916_v42, %v7069_v14  ;;  %v16416_v2 = vpop.f32.mrb[83].mxu1  ;;  %v7216_v36 = vpop.f32.mrb[75].mxu0 }
0x23b0   :  { %v16443_v37 = vadd.f32 %v7216_v36, %v7069_v14 }
0x23b2   :  { %v7358_v12 = vpop.f32.mrb[84].mxu1 }
0x23b3   :  { %v7359_v50 = vadd.f32 %v7358_v12, %v16419_v8  ;;  %v7360_v60 = vpop.f32.mrb[85].mxu1 }
0x23b4   :  { %v7361_v23 = vadd.f32 %v7360_v60, %v16422_v34 }
0x23b5   :  { %v7433_v39 = vadd.f32 %v7359_v50, %v16429_v31 }
0x23b6   :  { %v7440_v49 = vadd.f32 %v7361_v23, %v16436_v48 }
0x23b7   :  { %v8820_v11 = vmul.f32 -1.442695, %v7433_v39 }
0x23b8   :  { %v8821_v5 = vmul.f32 -1.442695, %v7440_v49 }
0x23b9   :  { %14093 = vpow2.f32 %v8820_v11 }
0x23ba   :  { %14095 = vpow2.f32 %v8821_v5 }
0x23c3   :  { %v14094_v61 = vpop.eup %14093 }
0x23c4   :  { %v7437_v1 = vadd.f32 1.0, %v14094_v61  ;;  %v14096_v40 = vpop.eup %14095 }
0x23c5   :  { %v7444_v29 = vadd.f32 1.0, %v14096_v40 }
0x23c6   :  { %14097 = vrcp.f32 %v7437_v1 }
0x23c7   :  { %14099 = vrcp.f32 %v7444_v29 }
0x23ce   :  { %v7429_v9 = vpop.f32.mrb[76].mxu0 }
0x23cf   :  { %v7430_v58 = vadd.f32 %v7429_v9, %v16440_v10  ;;  %v10951_v62 = vpop.f32.mrb[77].mxu0 }
0x23d0   :  { %v14098_v57 = vpop.eup %14097 }
0x23d1   :  { %v7447_v52 = vmul.f32 %v14098_v57, %v7430_v58  ;;  %v14100_v12 = vpop.eup %14099 }
0x23d2   :  { %v7450_v50 = vsub.f32 1.0, %v14100_v12  ;;  %v7452_v39 = vmul.f32 0.0, %v14100_v12 }
0x23d3   :  { %v7448_v42 = vadd.f32 %v7447_v52, %v16443_v37 }
0x23d5   :  { %14101 = vtanh.f32 %v7448_v42 }
0x23df   :  { %v14102_v60 = vpop.eup %14101 }
0x23e0   :  { %v7451_v23 = vmul.f32 %v14102_v60, %v7450_v50 }
0x23e2   :  { %v16446_v43 = vadd.f32 %v7452_v39, %v7451_v23 }
0x23e4   :  { %7519 = vmatmul.mubr.f32.vlgmr.msra.gmra.mrb[86].mxu1 %v16446_v43  ;;  %10985 = vmatmul.mubr.f32.vlgmr.msra.gmra.mrb[78].mxu0 %v16446_v43  ;;  %v7624_v23 = vrot.slane %v16446_v43, 6 }
0x23e5   :  { %13428 = vmatpush1.bf16.msra.mxu1 %v16258_v17  ;;  %13459 = vmatpush3.bf16.msra.mxu0 %v16324_v45 }
0x23e6   :  { %13430 = vmatprep.subr.bf16.mxu1 %v16262_v4  ;;  %13460 = vmatprep.subr.bf16.mxu0 %v14256_v26 }
0x23e7   :  { %7695 = vmatprep.mubr.f32.mxu1 %v14255_v7  ;;  %11019 = vmatprep.mubr.msk.f32.mxu0 %vm14257_vm3, %v14255_v7 }
0x23e9   :  { %13432 = vmatpush1.bf16.msra.mxu1 %v16264_v16  ;;  %13462 = vmatpush3.bf16.msra.mxu0 %v16329_v56 }
0x23ea   :  { %13434 = vmatprep.subr.bf16.mxu1 %v16268_v18  ;;  %13463 = vmatprep.subr.bf16.mxu0 %v14256_v26 }
0x23ed   :  { %13436 = vmatpush1.bf16.msra.mxu1 %v16270_v38  ;;  %13465 = vmatpush3.bf16.msra.mxu0 %v16336_v30 }
0x23ee   :  { %13438 = vmatprep.subr.bf16.mxu1 %v16273_v55  ;;  %13466 = vmatprep.subr.bf16.mxu0 %v14256_v26 }
0x23f1   :  { %13440 = vmatpush1.bf16.msra.mxu1 %v16276_v53  ;;  %13468 = vmatpush3.bf16.msra.mxu0 %v16343_v21 }
0x23f2   :  { %13442 = vmatprep.subr.bf16.mxu1 %v16279_v33  ;;  %13469 = vmatprep.subr.bf16.mxu0 %v14256_v26 }
0x23f5   :  { %13444 = vmatpush1.bf16.msra.mxu1 %v16282_v22  ;;  %13471 = vmatpush3.bf16.msra.mxu0 %v16349_v32 }
0x23f6   :  { %13446 = vmatprep.subr.bf16.mxu1 %v16285_v47  ;;  %13472 = vmatprep.subr.bf16.mxu0 %v14256_v26 }
0x23f9   :  { %13448 = vmatpush1.bf16.msra.mxu1 %v16288_v63  ;;  %13474 = vmatpush3.bf16.msra.mxu0 %v16355_v35 }
0x23fa   :  { %13450 = vmatprep.subr.bf16.mxu1 %v16292_v44  ;;  %13475 = vmatprep.subr.bf16.mxu0 %v14256_v26 }
0x23fd   :  { %13452 = vmatpush1.bf16.msra.mxu1 %v16294_v13  ;;  %13477 = vmatpush3.bf16.msra.mxu0 %v16361_v19 }
0x23fe   :  { %13454 = vmatprep.subr.bf16.mxu1 %v16299_v46  ;;  %13478 = vmatprep.subr.bf16.mxu0 %v14256_v26 }
0x2401   :  { %13456 = vmatpush1.bf16.msra.mxu1 %v16301_v51  ;;  %13480 = vmatpush3.bf16.msra.mxu0 %v16367_v54 }
0x2402   :  { %13482 = vmatprep.subr.bf16.mxu1 %v16256_v59  ;;  %13513 = vmatprep.subr.bf16.mxu0 %v14256_v26 }
0x24b7   :  { %v7520_v14 = vpop.f32.mrb[86].mxu1  ;;  %v7591_v28 = vpop.f32.mrb[78].mxu0 }
0x24b8   :  { %v7521_v36 = vadd.f32 %v7520_v14, %v16419_v8  ;;  %v7522_v11 = vpop.f32.mrb[87].mxu1  ;;  %v10986_v49 = vpop.f32.mrb[79].mxu0  ;;  %v7592_v12 = vadd.f32 %v7591_v28, %v16440_v10 }
0x24b9   :  { %v7523_v5 = vadd.f32 %v7522_v11, %v16422_v34 }
0x24ba   :  { %v7596_v61 = vrot.slane %v7521_v36, 6  ;;  %v7616_v50 = vrot.slane %v7592_v12, 6 }
0x24bb   :  { %v7606_v1 = vrot.slane %v7523_v5, 6 }
0x24bc   :  { %v7598_v40 = vadd.f32 %v7596_v61, %v16429_v31 }
0x24bd   :  { %v7608_v29 = vadd.f32 %v7606_v1, %v16436_v48 }
0x24be   :  { %v8822_v9 = vmul.f32 -1.442695, %v7598_v40 }
0x24bf   :  { %v8823_v58 = vmul.f32 -1.442695, %v7608_v29 }
0x24c0   :  { %14103 = vpow2.f32 %v8822_v9 }
0x24c1   :  { %14105 = vpow2.f32 %v8823_v58 }
0x24ca   :  { %v14104_v62 = vpop.eup %14103 }
0x24cb   :  { %v14106_v57 = vpop.eup %14105  ;;  %v7602_v52 = vadd.f32 1.0, %v14104_v62 }
0x24cc   :  { %v7612_v42 = vadd.f32 1.0, %v14106_v57 }
0x24cd   :  { %14107 = vrcp.f32 %v7602_v52 }
0x24ce   :  { %14109 = vrcp.f32 %v7612_v42 }
0x24d7   :  { %v14108_v60 = vpop.eup %14107 }
0x24d8   :  { %v14110_v39 = vpop.eup %14109  ;;  %v7618_v14 = vmul.f32 %v14108_v60, %v7616_v50 }
0x24d9   :  { %v7626_v36 = vmul.f32 %v14110_v39, %v7624_v23  ;;  %v7621_v49 = vsub.f32 1.0, %v14110_v39 }
0x24da   :  { %v7619_v11 = vadd.f32 %v7618_v14, %v16443_v37 }
0x24dc   :  { %14111 = vtanh.f32 %v7619_v11 }
0x24e6   :  { %v14112_v5 = vpop.eup %14111 }
0x24e7   :  { %v7622_v61 = vmul.f32 %v14112_v5, %v7621_v49 }
0x24e9   :  { %v16492_v1 = vadd.f32 %v7626_v36, %v7622_v61 }
0x24eb   :  { %v7629_v40 = vrot.slane %v16492_v1, 2  ;;  %v7800_v61 = vrot.slane %v16492_v1, 6 }
0x24ed   :  { %7696 = vmatmul.mubr.f32.vlgmr.msra.gmra.mrb[88].mxu1 %v7629_v40  ;;  %11020 = vmatmul.mubr.f32.vlgmr.msra.gmra.mrb[80].mxu0 %v7629_v40 }
0x24ee   :  { %13484 = vmatpush1.bf16.msra.mxu1 %v16258_v17  ;;  %13515 = vmatpush3.bf16.msra.mxu0 %v16324_v45 }
0x24ef   :  { %13486 = vmatprep.subr.bf16.mxu1 %v16262_v4  ;;  %13516 = vmatprep.subr.bf16.mxu0 %v14256_v26 }
0x24f0   :  { %7871 = vmatprep.mubr.f32.mxu1 %v14255_v7  ;;  %11054 = vmatprep.mubr.msk.f32.mxu0 %vm14257_vm3, %v14255_v7 }
0x24f2   :  { %13488 = vmatpush1.bf16.msra.mxu1 %v16264_v16  ;;  %13518 = vmatpush3.bf16.msra.mxu0 %v16329_v56 }
0x24f3   :  { %13490 = vmatprep.subr.bf16.mxu1 %v16268_v18  ;;  %13519 = vmatprep.subr.bf16.mxu0 %v14256_v26 }
0x24f6   :  { %13492 = vmatpush1.bf16.msra.mxu1 %v16270_v38  ;;  %13521 = vmatpush3.bf16.msra.mxu0 %v16336_v30 }
0x24f7   :  { %13494 = vmatprep.subr.bf16.mxu1 %v16273_v55  ;;  %13522 = vmatprep.subr.bf16.mxu0 %v14256_v26 }
0x24fa   :  { %13496 = vmatpush1.bf16.msra.mxu1 %v16276_v53  ;;  %13524 = vmatpush3.bf16.msra.mxu0 %v16343_v21 }
0x24fb   :  { %13498 = vmatprep.subr.bf16.mxu1 %v16279_v33  ;;  %13525 = vmatprep.subr.bf16.mxu0 %v14256_v26 }
0x24fe   :  { %13500 = vmatpush1.bf16.msra.mxu1 %v16282_v22  ;;  %13527 = vmatpush3.bf16.msra.mxu0 %v16349_v32 }
0x24ff   :  { %13502 = vmatprep.subr.bf16.mxu1 %v16285_v47  ;;  %13528 = vmatprep.subr.bf16.mxu0 %v14256_v26 }
0x2502   :  { %13504 = vmatpush1.bf16.msra.mxu1 %v16288_v63  ;;  %13530 = vmatpush3.bf16.msra.mxu0 %v16355_v35 }
0x2503   :  { %13506 = vmatprep.subr.bf16.mxu1 %v16292_v44  ;;  %13531 = vmatprep.subr.bf16.mxu0 %v14256_v26 }
0x2506   :  { %13508 = vmatpush1.bf16.msra.mxu1 %v16294_v13  ;;  %13533 = vmatpush3.bf16.msra.mxu0 %v16361_v19 }
0x2507   :  { %13510 = vmatprep.subr.bf16.mxu1 %v16299_v46  ;;  %13534 = vmatprep.subr.bf16.mxu0 %v14256_v26 }
0x250a   :  { %13512 = vmatpush1.bf16.msra.mxu1 %v16301_v51  ;;  %13536 = vmatpush3.bf16.msra.mxu0 %v16367_v54 }
0x250b   :  { %13538 = vmatprep.subr.bf16.mxu1 %v16256_v59  ;;  %13569 = vmatprep.subr.bf16.mxu0 %v14256_v26 }
0x25c0   :  { %v7697_v43 = vpop.f32.mrb[88].mxu1  ;;  %v7768_v28 = vpop.f32.mrb[80].mxu0 }
0x25c1   :  { %v7698_v29 = vadd.f32 %v7697_v43, %v16419_v8  ;;  %v7699_v9 = vpop.f32.mrb[89].mxu1  ;;  %v11021_v58 = vpop.f32.mrb[81].mxu0  ;;  %v7769_v11 = vadd.f32 %v7768_v28, %v16440_v10 }
0x25c2   :  { %v7700_v62 = vadd.f32 %v7699_v9, %v16422_v34 }
0x25c3   :  { %v7773_v57 = vrot.slane %v7698_v29, 4  ;;  %v7793_v49 = vrot.slane %v7769_v11, 4 }
0x25c4   :  { %v7783_v52 = vrot.slane %v7700_v62, 4 }
0x25c5   :  { %v7775_v42 = vadd.f32 %v7773_v57, %v16429_v31 }
0x25c6   :  { %v7785_v12 = vadd.f32 %v7783_v52, %v16436_v48 }
0x25c7   :  { %v8824_v50 = vmul.f32 -1.442695, %v7775_v42 }
0x25c8   :  { %v8825_v60 = vmul.f32 -1.442695, %v7785_v12 }
0x25c9   :  { %14113 = vpow2.f32 %v8824_v50 }
0x25ca   :  { %14115 = vpow2.f32 %v8825_v60 }
0x25d3   :  { %v14114_v23 = vpop.eup %14113 }
0x25d4   :  { %v14116_v39 = vpop.eup %14115  ;;  %v7779_v14 = vadd.f32 1.0, %v14114_v23 }
0x25d5   :  { %v7789_v36 = vadd.f32 1.0, %v14116_v39 }
0x25d6   :  { %14117 = vrcp.f32 %v7779_v14 }
0x25d7   :  { %14119 = vrcp.f32 %v7789_v36 }
0x25e0   :  { %v14118_v5 = vpop.eup %14117 }
0x25e1   :  { %v14120_v40 = vpop.eup %14119  ;;  %v7795_v43 = vmul.f32 %v14118_v5, %v7793_v49 }
0x25e2   :  { %v7802_v29 = vmul.f32 %v14120_v40, %v7800_v61  ;;  %v7798_v58 = vsub.f32 1.0, %v14120_v40 }
0x25e3   :  { %v7796_v9 = vadd.f32 %v7795_v43, %v16443_v37 }
0x25e5   :  { %14121 = vtanh.f32 %v7796_v9 }
0x25ef   :  { %v14122_v62 = vpop.eup %14121 }
0x25f0   :  { %v7799_v57 = vmul.f32 %v14122_v62, %v7798_v58 }
0x25f2   :  { %v16537_v52 = vadd.f32 %v7802_v29, %v7799_v57 }
0x25f4   :  { %v7805_v42 = vrot.slane %v16537_v52, 4  ;;  %v7976_v57 = vrot.slane %v16537_v52, 6 }
0x25f6   :  { %7872 = vmatmul.mubr.f32.vlgmr.msra.gmra.mrb[90].mxu1 %v7805_v42  ;;  %11055 = vmatmul.mubr.f32.vlgmr.msra.gmra.mrb[82].mxu0 %v7805_v42 }
0x25f7   :  { %13540 = vmatpush1.bf16.msra.mxu1 %v16258_v17  ;;  %13571 = vmatpush3.bf16.msra.mxu0 %v16324_v45 }
0x25f8   :  { %13542 = vmatprep.subr.bf16.mxu1 %v16262_v4  ;;  %13572 = vmatprep.subr.bf16.mxu0 %v14256_v26 }
0x25f9   :  { %8047 = vmatprep.mubr.f32.mxu1 %v14255_v7  ;;  %11089 = vmatprep.mubr.msk.f32.mxu0 %vm14257_vm3, %v14255_v7 }
0x25fb   :  { %13544 = vmatpush1.bf16.msra.mxu1 %v16264_v16  ;;  %13574 = vmatpush3.bf16.msra.mxu0 %v16329_v56 }
0x25fc   :  { %13546 = vmatprep.subr.bf16.mxu1 %v16268_v18  ;;  %13575 = vmatprep.subr.bf16.mxu0 %v14256_v26 }
0x25ff   :  { %13548 = vmatpush1.bf16.msra.mxu1 %v16270_v38  ;;  %13577 = vmatpush3.bf16.msra.mxu0 %v16336_v30 }
0x2600   :  { %13550 = vmatprep.subr.bf16.mxu1 %v16273_v55  ;;  %13578 = vmatprep.subr.bf16.mxu0 %v14256_v26 }
0x2603   :  { %13552 = vmatpush1.bf16.msra.mxu1 %v16276_v53  ;;  %13580 = vmatpush3.bf16.msra.mxu0 %v16343_v21 }
0x2604   :  { %13554 = vmatprep.subr.bf16.mxu1 %v16279_v33  ;;  %13581 = vmatprep.subr.bf16.mxu0 %v14256_v26 }
0x2607   :  { %13556 = vmatpush1.bf16.msra.mxu1 %v16282_v22  ;;  %13583 = vmatpush3.bf16.msra.mxu0 %v16349_v32 }
0x2608   :  { %13558 = vmatprep.subr.bf16.mxu1 %v16285_v47  ;;  %13584 = vmatprep.subr.bf16.mxu0 %v14256_v26 }
0x260b   :  { %13560 = vmatpush1.bf16.msra.mxu1 %v16288_v63  ;;  %13586 = vmatpush3.bf16.msra.mxu0 %v16355_v35 }
0x260c   :  { %13562 = vmatprep.subr.bf16.mxu1 %v16292_v44  ;;  %13587 = vmatprep.subr.bf16.mxu0 %v14256_v26 }
0x260f   :  { %13564 = vmatpush1.bf16.msra.mxu1 %v16294_v13  ;;  %13589 = vmatpush3.bf16.msra.mxu0 %v16361_v19 }
0x2610   :  { %13566 = vmatprep.subr.bf16.mxu1 %v16299_v46  ;;  %13590 = vmatprep.subr.bf16.mxu0 %v14256_v26 }
0x2613   :  { %13568 = vmatpush1.bf16.msra.mxu1 %v16301_v51  ;;  %13592 = vmatpush3.bf16.msra.mxu0 %v16367_v54 }
0x2614   :  { %13594 = vmatprep.subr.bf16.mxu1 %v16256_v59  ;;  %13625 = vmatprep.subr.bf16.mxu0 %v14256_v26 }
0x26c9   :  { %v7873_v1 = vpop.f32.mrb[90].mxu1  ;;  %v7944_v28 = vpop.f32.mrb[82].mxu0 }
0x26ca   :  { %v7874_v12 = vadd.f32 %v7873_v1, %v16419_v8  ;;  %v7875_v50 = vpop.f32.mrb[91].mxu1  ;;  %v11056_v60 = vpop.f32.mrb[83].mxu0  ;;  %v7945_v9 = vadd.f32 %v7944_v28, %v16440_v10  ;;  %v16623_v28 = vadd.f32 %v16409_v25, %v16412_v3 }
0x26cb   :  { %v7876_v23 = vadd.f32 %v7875_v50, %v16422_v34 }
0x26cc   :  { %v7949_v39 = vrot.slane %v7874_v12, 2  ;;  %v7969_v58 = vrot.slane %v7945_v9, 2 }
0x26cd   :  { %v7959_v14 = vrot.slane %v7876_v23, 2 }
0x26ce   :  { %v7951_v36 = vadd.f32 %v7949_v39, %v16429_v31 }
0x26cf   :  { %v7961_v11 = vadd.f32 %v7959_v14, %v16436_v48 }
0x26d0   :  { %v8826_v49 = vmul.f32 -1.442695, %v7951_v36 }
0x26d1   :  { %v8827_v5 = vmul.f32 -1.442695, %v7961_v11 }
0x26d2   :  { %14123 = vpow2.f32 %v8826_v49 }
0x26d3   :  { %14125 = vpow2.f32 %v8827_v5 }
0x26dc   :  { %v14124_v61 = vpop.eup %14123 }
0x26dd   :  { %v14126_v40 = vpop.eup %14125  ;;  %v7955_v43 = vadd.f32 1.0, %v14124_v61  ;;  %v16630_v61 = vadd.f32 %v16416_v2, %v16425_v41 }
0x26de   :  { %v7965_v29 = vadd.f32 1.0, %v14126_v40 }
0x26df   :  { %14127 = vrcp.f32 %v7955_v43 }
0x26e0   :  { %14129 = vrcp.f32 %v7965_v29 }
0x26e9   :  { %v14128_v62 = vpop.eup %14127 }
0x26ea   :  { %v14130_v42 = vpop.eup %14129  ;;  %v7971_v31 = vmul.f32 %v14128_v62, %v7969_v58 }
0x26eb   :  { %v7978_v1 = vmul.f32 %v14130_v42, %v7976_v57  ;;  %v7974_v12 = vsub.f32 1.0, %v14130_v42 }
0x26ec   :  { %v7972_v48 = vadd.f32 %v7971_v31, %v16443_v37 }
0x26ee   :  { %14131 = vtanh.f32 %v7972_v48 }
0x26f8   :  { %v14132_v50 = vpop.eup %14131 }
0x26f9   :  { %v7975_v60 = vmul.f32 %v14132_v50, %v7974_v12 }
0x26fb   :  { %v7979_v23 = vadd.f32 %v7978_v1, %v7975_v60 }
0x26fd   :  { %v16582_v39 = vrot.slane %v7979_v23, 6 }
0x26ff   :  { %8048 = vmatmul.mubr.f32.vlgmr.msra.gmra.mrb[92].mxu1 %v16582_v39  ;;  %11090 = vmatmul.mubr.f32.vlgmr.msra.gmra.mrb[84].mxu0 %v16582_v39 }
0x2700   :  { %13596 = vmatpush1.bf16.msra.mxu1 %v16258_v17  ;;  %13627 = vmatpush3.bf16.msra.mxu0 %v16324_v45 }
0x2701   :  { %13598 = vmatprep.subr.bf16.mxu1 %v16262_v4  ;;  %13628 = vmatprep.subr.bf16.mxu0 %v14256_v26 }
0x2702   :  { %8209 = vmatprep.mubr.f32.mxu1 %v14255_v7  ;;  %11124 = vmatprep.mubr.msk.f32.mxu0 %vm14257_vm3, %v14255_v7 }
0x2704   :  { %13600 = vmatpush1.bf16.msra.mxu1 %v16264_v16  ;;  %13630 = vmatpush3.bf16.msra.mxu0 %v16329_v56 }
0x2705   :  { %13602 = vmatprep.subr.bf16.mxu1 %v16268_v18  ;;  %13631 = vmatprep.subr.bf16.mxu0 %v14256_v26 }
0x2708   :  { %13604 = vmatpush1.bf16.msra.mxu1 %v16270_v38  ;;  %13633 = vmatpush3.bf16.msra.mxu0 %v16336_v30 }
0x2709   :  { %13606 = vmatprep.subr.bf16.mxu1 %v16273_v55  ;;  %13634 = vmatprep.subr.bf16.mxu0 %v14256_v26 }
0x270c   :  { %13608 = vmatpush1.bf16.msra.mxu1 %v16276_v53  ;;  %13636 = vmatpush3.bf16.msra.mxu0 %v16343_v21 }
0x270d   :  { %13610 = vmatprep.subr.bf16.mxu1 %v16279_v33  ;;  %13637 = vmatprep.subr.bf16.mxu0 %v14256_v26 }
0x2710   :  { %13612 = vmatpush1.bf16.msra.mxu1 %v16282_v22  ;;  %13639 = vmatpush3.bf16.msra.mxu0 %v16349_v32 }
0x2711   :  { %13614 = vmatprep.subr.bf16.mxu1 %v16285_v47  ;;  %13640 = vmatprep.subr.bf16.mxu0 %v14256_v26 }
0x2714   :  { %13616 = vmatpush1.bf16.msra.mxu1 %v16288_v63  ;;  %13642 = vmatpush3.bf16.msra.mxu0 %v16355_v35 }
0x2715   :  { %13618 = vmatprep.subr.bf16.mxu1 %v16292_v44  ;;  %13643 = vmatprep.subr.bf16.mxu0 %v14256_v26 }
0x2718   :  { %13620 = vmatpush1.bf16.msra.mxu1 %v16294_v13  ;;  %13645 = vmatpush3.bf16.msra.mxu0 %v16361_v19 }
0x2719   :  { %13622 = vmatprep.subr.bf16.mxu1 %v16299_v46  ;;  %13646 = vmatprep.subr.bf16.mxu0 %v14256_v26 }
0x271c   :  { %13624 = vmatpush1.bf16.msra.mxu1 %v16301_v51  ;;  %13648 = vmatpush3.bf16.msra.mxu0 %v16367_v54 }
0x271d   :  { %13650 = vmatprep.subr.bf16.mxu1 %v16256_v59  ;;  %13681 = vmatprep.subr.bf16.mxu0 %v14256_v26 }
0x27d2   :  { %v8049_v37 = vpop.f32.mrb[92].mxu1  ;;  %v8120_v52 = vpop.f32.mrb[84].mxu0 }
0x27d3   :  { %v8050_v14 = vadd.f32 %v8049_v37, %v16419_v8  ;;  %v8051_v36 = vpop.f32.mrb[93].mxu1  ;;  %v11091_v11 = vpop.f32.mrb[85].mxu0  ;;  %v8121_v62 = vadd.f32 %v8120_v52, %v16440_v10 }
0x27d4   :  { %v8052_v49 = vadd.f32 %v8051_v36, %v16422_v34 }
0x27d5   :  { %v8124_v5 = vadd.f32 %v8050_v14, %v16623_v28 }
0x27d6   :  { %v8131_v43 = vadd.f32 %v8052_v49, %v16630_v61 }
0x27d7   :  { %v8828_v40 = vmul.f32 -1.442695, %v8124_v5 }
0x27d8   :  { %v8829_v29 = vmul.f32 -1.442695, %v8131_v43 }
0x27d9   :  { %14133 = vpow2.f32 %v8828_v40 }
0x27da   :  { %14135 = vpow2.f32 %v8829_v29 }
0x27e3   :  { %v14134_v25 = vpop.eup %14133 }
0x27e4   :  { %v8128_v3 = vadd.f32 1.0, %v14134_v25  ;;  %v14136_v9 = vpop.eup %14135 }
0x27e5   :  { %v8135_v58 = vadd.f32 1.0, %v14136_v9 }
0x27e6   :  { %14137 = vrcp.f32 %v8128_v3 }
0x27e7   :  { %14139 = vrcp.f32 %v8135_v58 }
0x27f0   :  { %v14138_v57 = vpop.eup %14137 }
0x27f1   :  { %v8138_v42 = vmul.f32 %v14138_v57, %v8121_v62  ;;  %v14140_v2 = vpop.eup %14139 }
0x27f2   :  { %v8141_v41 = vsub.f32 1.0, %v14140_v2  ;;  %v8143_v12 = vmul.f32 %v14140_v2, %v16582_v39 }
0x27f3   :  { %v8139_v31 = vadd.f32 %v8138_v42, %v16414_v24 }
0x27f5   :  { %14141 = vtanh.f32 %v8139_v31 }
0x27ff   :  { %v14142_v1 = vpop.eup %14141 }
0x2800   :  { %v8142_v48 = vmul.f32 %v14142_v1, %v8141_v41 }
0x2802   :  { %v16636_v50 = vadd.f32 %v8143_v12, %v8142_v48 }
0x2804   :  { %8210 = vmatmul.mubr.f32.vlgmr.msra.gmra.mrb[94].mxu1 %v16636_v50  ;;  %11125 = vmatmul.mubr.f32.vlgmr.msra.gmra.mrb[86].mxu0 %v16636_v50  ;;  %v8315_v57 = vrot.slane %v16636_v50, 6 }
0x2805   :  { %13652 = vmatpush1.bf16.msra.mxu1 %v16258_v17  ;;  %13683 = vmatpush3.bf16.msra.mxu0 %v16324_v45 }
0x2806   :  { %13654 = vmatprep.subr.bf16.mxu1 %v16262_v4  ;;  %13684 = vmatprep.subr.bf16.mxu0 %v14256_v26 }
0x2807   :  { %8386 = vmatprep.mubr.f32.mxu1 %v14255_v7  ;;  %11159 = vmatprep.mubr.msk.f32.mxu0 %vm14257_vm3, %v14255_v7 }
0x2809   :  { %13656 = vmatpush1.bf16.msra.mxu1 %v16264_v16  ;;  %13686 = vmatpush3.bf16.msra.mxu0 %v16329_v56 }
0x280a   :  { %13658 = vmatprep.subr.bf16.mxu1 %v16268_v18  ;;  %13687 = vmatprep.subr.bf16.mxu0 %v14256_v26 }
0x280d   :  { %13660 = vmatpush1.bf16.msra.mxu1 %v16270_v38  ;;  %13689 = vmatpush3.bf16.msra.mxu0 %v16336_v30 }
0x280e   :  { %13662 = vmatprep.subr.bf16.mxu1 %v16273_v55  ;;  %13690 = vmatprep.subr.bf16.mxu0 %v14256_v26 }
0x2811   :  { %13664 = vmatpush1.bf16.msra.mxu1 %v16276_v53  ;;  %13692 = vmatpush3.bf16.msra.mxu0 %v16343_v21 }
0x2812   :  { %13666 = vmatprep.subr.bf16.mxu1 %v16279_v33  ;;  %13693 = vmatprep.subr.bf16.mxu0 %v14256_v26 }
0x2815   :  { %13668 = vmatpush1.bf16.msra.mxu1 %v16282_v22  ;;  %13695 = vmatpush3.bf16.msra.mxu0 %v16349_v32 }
0x2816   :  { %13670 = vmatprep.subr.bf16.mxu1 %v16285_v47  ;;  %13696 = vmatprep.subr.bf16.mxu0 %v14256_v26 }
0x2819   :  { %13672 = vmatpush1.bf16.msra.mxu1 %v16288_v63  ;;  %13698 = vmatpush3.bf16.msra.mxu0 %v16355_v35 }
0x281a   :  { %13674 = vmatprep.subr.bf16.mxu1 %v16292_v44  ;;  %13699 = vmatprep.subr.bf16.mxu0 %v14256_v26 }
0x281d   :  { %13676 = vmatpush1.bf16.msra.mxu1 %v16294_v13  ;;  %13701 = vmatpush3.bf16.msra.mxu0 %v16361_v19 }
0x281e   :  { %13678 = vmatprep.subr.bf16.mxu1 %v16299_v46  ;;  %13702 = vmatprep.subr.bf16.mxu0 %v14256_v26 }
0x2821   :  { %13680 = vmatpush1.bf16.msra.mxu1 %v16301_v51  ;;  %13704 = vmatpush3.bf16.msra.mxu0 %v16367_v54 }
0x2822   :  { %13706 = vmatprep.subr.bf16.mxu1 %v16256_v59  ;;  %13737 = vmatprep.subr.bf16.mxu0 %v14256_v26 }
0x28d7   :  { %v8211_v60 = vpop.f32.mrb[94].mxu1  ;;  %v8282_v23 = vpop.f32.mrb[86].mxu0 }
0x28d8   :  { %v8212_v39 = vadd.f32 %v8211_v60, %v16419_v8  ;;  %v8213_v37 = vpop.f32.mrb[95].mxu1  ;;  %v11126_v52 = vpop.f32.mrb[87].mxu0  ;;  %v8283_v9 = vadd.f32 %v8282_v23, %v16440_v10 }
0x28d9   :  { %v8214_v14 = vadd.f32 %v8213_v37, %v16422_v34 }
0x28da   :  { %v8287_v36 = vrot.slane %v8212_v39, 6  ;;  %v8307_v58 = vrot.slane %v8283_v9, 6 }
0x28db   :  { %v8297_v11 = vrot.slane %v8214_v14, 6 }
0x28dc   :  { %v8289_v49 = vadd.f32 %v8287_v36, %v16623_v28 }
0x28dd   :  { %v8299_v5 = vadd.f32 %v8297_v11, %v16630_v61 }
0x28de   :  { %v8830_v40 = vmul.f32 -1.442695, %v8289_v49 }
0x28df   :  { %v8831_v43 = vmul.f32 -1.442695, %v8299_v5 }
0x28e0   :  { %14143 = vpow2.f32 %v8830_v40 }
0x28e1   :  { %14145 = vpow2.f32 %v8831_v43 }
0x28ea   :  { %v14144_v59 = vpop.eup %14143 }
0x28eb   :  { %v14146_v29 = vpop.eup %14145  ;;  %v8293_v25 = vadd.f32 1.0, %v14144_v59 }
0x28ec   :  { %v8303_v3 = vadd.f32 1.0, %v14146_v29 }
0x28ed   :  { %14147 = vrcp.f32 %v8293_v25 }
0x28ee   :  { %14149 = vrcp.f32 %v8303_v3 }
0x28f7   :  { %v14148_v62 = vpop.eup %14147 }
0x28f8   :  { %v14150_v42 = vpop.eup %14149  ;;  %v8309_v31 = vmul.f32 %v14148_v62, %v8307_v58 }
0x28f9   :  { %v8317_v2 = vmul.f32 %v14150_v42, %v8315_v57  ;;  %v8312_v1 = vsub.f32 1.0, %v14150_v42 }
0x28fa   :  { %v8310_v41 = vadd.f32 %v8309_v31, %v16414_v24 }
0x28fc   :  { %14151 = vtanh.f32 %v8310_v41 }
0x2906   :  { %v14152_v48 = vpop.eup %14151 }
0x2907   :  { %v8313_v12 = vmul.f32 %v14152_v48, %v8312_v1  ;;  %v8836_v48 = vld [vmem:[%s16769_s7 + $0x10] sm:$0x3] }
0x2909   :  { %v16682_v60 = vadd.f32 %v8317_v2, %v8313_v12 }
0x290b   :  { %v8320_v39 = vrot.slane %v16682_v60, 2 }
0x290d   :  { %8387 = vmatmul.mubr.f32.vlgmr.msra.gmra.mrb[96].mxu1 %v8320_v39  ;;  %11160 = vmatmul.mubr.f32.vlgmr.msra.gmra.mrb[88].mxu0 %v8320_v39  ;;  %v8837_v39 = vld [vmem:[%s16769_s7 + $0x12] sm:$0x3] }
0x290e   :  { %13708 = vmatpush1.bf16.msra.mxu1 %v16258_v17  ;;  %13739 = vmatpush3.bf16.msra.mxu0 %v16324_v45 }
0x290f   :  { %13710 = vmatprep.subr.bf16.mxu1 %v16262_v4  ;;  %13740 = vmatprep.subr.bf16.mxu0 %v14256_v26 }
0x2910   :  { %8562 = vmatprep.mubr.f32.mxu1 %v14255_v7  ;;  %11194 = vmatprep.mubr.msk.f32.mxu0 %vm14257_vm3, %v14255_v7 }
0x2912   :  { %13712 = vmatpush1.bf16.msra.mxu1 %v16264_v16  ;;  %13742 = vmatpush3.bf16.msra.mxu0 %v16329_v56 }
0x2913   :  { %13714 = vmatprep.subr.bf16.mxu1 %v16268_v18  ;;  %13743 = vmatprep.subr.bf16.mxu0 %v14256_v26 }
0x2916   :  { %13716 = vmatpush1.bf16.msra.mxu1 %v16270_v38  ;;  %13745 = vmatpush3.bf16.msra.mxu0 %v16336_v30  ;;  %v8491_v30 = vrot.slane %v16682_v60, 6 }
0x2917   :  { %13718 = vmatprep.subr.bf16.mxu1 %v16273_v55  ;;  %13746 = vmatprep.subr.bf16.mxu0 %v14256_v26 }
0x291a   :  { %13720 = vmatpush1.bf16.msra.mxu1 %v16276_v53  ;;  %13748 = vmatpush3.bf16.msra.mxu0 %v16343_v21 }
0x291b   :  { %13722 = vmatprep.subr.bf16.mxu1 %v16279_v33  ;;  %13749 = vmatprep.subr.bf16.mxu0 %v14256_v26 }
0x291e   :  { %13724 = vmatpush1.bf16.msra.mxu1 %v16282_v22  ;;  %13751 = vmatpush3.bf16.msra.mxu0 %v16349_v32 }
0x291f   :  { %13726 = vmatprep.subr.bf16.mxu1 %v16285_v47  ;;  %13752 = vmatprep.subr.bf16.mxu0 %v14256_v26 }
0x2922   :  { %13728 = vmatpush1.bf16.msra.mxu1 %v16288_v63  ;;  %13754 = vmatpush3.bf16.msra.mxu0 %v16355_v35 }
0x2923   :  { %13730 = vmatprep.subr.bf16.mxu1 %v16292_v44  ;;  %13755 = vmatprep.subr.bf16.mxu0 %v14256_v26 }
0x2926   :  { %13732 = vmatpush1.bf16.msra.mxu1 %v16294_v13  ;;  %13757 = vmatpush3.bf16.msra.mxu0 %v16361_v19 }
0x2927   :  { %13734 = vmatprep.subr.bf16.mxu1 %v16299_v46  ;;  %13758 = vmatprep.subr.bf16.mxu0 %v14256_v26 }
0x292a   :  { %13736 = vmatpush1.bf16.msra.mxu1 %v16301_v51  ;;  %13760 = vmatpush3.bf16.msra.mxu0 %v16367_v54 }
0x29e0   :  { %v8388_v7 = vpop.f32.mrb[96].mxu1  ;;  %v8459_v17 = vpop.f32.mrb[88].mxu0 }
0x29e1   :  { %v8389_v4 = vadd.f32 %v8388_v7, %v16419_v8  ;;  %v8390_v16 = vpop.f32.mrb[97].mxu1  ;;  %v11161_v18 = vpop.f32.mrb[89].mxu0  ;;  %v8460_v51 = vadd.f32 %v8459_v17, %v16440_v10  ;;  %v8676_v7 = vrot.slane %v8836_v48, 2 }
0x29e2   :  { %v8391_v38 = vadd.f32 %v8390_v16, %v16422_v34  ;;  %v8838_v16 = vld [vmem:[%s16768_s6] ss:$0 sm:$0xff] }
0x29e3   :  { %v8464_v55 = vrot.slane %v8389_v4, 4  ;;  %v8484_v45 = vrot.slane %v8460_v51, 4  ;;  %v8677_v4 = vrot.slane %v8837_v39, 2 }
0x29e4   :  { %v8474_v53 = vrot.slane %v8391_v38, 4 }
0x29e5   :  { %v8466_v33 = vadd.f32 %v8464_v55, %v16623_v28 }
0x29e6   :  { %v8476_v22 = vadd.f32 %v8474_v53, %v16630_v61 }
0x29e7   :  { %v8832_v47 = vmul.f32 -1.442695, %v8466_v33  ;;  %v1873_v33 = vrot.slane %v15444_v20, %v15447_v27 }
0x29e8   :  { %v8833_v26 = vmul.f32 -1.442695, %v8476_v22 }
0x29e9   :  { %14153 = vpow2.f32 %v8832_v47  ;;  %v1869_v47 = vrot.slane %v15441_v0, %v15447_v27 }
0x29ea   :  { %14155 = vpow2.f32 %v8833_v26 }
0x29f3   :  { %v14154_v63 = vpop.eup %14153 }
0x29f4   :  { %v14156_v44 = vpop.eup %14155  ;;  %v8470_v13 = vadd.f32 1.0, %v14154_v63  ;;  %v5291_v63 = vrot.slane %v16399_v6, %v15447_v27 }
0x29f5   :  { %v8480_v46 = vadd.f32 1.0, %v14156_v44  ;;  %v1875_v44 = vsel %vm1874_vm5, %v1873_v33, %v1869_v47 }
0x29f6   :  { %14157 = vrcp.f32 %v8470_v13  ;;  %v5287_v13 = vrot.slane %v16397_v15, %v15447_v27  ;;  %v1878_v20 = vsel %vm1877_vm6, %v1875_v44, 0.0 }
0x29f7   :  { %14159 = vrcp.f32 %v8480_v46 }
0x29f8   :  { %v5292_v46 = vsel %vm1874_vm5, %v5291_v63, %v5287_v13 }
0x29f9   :  { %v5294_v51 = vsel %vm1877_vm6, %v5292_v46, 0.0 }
0x2a00   :  { %v14158_v56 = vpop.eup %14157 }
0x2a01   :  { %v14160_v21 = vpop.eup %14159  ;;  %v8486_v32 = vmul.f32 %v14158_v56, %v8484_v45 }
0x2a02   :  { %v8493_v35 = vmul.f32 %v14160_v21, %v8491_v30  ;;  %v8489_v54 = vsub.f32 1.0, %v14160_v21 }
0x2a03   :  { %v8487_v19 = vadd.f32 %v8486_v32, %v16414_v24  ;;  %v3588_v32 = vpop.xlane.xlu0 %3587 }
0x2a05   :  { %14161 = vtanh.f32 %v8487_v19 }
0x2a0f   :  { %v14162_v50 = vpop.eup %14161 }
0x2a10   :  { %v8490_v23 = vmul.f32 %v14162_v50, %v8489_v54  ;;  %v7004_v50 = vpop.xlane.xlu0 %7003 }
0x2a12   :  { %v8494_v37 = vadd.f32 %v8493_v35, %v8490_v23 }
0x2a14   :  { %v8496_v52 = vrot.slane %v8494_v37, 4  ;;  %v8667_v2 = vrot.slane %v8494_v37, 6 }
0x2a16   :  { %8563 = vmatmul.mubr.f32.vlgmr.msra.gmra.mrb[98].mxu1 %v8496_v52  ;;  %11195 = vmatmul.mubr.f32.vlgmr.msra.gmra.mrb[90].mxu0 %v8496_v52 }
0x2ae9   :  { %v8564_v14 = vpop.f32.mrb[98].mxu1  ;;  %v8635_v36 = vpop.f32.mrb[90].mxu0 }
0x2aea   :  { %v8565_v11 = vadd.f32 %v8564_v14, %v16419_v8  ;;  %v8566_v49 = vpop.f32.mrb[99].mxu1  ;;  %v11196_v5 = vpop.f32.mrb[91].mxu0  ;;  %v8636_v8 = vadd.f32 %v8635_v36, %v16440_v10 }
0x2aeb   :  { %v8567_v40 = vadd.f32 %v8566_v49, %v16422_v34 }
0x2aec   :  { %v8640_v43 = vrot.slane %v8565_v11, 2  ;;  %v8660_v31 = vrot.slane %v8636_v8, 2  ;;  %v8839_v11 = vld [vmem:[#allocation3] ss:$0 sm:$0xff] }
0x2aed   :  { %v8650_v59 = vrot.slane %v8567_v40, 2 }
0x2aee   :  { %v8642_v29 = vadd.f32 %v8640_v43, %v16623_v28 }
0x2aef   :  { %v8652_v25 = vadd.f32 %v8650_v59, %v16630_v61 }
0x2af0   :  { %v8834_v3 = vmul.f32 -1.442695, %v8642_v29 }
0x2af1   :  { %v8835_v9 = vmul.f32 -1.442695, %v8652_v25 }
0x2af2   :  { %14163 = vpow2.f32 %v8834_v3 }
0x2af3   :  { %14165 = vpow2.f32 %v8835_v9 }
0x2afc   :  { %v14164_v58 = vpop.eup %14163 }
0x2afd   :  { %v14166_v62 = vpop.eup %14165  ;;  %v8646_v57 = vadd.f32 1.0, %v14164_v58 }
0x2afe   :  { %v8656_v42 = vadd.f32 1.0, %v14166_v62 }
0x2aff   :  { %14167 = vrcp.f32 %v8646_v57 }
0x2b00   :  { %14169 = vrcp.f32 %v8656_v42 }
0x2b09   :  { %v14168_v34 = vpop.eup %14167 }
0x2b0a   :  { %v14170_v41 = vpop.eup %14169  ;;  %v8662_v1 = vmul.f32 %v14168_v34, %v8660_v31 }
0x2b0b   :  { %v8669_v28 = vmul.f32 %v14170_v41, %v8667_v2  ;;  %v8665_v12 = vsub.f32 1.0, %v14170_v41 }
0x2b0c   :  { %v8663_v61 = vadd.f32 %v8662_v1, %v16414_v24 }
0x2b0e   :  { %14171 = vtanh.f32 %v8663_v61 }
0x2b18   :  { %v14172_v60 = vpop.eup %14171 }
0x2b19   :  { %v8666_v10 = vmul.f32 %v14172_v60, %v8665_v12 }
0x2b1b   :  { %v8670_v17 = vadd.f32 %v8669_v28, %v8666_v10 }
0x2b1d   :  { %v8680_v24 = vmul.f32 %v8676_v7, %v8670_v17  ;;  %v8704_v18 = vmax.f32 %v8670_v17, 0.0  ;;  %v8681_v53 = vmul.f32 %v8677_v4, %v8670_v17 }
0x2b1f   :  { %v8682_v38 = vsel %vm1856_vm4, %v8680_v24, 0.0  ;;  %v8712_v55 = vmul.f32 %v8838_v16, %v8704_v18  ;;  %v8685_v26 = vsel %vm1856_vm4, %v8681_v53, 0.0 }
0x2b20   :  { %8683 = vadd.xlane.f32.xlu1 %v8682_v38 }
0x2b21   :  { %v8713_v22 = vsel %vm1856_vm4, %v8712_v55, 0.0 }
0x2b22   :  { %8714 = vadd.xlane.f32.xlu0 %v8713_v22 }
0x2b24   :  { %8686 = vadd.xlane.f32.xlu1 %v8685_v26 }
0x2b28   :  { %1879 = vadd.xlane.f32.xlu1 %v1878_v20 }
0x2b2c   :  { %5295 = vadd.xlane.f32.xlu1 %v5294_v51 }
0x2bad   :  { %v8684_v0 = vpop.xlane.xlu1 %8683 }
0x2bae   :  { %v8693_v56 = vrot.slane %v8684_v0, %v15447_v27 }
0x2baf   :  { %v8715_v36 = vpop.xlane.xlu0 %8714 }
0x2bb1   :  { %v8687_v45 = vpop.xlane.xlu1 %8686 }
0x2bb2   :  { %v8697_v6 = vrot.slane %v8687_v45, %v15447_v27 }
0x2bb4   :  { %v8698_v30 = vsel %vm1874_vm5, %v8697_v6, %v8693_v56 }
0x2bb5   :  { %v8700_v21 = vsel %vm1877_vm6, %v8698_v30, 0.0  ;;  %v1880_v15 = vpop.xlane.xlu1 %1879 }
0x2bb6   :  { %8701 = vadd.xlane.f32.xlu1 %v8700_v21  ;;  %v3589_v19 = vadd.f32 %v3588_v32, %v1880_v15 }
0x2bb9   :  { %v5296_v35 = vpop.xlane.xlu1 %5295 }
0x2bba   :  { %v5297_v54 = vadd.f32 %v5296_v35, %v3589_v19 }
0x2bbc   :  { %v7005_v23 = vadd.f32 %v7004_v50, %v5297_v54 }
0x2c43   :  { %v8702_v37 = vpop.xlane.xlu1 %8701 }
0x2c44   :  { %v8703_v52 = vadd.f32 %v8702_v37, %v7005_v23 }
0x2c46   :  { %v8717_v14 = vrot.slane %v8703_v52, 2 }
0x2c48   :  { %v8719_v49 = vadd.f32 %v8717_v14, %v8715_v36 }
0x2c4a   :  { %v8727_v5 = vadd.f32 %v8839_v11, %v8719_v49 }
0x2c4c   :  { %v8840_v27 = vmul.f32 -1.442695, %v8727_v5 }
0x2c4e   :  { %14173 = vpow2.f32 %v8840_v27 }
0x2c58   :  { %v14174_v40 = vpop.eup %14173 }
0x2c59   :  { %v8731_v43 = vadd.f32 1.0, %v14174_v40 }
0x2c5b   :  { %14175 = vrcp.f32 %v8731_v43 }
0x2c65   :  { %v14176_v59 = vpop.eup %14175 }
0x2c66   :  { %8735 = vst.msk [vmem:[%s16771_s9 - $0x6] sm:$0xc0] %vm8734_vm7, %v14176_v59 }
0x2c67   :  { %8740 = vsyncpa [#allocation5], 1 }
0x2c68   :  { %8741 = vsyncpa [#allocation7], 1 }

</bundles_post_ra>
